<compile_context>
chip_gen: v6e
topology: v6e:2x2x1
jax: 0.10.0
libtpu: 0.0.40
codegen_flags: <defaults>
</compile_context>

<pallas_src>
import functools
import math

import jax
import jax.numpy as jnp
from jax import lax
from jax.experimental import pallas as pl
from jax.experimental.pallas import tpu as pltpu

# ----------------------------- reduced config --------------------------------
BATCH = 2
WAVE_LEN = 330                      # chosen so the conv stack yields T = 16 frames
CONV_DIM = 32                       # feature-extractor channels (512 in wavlm-base)
CONV_KERNELS = (10, 3, 2)           # reduced conv stack (wavlm-base: 10,3,3,3,3,2,2)
CONV_STRIDES = (5, 2, 2)            # (wavlm-base: 5,2,2,2,2,2,2)
HIDDEN = 128                        # hidden_size (768 in wavlm-base); 128 -> lane-dense
NUM_HEADS = 2                       # head_dim = 64 (same head_dim as wavlm-base)
NUM_LAYERS = 2
INTERMEDIATE = 256
POS_KERNEL = 4                      # positional conv kernel (128 in wavlm-base)
POS_GROUPS = 2                      # positional conv groups (16 in wavlm-base)
LN_EPS = 1e-5

ACT_DTYPE = jnp.bfloat16            # activation / weight dtype at call boundaries

_ARB1 = pltpu.CompilerParams(dimension_semantics=("arbitrary",))


def _full_spec(shape):
    """Whole-array BlockSpec under grid=(1,)."""
    return pl.BlockSpec(shape, lambda *_: (0,) * len(shape))


def _gelu(x):
    # tanh-approximate GELU (VPU/EUP friendly), f32 math
    return 0.5 * x * (1.0 + jnp.tanh(0.7978845608028654 * (x + 0.044715 * x * x * x)))


def _ln(x, ln, eps):
    """LayerNorm over last axis; x:[M,H] f32, ln:[2,H] (gamma row 0, beta row 1)."""
    mu = jnp.mean(x, axis=-1, keepdims=True)
    var = jnp.mean(jnp.square(x - mu), axis=-1, keepdims=True)
    return (x - mu) * lax.rsqrt(var + eps) * ln[0:1, :] + ln[1:2, :]


# ------------------------------ Pallas kernels ------------------------------
def _frontend_kernel(patches_ref, w0_ref, gn0_ref, w1_ref, w2_ref,
                     fpln_ref, fpw_ref, fpb_ref,
                     posw_ref, posb_ref, encln_ref,
                     o_ref, y0_scr, y1_scr, hp_scr,
                     *, batch, t1, t2, groups, pos_kernel, pad, eps):
    """Fused: conv stack (+GroupNorm/GELU) -> feature projection (LN+Linear)
    -> positional grouped conv + GELU + residual + encoder LayerNorm.
    Single grid step; output is the flattened [B*T, H] slab."""
    c = w0_ref.shape[-1]
    hidden = fpw_ref.shape[-1]
    hg = hidden // groups

    w0 = w0_ref[...]                                  # [k0, C]  bf16
    gn0 = gn0_ref[...]                                # [2, C]   f32
    fp_ln = fpln_ref[...]
    fp_w = fpw_ref[...]
    fp_b = fpb_ref[...]
    pos_b = posb_ref[...]
    enc_ln = encln_ref[...]

    # zero the positional-conv "same" padding rows once; live rows are
    # overwritten per batch element below.
    hp_scr[...] = jnp.zeros(hp_scr.shape, jnp.float32)

    for b in range(batch):                            # B = 2, fully unrolled
        # --- conv layer 0 (c_in == 1): one MXU matmul over im2col patches ---
        y0 = jnp.dot(patches_ref[b], w0, preferred_element_type=jnp.float32)  # [t0, C]
        # GroupNorm with num_groups == num_channels: per-channel stats over time
        mu = jnp.mean(y0, axis=0, keepdims=True)
        var = jnp.mean(jnp.square(y0 - mu), axis=0, keepdims=True)
        y0 = (y0 - mu) * lax.rsqrt(var + eps) * gn0[0:1, :] + gn0[1:2, :]
        y0_scr[...] = _gelu(y0)

        # --- conv layer 1 (kernel 3, stride 2): strided tap reads from VMEM ---
        acc = jnp.zeros((t1, c), jnp.float32)
        for j in range(w1_ref.shape[0]):
            xs = y0_scr[pl.ds(j, t1, stride=2), :].astype(ACT_DTYPE)
            acc = acc + jnp.dot(xs, w1_ref[j], preferred_element_type=jnp.float32)
        y1_scr[...] = _gelu(acc)

        # --- conv layer 2 (kernel 2, stride 2) ---
        acc = jnp.zeros((t2, c), jnp.float32)
        for j in range(w2_ref.shape[0]):
            xs = y1_scr[pl.ds(j, t2, stride=2), :].astype(ACT_DTYPE)
            acc = acc + jnp.dot(xs, w2_ref[j], preferred_element_type=jnp.float32)
        feats = _gelu(acc)                            # [T, C] f32

        # --- feature projection: LayerNorm + Linear ---
        hres = jnp.dot(_ln(feats, fp_ln, eps).astype(ACT_DTYPE), fp_w,
                       preferred_element_type=jnp.float32) + fp_b          # [T, H]

        # --- positional grouped conv ("same" pad, even-kernel trim) ---
        # true grouped formulation: per-group [hg,hg] taps (no dense zeros)
        hp_scr[pad:pad + t2, :] = hres
        parts = []
        for g in range(groups):
            accg = jnp.zeros((t2, hg), jnp.float32)
            for j in range(pos_kernel):
                xg = hp_scr[j:j + t2, g * hg:(g + 1) * hg].astype(ACT_DTYPE)
                accg = accg + jnp.dot(xg, posw_ref[j, g],
                                      preferred_element_type=jnp.float32)
            parts.append(accg)
        pos = _gelu(jnp.concatenate(parts, axis=-1) + pos_b)

        # residual add + encoder LayerNorm; write this batch's rows of [B*T, H]
        o_ref[b * t2:(b + 1) * t2, :] = _ln(hres + pos, enc_ln, eps).astype(o_ref.dtype)


def _encoder_layer_kernel(x_ref, wq_ref, wk_ref, wv_ref, bq_ref, bk_ref, bv_ref,
                          wo_ref, bo_ref, ln1_ref, w1_ref, b1_ref, w2_ref, b2_ref,
                          ln2_ref, o_ref, *rest, batch, seq, num_heads, eps, pool):
    """One fused post-LN transformer encoder layer on the flattened [B*T, H]
    slab; optionally also emits the time-mean pooled embedding (last layer)."""
    x = x_ref[...]                                    # [B*T, H] bf16
    xf = x.astype(jnp.float32)
    hidden = x.shape[-1]
    dh = wq_ref.shape[-1]
    scale = 1.0 / math.sqrt(dh)

    # per-head projections on the whole [B*T, H] slab (bf16 MXU operands, f32 acc)
    qs, ks, vs, wos = [], [], [], []
    for hh in range(num_heads):
        q = jnp.dot(x, wq_ref[hh], preferred_element_type=jnp.float32) + bq_ref[hh]
        k = jnp.dot(x, wk_ref[hh], preferred_element_type=jnp.float32) + bk_ref[hh]
        v = jnp.dot(x, wv_ref[hh], preferred_element_type=jnp.float32) + bv_ref[hh]
        qs.append((q * scale).astype(ACT_DTYPE))
        ks.append(k.astype(ACT_DTYPE))
        vs.append(v.astype(ACT_DTYPE))
        wos.append(wo_ref[hh])                        # [dh, H] bf16

    bo = bo_ref[...]
    ctx_parts = []
    for b in range(batch):                            # [T, T] attention is per sequence
        r0 = b * seq
        acc = jnp.zeros((seq, hidden), jnp.float32) + bo
        for hh in range(num_heads):
            qh = qs[hh][r0:r0 + seq, :]
            kh = ks[hh][r0:r0 + seq, :]
            vh = vs[hh][r0:r0 + seq, :]
            s = lax.dot_general(qh, kh, (((1,), (1,)), ((), ())),
                                preferred_element_type=jnp.float32)        # [T, T]
            # scores are O(1) here; skip the per-row max-subtraction XLU reduce
            # (softmax is shift-invariant, overflow not reachable at this scale).
            p = jnp.exp(s)
            p = p * pl.reciprocal(jnp.sum(p, axis=-1, keepdims=True), approx=True)
            oh = jnp.dot(p.astype(ACT_DTYPE), vh, preferred_element_type=jnp.float32)
            acc = acc + jnp.dot(oh.astype(ACT_DTYPE), wos[hh],
                                preferred_element_type=jnp.float32)
        ctx_parts.append(acc)
    attn = jnp.concatenate(ctx_parts, axis=0)         # [B*T, H] f32

    # post-LN layer (do_stable_layer_norm = False in wavlm-base)
    h1 = _ln(xf + attn, ln1_ref[...], eps)
    ff = jnp.dot(h1.astype(ACT_DTYPE), w1_ref[...],
                 preferred_element_type=jnp.float32) + b1_ref[...]
    ff = jnp.dot(_gelu(ff).astype(ACT_DTYPE), w2_ref[...],
                 preferred_element_type=jnp.float32) + b2_ref[...]
    out = _ln(h1 + ff, ln2_ref[...], eps)
    o_ref[...] = out.astype(o_ref.dtype)

    if pool:
        # fused torch.mean(last_hidden_state, dim=1) on the final layer output
        pooled_ref = rest[0]
        means = [jnp.mean(out[b * seq:(b + 1) * seq, :], axis=0, keepdims=True)
                 for b in range(batch)]
        pooled_ref[...] = jnp.concatenate(means, axis=0)    # [B, H] f32


# ------------------------------ Pallas wrappers ------------------------------
def pallas_frontend(patches, params, *, t1, t2):
    b, t0, k0 = patches.shape
    c = CONV_DIM
    hid = HIDDEN
    hg = hid // POS_GROUPS
    pad = POS_KERNEL // 2
    kern = functools.partial(_frontend_kernel, batch=b, t1=t1, t2=t2,
                             groups=POS_GROUPS, pos_kernel=POS_KERNEL,
                             pad=pad, eps=LN_EPS)
    return pl.pallas_call(
        kern,
        out_shape=jax.ShapeDtypeStruct((b * t2, hid), ACT_DTYPE),
        grid=(1,),
        in_specs=[_full_spec((b, t0, k0)),
                  _full_spec((k0, c)),
                  _full_spec((2, c)),
                  _full_spec((CONV_KERNELS[1], c, c)),
                  _full_spec((CONV_KERNELS[2], c, c)),
                  _full_spec((2, c)),
                  _full_spec((c, hid)),
                  _full_spec((1, hid)),
                  _full_spec((POS_KERNEL, POS_GROUPS, hg, hg)),
                  _full_spec((1, hid)),
                  _full_spec((2, hid))],
        out_specs=_full_spec((b * t2, hid)),
        scratch_shapes=[pltpu.VMEM((t0, c), jnp.float32),
                        pltpu.VMEM((t1, c), jnp.float32),
                        pltpu.VMEM((t2 + 2 * pad, hid), jnp.float32)],
        compiler_params=_ARB1,
    )(patches, params["conv_w0"], params["conv_gn0"], params["conv_w1"],
      params["conv_w2"], params["fp_ln"], params["fp_w"], params["fp_b"],
      params["pos_w"], params["pos_b"], params["enc_ln"])


def pallas_encoder_layer(h, p, *, batch, seq, pool,
                         num_heads=NUM_HEADS, eps=LN_EPS):
    bt, hidden = h.shape
    dh = hidden // num_heads
    inter = p["w1"].shape[-1]
    in_specs = [_full_spec((bt, hidden)),
                _full_spec((num_heads, hidden, dh)),
                _full_spec((num_heads, hidden, dh)),
                _full_spec((num_heads, hidden, dh)),
                _full_spec((num_heads, 1, dh)),
                _full_spec((num_heads, 1, dh)),
                _full_spec((num_heads, 1, dh)),
                _full_spec((num_heads, dh, hidden)),
                _full_spec((1, hidden)),
                _full_spec((2, hidden)),
                _full_spec((hidden, inter)),
                _full_spec((1, inter)),
                _full_spec((inter, hidden)),
                _full_spec((1, hidden)),
                _full_spec((2, hidden))]
    if pool:
        out_shape = (jax.ShapeDtypeStruct((bt, hidden), ACT_DTYPE),
                     jax.ShapeDtypeStruct((batch, hidden), jnp.float32))
        out_specs = (_full_spec((bt, hidden)), _full_spec((batch, hidden)))
    else:
        out_shape = jax.ShapeDtypeStruct((bt, hidden), ACT_DTYPE)
        out_specs = _full_spec((bt, hidden))
    kern = functools.partial(_encoder_layer_kernel, batch=batch, seq=seq,
                             num_heads=num_heads, eps=eps, pool=pool)
    return pl.pallas_call(
        kern, out_shape=out_shape, grid=(1,),
        in_specs=in_specs, out_specs=out_specs,
        compiler_params=_ARB1,
    )(h, p["wq"], p["wk"], p["wv"], p["bq"], p["bk"], p["bv"], p["wo"], p["bo"],
      p["ln1"], p["w1"], p["b1"], p["w2"], p["b2"], p["ln2"])


# ------------------------------ parameter init -------------------------------
def init_params(key):
    keys = iter(jax.random.split(key, 64))

    def nrm(shape, scale=0.02, dtype=ACT_DTYPE):
        return (scale * jax.random.normal(next(keys), shape, jnp.float32)).astype(dtype)

    def ln_params(c):  # [2, c]: row 0 = gamma, row 1 = beta
        return jnp.concatenate([jnp.ones((1, c), jnp.float32),
                                jnp.zeros((1, c), jnp.float32)], axis=0)

    dh = HIDDEN // NUM_HEADS
    hg = HIDDEN // POS_GROUPS
    p = {
        # conv feature extractor (conv_bias=False, as in wavlm-base)
        "conv_w0": nrm((CONV_KERNELS[0], CONV_DIM)),                 # c_in == 1
        "conv_gn0": ln_params(CONV_DIM),
        "conv_w1": nrm((CONV_KERNELS[1], CONV_DIM, CONV_DIM)),       # tap-major
        "conv_w2": nrm((CONV_KERNELS[2], CONV_DIM, CONV_DIM)),
        # feature projection
        "fp_ln": ln_params(CONV_DIM),
        "fp_w": nrm((CONV_DIM, HIDDEN)),
        "fp_b": nrm((1, HIDDEN), dtype=jnp.float32),
        # positional grouped conv, true grouped storage [K, G, H/g, H/g]
        # TODO(synk): HF weight-norm parametrization of pos conv not reproduced.
        "pos_w": nrm((POS_KERNEL, POS_GROUPS, hg, hg)),
        "pos_b": nrm((1, HIDDEN), dtype=jnp.float32),
        "enc_ln": ln_params(HIDDEN),
    }
    layers = []
    for _ in range(NUM_LAYERS):
        layers.append({
            "wq": nrm((NUM_HEADS, HIDDEN, dh)),
            "bq": nrm((NUM_HEADS, 1, dh), dtype=jnp.float32),
            "wk": nrm((NUM_HEADS, HIDDEN, dh)),
            "bk": nrm((NUM_HEADS, 1, dh), dtype=jnp.float32),
            "wv": nrm((NUM_HEADS, HIDDEN, dh)),
            "bv": nrm((NUM_HEADS, 1, dh), dtype=jnp.float32),
            "wo": nrm((NUM_HEADS, dh, HIDDEN)),
            "bo": nrm((1, HIDDEN), dtype=jnp.float32),
            "ln1": ln_params(HIDDEN),
            "w1": nrm((HIDDEN, INTERMEDIATE)),
            "b1": nrm((1, INTERMEDIATE), dtype=jnp.float32),
            "w2": nrm((INTERMEDIATE, HIDDEN)),
            "b2": nrm((1, HIDDEN), dtype=jnp.float32),
            "ln2": ln_params(HIDDEN),
        })
    p["layers"] = layers
    return p


# ------------------------------ forward pass ---------------------------------
def wavlm_forward(params, input_waveform, attention_mask=None):
    """Equivalent of WavLM.forward: returns {'embedding': mean_t(last_hidden_state)}."""
    del attention_mask  # TODO(synk): attention_mask (padding) handling omitted.

    b, length = input_waveform.shape
    k0, s0 = CONV_KERNELS[0], CONV_STRIDES[0]
    assert k0 == 2 * s0 and length % s0 == 0
    # layer-0 im2col (c_in == 1) in plain JAX: reshape + shifted concat only.
    w5 = input_waveform.reshape(b, length // s0, s0)
    patches = jnp.concatenate([w5[:, :-1, :], w5[:, 1:, :]], axis=-1).astype(ACT_DTYPE)
    t0 = patches.shape[1]
    t1 = (t0 - CONV_KERNELS[1]) // CONV_STRIDES[1] + 1
    t2 = (t1 - CONV_KERNELS[2]) // CONV_STRIDES[2] + 1

    # fused conv stack + feature projection + positional conv + residual + LN
    h = pallas_frontend(patches, params, t1=t1, t2=t2)        # [B*T, H] bf16

    n_layers = len(params["layers"])
    pooled = None
    for i, layer in enumerate(params["layers"]):
        last = (i == n_layers - 1)
        res = pallas_encoder_layer(h, layer, batch=b, seq=t2, pool=last)
        if last:
            h, pooled = res                                   # pooled: [B, H] f32
        else:
            h = res
    return {"embedding": pooled}


# ----------------------------------- main ------------------------------------
if __name__ == "__main__":
    key = jax.random.PRNGKey(0)
    pkey, xkey = jax.random.split(key)
    params = init_params(pkey)
    waveform = jax.random.normal(xkey, (BATCH, WAVE_LEN), dtype=jnp.float32)

    fwd = jax.jit(wavlm_forward)
    out = fwd(params, waveform)
    emb = jax.block_until_ready(out["embedding"])

    assert emb.shape == (BATCH, HIDDEN), emb.shape
    assert bool(jnp.all(jnp.isfinite(emb)))
    print("KERNEL_OK")
</pallas_src>

<mosaic_0001>
module attributes {stable_mosaic.version = 11 : i64} {
  func.func @_frontend_kernel(%arg0: i32, %arg1: memref<2x65x10xbf16, #tpu.memory_space<vmem>>, %arg2: memref<10x32xbf16, #tpu.memory_space<vmem>>, %arg3: memref<2x32xf32, #tpu.memory_space<vmem>>, %arg4: memref<3x32x32xbf16, #tpu.memory_space<vmem>>, %arg5: memref<2x32x32xbf16, #tpu.memory_space<vmem>>, %arg6: memref<2x32xf32, #tpu.memory_space<vmem>>, %arg7: memref<32x128xbf16, #tpu.memory_space<vmem>>, %arg8: memref<1x128xf32, #tpu.memory_space<vmem>>, %arg9: memref<4x2x64x64xbf16, #tpu.memory_space<vmem>>, %arg10: memref<1x128xf32, #tpu.memory_space<vmem>>, %arg11: memref<2x128xf32, #tpu.memory_space<vmem>>, %arg12: memref<32x128xbf16, #tpu.memory_space<vmem>>, %arg13: memref<65x32xf32, #tpu.memory_space<vmem>>, %arg14: memref<32x32xf32, #tpu.memory_space<vmem>>, %arg15: memref<20x128xf32, #tpu.memory_space<vmem>>) attributes {dimension_semantics = [#tpu.dimension_semantics<arbitrary>], iteration_bounds = array<i64: 1>, scalar_prefetch = 0 : i64, scratch_operands = 3 : i64, tpu.core_type = #tpu.core_type<tc>, window_params = [{pipeline_mode = #tpu.pipeline_mode<synchronous>, transform_indices = @transform_0, window_bounds = array<i64: 2, 65, 10>}, {pipeline_mode = #tpu.pipeline_mode<synchronous>, transform_indices = @transform_1, window_bounds = array<i64: 10, 32>}, {pipeline_mode = #tpu.pipeline_mode<synchronous>, transform_indices = @transform_2, window_bounds = array<i64: 2, 32>}, {pipeline_mode = #tpu.pipeline_mode<synchronous>, transform_indices = @transform_3, window_bounds = array<i64: 3, 32, 32>}, {pipeline_mode = #tpu.pipeline_mode<synchronous>, transform_indices = @transform_4, window_bounds = array<i64: 2, 32, 32>}, {pipeline_mode = #tpu.pipeline_mode<synchronous>, transform_indices = @transform_5, window_bounds = array<i64: 2, 32>}, {pipeline_mode = #tpu.pipeline_mode<synchronous>, transform_indices = @transform_6, window_bounds = array<i64: 32, 128>}, {pipeline_mode = #tpu.pipeline_mode<synchronous>, transform_indices = @transform_7, window_bounds = array<i64: 1, 128>}, {pipeline_mode = #tpu.pipeline_mode<synchronous>, transform_indices = @transform_8, window_bounds = array<i64: 4, 2, 64, 64>}, {pipeline_mode = #tpu.pipeline_mode<synchronous>, transform_indices = @transform_9, window_bounds = array<i64: 1, 128>}, {pipeline_mode = #tpu.pipeline_mode<synchronous>, transform_indices = @transform_10, window_bounds = array<i64: 2, 128>}, {pipeline_mode = #tpu.pipeline_mode<synchronous>, transform_indices = @transform_11, window_bounds = array<i64: 32, 128>}]} {
    %c0 = arith.constant 0 : index
    %c0_0 = arith.constant 0 : index
    %0 = vector.load %arg2[%c0, %c0_0] : memref<10x32xbf16, #tpu.memory_space<vmem>>, vector<10x32xbf16>
    %c0_1 = arith.constant 0 : index
    %c0_2 = arith.constant 0 : index
    %1 = vector.load %arg3[%c0_1, %c0_2] : memref<2x32xf32, #tpu.memory_space<vmem>>, vector<2x32xf32>
    %c0_3 = arith.constant 0 : index
    %c0_4 = arith.constant 0 : index
    %2 = vector.load %arg6[%c0_3, %c0_4] : memref<2x32xf32, #tpu.memory_space<vmem>>, vector<2x32xf32>
    %c0_5 = arith.constant 0 : index
    %c0_6 = arith.constant 0 : index
    %3 = vector.load %arg7[%c0_5, %c0_6] : memref<32x128xbf16, #tpu.memory_space<vmem>>, vector<32x128xbf16>
    %c0_7 = arith.constant 0 : index
    %c0_8 = arith.constant 0 : index
    %4 = vector.load %arg8[%c0_7, %c0_8] : memref<1x128xf32, #tpu.memory_space<vmem>>, vector<1x128xf32>
    %c0_9 = arith.constant 0 : index
    %c0_10 = arith.constant 0 : index
    %5 = vector.load %arg10[%c0_9, %c0_10] : memref<1x128xf32, #tpu.memory_space<vmem>>, vector<1x128xf32>
    %c0_11 = arith.constant 0 : index
    %c0_12 = arith.constant 0 : index
    %6 = vector.load %arg11[%c0_11, %c0_12] : memref<2x128xf32, #tpu.memory_space<vmem>>, vector<2x128xf32>
    %cst = arith.constant 0.000000e+00 : f32
    %7 = vector.broadcast %cst : f32 to vector<20x128xf32>
    %c0_13 = arith.constant 0 : index
    %c0_14 = arith.constant 0 : index
    %8 = vector.load %arg15[%c0_13, %c0_14] : memref<20x128xf32, #tpu.memory_space<vmem>>, vector<20x128xf32>
    tpu.vector_store %arg15[%c0_13, %c0_14], %7 {strides = array<i32>} : memref<20x128xf32, #tpu.memory_space<vmem>>, vector<20x128xf32>,
    %c0_15 = arith.constant 0 : index
    %c0_16 = arith.constant 0 : index
    %c0_17 = arith.constant 0 : index
    %9 = vector.load %arg1[%c0_15, %c0_16, %c0_17] : memref<2x65x10xbf16, #tpu.memory_space<vmem>>, vector<1x65x10xbf16>
    %10 = vector.shape_cast %9 : vector<1x65x10xbf16> to vector<65x10xbf16>
    %cst_18 = arith.constant dense<0.000000e+00> : vector<65x32xf32>
    %11 = tpu.matmul %10, %0, %cst_18 {dimension_numbers = #tpu.dot_dimension_numbers<[1], [0], [0], [1], [0, 0, 1, 1], [], []>} : vector<65x10xbf16>, vector<10x32xbf16>, vector<65x32xf32> -> vector<65x32xf32>
    %cst_19 = arith.constant dense<0.000000e+00> : vector<32xf32>
    %12 = vector.multi_reduction <add>, %11, %cst_19 [0] : vector<65x32xf32> to vector<32xf32>
    %13 = vector.shape_cast %12 : vector<32xf32> to vector<1x32xf32>
    %cst_20 = arith.constant 6.500000e+01 : f32
    %14 = vector.broadcast %cst_20 : f32 to vector<1x32xf32>
    %15 = arith.divf %13, %14 : vector<1x32xf32>
    %16 = vector.broadcast %15 : vector<1x32xf32> to vector<65x32xf32>
    %17 = arith.subf %11, %16 : vector<65x32xf32>
    %18 = arith.mulf %17, %17 : vector<65x32xf32>
    %cst_21 = arith.constant dense<0.000000e+00> : vector<32xf32>
    %19 = vector.multi_reduction <add>, %18, %cst_21 [0] : vector<65x32xf32> to vector<32xf32>
    %20 = vector.shape_cast %19 : vector<32xf32> to vector<1x32xf32>
    %cst_22 = arith.constant 6.500000e+01 : f32
    %21 = vector.broadcast %cst_22 : f32 to vector<1x32xf32>
    %22 = arith.divf %20, %21 : vector<1x32xf32>
    %23 = vector.broadcast %15 : vector<1x32xf32> to vector<65x32xf32>
    %24 = arith.subf %11, %23 : vector<65x32xf32>
    %cst_23 = arith.constant 9.99999974E-6 : f32
    %25 = vector.broadcast %cst_23 : f32 to vector<1x32xf32>
    %26 = arith.addf %22, %25 : vector<1x32xf32>
    %27 = math.rsqrt %26 : vector<1x32xf32>
    %28 = vector.broadcast %27 : vector<1x32xf32> to vector<65x32xf32>
    %29 = arith.mulf %24, %28 : vector<65x32xf32>
    %30 = vector.extract_strided_slice %1 {offsets = [0, 0], sizes = [1, 32], strides = [1, 1]} : vector<2x32xf32> to vector<1x32xf32>
    %31 = vector.broadcast %30 : vector<1x32xf32> to vector<65x32xf32>
    %32 = arith.mulf %29, %31 : vector<65x32xf32>
    %33 = vector.extract_strided_slice %1 {offsets = [1, 0], sizes = [1, 32], strides = [1, 1]} : vector<2x32xf32> to vector<1x32xf32>
    %34 = vector.broadcast %33 : vector<1x32xf32> to vector<65x32xf32>
    %35 = arith.addf %32, %34 : vector<65x32xf32>
    %cst_24 = arith.constant 5.000000e-01 : f32
    %36 = vector.broadcast %cst_24 : f32 to vector<65x32xf32>
    %37 = arith.mulf %36, %35 : vector<65x32xf32>
    %cst_25 = arith.constant 4.471500e-02 : f32
    %38 = vector.broadcast %cst_25 : f32 to vector<65x32xf32>
    %39 = arith.mulf %38, %35 : vector<65x32xf32>
    %40 = arith.mulf %39, %35 : vector<65x32xf32>
    %41 = arith.mulf %40, %35 : vector<65x32xf32>
    %42 = arith.addf %35, %41 : vector<65x32xf32>
    %cst_26 = arith.constant 0.797884583 : f32
    %43 = vector.broadcast %cst_26 : f32 to vector<65x32xf32>
    %44 = arith.mulf %43, %42 : vector<65x32xf32>
    %45 = math.tanh %44 : vector<65x32xf32>
    %cst_27 = arith.constant 1.000000e+00 : f32
    %46 = vector.broadcast %cst_27 : f32 to vector<65x32xf32>
    %47 = arith.addf %46, %45 : vector<65x32xf32>
    %48 = arith.mulf %37, %47 : vector<65x32xf32>
    %c0_28 = arith.constant 0 : index
    %c0_29 = arith.constant 0 : index
    %49 = vector.load %arg13[%c0_28, %c0_29] : memref<65x32xf32, #tpu.memory_space<vmem>>, vector<65x32xf32>
    tpu.vector_store %arg13[%c0_28, %c0_29], %48 {strides = array<i32>} : memref<65x32xf32, #tpu.memory_space<vmem>>, vector<65x32xf32>,
    %cst_30 = arith.constant 0.000000e+00 : f32
    %50 = vector.broadcast %cst_30 : f32 to vector<32x32xf32>
    %c0_31 = arith.constant 0 : index
    %c0_32 = arith.constant 0 : index
    %51 = tpu.strided_load %arg13[%c0_31, %c0_32] {strides = array<i32: 2, 1>} : memref<65x32xf32, #tpu.memory_space<vmem>>, vector<32x32xf32>
    %52 = arith.truncf %51 : vector<32x32xf32> to vector<32x32xbf16>
    %c0_33 = arith.constant 0 : index
    %c0_34 = arith.constant 0 : index
    %c0_35 = arith.constant 0 : index
    %53 = vector.load %arg4[%c0_33, %c0_34, %c0_35] : memref<3x32x32xbf16, #tpu.memory_space<vmem>>, vector<1x32x32xbf16>
    %54 = vector.shape_cast %53 : vector<1x32x32xbf16> to vector<32x32xbf16>
    %cst_36 = arith.constant dense<0.000000e+00> : vector<32x32xf32>
    %55 = tpu.matmul %52, %54, %cst_36 {dimension_numbers = #tpu.dot_dimension_numbers<[1], [0], [0], [1], [0, 0, 1, 1], [], []>} : vector<32x32xbf16>, vector<32x32xbf16>, vector<32x32xf32> -> vector<32x32xf32>
    %56 = arith.addf %50, %55 : vector<32x32xf32>
    %c1 = arith.constant 1 : index
    %c0_37 = arith.constant 0 : index
    %57 = tpu.strided_load %arg13[%c1, %c0_37] {strides = array<i32: 2, 1>} : memref<65x32xf32, #tpu.memory_space<vmem>>, vector<32x32xf32>
    %58 = arith.truncf %57 : vector<32x32xf32> to vector<32x32xbf16>
    %c1_38 = arith.constant 1 : index
    %c0_39 = arith.constant 0 : index
    %c0_40 = arith.constant 0 : index
    %59 = vector.load %arg4[%c1_38, %c0_39, %c0_40] : memref<3x32x32xbf16, #tpu.memory_space<vmem>>, vector<1x32x32xbf16>
    %60 = vector.shape_cast %59 : vector<1x32x32xbf16> to vector<32x32xbf16>
    %cst_41 = arith.constant dense<0.000000e+00> : vector<32x32xf32>
    %61 = tpu.matmul %58, %60, %cst_41 {dimension_numbers = #tpu.dot_dimension_numbers<[1], [0], [0], [1], [0, 0, 1, 1], [], []>} : vector<32x32xbf16>, vector<32x32xbf16>, vector<32x32xf32> -> vector<32x32xf32>
    %62 = arith.addf %56, %61 : vector<32x32xf32>
    %c2 = arith.constant 2 : index
    %c0_42 = arith.constant 0 : index
    %63 = tpu.strided_load %arg13[%c2, %c0_42] {strides = array<i32: 2, 1>} : memref<65x32xf32, #tpu.memory_space<vmem>>, vector<32x32xf32>
    %64 = arith.truncf %63 : vector<32x32xf32> to vector<32x32xbf16>
    %c2_43 = arith.constant 2 : index
    %c0_44 = arith.constant 0 : index
    %c0_45 = arith.constant 0 : index
    %65 = vector.load %arg4[%c2_43, %c0_44, %c0_45] : memref<3x32x32xbf16, #tpu.memory_space<vmem>>, vector<1x32x32xbf16>
    %66 = vector.shape_cast %65 : vector<1x32x32xbf16> to vector<32x32xbf16>
    %cst_46 = arith.constant dense<0.000000e+00> : vector<32x32xf32>
    %67 = tpu.matmul %64, %66, %cst_46 {dimension_numbers = #tpu.dot_dimension_numbers<[1], [0], [0], [1], [0, 0, 1, 1], [], []>} : vector<32x32xbf16>, vector<32x32xbf16>, vector<32x32xf32> -> vector<32x32xf32>
    %68 = arith.addf %62, %67 : vector<32x32xf32>
    %cst_47 = arith.constant 5.000000e-01 : f32
    %69 = vector.broadcast %cst_47 : f32 to vector<32x32xf32>
    %70 = arith.mulf %69, %68 : vector<32x32xf32>
    %cst_48 = arith.constant 4.471500e-02 : f32
    %71 = vector.broadcast %cst_48 : f32 to vector<32x32xf32>
    %72 = arith.mulf %71, %68 : vector<32x32xf32>
    %73 = arith.mulf %72, %68 : vector<32x32xf32>
    %74 = arith.mulf %73, %68 : vector<32x32xf32>
    %75 = arith.addf %68, %74 : vector<32x32xf32>
    %cst_49 = arith.constant 0.797884583 : f32
    %76 = vector.broadcast %cst_49 : f32 to vector<32x32xf32>
    %77 = arith.mulf %76, %75 : vector<32x32xf32>
    %78 = math.tanh %77 : vector<32x32xf32>
    %cst_50 = arith.constant 1.000000e+00 : f32
    %79 = vector.broadcast %cst_50 : f32 to vector<32x32xf32>
    %80 = arith.addf %79, %78 : vector<32x32xf32>
    %81 = arith.mulf %70, %80 : vector<32x32xf32>
    %c0_51 = arith.constant 0 : index
    %c0_52 = arith.constant 0 : index
    %82 = vector.load %arg14[%c0_51, %c0_52] : memref<32x32xf32, #tpu.memory_space<vmem>>, vector<32x32xf32>
    tpu.vector_store %arg14[%c0_51, %c0_52], %81 {strides = array<i32>} : memref<32x32xf32, #tpu.memory_space<vmem>>, vector<32x32xf32>,
    %cst_53 = arith.constant 0.000000e+00 : f32
    %83 = vector.broadcast %cst_53 : f32 to vector<16x32xf32>
    %c0_54 = arith.constant 0 : index
    %c0_55 = arith.constant 0 : index
    %84 = tpu.strided_load %arg14[%c0_54, %c0_55] {strides = array<i32: 2, 1>} : memref<32x32xf32, #tpu.memory_space<vmem>>, vector<16x32xf32>
    %85 = arith.truncf %84 : vector<16x32xf32> to vector<16x32xbf16>
    %c0_56 = arith.constant 0 : index
    %c0_57 = arith.constant 0 : index
    %c0_58 = arith.constant 0 : index
    %86 = vector.load %arg5[%c0_56, %c0_57, %c0_58] : memref<2x32x32xbf16, #tpu.memory_space<vmem>>, vector<1x32x32xbf16>
    %87 = vector.shape_cast %86 : vector<1x32x32xbf16> to vector<32x32xbf16>
    %cst_59 = arith.constant dense<0.000000e+00> : vector<16x32xf32>
    %88 = tpu.matmul %85, %87, %cst_59 {dimension_numbers = #tpu.dot_dimension_numbers<[1], [0], [0], [1], [0, 0, 1, 1], [], []>} : vector<16x32xbf16>, vector<32x32xbf16>, vector<16x32xf32> -> vector<16x32xf32>
    %89 = arith.addf %83, %88 : vector<16x32xf32>
    %c1_60 = arith.constant 1 : index
    %c0_61 = arith.constant 0 : index
    %90 = tpu.strided_load %arg14[%c1_60, %c0_61] {strides = array<i32: 2, 1>} : memref<32x32xf32, #tpu.memory_space<vmem>>, vector<16x32xf32>
    %91 = arith.truncf %90 : vector<16x32xf32> to vector<16x32xbf16>
    %c1_62 = arith.constant 1 : index
    %c0_63 = arith.constant 0 : index
    %c0_64 = arith.constant 0 : index
    %92 = vector.load %arg5[%c1_62, %c0_63, %c0_64] : memref<2x32x32xbf16, #tpu.memory_space<vmem>>, vector<1x32x32xbf16>
    %93 = vector.shape_cast %92 : vector<1x32x32xbf16> to vector<32x32xbf16>
    %cst_65 = arith.constant dense<0.000000e+00> : vector<16x32xf32>
    %94 = tpu.matmul %91, %93, %cst_65 {dimension_numbers = #tpu.dot_dimension_numbers<[1], [0], [0], [1], [0, 0, 1, 1], [], []>} : vector<16x32xbf16>, vector<32x32xbf16>, vector<16x32xf32> -> vector<16x32xf32>
    %95 = arith.addf %89, %94 : vector<16x32xf32>
    %cst_66 = arith.constant 5.000000e-01 : f32
    %96 = vector.broadcast %cst_66 : f32 to vector<16x32xf32>
    %97 = arith.mulf %96, %95 : vector<16x32xf32>
    %cst_67 = arith.constant 4.471500e-02 : f32
    %98 = vector.broadcast %cst_67 : f32 to vector<16x32xf32>
    %99 = arith.mulf %98, %95 : vector<16x32xf32>
    %100 = arith.mulf %99, %95 : vector<16x32xf32>
    %101 = arith.mulf %100, %95 : vector<16x32xf32>
    %102 = arith.addf %95, %101 : vector<16x32xf32>
    %cst_68 = arith.constant 0.797884583 : f32
    %103 = vector.broadcast %cst_68 : f32 to vector<16x32xf32>
    %104 = arith.mulf %103, %102 : vector<16x32xf32>
    %105 = math.tanh %104 : vector<16x32xf32>
    %cst_69 = arith.constant 1.000000e+00 : f32
    %106 = vector.broadcast %cst_69 : f32 to vector<16x32xf32>
    %107 = arith.addf %106, %105 : vector<16x32xf32>
    %108 = arith.mulf %97, %107 : vector<16x32xf32>
    %cst_70 = arith.constant dense<0.000000e+00> : vector<16xf32>
    %109 = vector.multi_reduction <add>, %108, %cst_70 [1] : vector<16x32xf32> to vector<16xf32>
    %110 = vector.shape_cast %109 : vector<16xf32> to vector<16x1xf32>
    %cst_71 = arith.constant 3.200000e+01 : f32
    %111 = vector.broadcast %cst_71 : f32 to vector<16x1xf32>
    %112 = arith.divf %110, %111 : vector<16x1xf32>
    %113 = vector.broadcast %112 : vector<16x1xf32> to vector<16x32xf32>
    %114 = arith.subf %108, %113 : vector<16x32xf32>
    %115 = arith.mulf %114, %114 : vector<16x32xf32>
    %cst_72 = arith.constant dense<0.000000e+00> : vector<16xf32>
    %116 = vector.multi_reduction <add>, %115, %cst_72 [1] : vector<16x32xf32> to vector<16xf32>
    %117 = vector.shape_cast %116 : vector<16xf32> to vector<16x1xf32>
    %cst_73 = arith.constant 3.200000e+01 : f32
    %118 = vector.broadcast %cst_73 : f32 to vector<16x1xf32>
    %119 = arith.divf %117, %118 : vector<16x1xf32>
    %120 = vector.broadcast %112 : vector<16x1xf32> to vector<16x32xf32>
    %121 = arith.subf %108, %120 : vector<16x32xf32>
    %cst_74 = arith.constant 9.99999974E-6 : f32
    %122 = vector.broadcast %cst_74 : f32 to vector<16x1xf32>
    %123 = arith.addf %119, %122 : vector<16x1xf32>
    %124 = math.rsqrt %123 : vector<16x1xf32>
    %125 = vector.broadcast %124 : vector<16x1xf32> to vector<16x32xf32>
    %126 = arith.mulf %121, %125 : vector<16x32xf32>
    %127 = vector.extract_strided_slice %2 {offsets = [0, 0], sizes = [1, 32], strides = [1, 1]} : vector<2x32xf32> to vector<1x32xf32>
    %128 = vector.broadcast %127 : vector<1x32xf32> to vector<16x32xf32>
    %129 = arith.mulf %126, %128 : vector<16x32xf32>
    %130 = vector.extract_strided_slice %2 {offsets = [1, 0], sizes = [1, 32], strides = [1, 1]} : vector<2x32xf32> to vector<1x32xf32>
    %131 = vector.broadcast %130 : vector<1x32xf32> to vector<16x32xf32>
    %132 = arith.addf %129, %131 : vector<16x32xf32>
    %133 = arith.truncf %132 : vector<16x32xf32> to vector<16x32xbf16>
    %cst_75 = arith.constant dense<0.000000e+00> : vector<16x128xf32>
    %134 = tpu.matmul %133, %3, %cst_75 {dimension_numbers = #tpu.dot_dimension_numbers<[1], [0], [0], [1], [0, 0, 1, 1], [], []>} : vector<16x32xbf16>, vector<32x128xbf16>, vector<16x128xf32> -> vector<16x128xf32>
    %135 = vector.broadcast %4 : vector<1x128xf32> to vector<16x128xf32>
    %136 = arith.addf %134, %135 : vector<16x128xf32>
    %c2_76 = arith.constant 2 : index
    %c0_77 = arith.constant 0 : index
    %137 = vector.load %arg15[%c2_76, %c0_77] : memref<20x128xf32, #tpu.memory_space<vmem>>, vector<16x128xf32>
    tpu.vector_store %arg15[%c2_76, %c0_77], %136 {strides = array<i32>} : memref<20x128xf32, #tpu.memory_space<vmem>>, vector<16x128xf32>,
    %cst_78 = arith.constant 0.000000e+00 : f32
    %138 = vector.broadcast %cst_78 : f32 to vector<16x64xf32>
    %c0_79 = arith.constant 0 : index
    %c0_80 = arith.constant 0 : index
    %139 = vector.load %arg15[%c0_79, %c0_80] : memref<20x128xf32, #tpu.memory_space<vmem>>, vector<16x64xf32>
    %140 = arith.truncf %139 : vector<16x64xf32> to vector<16x64xbf16>
    %c0_81 = arith.constant 0 : index
    %c0_82 = arith.constant 0 : index
    %c0_83 = arith.constant 0 : index
    %c0_84 = arith.constant 0 : index
    %141 = vector.load %arg9[%c0_81, %c0_82, %c0_83, %c0_84] : memref<4x2x64x64xbf16, #tpu.memory_space<vmem>>, vector<1x1x64x64xbf16>
    %142 = vector.shape_cast %141 : vector<1x1x64x64xbf16> to vector<64x64xbf16>
    %cst_85 = arith.constant dense<0.000000e+00> : vector<16x64xf32>
    %143 = tpu.matmul %140, %142, %cst_85 {dimension_numbers = #tpu.dot_dimension_numbers<[1], [0], [0], [1], [0, 0, 1, 1], [], []>} : vector<16x64xbf16>, vector<64x64xbf16>, vector<16x64xf32> -> vector<16x64xf32>
    %144 = arith.addf %138, %143 : vector<16x64xf32>
    %c1_86 = arith.constant 1 : index
    %c0_87 = arith.constant 0 : index
    %145 = vector.load %arg15[%c1_86, %c0_87] : memref<20x128xf32, #tpu.memory_space<vmem>>, vector<16x64xf32>
    %146 = arith.truncf %145 : vector<16x64xf32> to vector<16x64xbf16>
    %c1_88 = arith.constant 1 : index
    %c0_89 = arith.constant 0 : index
    %c0_90 = arith.constant 0 : index
    %c0_91 = arith.constant 0 : index
    %147 = vector.load %arg9[%c1_88, %c0_89, %c0_90, %c0_91] : memref<4x2x64x64xbf16, #tpu.memory_space<vmem>>, vector<1x1x64x64xbf16>
    %148 = vector.shape_cast %147 : vector<1x1x64x64xbf16> to vector<64x64xbf16>
    %cst_92 = arith.constant dense<0.000000e+00> : vector<16x64xf32>
    %149 = tpu.matmul %146, %148, %cst_92 {dimension_numbers = #tpu.dot_dimension_numbers<[1], [0], [0], [1], [0, 0, 1, 1], [], []>} : vector<16x64xbf16>, vector<64x64xbf16>, vector<16x64xf32> -> vector<16x64xf32>
    %150 = arith.addf %144, %149 : vector<16x64xf32>
    %c2_93 = arith.constant 2 : index
    %c0_94 = arith.constant 0 : index
    %151 = vector.load %arg15[%c2_93, %c0_94] : memref<20x128xf32, #tpu.memory_space<vmem>>, vector<16x64xf32>
    %152 = arith.truncf %151 : vector<16x64xf32> to vector<16x64xbf16>
    %c2_95 = arith.constant 2 : index
    %c0_96 = arith.constant 0 : index
    %c0_97 = arith.constant 0 : index
    %c0_98 = arith.constant 0 : index
    %153 = vector.load %arg9[%c2_95, %c0_96, %c0_97, %c0_98] : memref<4x2x64x64xbf16, #tpu.memory_space<vmem>>, vector<1x1x64x64xbf16>
    %154 = vector.shape_cast %153 : vector<1x1x64x64xbf16> to vector<64x64xbf16>
    %cst_99 = arith.constant dense<0.000000e+00> : vector<16x64xf32>
    %155 = tpu.matmul %152, %154, %cst_99 {dimension_numbers = #tpu.dot_dimension_numbers<[1], [0], [0], [1], [0, 0, 1, 1], [], []>} : vector<16x64xbf16>, vector<64x64xbf16>, vector<16x64xf32> -> vector<16x64xf32>
    %156 = arith.addf %150, %155 : vector<16x64xf32>
    %c3 = arith.constant 3 : index
    %c0_100 = arith.constant 0 : index
    %157 = vector.load %arg15[%c3, %c0_100] : memref<20x128xf32, #tpu.memory_space<vmem>>, vector<16x64xf32>
    %158 = arith.truncf %157 : vector<16x64xf32> to vector<16x64xbf16>
    %c3_101 = arith.constant 3 : index
    %c0_102 = arith.constant 0 : index
    %c0_103 = arith.constant 0 : index
    %c0_104 = arith.constant 0 : index
    %159 = vector.load %arg9[%c3_101, %c0_102, %c0_103, %c0_104] : memref<4x2x64x64xbf16, #tpu.memory_space<vmem>>, vector<1x1x64x64xbf16>
    %160 = vector.shape_cast %159 : vector<1x1x64x64xbf16> to vector<64x64xbf16>
    %cst_105 = arith.constant dense<0.000000e+00> : vector<16x64xf32>
    %161 = tpu.matmul %158, %160, %cst_105 {dimension_numbers = #tpu.dot_dimension_numbers<[1], [0], [0], [1], [0, 0, 1, 1], [], []>} : vector<16x64xbf16>, vector<64x64xbf16>, vector<16x64xf32> -> vector<16x64xf32>
    %162 = arith.addf %156, %161 : vector<16x64xf32>
    %cst_106 = arith.constant 0.000000e+00 : f32
    %163 = vector.broadcast %cst_106 : f32 to vector<16x64xf32>
    %c0_107 = arith.constant 0 : index
    %c64 = arith.constant 64 : index
    %164 = vector.load %arg15[%c0_107, %c64] : memref<20x128xf32, #tpu.memory_space<vmem>>, vector<16x64xf32>
    %165 = arith.truncf %164 : vector<16x64xf32> to vector<16x64xbf16>
    %c0_108 = arith.constant 0 : index
    %c1_109 = arith.constant 1 : index
    %c0_110 = arith.constant 0 : index
    %c0_111 = arith.constant 0 : index
    %166 = vector.load %arg9[%c0_108, %c1_109, %c0_110, %c0_111] : memref<4x2x64x64xbf16, #tpu.memory_space<vmem>>, vector<1x1x64x64xbf16>
    %167 = vector.shape_cast %166 : vector<1x1x64x64xbf16> to vector<64x64xbf16>
    %cst_112 = arith.constant dense<0.000000e+00> : vector<16x64xf32>
    %168 = tpu.matmul %165, %167, %cst_112 {dimension_numbers = #tpu.dot_dimension_numbers<[1], [0], [0], [1], [0, 0, 1, 1], [], []>} : vector<16x64xbf16>, vector<64x64xbf16>, vector<16x64xf32> -> vector<16x64xf32>
    %169 = arith.addf %163, %168 : vector<16x64xf32>
    %c1_113 = arith.constant 1 : index
    %c64_114 = arith.constant 64 : index
    %170 = vector.load %arg15[%c1_113, %c64_114] : memref<20x128xf32, #tpu.memory_space<vmem>>, vector<16x64xf32>
    %171 = arith.truncf %170 : vector<16x64xf32> to vector<16x64xbf16>
    %c1_115 = arith.constant 1 : index
    %c1_116 = arith.constant 1 : index
    %c0_117 = arith.constant 0 : index
    %c0_118 = arith.constant 0 : index
    %172 = vector.load %arg9[%c1_115, %c1_116, %c0_117, %c0_118] : memref<4x2x64x64xbf16, #tpu.memory_space<vmem>>, vector<1x1x64x64xbf16>
    %173 = vector.shape_cast %172 : vector<1x1x64x64xbf16> to vector<64x64xbf16>
    %cst_119 = arith.constant dense<0.000000e+00> : vector<16x64xf32>
    %174 = tpu.matmul %171, %173, %cst_119 {dimension_numbers = #tpu.dot_dimension_numbers<[1], [0], [0], [1], [0, 0, 1, 1], [], []>} : vector<16x64xbf16>, vector<64x64xbf16>, vector<16x64xf32> -> vector<16x64xf32>
    %175 = arith.addf %169, %174 : vector<16x64xf32>
    %c2_120 = arith.constant 2 : index
    %c64_121 = arith.constant 64 : index
    %176 = vector.load %arg15[%c2_120, %c64_121] : memref<20x128xf32, #tpu.memory_space<vmem>>, vector<16x64xf32>
    %177 = arith.truncf %176 : vector<16x64xf32> to vector<16x64xbf16>
    %c2_122 = arith.constant 2 : index
    %c1_123 = arith.constant 1 : index
    %c0_124 = arith.constant 0 : index
    %c0_125 = arith.constant 0 : index
    %178 = vector.load %arg9[%c2_122, %c1_123, %c0_124, %c0_125] : memref<4x2x64x64xbf16, #tpu.memory_space<vmem>>, vector<1x1x64x64xbf16>
    %179 = vector.shape_cast %178 : vector<1x1x64x64xbf16> to vector<64x64xbf16>
    %cst_126 = arith.constant dense<0.000000e+00> : vector<16x64xf32>
    %180 = tpu.matmul %177, %179, %cst_126 {dimension_numbers = #tpu.dot_dimension_numbers<[1], [0], [0], [1], [0, 0, 1, 1], [], []>} : vector<16x64xbf16>, vector<64x64xbf16>, vector<16x64xf32> -> vector<16x64xf32>
    %181 = arith.addf %175, %180 : vector<16x64xf32>
    %c3_127 = arith.constant 3 : index
    %c64_128 = arith.constant 64 : index
    %182 = vector.load %arg15[%c3_127, %c64_128] : memref<20x128xf32, #tpu.memory_space<vmem>>, vector<16x64xf32>
    %183 = arith.truncf %182 : vector<16x64xf32> to vector<16x64xbf16>
    %c3_129 = arith.constant 3 : index
    %c1_130 = arith.constant 1 : index
    %c0_131 = arith.constant 0 : index
    %c0_132 = arith.constant 0 : index
    %184 = vector.load %arg9[%c3_129, %c1_130, %c0_131, %c0_132] : memref<4x2x64x64xbf16, #tpu.memory_space<vmem>>, vector<1x1x64x64xbf16>
    %185 = vector.shape_cast %184 : vector<1x1x64x64xbf16> to vector<64x64xbf16>
    %cst_133 = arith.constant dense<0.000000e+00> : vector<16x64xf32>
    %186 = tpu.matmul %183, %185, %cst_133 {dimension_numbers = #tpu.dot_dimension_numbers<[1], [0], [0], [1], [0, 0, 1, 1], [], []>} : vector<16x64xbf16>, vector<64x64xbf16>, vector<16x64xf32> -> vector<16x64xf32>
    %187 = arith.addf %181, %186 : vector<16x64xf32>
    %188 = tpu.concatenate %162, %187 in 1 : vector<16x64xf32>, vector<16x64xf32> -> vector<16x128xf32>
    %189 = vector.broadcast %5 : vector<1x128xf32> to vector<16x128xf32>
    %190 = arith.addf %188, %189 : vector<16x128xf32>
    %cst_134 = arith.constant 5.000000e-01 : f32
    %191 = vector.broadcast %cst_134 : f32 to vector<16x128xf32>
    %192 = arith.mulf %191, %190 : vector<16x128xf32>
    %cst_135 = arith.constant 4.471500e-02 : f32
    %193 = vector.broadcast %cst_135 : f32 to vector<16x128xf32>
    %194 = arith.mulf %193, %190 : vector<16x128xf32>
    %195 = arith.mulf %194, %190 : vector<16x128xf32>
    %196 = arith.mulf %195, %190 : vector<16x128xf32>
    %197 = arith.addf %190, %196 : vector<16x128xf32>
    %cst_136 = arith.constant 0.797884583 : f32
    %198 = vector.broadcast %cst_136 : f32 to vector<16x128xf32>
    %199 = arith.mulf %198, %197 : vector<16x128xf32>
    %200 = math.tanh %199 : vector<16x128xf32>
    %cst_137 = arith.constant 1.000000e+00 : f32
    %201 = vector.broadcast %cst_137 : f32 to vector<16x128xf32>
    %202 = arith.addf %201, %200 : vector<16x128xf32>
    %203 = arith.mulf %192, %202 : vector<16x128xf32>
    %204 = arith.addf %136, %203 : vector<16x128xf32>
    %cst_138 = arith.constant dense<0.000000e+00> : vector<16xf32>
    %205 = vector.multi_reduction <add>, %204, %cst_138 [1] : vector<16x128xf32> to vector<16xf32>
    %206 = vector.shape_cast %205 : vector<16xf32> to vector<16x1xf32>
    %cst_139 = arith.constant 1.280000e+02 : f32
    %207 = vector.broadcast %cst_139 : f32 to vector<16x1xf32>
    %208 = arith.divf %206, %207 : vector<16x1xf32>
    %209 = vector.broadcast %208 : vector<16x1xf32> to vector<16x128xf32>
    %210 = arith.subf %204, %209 : vector<16x128xf32>
    %211 = arith.mulf %210, %210 : vector<16x128xf32>
    %cst_140 = arith.constant dense<0.000000e+00> : vector<16xf32>
    %212 = vector.multi_reduction <add>, %211, %cst_140 [1] : vector<16x128xf32> to vector<16xf32>
    %213 = vector.shape_cast %212 : vector<16xf32> to vector<16x1xf32>
    %cst_141 = arith.constant 1.280000e+02 : f32
    %214 = vector.broadcast %cst_141 : f32 to vector<16x1xf32>
    %215 = arith.divf %213, %214 : vector<16x1xf32>
    %216 = vector.broadcast %208 : vector<16x1xf32> to vector<16x128xf32>
    %217 = arith.subf %204, %216 : vector<16x128xf32>
    %cst_142 = arith.constant 9.99999974E-6 : f32
    %218 = vector.broadcast %cst_142 : f32 to vector<16x1xf32>
    %219 = arith.addf %215, %218 : vector<16x1xf32>
    %220 = math.rsqrt %219 : vector<16x1xf32>
    %221 = vector.broadcast %220 : vector<16x1xf32> to vector<16x128xf32>
    %222 = arith.mulf %217, %221 : vector<16x128xf32>
    %223 = vector.extract_strided_slice %6 {offsets = [0, 0], sizes = [1, 128], strides = [1, 1]} : vector<2x128xf32> to vector<1x128xf32>
    %224 = vector.broadcast %223 : vector<1x128xf32> to vector<16x128xf32>
    %225 = arith.mulf %222, %224 : vector<16x128xf32>
    %226 = vector.extract_strided_slice %6 {offsets = [1, 0], sizes = [1, 128], strides = [1, 1]} : vector<2x128xf32> to vector<1x128xf32>
    %227 = vector.broadcast %226 : vector<1x128xf32> to vector<16x128xf32>
    %228 = arith.addf %225, %227 : vector<16x128xf32>
    %229 = arith.truncf %228 : vector<16x128xf32> to vector<16x128xbf16>
    %c0_143 = arith.constant 0 : index
    %c0_144 = arith.constant 0 : index
    %230 = vector.load %arg12[%c0_143, %c0_144] : memref<32x128xbf16, #tpu.memory_space<vmem>>, vector<16x128xbf16>
    tpu.vector_store %arg12[%c0_143, %c0_144], %229 {strides = array<i32>} : memref<32x128xbf16, #tpu.memory_space<vmem>>, vector<16x128xbf16>,
    %c1_145 = arith.constant 1 : index
    %c0_146 = arith.constant 0 : index
    %c0_147 = arith.constant 0 : index
    %231 = vector.load %arg1[%c1_145, %c0_146, %c0_147] : memref<2x65x10xbf16, #tpu.memory_space<vmem>>, vector<1x65x10xbf16>
    %232 = vector.shape_cast %231 : vector<1x65x10xbf16> to vector<65x10xbf16>
    %cst_148 = arith.constant dense<0.000000e+00> : vector<65x32xf32>
    %233 = tpu.matmul %232, %0, %cst_148 {dimension_numbers = #tpu.dot_dimension_numbers<[1], [0], [0], [1], [0, 0, 1, 1], [], []>} : vector<65x10xbf16>, vector<10x32xbf16>, vector<65x32xf32> -> vector<65x32xf32>
    %cst_149 = arith.constant dense<0.000000e+00> : vector<32xf32>
    %234 = vector.multi_reduction <add>, %233, %cst_149 [0] : vector<65x32xf32> to vector<32xf32>
    %235 = vector.shape_cast %234 : vector<32xf32> to vector<1x32xf32>
    %cst_150 = arith.constant 6.500000e+01 : f32
    %236 = vector.broadcast %cst_150 : f32 to vector<1x32xf32>
    %237 = arith.divf %235, %236 : vector<1x32xf32>
    %238 = vector.broadcast %237 : vector<1x32xf32> to vector<65x32xf32>
    %239 = arith.subf %233, %238 : vector<65x32xf32>
    %240 = arith.mulf %239, %239 : vector<65x32xf32>
    %cst_151 = arith.constant dense<0.000000e+00> : vector<32xf32>
    %241 = vector.multi_reduction <add>, %240, %cst_151 [0] : vector<65x32xf32> to vector<32xf32>
    %242 = vector.shape_cast %241 : vector<32xf32> to vector<1x32xf32>
    %cst_152 = arith.constant 6.500000e+01 : f32
    %243 = vector.broadcast %cst_152 : f32 to vector<1x32xf32>
    %244 = arith.divf %242, %243 : vector<1x32xf32>
    %245 = vector.broadcast %237 : vector<1x32xf32> to vector<65x32xf32>
    %246 = arith.subf %233, %245 : vector<65x32xf32>
    %cst_153 = arith.constant 9.99999974E-6 : f32
    %247 = vector.broadcast %cst_153 : f32 to vector<1x32xf32>
    %248 = arith.addf %244, %247 : vector<1x32xf32>
    %249 = math.rsqrt %248 : vector<1x32xf32>
    %250 = vector.broadcast %249 : vector<1x32xf32> to vector<65x32xf32>
    %251 = arith.mulf %246, %250 : vector<65x32xf32>
    %252 = vector.extract_strided_slice %1 {offsets = [0, 0], sizes = [1, 32], strides = [1, 1]} : vector<2x32xf32> to vector<1x32xf32>
    %253 = vector.broadcast %252 : vector<1x32xf32> to vector<65x32xf32>
    %254 = arith.mulf %251, %253 : vector<65x32xf32>
    %255 = vector.extract_strided_slice %1 {offsets = [1, 0], sizes = [1, 32], strides = [1, 1]} : vector<2x32xf32> to vector<1x32xf32>
    %256 = vector.broadcast %255 : vector<1x32xf32> to vector<65x32xf32>
    %257 = arith.addf %254, %256 : vector<65x32xf32>
    %cst_154 = arith.constant 5.000000e-01 : f32
    %258 = vector.broadcast %cst_154 : f32 to vector<65x32xf32>
    %259 = arith.mulf %258, %257 : vector<65x32xf32>
    %cst_155 = arith.constant 4.471500e-02 : f32
    %260 = vector.broadcast %cst_155 : f32 to vector<65x32xf32>
    %261 = arith.mulf %260, %257 : vector<65x32xf32>
    %262 = arith.mulf %261, %257 : vector<65x32xf32>
    %263 = arith.mulf %262, %257 : vector<65x32xf32>
    %264 = arith.addf %257, %263 : vector<65x32xf32>
    %cst_156 = arith.constant 0.797884583 : f32
    %265 = vector.broadcast %cst_156 : f32 to vector<65x32xf32>
    %266 = arith.mulf %265, %264 : vector<65x32xf32>
    %267 = math.tanh %266 : vector<65x32xf32>
    %cst_157 = arith.constant 1.000000e+00 : f32
    %268 = vector.broadcast %cst_157 : f32 to vector<65x32xf32>
    %269 = arith.addf %268, %267 : vector<65x32xf32>
    %270 = arith.mulf %259, %269 : vector<65x32xf32>
    %c0_158 = arith.constant 0 : index
    %c0_159 = arith.constant 0 : index
    %271 = vector.load %arg13[%c0_158, %c0_159] : memref<65x32xf32, #tpu.memory_space<vmem>>, vector<65x32xf32>
    tpu.vector_store %arg13[%c0_158, %c0_159], %270 {strides = array<i32>} : memref<65x32xf32, #tpu.memory_space<vmem>>, vector<65x32xf32>,
    %cst_160 = arith.constant 0.000000e+00 : f32
    %272 = vector.broadcast %cst_160 : f32 to vector<32x32xf32>
    %c0_161 = arith.constant 0 : index
    %c0_162 = arith.constant 0 : index
    %273 = tpu.strided_load %arg13[%c0_161, %c0_162] {strides = array<i32: 2, 1>} : memref<65x32xf32, #tpu.memory_space<vmem>>, vector<32x32xf32>
    %274 = arith.truncf %273 : vector<32x32xf32> to vector<32x32xbf16>
    %c0_163 = arith.constant 0 : index
    %c0_164 = arith.constant 0 : index
    %c0_165 = arith.constant 0 : index
    %275 = vector.load %arg4[%c0_163, %c0_164, %c0_165] : memref<3x32x32xbf16, #tpu.memory_space<vmem>>, vector<1x32x32xbf16>
    %276 = vector.shape_cast %275 : vector<1x32x32xbf16> to vector<32x32xbf16>
    %cst_166 = arith.constant dense<0.000000e+00> : vector<32x32xf32>
    %277 = tpu.matmul %274, %276, %cst_166 {dimension_numbers = #tpu.dot_dimension_numbers<[1], [0], [0], [1], [0, 0, 1, 1], [], []>} : vector<32x32xbf16>, vector<32x32xbf16>, vector<32x32xf32> -> vector<32x32xf32>
    %278 = arith.addf %272, %277 : vector<32x32xf32>
    %c1_167 = arith.constant 1 : index
    %c0_168 = arith.constant 0 : index
    %279 = tpu.strided_load %arg13[%c1_167, %c0_168] {strides = array<i32: 2, 1>} : memref<65x32xf32, #tpu.memory_space<vmem>>, vector<32x32xf32>
    %280 = arith.truncf %279 : vector<32x32xf32> to vector<32x32xbf16>
    %c1_169 = arith.constant 1 : index
    %c0_170 = arith.constant 0 : index
    %c0_171 = arith.constant 0 : index
    %281 = vector.load %arg4[%c1_169, %c0_170, %c0_171] : memref<3x32x32xbf16, #tpu.memory_space<vmem>>, vector<1x32x32xbf16>
    %282 = vector.shape_cast %281 : vector<1x32x32xbf16> to vector<32x32xbf16>
    %cst_172 = arith.constant dense<0.000000e+00> : vector<32x32xf32>
    %283 = tpu.matmul %280, %282, %cst_172 {dimension_numbers = #tpu.dot_dimension_numbers<[1], [0], [0], [1], [0, 0, 1, 1], [], []>} : vector<32x32xbf16>, vector<32x32xbf16>, vector<32x32xf32> -> vector<32x32xf32>
    %284 = arith.addf %278, %283 : vector<32x32xf32>
    %c2_173 = arith.constant 2 : index
    %c0_174 = arith.constant 0 : index
    %285 = tpu.strided_load %arg13[%c2_173, %c0_174] {strides = array<i32: 2, 1>} : memref<65x32xf32, #tpu.memory_space<vmem>>, vector<32x32xf32>
    %286 = arith.truncf %285 : vector<32x32xf32> to vector<32x32xbf16>
    %c2_175 = arith.constant 2 : index
    %c0_176 = arith.constant 0 : index
    %c0_177 = arith.constant 0 : index
    %287 = vector.load %arg4[%c2_175, %c0_176, %c0_177] : memref<3x32x32xbf16, #tpu.memory_space<vmem>>, vector<1x32x32xbf16>
    %288 = vector.shape_cast %287 : vector<1x32x32xbf16> to vector<32x32xbf16>
    %cst_178 = arith.constant dense<0.000000e+00> : vector<32x32xf32>
    %289 = tpu.matmul %286, %288, %cst_178 {dimension_numbers = #tpu.dot_dimension_numbers<[1], [0], [0], [1], [0, 0, 1, 1], [], []>} : vector<32x32xbf16>, vector<32x32xbf16>, vector<32x32xf32> -> vector<32x32xf32>
    %290 = arith.addf %284, %289 : vector<32x32xf32>
    %cst_179 = arith.constant 5.000000e-01 : f32
    %291 = vector.broadcast %cst_179 : f32 to vector<32x32xf32>
    %292 = arith.mulf %291, %290 : vector<32x32xf32>
    %cst_180 = arith.constant 4.471500e-02 : f32
    %293 = vector.broadcast %cst_180 : f32 to vector<32x32xf32>
    %294 = arith.mulf %293, %290 : vector<32x32xf32>
    %295 = arith.mulf %294, %290 : vector<32x32xf32>
    %296 = arith.mulf %295, %290 : vector<32x32xf32>
    %297 = arith.addf %290, %296 : vector<32x32xf32>
    %cst_181 = arith.constant 0.797884583 : f32
    %298 = vector.broadcast %cst_181 : f32 to vector<32x32xf32>
    %299 = arith.mulf %298, %297 : vector<32x32xf32>
    %300 = math.tanh %299 : vector<32x32xf32>
    %cst_182 = arith.constant 1.000000e+00 : f32
    %301 = vector.broadcast %cst_182 : f32 to vector<32x32xf32>
    %302 = arith.addf %301, %300 : vector<32x32xf32>
    %303 = arith.mulf %292, %302 : vector<32x32xf32>
    %c0_183 = arith.constant 0 : index
    %c0_184 = arith.constant 0 : index
    %304 = vector.load %arg14[%c0_183, %c0_184] : memref<32x32xf32, #tpu.memory_space<vmem>>, vector<32x32xf32>
    tpu.vector_store %arg14[%c0_183, %c0_184], %303 {strides = array<i32>} : memref<32x32xf32, #tpu.memory_space<vmem>>, vector<32x32xf32>,
    %cst_185 = arith.constant 0.000000e+00 : f32
    %305 = vector.broadcast %cst_185 : f32 to vector<16x32xf32>
    %c0_186 = arith.constant 0 : index
    %c0_187 = arith.constant 0 : index
    %306 = tpu.strided_load %arg14[%c0_186, %c0_187] {strides = array<i32: 2, 1>} : memref<32x32xf32, #tpu.memory_space<vmem>>, vector<16x32xf32>
    %307 = arith.truncf %306 : vector<16x32xf32> to vector<16x32xbf16>
    %c0_188 = arith.constant 0 : index
    %c0_189 = arith.constant 0 : index
    %c0_190 = arith.constant 0 : index
    %308 = vector.load %arg5[%c0_188, %c0_189, %c0_190] : memref<2x32x32xbf16, #tpu.memory_space<vmem>>, vector<1x32x32xbf16>
    %309 = vector.shape_cast %308 : vector<1x32x32xbf16> to vector<32x32xbf16>
    %cst_191 = arith.constant dense<0.000000e+00> : vector<16x32xf32>
    %310 = tpu.matmul %307, %309, %cst_191 {dimension_numbers = #tpu.dot_dimension_numbers<[1], [0], [0], [1], [0, 0, 1, 1], [], []>} : vector<16x32xbf16>, vector<32x32xbf16>, vector<16x32xf32> -> vector<16x32xf32>
    %311 = arith.addf %305, %310 : vector<16x32xf32>
    %c1_192 = arith.constant 1 : index
    %c0_193 = arith.constant 0 : index
    %312 = tpu.strided_load %arg14[%c1_192, %c0_193] {strides = array<i32: 2, 1>} : memref<32x32xf32, #tpu.memory_space<vmem>>, vector<16x32xf32>
    %313 = arith.truncf %312 : vector<16x32xf32> to vector<16x32xbf16>
    %c1_194 = arith.constant 1 : index
    %c0_195 = arith.constant 0 : index
    %c0_196 = arith.constant 0 : index
    %314 = vector.load %arg5[%c1_194, %c0_195, %c0_196] : memref<2x32x32xbf16, #tpu.memory_space<vmem>>, vector<1x32x32xbf16>
    %315 = vector.shape_cast %314 : vector<1x32x32xbf16> to vector<32x32xbf16>
    %cst_197 = arith.constant dense<0.000000e+00> : vector<16x32xf32>
    %316 = tpu.matmul %313, %315, %cst_197 {dimension_numbers = #tpu.dot_dimension_numbers<[1], [0], [0], [1], [0, 0, 1, 1], [], []>} : vector<16x32xbf16>, vector<32x32xbf16>, vector<16x32xf32> -> vector<16x32xf32>
    %317 = arith.addf %311, %316 : vector<16x32xf32>
    %cst_198 = arith.constant 5.000000e-01 : f32
    %318 = vector.broadcast %cst_198 : f32 to vector<16x32xf32>
    %319 = arith.mulf %318, %317 : vector<16x32xf32>
    %cst_199 = arith.constant 4.471500e-02 : f32
    %320 = vector.broadcast %cst_199 : f32 to vector<16x32xf32>
    %321 = arith.mulf %320, %317 : vector<16x32xf32>
    %322 = arith.mulf %321, %317 : vector<16x32xf32>
    %323 = arith.mulf %322, %317 : vector<16x32xf32>
    %324 = arith.addf %317, %323 : vector<16x32xf32>
    %cst_200 = arith.constant 0.797884583 : f32
    %325 = vector.broadcast %cst_200 : f32 to vector<16x32xf32>
    %326 = arith.mulf %325, %324 : vector<16x32xf32>
    %327 = math.tanh %326 : vector<16x32xf32>
    %cst_201 = arith.constant 1.000000e+00 : f32
    %328 = vector.broadcast %cst_201 : f32 to vector<16x32xf32>
    %329 = arith.addf %328, %327 : vector<16x32xf32>
    %330 = arith.mulf %319, %329 : vector<16x32xf32>
    %cst_202 = arith.constant dense<0.000000e+00> : vector<16xf32>
    %331 = vector.multi_reduction <add>, %330, %cst_202 [1] : vector<16x32xf32> to vector<16xf32>
    %332 = vector.shape_cast %331 : vector<16xf32> to vector<16x1xf32>
    %cst_203 = arith.constant 3.200000e+01 : f32
    %333 = vector.broadcast %cst_203 : f32 to vector<16x1xf32>
    %334 = arith.divf %332, %333 : vector<16x1xf32>
    %335 = vector.broadcast %334 : vector<16x1xf32> to vector<16x32xf32>
    %336 = arith.subf %330, %335 : vector<16x32xf32>
    %337 = arith.mulf %336, %336 : vector<16x32xf32>
    %cst_204 = arith.constant dense<0.000000e+00> : vector<16xf32>
    %338 = vector.multi_reduction <add>, %337, %cst_204 [1] : vector<16x32xf32> to vector<16xf32>
    %339 = vector.shape_cast %338 : vector<16xf32> to vector<16x1xf32>
    %cst_205 = arith.constant 3.200000e+01 : f32
    %340 = vector.broadcast %cst_205 : f32 to vector<16x1xf32>
    %341 = arith.divf %339, %340 : vector<16x1xf32>
    %342 = vector.broadcast %334 : vector<16x1xf32> to vector<16x32xf32>
    %343 = arith.subf %330, %342 : vector<16x32xf32>
    %cst_206 = arith.constant 9.99999974E-6 : f32
    %344 = vector.broadcast %cst_206 : f32 to vector<16x1xf32>
    %345 = arith.addf %341, %344 : vector<16x1xf32>
    %346 = math.rsqrt %345 : vector<16x1xf32>
    %347 = vector.broadcast %346 : vector<16x1xf32> to vector<16x32xf32>
    %348 = arith.mulf %343, %347 : vector<16x32xf32>
    %349 = vector.extract_strided_slice %2 {offsets = [0, 0], sizes = [1, 32], strides = [1, 1]} : vector<2x32xf32> to vector<1x32xf32>
    %350 = vector.broadcast %349 : vector<1x32xf32> to vector<16x32xf32>
    %351 = arith.mulf %348, %350 : vector<16x32xf32>
    %352 = vector.extract_strided_slice %2 {offsets = [1, 0], sizes = [1, 32], strides = [1, 1]} : vector<2x32xf32> to vector<1x32xf32>
    %353 = vector.broadcast %352 : vector<1x32xf32> to vector<16x32xf32>
    %354 = arith.addf %351, %353 : vector<16x32xf32>
    %355 = arith.truncf %354 : vector<16x32xf32> to vector<16x32xbf16>
    %cst_207 = arith.constant dense<0.000000e+00> : vector<16x128xf32>
    %356 = tpu.matmul %355, %3, %cst_207 {dimension_numbers = #tpu.dot_dimension_numbers<[1], [0], [0], [1], [0, 0, 1, 1], [], []>} : vector<16x32xbf16>, vector<32x128xbf16>, vector<16x128xf32> -> vector<16x128xf32>
    %357 = vector.broadcast %4 : vector<1x128xf32> to vector<16x128xf32>
    %358 = arith.addf %356, %357 : vector<16x128xf32>
    %c2_208 = arith.constant 2 : index
    %c0_209 = arith.constant 0 : index
    %359 = vector.load %arg15[%c2_208, %c0_209] : memref<20x128xf32, #tpu.memory_space<vmem>>, vector<16x128xf32>
    tpu.vector_store %arg15[%c2_208, %c0_209], %358 {strides = array<i32>} : memref<20x128xf32, #tpu.memory_space<vmem>>, vector<16x128xf32>,
    %cst_210 = arith.constant 0.000000e+00 : f32
    %360 = vector.broadcast %cst_210 : f32 to vector<16x64xf32>
    %c0_211 = arith.constant 0 : index
    %c0_212 = arith.constant 0 : index
    %361 = vector.load %arg15[%c0_211, %c0_212] : memref<20x128xf32, #tpu.memory_space<vmem>>, vector<16x64xf32>
    %362 = arith.truncf %361 : vector<16x64xf32> to vector<16x64xbf16>
    %c0_213 = arith.constant 0 : index
    %c0_214 = arith.constant 0 : index
    %c0_215 = arith.constant 0 : index
    %c0_216 = arith.constant 0 : index
    %363 = vector.load %arg9[%c0_213, %c0_214, %c0_215, %c0_216] : memref<4x2x64x64xbf16, #tpu.memory_space<vmem>>, vector<1x1x64x64xbf16>
    %364 = vector.shape_cast %363 : vector<1x1x64x64xbf16> to vector<64x64xbf16>
    %cst_217 = arith.constant dense<0.000000e+00> : vector<16x64xf32>
    %365 = tpu.matmul %362, %364, %cst_217 {dimension_numbers = #tpu.dot_dimension_numbers<[1], [0], [0], [1], [0, 0, 1, 1], [], []>} : vector<16x64xbf16>, vector<64x64xbf16>, vector<16x64xf32> -> vector<16x64xf32>
    %366 = arith.addf %360, %365 : vector<16x64xf32>
    %c1_218 = arith.constant 1 : index
    %c0_219 = arith.constant 0 : index
    %367 = vector.load %arg15[%c1_218, %c0_219] : memref<20x128xf32, #tpu.memory_space<vmem>>, vector<16x64xf32>
    %368 = arith.truncf %367 : vector<16x64xf32> to vector<16x64xbf16>
    %c1_220 = arith.constant 1 : index
    %c0_221 = arith.constant 0 : index
    %c0_222 = arith.constant 0 : index
    %c0_223 = arith.constant 0 : index
    %369 = vector.load %arg9[%c1_220, %c0_221, %c0_222, %c0_223] : memref<4x2x64x64xbf16, #tpu.memory_space<vmem>>, vector<1x1x64x64xbf16>
    %370 = vector.shape_cast %369 : vector<1x1x64x64xbf16> to vector<64x64xbf16>
    %cst_224 = arith.constant dense<0.000000e+00> : vector<16x64xf32>
    %371 = tpu.matmul %368, %370, %cst_224 {dimension_numbers = #tpu.dot_dimension_numbers<[1], [0], [0], [1], [0, 0, 1, 1], [], []>} : vector<16x64xbf16>, vector<64x64xbf16>, vector<16x64xf32> -> vector<16x64xf32>
    %372 = arith.addf %366, %371 : vector<16x64xf32>
    %c2_225 = arith.constant 2 : index
    %c0_226 = arith.constant 0 : index
    %373 = vector.load %arg15[%c2_225, %c0_226] : memref<20x128xf32, #tpu.memory_space<vmem>>, vector<16x64xf32>
    %374 = arith.truncf %373 : vector<16x64xf32> to vector<16x64xbf16>
    %c2_227 = arith.constant 2 : index
    %c0_228 = arith.constant 0 : index
    %c0_229 = arith.constant 0 : index
    %c0_230 = arith.constant 0 : index
    %375 = vector.load %arg9[%c2_227, %c0_228, %c0_229, %c0_230] : memref<4x2x64x64xbf16, #tpu.memory_space<vmem>>, vector<1x1x64x64xbf16>
    %376 = vector.shape_cast %375 : vector<1x1x64x64xbf16> to vector<64x64xbf16>
    %cst_231 = arith.constant dense<0.000000e+00> : vector<16x64xf32>
    %377 = tpu.matmul %374, %376, %cst_231 {dimension_numbers = #tpu.dot_dimension_numbers<[1], [0], [0], [1], [0, 0, 1, 1], [], []>} : vector<16x64xbf16>, vector<64x64xbf16>, vector<16x64xf32> -> vector<16x64xf32>
    %378 = arith.addf %372, %377 : vector<16x64xf32>
    %c3_232 = arith.constant 3 : index
    %c0_233 = arith.constant 0 : index
    %379 = vector.load %arg15[%c3_232, %c0_233] : memref<20x128xf32, #tpu.memory_space<vmem>>, vector<16x64xf32>
    %380 = arith.truncf %379 : vector<16x64xf32> to vector<16x64xbf16>
    %c3_234 = arith.constant 3 : index
    %c0_235 = arith.constant 0 : index
    %c0_236 = arith.constant 0 : index
    %c0_237 = arith.constant 0 : index
    %381 = vector.load %arg9[%c3_234, %c0_235, %c0_236, %c0_237] : memref<4x2x64x64xbf16, #tpu.memory_space<vmem>>, vector<1x1x64x64xbf16>
    %382 = vector.shape_cast %381 : vector<1x1x64x64xbf16> to vector<64x64xbf16>
    %cst_238 = arith.constant dense<0.000000e+00> : vector<16x64xf32>
    %383 = tpu.matmul %380, %382, %cst_238 {dimension_numbers = #tpu.dot_dimension_numbers<[1], [0], [0], [1], [0, 0, 1, 1], [], []>} : vector<16x64xbf16>, vector<64x64xbf16>, vector<16x64xf32> -> vector<16x64xf32>
    %384 = arith.addf %378, %383 : vector<16x64xf32>
    %cst_239 = arith.constant 0.000000e+00 : f32
    %385 = vector.broadcast %cst_239 : f32 to vector<16x64xf32>
    %c0_240 = arith.constant 0 : index
    %c64_241 = arith.constant 64 : index
    %386 = vector.load %arg15[%c0_240, %c64_241] : memref<20x128xf32, #tpu.memory_space<vmem>>, vector<16x64xf32>
    %387 = arith.truncf %386 : vector<16x64xf32> to vector<16x64xbf16>
    %c0_242 = arith.constant 0 : index
    %c1_243 = arith.constant 1 : index
    %c0_244 = arith.constant 0 : index
    %c0_245 = arith.constant 0 : index
    %388 = vector.load %arg9[%c0_242, %c1_243, %c0_244, %c0_245] : memref<4x2x64x64xbf16, #tpu.memory_space<vmem>>, vector<1x1x64x64xbf16>
    %389 = vector.shape_cast %388 : vector<1x1x64x64xbf16> to vector<64x64xbf16>
    %cst_246 = arith.constant dense<0.000000e+00> : vector<16x64xf32>
    %390 = tpu.matmul %387, %389, %cst_246 {dimension_numbers = #tpu.dot_dimension_numbers<[1], [0], [0], [1], [0, 0, 1, 1], [], []>} : vector<16x64xbf16>, vector<64x64xbf16>, vector<16x64xf32> -> vector<16x64xf32>
    %391 = arith.addf %385, %390 : vector<16x64xf32>
    %c1_247 = arith.constant 1 : index
    %c64_248 = arith.constant 64 : index
    %392 = vector.load %arg15[%c1_247, %c64_248] : memref<20x128xf32, #tpu.memory_space<vmem>>, vector<16x64xf32>
    %393 = arith.truncf %392 : vector<16x64xf32> to vector<16x64xbf16>
    %c1_249 = arith.constant 1 : index
    %c1_250 = arith.constant 1 : index
    %c0_251 = arith.constant 0 : index
    %c0_252 = arith.constant 0 : index
    %394 = vector.load %arg9[%c1_249, %c1_250, %c0_251, %c0_252] : memref<4x2x64x64xbf16, #tpu.memory_space<vmem>>, vector<1x1x64x64xbf16>
    %395 = vector.shape_cast %394 : vector<1x1x64x64xbf16> to vector<64x64xbf16>
    %cst_253 = arith.constant dense<0.000000e+00> : vector<16x64xf32>
    %396 = tpu.matmul %393, %395, %cst_253 {dimension_numbers = #tpu.dot_dimension_numbers<[1], [0], [0], [1], [0, 0, 1, 1], [], []>} : vector<16x64xbf16>, vector<64x64xbf16>, vector<16x64xf32> -> vector<16x64xf32>
    %397 = arith.addf %391, %396 : vector<16x64xf32>
    %c2_254 = arith.constant 2 : index
    %c64_255 = arith.constant 64 : index
    %398 = vector.load %arg15[%c2_254, %c64_255] : memref<20x128xf32, #tpu.memory_space<vmem>>, vector<16x64xf32>
    %399 = arith.truncf %398 : vector<16x64xf32> to vector<16x64xbf16>
    %c2_256 = arith.constant 2 : index
    %c1_257 = arith.constant 1 : index
    %c0_258 = arith.constant 0 : index
    %c0_259 = arith.constant 0 : index
    %400 = vector.load %arg9[%c2_256, %c1_257, %c0_258, %c0_259] : memref<4x2x64x64xbf16, #tpu.memory_space<vmem>>, vector<1x1x64x64xbf16>
    %401 = vector.shape_cast %400 : vector<1x1x64x64xbf16> to vector<64x64xbf16>
    %cst_260 = arith.constant dense<0.000000e+00> : vector<16x64xf32>
    %402 = tpu.matmul %399, %401, %cst_260 {dimension_numbers = #tpu.dot_dimension_numbers<[1], [0], [0], [1], [0, 0, 1, 1], [], []>} : vector<16x64xbf16>, vector<64x64xbf16>, vector<16x64xf32> -> vector<16x64xf32>
    %403 = arith.addf %397, %402 : vector<16x64xf32>
    %c3_261 = arith.constant 3 : index
    %c64_262 = arith.constant 64 : index
    %404 = vector.load %arg15[%c3_261, %c64_262] : memref<20x128xf32, #tpu.memory_space<vmem>>, vector<16x64xf32>
    %405 = arith.truncf %404 : vector<16x64xf32> to vector<16x64xbf16>
    %c3_263 = arith.constant 3 : index
    %c1_264 = arith.constant 1 : index
    %c0_265 = arith.constant 0 : index
    %c0_266 = arith.constant 0 : index
    %406 = vector.load %arg9[%c3_263, %c1_264, %c0_265, %c0_266] : memref<4x2x64x64xbf16, #tpu.memory_space<vmem>>, vector<1x1x64x64xbf16>
    %407 = vector.shape_cast %406 : vector<1x1x64x64xbf16> to vector<64x64xbf16>
    %cst_267 = arith.constant dense<0.000000e+00> : vector<16x64xf32>
    %408 = tpu.matmul %405, %407, %cst_267 {dimension_numbers = #tpu.dot_dimension_numbers<[1], [0], [0], [1], [0, 0, 1, 1], [], []>} : vector<16x64xbf16>, vector<64x64xbf16>, vector<16x64xf32> -> vector<16x64xf32>
    %409 = arith.addf %403, %408 : vector<16x64xf32>
    %410 = tpu.concatenate %384, %409 in 1 : vector<16x64xf32>, vector<16x64xf32> -> vector<16x128xf32>
    %411 = vector.broadcast %5 : vector<1x128xf32> to vector<16x128xf32>
    %412 = arith.addf %410, %411 : vector<16x128xf32>
    %cst_268 = arith.constant 5.000000e-01 : f32
    %413 = vector.broadcast %cst_268 : f32 to vector<16x128xf32>
    %414 = arith.mulf %413, %412 : vector<16x128xf32>
    %cst_269 = arith.constant 4.471500e-02 : f32
    %415 = vector.broadcast %cst_269 : f32 to vector<16x128xf32>
    %416 = arith.mulf %415, %412 : vector<16x128xf32>
    %417 = arith.mulf %416, %412 : vector<16x128xf32>
    %418 = arith.mulf %417, %412 : vector<16x128xf32>
    %419 = arith.addf %412, %418 : vector<16x128xf32>
    %cst_270 = arith.constant 0.797884583 : f32
    %420 = vector.broadcast %cst_270 : f32 to vector<16x128xf32>
    %421 = arith.mulf %420, %419 : vector<16x128xf32>
    %422 = math.tanh %421 : vector<16x128xf32>
    %cst_271 = arith.constant 1.000000e+00 : f32
    %423 = vector.broadcast %cst_271 : f32 to vector<16x128xf32>
    %424 = arith.addf %423, %422 : vector<16x128xf32>
    %425 = arith.mulf %414, %424 : vector<16x128xf32>
    %426 = arith.addf %358, %425 : vector<16x128xf32>
    %cst_272 = arith.constant dense<0.000000e+00> : vector<16xf32>
    %427 = vector.multi_reduction <add>, %426, %cst_272 [1] : vector<16x128xf32> to vector<16xf32>
    %428 = vector.shape_cast %427 : vector<16xf32> to vector<16x1xf32>
    %cst_273 = arith.constant 1.280000e+02 : f32
    %429 = vector.broadcast %cst_273 : f32 to vector<16x1xf32>
    %430 = arith.divf %428, %429 : vector<16x1xf32>
    %431 = vector.broadcast %430 : vector<16x1xf32> to vector<16x128xf32>
    %432 = arith.subf %426, %431 : vector<16x128xf32>
    %433 = arith.mulf %432, %432 : vector<16x128xf32>
    %cst_274 = arith.constant dense<0.000000e+00> : vector<16xf32>
    %434 = vector.multi_reduction <add>, %433, %cst_274 [1] : vector<16x128xf32> to vector<16xf32>
    %435 = vector.shape_cast %434 : vector<16xf32> to vector<16x1xf32>
    %cst_275 = arith.constant 1.280000e+02 : f32
    %436 = vector.broadcast %cst_275 : f32 to vector<16x1xf32>
    %437 = arith.divf %435, %436 : vector<16x1xf32>
    %438 = vector.broadcast %430 : vector<16x1xf32> to vector<16x128xf32>
    %439 = arith.subf %426, %438 : vector<16x128xf32>
    %cst_276 = arith.constant 9.99999974E-6 : f32
    %440 = vector.broadcast %cst_276 : f32 to vector<16x1xf32>
    %441 = arith.addf %437, %440 : vector<16x1xf32>
    %442 = math.rsqrt %441 : vector<16x1xf32>
    %443 = vector.broadcast %442 : vector<16x1xf32> to vector<16x128xf32>
    %444 = arith.mulf %439, %443 : vector<16x128xf32>
    %445 = vector.extract_strided_slice %6 {offsets = [0, 0], sizes = [1, 128], strides = [1, 1]} : vector<2x128xf32> to vector<1x128xf32>
    %446 = vector.broadcast %445 : vector<1x128xf32> to vector<16x128xf32>
    %447 = arith.mulf %444, %446 : vector<16x128xf32>
    %448 = vector.extract_strided_slice %6 {offsets = [1, 0], sizes = [1, 128], strides = [1, 1]} : vector<2x128xf32> to vector<1x128xf32>
    %449 = vector.broadcast %448 : vector<1x128xf32> to vector<16x128xf32>
    %450 = arith.addf %447, %449 : vector<16x128xf32>
    %451 = arith.truncf %450 : vector<16x128xf32> to vector<16x128xbf16>
    %c16 = arith.constant 16 : index
    %c0_277 = arith.constant 0 : index
    %452 = vector.load %arg12[%c16, %c0_277] : memref<32x128xbf16, #tpu.memory_space<vmem>>, vector<16x128xbf16>
    tpu.vector_store %arg12[%c16, %c0_277], %451 {strides = array<i32>} : memref<32x128xbf16, #tpu.memory_space<vmem>>, vector<16x128xbf16>,
    return
  }
  func.func @transform_0(%arg0: i32) -> (i32, i32, i32) {
    %c0_i32 = arith.constant 0 : i32
    %c0_i32_0 = arith.constant 0 : i32
    %c0_i32_1 = arith.constant 0 : i32
    %c0_i32_2 = arith.constant 0 : i32
    return %c0_i32, %c0_i32_0, %c0_i32_1 : i32, i32, i32
  }
  func.func @transform_1(%arg0: i32) -> (i32, i32) {
    %c0_i32 = arith.constant 0 : i32
    %c0_i32_0 = arith.constant 0 : i32
    %c0_i32_1 = arith.constant 0 : i32
    return %c0_i32, %c0_i32_0 : i32, i32
  }
  func.func @transform_2(%arg0: i32) -> (i32, i32) {
    %c0_i32 = arith.constant 0 : i32
    %c0_i32_0 = arith.constant 0 : i32
    %c0_i32_1 = arith.constant 0 : i32
    return %c0_i32, %c0_i32_0 : i32, i32
  }
  func.func @transform_3(%arg0: i32) -> (i32, i32, i32) {
    %c0_i32 = arith.constant 0 : i32
    %c0_i32_0 = arith.constant 0 : i32
    %c0_i32_1 = arith.constant 0 : i32
    %c0_i32_2 = arith.constant 0 : i32
    return %c0_i32, %c0_i32_0, %c0_i32_1 : i32, i32, i32
  }
  func.func @transform_4(%arg0: i32) -> (i32, i32, i32) {
    %c0_i32 = arith.constant 0 : i32
    %c0_i32_0 = arith.constant 0 : i32
    %c0_i32_1 = arith.constant 0 : i32
    %c0_i32_2 = arith.constant 0 : i32
    return %c0_i32, %c0_i32_0, %c0_i32_1 : i32, i32, i32
  }
  func.func @transform_5(%arg0: i32) -> (i32, i32) {
    %c0_i32 = arith.constant 0 : i32
    %c0_i32_0 = arith.constant 0 : i32
    %c0_i32_1 = arith.constant 0 : i32
    return %c0_i32, %c0_i32_0 : i32, i32
  }
  func.func @transform_6(%arg0: i32) -> (i32, i32) {
    %c0_i32 = arith.constant 0 : i32
    %c0_i32_0 = arith.constant 0 : i32
    %c0_i32_1 = arith.constant 0 : i32
    return %c0_i32, %c0_i32_0 : i32, i32
  }
  func.func @transform_7(%arg0: i32) -> (i32, i32) {
    %c0_i32 = arith.constant 0 : i32
    %c0_i32_0 = arith.constant 0 : i32
    %c0_i32_1 = arith.constant 0 : i32
    return %c0_i32, %c0_i32_0 : i32, i32
  }
  func.func @transform_8(%arg0: i32) -> (i32, i32, i32, i32) {
    %c0_i32 = arith.constant 0 : i32
    %c0_i32_0 = arith.constant 0 : i32
    %c0_i32_1 = arith.constant 0 : i32
    %c0_i32_2 = arith.constant 0 : i32
    %c0_i32_3 = arith.constant 0 : i32
    return %c0_i32, %c0_i32_0, %c0_i32_1, %c0_i32_2 : i32, i32, i32, i32
  }
  func.func @transform_9(%arg0: i32) -> (i32, i32) {
    %c0_i32 = arith.constant 0 : i32
    %c0_i32_0 = arith.constant 0 : i32
    %c0_i32_1 = arith.constant 0 : i32
    return %c0_i32, %c0_i32_0 : i32, i32
  }
  func.func @transform_10(%arg0: i32) -> (i32, i32) {
    %c0_i32 = arith.constant 0 : i32
    %c0_i32_0 = arith.constant 0 : i32
    %c0_i32_1 = arith.constant 0 : i32
    return %c0_i32, %c0_i32_0 : i32, i32
  }
  func.func @transform_11(%arg0: i32) -> (i32, i32) {
    %c0_i32 = arith.constant 0 : i32
    %c0_i32_0 = arith.constant 0 : i32
    %c0_i32_1 = arith.constant 0 : i32
    return %c0_i32, %c0_i32_0 : i32, i32
  }
}

module attributes {stable_mosaic.version = 11 : i64} {
  func.func @_encoder_layer_kernel(%arg0: i32, %arg1: memref<32x128xbf16, #tpu.memory_space<vmem>>, %arg2: memref<2x128x64xbf16, #tpu.memory_space<vmem>>, %arg3: memref<2x128x64xbf16, #tpu.memory_space<vmem>>, %arg4: memref<2x128x64xbf16, #tpu.memory_space<vmem>>, %arg5: memref<2x1x64xf32, #tpu.memory_space<vmem>>, %arg6: memref<2x1x64xf32, #tpu.memory_space<vmem>>, %arg7: memref<2x1x64xf32, #tpu.memory_space<vmem>>, %arg8: memref<2x64x128xbf16, #tpu.memory_space<vmem>>, %arg9: memref<1x128xf32, #tpu.memory_space<vmem>>, %arg10: memref<2x128xf32, #tpu.memory_space<vmem>>, %arg11: memref<128x256xbf16, #tpu.memory_space<vmem>>, %arg12: memref<1x256xf32, #tpu.memory_space<vmem>>, %arg13: memref<256x128xbf16, #tpu.memory_space<vmem>>, %arg14: memref<1x128xf32, #tpu.memory_space<vmem>>, %arg15: memref<2x128xf32, #tpu.memory_space<vmem>>, %arg16: memref<32x128xbf16, #tpu.memory_space<vmem>>) attributes {dimension_semantics = [#tpu.dimension_semantics<arbitrary>], iteration_bounds = array<i64: 1>, scalar_prefetch = 0 : i64, scratch_operands = 0 : i64, tpu.core_type = #tpu.core_type<tc>, window_params = [{pipeline_mode = #tpu.pipeline_mode<synchronous>, transform_indices = @transform_0, window_bounds = array<i64: 32, 128>}, {pipeline_mode = #tpu.pipeline_mode<synchronous>, transform_indices = @transform_1, window_bounds = array<i64: 2, 128, 64>}, {pipeline_mode = #tpu.pipeline_mode<synchronous>, transform_indices = @transform_2, window_bounds = array<i64: 2, 128, 64>}, {pipeline_mode = #tpu.pipeline_mode<synchronous>, transform_indices = @transform_3, window_bounds = array<i64: 2, 128, 64>}, {pipeline_mode = #tpu.pipeline_mode<synchronous>, transform_indices = @transform_4, window_bounds = array<i64: 2, 1, 64>}, {pipeline_mode = #tpu.pipeline_mode<synchronous>, transform_indices = @transform_5, window_bounds = array<i64: 2, 1, 64>}, {pipeline_mode = #tpu.pipeline_mode<synchronous>, transform_indices = @transform_6, window_bounds = array<i64: 2, 1, 64>}, {pipeline_mode = #tpu.pipeline_mode<synchronous>, transform_indices = @transform_7, window_bounds = array<i64: 2, 64, 128>}, {pipeline_mode = #tpu.pipeline_mode<synchronous>, transform_indices = @transform_8, window_bounds = array<i64: 1, 128>}, {pipeline_mode = #tpu.pipeline_mode<synchronous>, transform_indices = @transform_9, window_bounds = array<i64: 2, 128>}, {pipeline_mode = #tpu.pipeline_mode<synchronous>, transform_indices = @transform_10, window_bounds = array<i64: 128, 256>}, {pipeline_mode = #tpu.pipeline_mode<synchronous>, transform_indices = @transform_11, window_bounds = array<i64: 1, 256>}, {pipeline_mode = #tpu.pipeline_mode<synchronous>, transform_indices = @transform_12, window_bounds = array<i64: 256, 128>}, {pipeline_mode = #tpu.pipeline_mode<synchronous>, transform_indices = @transform_13, window_bounds = array<i64: 1, 128>}, {pipeline_mode = #tpu.pipeline_mode<synchronous>, transform_indices = @transform_14, window_bounds = array<i64: 2, 128>}, {pipeline_mode = #tpu.pipeline_mode<synchronous>, transform_indices = @transform_15, window_bounds = array<i64: 32, 128>}]} {
    %c0 = arith.constant 0 : index
    %c0_0 = arith.constant 0 : index
    %0 = vector.load %arg1[%c0, %c0_0] : memref<32x128xbf16, #tpu.memory_space<vmem>>, vector<32x128xbf16>
    %1 = arith.extf %0 : vector<32x128xbf16> to vector<32x128xf32>
    %c0_1 = arith.constant 0 : index
    %c0_2 = arith.constant 0 : index
    %c0_3 = arith.constant 0 : index
    %2 = vector.load %arg2[%c0_1, %c0_2, %c0_3] : memref<2x128x64xbf16, #tpu.memory_space<vmem>>, vector<1x128x64xbf16>
    %3 = vector.shape_cast %2 : vector<1x128x64xbf16> to vector<128x64xbf16>
    %cst = arith.constant dense<0.000000e+00> : vector<32x64xf32>
    %4 = tpu.matmul %0, %3, %cst {dimension_numbers = #tpu.dot_dimension_numbers<[1], [0], [0], [1], [0, 0, 1, 1], [], []>} : vector<32x128xbf16>, vector<128x64xbf16>, vector<32x64xf32> -> vector<32x64xf32>
    %c0_4 = arith.constant 0 : index
    %c0_5 = arith.constant 0 : index
    %c0_6 = arith.constant 0 : index
    %5 = vector.load %arg5[%c0_4, %c0_5, %c0_6] : memref<2x1x64xf32, #tpu.memory_space<vmem>>, vector<1x1x64xf32>
    %6 = vector.shape_cast %5 : vector<1x1x64xf32> to vector<1x64xf32>
    %7 = vector.broadcast %6 : vector<1x64xf32> to vector<32x64xf32>
    %8 = arith.addf %4, %7 : vector<32x64xf32>
    %c0_7 = arith.constant 0 : index
    %c0_8 = arith.constant 0 : index
    %c0_9 = arith.constant 0 : index
    %9 = vector.load %arg3[%c0_7, %c0_8, %c0_9] : memref<2x128x64xbf16, #tpu.memory_space<vmem>>, vector<1x128x64xbf16>
    %10 = vector.shape_cast %9 : vector<1x128x64xbf16> to vector<128x64xbf16>
    %cst_10 = arith.constant dense<0.000000e+00> : vector<32x64xf32>
    %11 = tpu.matmul %0, %10, %cst_10 {dimension_numbers = #tpu.dot_dimension_numbers<[1], [0], [0], [1], [0, 0, 1, 1], [], []>} : vector<32x128xbf16>, vector<128x64xbf16>, vector<32x64xf32> -> vector<32x64xf32>
    %c0_11 = arith.constant 0 : index
    %c0_12 = arith.constant 0 : index
    %c0_13 = arith.constant 0 : index
    %12 = vector.load %arg6[%c0_11, %c0_12, %c0_13] : memref<2x1x64xf32, #tpu.memory_space<vmem>>, vector<1x1x64xf32>
    %13 = vector.shape_cast %12 : vector<1x1x64xf32> to vector<1x64xf32>
    %14 = vector.broadcast %13 : vector<1x64xf32> to vector<32x64xf32>
    %15 = arith.addf %11, %14 : vector<32x64xf32>
    %c0_14 = arith.constant 0 : index
    %c0_15 = arith.constant 0 : index
    %c0_16 = arith.constant 0 : index
    %16 = vector.load %arg4[%c0_14, %c0_15, %c0_16] : memref<2x128x64xbf16, #tpu.memory_space<vmem>>, vector<1x128x64xbf16>
    %17 = vector.shape_cast %16 : vector<1x128x64xbf16> to vector<128x64xbf16>
    %cst_17 = arith.constant dense<0.000000e+00> : vector<32x64xf32>
    %18 = tpu.matmul %0, %17, %cst_17 {dimension_numbers = #tpu.dot_dimension_numbers<[1], [0], [0], [1], [0, 0, 1, 1], [], []>} : vector<32x128xbf16>, vector<128x64xbf16>, vector<32x64xf32> -> vector<32x64xf32>
    %c0_18 = arith.constant 0 : index
    %c0_19 = arith.constant 0 : index
    %c0_20 = arith.constant 0 : index
    %19 = vector.load %arg7[%c0_18, %c0_19, %c0_20] : memref<2x1x64xf32, #tpu.memory_space<vmem>>, vector<1x1x64xf32>
    %20 = vector.shape_cast %19 : vector<1x1x64xf32> to vector<1x64xf32>
    %21 = vector.broadcast %20 : vector<1x64xf32> to vector<32x64xf32>
    %22 = arith.addf %18, %21 : vector<32x64xf32>
    %cst_21 = arith.constant 1.250000e-01 : f32
    %23 = vector.broadcast %cst_21 : f32 to vector<32x64xf32>
    %24 = arith.mulf %8, %23 : vector<32x64xf32>
    %25 = arith.truncf %24 : vector<32x64xf32> to vector<32x64xbf16>
    %26 = arith.truncf %15 : vector<32x64xf32> to vector<32x64xbf16>
    %27 = arith.truncf %22 : vector<32x64xf32> to vector<32x64xbf16>
    %c0_22 = arith.constant 0 : index
    %c0_23 = arith.constant 0 : index
    %c0_24 = arith.constant 0 : index
    %28 = vector.load %arg8[%c0_22, %c0_23, %c0_24] : memref<2x64x128xbf16, #tpu.memory_space<vmem>>, vector<1x64x128xbf16>
    %29 = vector.shape_cast %28 : vector<1x64x128xbf16> to vector<64x128xbf16>
    %c1 = arith.constant 1 : index
    %c0_25 = arith.constant 0 : index
    %c0_26 = arith.constant 0 : index
    %30 = vector.load %arg2[%c1, %c0_25, %c0_26] : memref<2x128x64xbf16, #tpu.memory_space<vmem>>, vector<1x128x64xbf16>
    %31 = vector.shape_cast %30 : vector<1x128x64xbf16> to vector<128x64xbf16>
    %cst_27 = arith.constant dense<0.000000e+00> : vector<32x64xf32>
    %32 = tpu.matmul %0, %31, %cst_27 {dimension_numbers = #tpu.dot_dimension_numbers<[1], [0], [0], [1], [0, 0, 1, 1], [], []>} : vector<32x128xbf16>, vector<128x64xbf16>, vector<32x64xf32> -> vector<32x64xf32>
    %c1_28 = arith.constant 1 : index
    %c0_29 = arith.constant 0 : index
    %c0_30 = arith.constant 0 : index
    %33 = vector.load %arg5[%c1_28, %c0_29, %c0_30] : memref<2x1x64xf32, #tpu.memory_space<vmem>>, vector<1x1x64xf32>
    %34 = vector.shape_cast %33 : vector<1x1x64xf32> to vector<1x64xf32>
    %35 = vector.broadcast %34 : vector<1x64xf32> to vector<32x64xf32>
    %36 = arith.addf %32, %35 : vector<32x64xf32>
    %c1_31 = arith.constant 1 : index
    %c0_32 = arith.constant 0 : index
    %c0_33 = arith.constant 0 : index
    %37 = vector.load %arg3[%c1_31, %c0_32, %c0_33] : memref<2x128x64xbf16, #tpu.memory_space<vmem>>, vector<1x128x64xbf16>
    %38 = vector.shape_cast %37 : vector<1x128x64xbf16> to vector<128x64xbf16>
    %cst_34 = arith.constant dense<0.000000e+00> : vector<32x64xf32>
    %39 = tpu.matmul %0, %38, %cst_34 {dimension_numbers = #tpu.dot_dimension_numbers<[1], [0], [0], [1], [0, 0, 1, 1], [], []>} : vector<32x128xbf16>, vector<128x64xbf16>, vector<32x64xf32> -> vector<32x64xf32>
    %c1_35 = arith.constant 1 : index
    %c0_36 = arith.constant 0 : index
    %c0_37 = arith.constant 0 : index
    %40 = vector.load %arg6[%c1_35, %c0_36, %c0_37] : memref<2x1x64xf32, #tpu.memory_space<vmem>>, vector<1x1x64xf32>
    %41 = vector.shape_cast %40 : vector<1x1x64xf32> to vector<1x64xf32>
    %42 = vector.broadcast %41 : vector<1x64xf32> to vector<32x64xf32>
    %43 = arith.addf %39, %42 : vector<32x64xf32>
    %c1_38 = arith.constant 1 : index
    %c0_39 = arith.constant 0 : index
    %c0_40 = arith.constant 0 : index
    %44 = vector.load %arg4[%c1_38, %c0_39, %c0_40] : memref<2x128x64xbf16, #tpu.memory_space<vmem>>, vector<1x128x64xbf16>
    %45 = vector.shape_cast %44 : vector<1x128x64xbf16> to vector<128x64xbf16>
    %cst_41 = arith.constant dense<0.000000e+00> : vector<32x64xf32>
    %46 = tpu.matmul %0, %45, %cst_41 {dimension_numbers = #tpu.dot_dimension_numbers<[1], [0], [0], [1], [0, 0, 1, 1], [], []>} : vector<32x128xbf16>, vector<128x64xbf16>, vector<32x64xf32> -> vector<32x64xf32>
    %c1_42 = arith.constant 1 : index
    %c0_43 = arith.constant 0 : index
    %c0_44 = arith.constant 0 : index
    %47 = vector.load %arg7[%c1_42, %c0_43, %c0_44] : memref<2x1x64xf32, #tpu.memory_space<vmem>>, vector<1x1x64xf32>
    %48 = vector.shape_cast %47 : vector<1x1x64xf32> to vector<1x64xf32>
    %49 = vector.broadcast %48 : vector<1x64xf32> to vector<32x64xf32>
    %50 = arith.addf %46, %49 : vector<32x64xf32>
    %cst_45 = arith.constant 1.250000e-01 : f32
    %51 = vector.broadcast %cst_45 : f32 to vector<32x64xf32>
    %52 = arith.mulf %36, %51 : vector<32x64xf32>
    %53 = arith.truncf %52 : vector<32x64xf32> to vector<32x64xbf16>
    %54 = arith.truncf %43 : vector<32x64xf32> to vector<32x64xbf16>
    %55 = arith.truncf %50 : vector<32x64xf32> to vector<32x64xbf16>
    %c1_46 = arith.constant 1 : index
    %c0_47 = arith.constant 0 : index
    %c0_48 = arith.constant 0 : index
    %56 = vector.load %arg8[%c1_46, %c0_47, %c0_48] : memref<2x64x128xbf16, #tpu.memory_space<vmem>>, vector<1x64x128xbf16>
    %57 = vector.shape_cast %56 : vector<1x64x128xbf16> to vector<64x128xbf16>
    %c0_49 = arith.constant 0 : index
    %c0_50 = arith.constant 0 : index
    %58 = vector.load %arg9[%c0_49, %c0_50] : memref<1x128xf32, #tpu.memory_space<vmem>>, vector<1x128xf32>
    %cst_51 = arith.constant 0.000000e+00 : f32
    %59 = vector.broadcast %cst_51 : f32 to vector<16x128xf32>
    %60 = vector.broadcast %58 : vector<1x128xf32> to vector<16x128xf32>
    %61 = arith.addf %59, %60 : vector<16x128xf32>
    %62 = vector.extract_strided_slice %25 {offsets = [0, 0], sizes = [16, 64], strides = [1, 1]} : vector<32x64xbf16> to vector<16x64xbf16>
    %63 = vector.extract_strided_slice %26 {offsets = [0, 0], sizes = [16, 64], strides = [1, 1]} : vector<32x64xbf16> to vector<16x64xbf16>
    %64 = vector.extract_strided_slice %27 {offsets = [0, 0], sizes = [16, 64], strides = [1, 1]} : vector<32x64xbf16> to vector<16x64xbf16>
    %cst_52 = arith.constant dense<0.000000e+00> : vector<16x16xf32>
    %65 = tpu.matmul %62, %63, %cst_52 {dimension_numbers = #tpu.dot_dimension_numbers<[1], [1], [0], [0], [0, 0, 1, 0], [], []>} : vector<16x64xbf16>, vector<16x64xbf16>, vector<16x16xf32> -> vector<16x16xf32>
    %66 = math.exp %65 : vector<16x16xf32>
    %cst_53 = arith.constant dense<0.000000e+00> : vector<16xf32>
    %67 = vector.multi_reduction <add>, %66, %cst_53 [1] : vector<16x16xf32> to vector<16xf32>
    %68 = vector.shape_cast %67 : vector<16xf32> to vector<16x1xf32>
    %69 = tpu.reciprocal %68 {approx = true} : vector<16x1xf32> -> vector<16x1xf32>
    %70 = vector.broadcast %69 : vector<16x1xf32> to vector<16x16xf32>
    %71 = arith.mulf %66, %70 : vector<16x16xf32>
    %72 = arith.truncf %71 : vector<16x16xf32> to vector<16x16xbf16>
    %cst_54 = arith.constant dense<0.000000e+00> : vector<16x64xf32>
    %73 = tpu.matmul %72, %64, %cst_54 {dimension_numbers = #tpu.dot_dimension_numbers<[1], [0], [0], [1], [0, 0, 1, 1], [], []>} : vector<16x16xbf16>, vector<16x64xbf16>, vector<16x64xf32> -> vector<16x64xf32>
    %74 = arith.truncf %73 : vector<16x64xf32> to vector<16x64xbf16>
    %cst_55 = arith.constant dense<0.000000e+00> : vector<16x128xf32>
    %75 = tpu.matmul %74, %29, %cst_55 {dimension_numbers = #tpu.dot_dimension_numbers<[1], [0], [0], [1], [0, 0, 1, 1], [], []>} : vector<16x64xbf16>, vector<64x128xbf16>, vector<16x128xf32> -> vector<16x128xf32>
    %76 = arith.addf %61, %75 : vector<16x128xf32>
    %77 = vector.extract_strided_slice %53 {offsets = [0, 0], sizes = [16, 64], strides = [1, 1]} : vector<32x64xbf16> to vector<16x64xbf16>
    %78 = vector.extract_strided_slice %54 {offsets = [0, 0], sizes = [16, 64], strides = [1, 1]} : vector<32x64xbf16> to vector<16x64xbf16>
    %79 = vector.extract_strided_slice %55 {offsets = [0, 0], sizes = [16, 64], strides = [1, 1]} : vector<32x64xbf16> to vector<16x64xbf16>
    %cst_56 = arith.constant dense<0.000000e+00> : vector<16x16xf32>
    %80 = tpu.matmul %77, %78, %cst_56 {dimension_numbers = #tpu.dot_dimension_numbers<[1], [1], [0], [0], [0, 0, 1, 0], [], []>} : vector<16x64xbf16>, vector<16x64xbf16>, vector<16x16xf32> -> vector<16x16xf32>
    %81 = math.exp %80 : vector<16x16xf32>
    %cst_57 = arith.constant dense<0.000000e+00> : vector<16xf32>
    %82 = vector.multi_reduction <add>, %81, %cst_57 [1] : vector<16x16xf32> to vector<16xf32>
    %83 = vector.shape_cast %82 : vector<16xf32> to vector<16x1xf32>
    %84 = tpu.reciprocal %83 {approx = true} : vector<16x1xf32> -> vector<16x1xf32>
    %85 = vector.broadcast %84 : vector<16x1xf32> to vector<16x16xf32>
    %86 = arith.mulf %81, %85 : vector<16x16xf32>
    %87 = arith.truncf %86 : vector<16x16xf32> to vector<16x16xbf16>
    %cst_58 = arith.constant dense<0.000000e+00> : vector<16x64xf32>
    %88 = tpu.matmul %87, %79, %cst_58 {dimension_numbers = #tpu.dot_dimension_numbers<[1], [0], [0], [1], [0, 0, 1, 1], [], []>} : vector<16x16xbf16>, vector<16x64xbf16>, vector<16x64xf32> -> vector<16x64xf32>
    %89 = arith.truncf %88 : vector<16x64xf32> to vector<16x64xbf16>
    %cst_59 = arith.constant dense<0.000000e+00> : vector<16x128xf32>
    %90 = tpu.matmul %89, %57, %cst_59 {dimension_numbers = #tpu.dot_dimension_numbers<[1], [0], [0], [1], [0, 0, 1, 1], [], []>} : vector<16x64xbf16>, vector<64x128xbf16>, vector<16x128xf32> -> vector<16x128xf32>
    %91 = arith.addf %76, %90 : vector<16x128xf32>
    %cst_60 = arith.constant 0.000000e+00 : f32
    %92 = vector.broadcast %cst_60 : f32 to vector<16x128xf32>
    %93 = vector.broadcast %58 : vector<1x128xf32> to vector<16x128xf32>
    %94 = arith.addf %92, %93 : vector<16x128xf32>
    %95 = vector.extract_strided_slice %25 {offsets = [16, 0], sizes = [16, 64], strides = [1, 1]} : vector<32x64xbf16> to vector<16x64xbf16>
    %96 = vector.extract_strided_slice %26 {offsets = [16, 0], sizes = [16, 64], strides = [1, 1]} : vector<32x64xbf16> to vector<16x64xbf16>
    %97 = vector.extract_strided_slice %27 {offsets = [16, 0], sizes = [16, 64], strides = [1, 1]} : vector<32x64xbf16> to vector<16x64xbf16>
    %cst_61 = arith.constant dense<0.000000e+00> : vector<16x16xf32>
    %98 = tpu.matmul %95, %96, %cst_61 {dimension_numbers = #tpu.dot_dimension_numbers<[1], [1], [0], [0], [0, 0, 1, 0], [], []>} : vector<16x64xbf16>, vector<16x64xbf16>, vector<16x16xf32> -> vector<16x16xf32>
    %99 = math.exp %98 : vector<16x16xf32>
    %cst_62 = arith.constant dense<0.000000e+00> : vector<16xf32>
    %100 = vector.multi_reduction <add>, %99, %cst_62 [1] : vector<16x16xf32> to vector<16xf32>
    %101 = vector.shape_cast %100 : vector<16xf32> to vector<16x1xf32>
    %102 = tpu.reciprocal %101 {approx = true} : vector<16x1xf32> -> vector<16x1xf32>
    %103 = vector.broadcast %102 : vector<16x1xf32> to vector<16x16xf32>
    %104 = arith.mulf %99, %103 : vector<16x16xf32>
    %105 = arith.truncf %104 : vector<16x16xf32> to vector<16x16xbf16>
    %cst_63 = arith.constant dense<0.000000e+00> : vector<16x64xf32>
    %106 = tpu.matmul %105, %97, %cst_63 {dimension_numbers = #tpu.dot_dimension_numbers<[1], [0], [0], [1], [0, 0, 1, 1], [], []>} : vector<16x16xbf16>, vector<16x64xbf16>, vector<16x64xf32> -> vector<16x64xf32>
    %107 = arith.truncf %106 : vector<16x64xf32> to vector<16x64xbf16>
    %cst_64 = arith.constant dense<0.000000e+00> : vector<16x128xf32>
    %108 = tpu.matmul %107, %29, %cst_64 {dimension_numbers = #tpu.dot_dimension_numbers<[1], [0], [0], [1], [0, 0, 1, 1], [], []>} : vector<16x64xbf16>, vector<64x128xbf16>, vector<16x128xf32> -> vector<16x128xf32>
    %109 = arith.addf %94, %108 : vector<16x128xf32>
    %110 = vector.extract_strided_slice %53 {offsets = [16, 0], sizes = [16, 64], strides = [1, 1]} : vector<32x64xbf16> to vector<16x64xbf16>
    %111 = vector.extract_strided_slice %54 {offsets = [16, 0], sizes = [16, 64], strides = [1, 1]} : vector<32x64xbf16> to vector<16x64xbf16>
    %112 = vector.extract_strided_slice %55 {offsets = [16, 0], sizes = [16, 64], strides = [1, 1]} : vector<32x64xbf16> to vector<16x64xbf16>
    %cst_65 = arith.constant dense<0.000000e+00> : vector<16x16xf32>
    %113 = tpu.matmul %110, %111, %cst_65 {dimension_numbers = #tpu.dot_dimension_numbers<[1], [1], [0], [0], [0, 0, 1, 0], [], []>} : vector<16x64xbf16>, vector<16x64xbf16>, vector<16x16xf32> -> vector<16x16xf32>
    %114 = math.exp %113 : vector<16x16xf32>
    %cst_66 = arith.constant dense<0.000000e+00> : vector<16xf32>
    %115 = vector.multi_reduction <add>, %114, %cst_66 [1] : vector<16x16xf32> to vector<16xf32>
    %116 = vector.shape_cast %115 : vector<16xf32> to vector<16x1xf32>
    %117 = tpu.reciprocal %116 {approx = true} : vector<16x1xf32> -> vector<16x1xf32>
    %118 = vector.broadcast %117 : vector<16x1xf32> to vector<16x16xf32>
    %119 = arith.mulf %114, %118 : vector<16x16xf32>
    %120 = arith.truncf %119 : vector<16x16xf32> to vector<16x16xbf16>
    %cst_67 = arith.constant dense<0.000000e+00> : vector<16x64xf32>
    %121 = tpu.matmul %120, %112, %cst_67 {dimension_numbers = #tpu.dot_dimension_numbers<[1], [0], [0], [1], [0, 0, 1, 1], [], []>} : vector<16x16xbf16>, vector<16x64xbf16>, vector<16x64xf32> -> vector<16x64xf32>
    %122 = arith.truncf %121 : vector<16x64xf32> to vector<16x64xbf16>
    %cst_68 = arith.constant dense<0.000000e+00> : vector<16x128xf32>
    %123 = tpu.matmul %122, %57, %cst_68 {dimension_numbers = #tpu.dot_dimension_numbers<[1], [0], [0], [1], [0, 0, 1, 1], [], []>} : vector<16x64xbf16>, vector<64x128xbf16>, vector<16x128xf32> -> vector<16x128xf32>
    %124 = arith.addf %109, %123 : vector<16x128xf32>
    %125 = tpu.concatenate %91, %124 in 0 : vector<16x128xf32>, vector<16x128xf32> -> vector<32x128xf32>
    %126 = arith.addf %1, %125 : vector<32x128xf32>
    %c0_69 = arith.constant 0 : index
    %c0_70 = arith.constant 0 : index
    %127 = vector.load %arg10[%c0_69, %c0_70] : memref<2x128xf32, #tpu.memory_space<vmem>>, vector<2x128xf32>
    %cst_71 = arith.constant dense<0.000000e+00> : vector<32xf32>
    %128 = vector.multi_reduction <add>, %126, %cst_71 [1] : vector<32x128xf32> to vector<32xf32>
    %129 = vector.shape_cast %128 : vector<32xf32> to vector<32x1xf32>
    %cst_72 = arith.constant 1.280000e+02 : f32
    %130 = vector.broadcast %cst_72 : f32 to vector<32x1xf32>
    %131 = arith.divf %129, %130 : vector<32x1xf32>
    %132 = vector.broadcast %131 : vector<32x1xf32> to vector<32x128xf32>
    %133 = arith.subf %126, %132 : vector<32x128xf32>
    %134 = arith.mulf %133, %133 : vector<32x128xf32>
    %cst_73 = arith.constant dense<0.000000e+00> : vector<32xf32>
    %135 = vector.multi_reduction <add>, %134, %cst_73 [1] : vector<32x128xf32> to vector<32xf32>
    %136 = vector.shape_cast %135 : vector<32xf32> to vector<32x1xf32>
    %cst_74 = arith.constant 1.280000e+02 : f32
    %137 = vector.broadcast %cst_74 : f32 to vector<32x1xf32>
    %138 = arith.divf %136, %137 : vector<32x1xf32>
    %139 = vector.broadcast %131 : vector<32x1xf32> to vector<32x128xf32>
    %140 = arith.subf %126, %139 : vector<32x128xf32>
    %cst_75 = arith.constant 9.99999974E-6 : f32
    %141 = vector.broadcast %cst_75 : f32 to vector<32x1xf32>
    %142 = arith.addf %138, %141 : vector<32x1xf32>
    %143 = math.rsqrt %142 : vector<32x1xf32>
    %144 = vector.broadcast %143 : vector<32x1xf32> to vector<32x128xf32>
    %145 = arith.mulf %140, %144 : vector<32x128xf32>
    %146 = vector.extract_strided_slice %127 {offsets = [0, 0], sizes = [1, 128], strides = [1, 1]} : vector<2x128xf32> to vector<1x128xf32>
    %147 = vector.broadcast %146 : vector<1x128xf32> to vector<32x128xf32>
    %148 = arith.mulf %145, %147 : vector<32x128xf32>
    %149 = vector.extract_strided_slice %127 {offsets = [1, 0], sizes = [1, 128], strides = [1, 1]} : vector<2x128xf32> to vector<1x128xf32>
    %150 = vector.broadcast %149 : vector<1x128xf32> to vector<32x128xf32>
    %151 = arith.addf %148, %150 : vector<32x128xf32>
    %152 = arith.truncf %151 : vector<32x128xf32> to vector<32x128xbf16>
    %c0_76 = arith.constant 0 : index
    %c0_77 = arith.constant 0 : index
    %153 = vector.load %arg11[%c0_76, %c0_77] : memref<128x256xbf16, #tpu.memory_space<vmem>>, vector<128x256xbf16>
    %cst_78 = arith.constant dense<0.000000e+00> : vector<32x256xf32>
    %154 = tpu.matmul %152, %153, %cst_78 {dimension_numbers = #tpu.dot_dimension_numbers<[1], [0], [0], [1], [0, 0, 1, 1], [], []>} : vector<32x128xbf16>, vector<128x256xbf16>, vector<32x256xf32> -> vector<32x256xf32>
    %c0_79 = arith.constant 0 : index
    %c0_80 = arith.constant 0 : index
    %155 = vector.load %arg12[%c0_79, %c0_80] : memref<1x256xf32, #tpu.memory_space<vmem>>, vector<1x256xf32>
    %156 = vector.broadcast %155 : vector<1x256xf32> to vector<32x256xf32>
    %157 = arith.addf %154, %156 : vector<32x256xf32>
    %cst_81 = arith.constant 5.000000e-01 : f32
    %158 = vector.broadcast %cst_81 : f32 to vector<32x256xf32>
    %159 = arith.mulf %158, %157 : vector<32x256xf32>
    %cst_82 = arith.constant 4.471500e-02 : f32
    %160 = vector.broadcast %cst_82 : f32 to vector<32x256xf32>
    %161 = arith.mulf %160, %157 : vector<32x256xf32>
    %162 = arith.mulf %161, %157 : vector<32x256xf32>
    %163 = arith.mulf %162, %157 : vector<32x256xf32>
    %164 = arith.addf %157, %163 : vector<32x256xf32>
    %cst_83 = arith.constant 0.797884583 : f32
    %165 = vector.broadcast %cst_83 : f32 to vector<32x256xf32>
    %166 = arith.mulf %165, %164 : vector<32x256xf32>
    %167 = math.tanh %166 : vector<32x256xf32>
    %cst_84 = arith.constant 1.000000e+00 : f32
    %168 = vector.broadcast %cst_84 : f32 to vector<32x256xf32>
    %169 = arith.addf %168, %167 : vector<32x256xf32>
    %170 = arith.mulf %159, %169 : vector<32x256xf32>
    %171 = arith.truncf %170 : vector<32x256xf32> to vector<32x256xbf16>
    %c0_85 = arith.constant 0 : index
    %c0_86 = arith.constant 0 : index
    %172 = vector.load %arg13[%c0_85, %c0_86] : memref<256x128xbf16, #tpu.memory_space<vmem>>, vector<256x128xbf16>
    %cst_87 = arith.constant dense<0.000000e+00> : vector<32x128xf32>
    %173 = tpu.matmul %171, %172, %cst_87 {dimension_numbers = #tpu.dot_dimension_numbers<[1], [0], [0], [1], [0, 0, 1, 1], [], []>} : vector<32x256xbf16>, vector<256x128xbf16>, vector<32x128xf32> -> vector<32x128xf32>
    %c0_88 = arith.constant 0 : index
    %c0_89 = arith.constant 0 : index
    %174 = vector.load %arg14[%c0_88, %c0_89] : memref<1x128xf32, #tpu.memory_space<vmem>>, vector<1x128xf32>
    %175 = vector.broadcast %174 : vector<1x128xf32> to vector<32x128xf32>
    %176 = arith.addf %173, %175 : vector<32x128xf32>
    %177 = arith.addf %151, %176 : vector<32x128xf32>
    %c0_90 = arith.constant 0 : index
    %c0_91 = arith.constant 0 : index
    %178 = vector.load %arg15[%c0_90, %c0_91] : memref<2x128xf32, #tpu.memory_space<vmem>>, vector<2x128xf32>
    %cst_92 = arith.constant dense<0.000000e+00> : vector<32xf32>
    %179 = vector.multi_reduction <add>, %177, %cst_92 [1] : vector<32x128xf32> to vector<32xf32>
    %180 = vector.shape_cast %179 : vector<32xf32> to vector<32x1xf32>
    %cst_93 = arith.constant 1.280000e+02 : f32
    %181 = vector.broadcast %cst_93 : f32 to vector<32x1xf32>
    %182 = arith.divf %180, %181 : vector<32x1xf32>
    %183 = vector.broadcast %182 : vector<32x1xf32> to vector<32x128xf32>
    %184 = arith.subf %177, %183 : vector<32x128xf32>
    %185 = arith.mulf %184, %184 : vector<32x128xf32>
    %cst_94 = arith.constant dense<0.000000e+00> : vector<32xf32>
    %186 = vector.multi_reduction <add>, %185, %cst_94 [1] : vector<32x128xf32> to vector<32xf32>
    %187 = vector.shape_cast %186 : vector<32xf32> to vector<32x1xf32>
    %cst_95 = arith.constant 1.280000e+02 : f32
    %188 = vector.broadcast %cst_95 : f32 to vector<32x1xf32>
    %189 = arith.divf %187, %188 : vector<32x1xf32>
    %190 = vector.broadcast %182 : vector<32x1xf32> to vector<32x128xf32>
    %191 = arith.subf %177, %190 : vector<32x128xf32>
    %cst_96 = arith.constant 9.99999974E-6 : f32
    %192 = vector.broadcast %cst_96 : f32 to vector<32x1xf32>
    %193 = arith.addf %189, %192 : vector<32x1xf32>
    %194 = math.rsqrt %193 : vector<32x1xf32>
    %195 = vector.broadcast %194 : vector<32x1xf32> to vector<32x128xf32>
    %196 = arith.mulf %191, %195 : vector<32x128xf32>
    %197 = vector.extract_strided_slice %178 {offsets = [0, 0], sizes = [1, 128], strides = [1, 1]} : vector<2x128xf32> to vector<1x128xf32>
    %198 = vector.broadcast %197 : vector<1x128xf32> to vector<32x128xf32>
    %199 = arith.mulf %196, %198 : vector<32x128xf32>
    %200 = vector.extract_strided_slice %178 {offsets = [1, 0], sizes = [1, 128], strides = [1, 1]} : vector<2x128xf32> to vector<1x128xf32>
    %201 = vector.broadcast %200 : vector<1x128xf32> to vector<32x128xf32>
    %202 = arith.addf %199, %201 : vector<32x128xf32>
    %203 = arith.truncf %202 : vector<32x128xf32> to vector<32x128xbf16>
    %c0_97 = arith.constant 0 : index
    %c0_98 = arith.constant 0 : index
    %204 = vector.load %arg16[%c0_97, %c0_98] : memref<32x128xbf16, #tpu.memory_space<vmem>>, vector<32x128xbf16>
    tpu.vector_store %arg16[%c0_97, %c0_98], %203 {strides = array<i32>} : memref<32x128xbf16, #tpu.memory_space<vmem>>, vector<32x128xbf16>,
    return
  }
  func.func @transform_0(%arg0: i32) -> (i32, i32) {
    %c0_i32 = arith.constant 0 : i32
    %c0_i32_0 = arith.constant 0 : i32
    %c0_i32_1 = arith.constant 0 : i32
    return %c0_i32, %c0_i32_0 : i32, i32
  }
  func.func @transform_1(%arg0: i32) -> (i32, i32, i32) {
    %c0_i32 = arith.constant 0 : i32
    %c0_i32_0 = arith.constant 0 : i32
    %c0_i32_1 = arith.constant 0 : i32
    %c0_i32_2 = arith.constant 0 : i32
    return %c0_i32, %c0_i32_0, %c0_i32_1 : i32, i32, i32
  }
  func.func @transform_2(%arg0: i32) -> (i32, i32, i32) {
    %c0_i32 = arith.constant 0 : i32
    %c0_i32_0 = arith.constant 0 : i32
    %c0_i32_1 = arith.constant 0 : i32
    %c0_i32_2 = arith.constant 0 : i32
    return %c0_i32, %c0_i32_0, %c0_i32_1 : i32, i32, i32
  }
  func.func @transform_3(%arg0: i32) -> (i32, i32, i32) {
    %c0_i32 = arith.constant 0 : i32
    %c0_i32_0 = arith.constant 0 : i32
    %c0_i32_1 = arith.constant 0 : i32
    %c0_i32_2 = arith.constant 0 : i32
    return %c0_i32, %c0_i32_0, %c0_i32_1 : i32, i32, i32
  }
  func.func @transform_4(%arg0: i32) -> (i32, i32, i32) {
    %c0_i32 = arith.constant 0 : i32
    %c0_i32_0 = arith.constant 0 : i32
    %c0_i32_1 = arith.constant 0 : i32
    %c0_i32_2 = arith.constant 0 : i32
    return %c0_i32, %c0_i32_0, %c0_i32_1 : i32, i32, i32
  }
  func.func @transform_5(%arg0: i32) -> (i32, i32, i32) {
    %c0_i32 = arith.constant 0 : i32
    %c0_i32_0 = arith.constant 0 : i32
    %c0_i32_1 = arith.constant 0 : i32
    %c0_i32_2 = arith.constant 0 : i32
    return %c0_i32, %c0_i32_0, %c0_i32_1 : i32, i32, i32
  }
  func.func @transform_6(%arg0: i32) -> (i32, i32, i32) {
    %c0_i32 = arith.constant 0 : i32
    %c0_i32_0 = arith.constant 0 : i32
    %c0_i32_1 = arith.constant 0 : i32
    %c0_i32_2 = arith.constant 0 : i32
    return %c0_i32, %c0_i32_0, %c0_i32_1 : i32, i32, i32
  }
  func.func @transform_7(%arg0: i32) -> (i32, i32, i32) {
    %c0_i32 = arith.constant 0 : i32
    %c0_i32_0 = arith.constant 0 : i32
    %c0_i32_1 = arith.constant 0 : i32
    %c0_i32_2 = arith.constant 0 : i32
    return %c0_i32, %c0_i32_0, %c0_i32_1 : i32, i32, i32
  }
  func.func @transform_8(%arg0: i32) -> (i32, i32) {
    %c0_i32 = arith.constant 0 : i32
    %c0_i32_0 = arith.constant 0 : i32
    %c0_i32_1 = arith.constant 0 : i32
    return %c0_i32, %c0_i32_0 : i32, i32
  }
  func.func @transform_9(%arg0: i32) -> (i32, i32) {
    %c0_i32 = arith.constant 0 : i32
    %c0_i32_0 = arith.constant 0 : i32
    %c0_i32_1 = arith.constant 0 : i32
    return %c0_i32, %c0_i32_0 : i32, i32
  }
  func.func @transform_10(%arg0: i32) -> (i32, i32) {
    %c0_i32 = arith.constant 0 : i32
    %c0_i32_0 = arith.constant 0 : i32
    %c0_i32_1 = arith.constant 0 : i32
    return %c0_i32, %c0_i32_0 : i32, i32
  }
  func.func @transform_11(%arg0: i32) -> (i32, i32) {
    %c0_i32 = arith.constant 0 : i32
    %c0_i32_0 = arith.constant 0 : i32
    %c0_i32_1 = arith.constant 0 : i32
    return %c0_i32, %c0_i32_0 : i32, i32
  }
  func.func @transform_12(%arg0: i32) -> (i32, i32) {
    %c0_i32 = arith.constant 0 : i32
    %c0_i32_0 = arith.constant 0 : i32
    %c0_i32_1 = arith.constant 0 : i32
    return %c0_i32, %c0_i32_0 : i32, i32
  }
  func.func @transform_13(%arg0: i32) -> (i32, i32) {
    %c0_i32 = arith.constant 0 : i32
    %c0_i32_0 = arith.constant 0 : i32
    %c0_i32_1 = arith.constant 0 : i32
    return %c0_i32, %c0_i32_0 : i32, i32
  }
  func.func @transform_14(%arg0: i32) -> (i32, i32) {
    %c0_i32 = arith.constant 0 : i32
    %c0_i32_0 = arith.constant 0 : i32
    %c0_i32_1 = arith.constant 0 : i32
    return %c0_i32, %c0_i32_0 : i32, i32
  }
  func.func @transform_15(%arg0: i32) -> (i32, i32) {
    %c0_i32 = arith.constant 0 : i32
    %c0_i32_0 = arith.constant 0 : i32
    %c0_i32_1 = arith.constant 0 : i32
    return %c0_i32, %c0_i32_0 : i32, i32
  }
}

module attributes {stable_mosaic.version = 11 : i64} {
  func.func @_encoder_layer_kernel(%arg0: i32, %arg1: memref<32x128xbf16, #tpu.memory_space<vmem>>, %arg2: memref<2x128x64xbf16, #tpu.memory_space<vmem>>, %arg3: memref<2x128x64xbf16, #tpu.memory_space<vmem>>, %arg4: memref<2x128x64xbf16, #tpu.memory_space<vmem>>, %arg5: memref<2x1x64xf32, #tpu.memory_space<vmem>>, %arg6: memref<2x1x64xf32, #tpu.memory_space<vmem>>, %arg7: memref<2x1x64xf32, #tpu.memory_space<vmem>>, %arg8: memref<2x64x128xbf16, #tpu.memory_space<vmem>>, %arg9: memref<1x128xf32, #tpu.memory_space<vmem>>, %arg10: memref<2x128xf32, #tpu.memory_space<vmem>>, %arg11: memref<128x256xbf16, #tpu.memory_space<vmem>>, %arg12: memref<1x256xf32, #tpu.memory_space<vmem>>, %arg13: memref<256x128xbf16, #tpu.memory_space<vmem>>, %arg14: memref<1x128xf32, #tpu.memory_space<vmem>>, %arg15: memref<2x128xf32, #tpu.memory_space<vmem>>, %arg16: memref<32x128xbf16, #tpu.memory_space<vmem>>, %arg17: memref<2x128xf32, #tpu.memory_space<vmem>>) attributes {dimension_semantics = [#tpu.dimension_semantics<arbitrary>], iteration_bounds = array<i64: 1>, scalar_prefetch = 0 : i64, scratch_operands = 0 : i64, tpu.core_type = #tpu.core_type<tc>, window_params = [{pipeline_mode = #tpu.pipeline_mode<synchronous>, transform_indices = @transform_0, window_bounds = array<i64: 32, 128>}, {pipeline_mode = #tpu.pipeline_mode<synchronous>, transform_indices = @transform_1, window_bounds = array<i64: 2, 128, 64>}, {pipeline_mode = #tpu.pipeline_mode<synchronous>, transform_indices = @transform_2, window_bounds = array<i64: 2, 128, 64>}, {pipeline_mode = #tpu.pipeline_mode<synchronous>, transform_indices = @transform_3, window_bounds = array<i64: 2, 128, 64>}, {pipeline_mode = #tpu.pipeline_mode<synchronous>, transform_indices = @transform_4, window_bounds = array<i64: 2, 1, 64>}, {pipeline_mode = #tpu.pipeline_mode<synchronous>, transform_indices = @transform_5, window_bounds = array<i64: 2, 1, 64>}, {pipeline_mode = #tpu.pipeline_mode<synchronous>, transform_indices = @transform_6, window_bounds = array<i64: 2, 1, 64>}, {pipeline_mode = #tpu.pipeline_mode<synchronous>, transform_indices = @transform_7, window_bounds = array<i64: 2, 64, 128>}, {pipeline_mode = #tpu.pipeline_mode<synchronous>, transform_indices = @transform_8, window_bounds = array<i64: 1, 128>}, {pipeline_mode = #tpu.pipeline_mode<synchronous>, transform_indices = @transform_9, window_bounds = array<i64: 2, 128>}, {pipeline_mode = #tpu.pipeline_mode<synchronous>, transform_indices = @transform_10, window_bounds = array<i64: 128, 256>}, {pipeline_mode = #tpu.pipeline_mode<synchronous>, transform_indices = @transform_11, window_bounds = array<i64: 1, 256>}, {pipeline_mode = #tpu.pipeline_mode<synchronous>, transform_indices = @transform_12, window_bounds = array<i64: 256, 128>}, {pipeline_mode = #tpu.pipeline_mode<synchronous>, transform_indices = @transform_13, window_bounds = array<i64: 1, 128>}, {pipeline_mode = #tpu.pipeline_mode<synchronous>, transform_indices = @transform_14, window_bounds = array<i64: 2, 128>}, {pipeline_mode = #tpu.pipeline_mode<synchronous>, transform_indices = @transform_15, window_bounds = array<i64: 32, 128>}, {pipeline_mode = #tpu.pipeline_mode<synchronous>, transform_indices = @transform_16, window_bounds = array<i64: 2, 128>}]} {
    %c0 = arith.constant 0 : index
    %c0_0 = arith.constant 0 : index
    %0 = vector.load %arg1[%c0, %c0_0] : memref<32x128xbf16, #tpu.memory_space<vmem>>, vector<32x128xbf16>
    %1 = arith.extf %0 : vector<32x128xbf16> to vector<32x128xf32>
    %c0_1 = arith.constant 0 : index
    %c0_2 = arith.constant 0 : index
    %c0_3 = arith.constant 0 : index
    %2 = vector.load %arg2[%c0_1, %c0_2, %c0_3] : memref<2x128x64xbf16, #tpu.memory_space<vmem>>, vector<1x128x64xbf16>
    %3 = vector.shape_cast %2 : vector<1x128x64xbf16> to vector<128x64xbf16>
    %cst = arith.constant dense<0.000000e+00> : vector<32x64xf32>
    %4 = tpu.matmul %0, %3, %cst {dimension_numbers = #tpu.dot_dimension_numbers<[1], [0], [0], [1], [0, 0, 1, 1], [], []>} : vector<32x128xbf16>, vector<128x64xbf16>, vector<32x64xf32> -> vector<32x64xf32>
    %c0_4 = arith.constant 0 : index
    %c0_5 = arith.constant 0 : index
    %c0_6 = arith.constant 0 : index
    %5 = vector.load %arg5[%c0_4, %c0_5, %c0_6] : memref<2x1x64xf32, #tpu.memory_space<vmem>>, vector<1x1x64xf32>
    %6 = vector.shape_cast %5 : vector<1x1x64xf32> to vector<1x64xf32>
    %7 = vector.broadcast %6 : vector<1x64xf32> to vector<32x64xf32>
    %8 = arith.addf %4, %7 : vector<32x64xf32>
    %c0_7 = arith.constant 0 : index
    %c0_8 = arith.constant 0 : index
    %c0_9 = arith.constant 0 : index
    %9 = vector.load %arg3[%c0_7, %c0_8, %c0_9] : memref<2x128x64xbf16, #tpu.memory_space<vmem>>, vector<1x128x64xbf16>
    %10 = vector.shape_cast %9 : vector<1x128x64xbf16> to vector<128x64xbf16>
    %cst_10 = arith.constant dense<0.000000e+00> : vector<32x64xf32>
    %11 = tpu.matmul %0, %10, %cst_10 {dimension_numbers = #tpu.dot_dimension_numbers<[1], [0], [0], [1], [0, 0, 1, 1], [], []>} : vector<32x128xbf16>, vector<128x64xbf16>, vector<32x64xf32> -> vector<32x64xf32>
    %c0_11 = arith.constant 0 : index
    %c0_12 = arith.constant 0 : index
    %c0_13 = arith.constant 0 : index
    %12 = vector.load %arg6[%c0_11, %c0_12, %c0_13] : memref<2x1x64xf32, #tpu.memory_space<vmem>>, vector<1x1x64xf32>
    %13 = vector.shape_cast %12 : vector<1x1x64xf32> to vector<1x64xf32>
    %14 = vector.broadcast %13 : vector<1x64xf32> to vector<32x64xf32>
    %15 = arith.addf %11, %14 : vector<32x64xf32>
    %c0_14 = arith.constant 0 : index
    %c0_15 = arith.constant 0 : index
    %c0_16 = arith.constant 0 : index
    %16 = vector.load %arg4[%c0_14, %c0_15, %c0_16] : memref<2x128x64xbf16, #tpu.memory_space<vmem>>, vector<1x128x64xbf16>
    %17 = vector.shape_cast %16 : vector<1x128x64xbf16> to vector<128x64xbf16>
    %cst_17 = arith.constant dense<0.000000e+00> : vector<32x64xf32>
    %18 = tpu.matmul %0, %17, %cst_17 {dimension_numbers = #tpu.dot_dimension_numbers<[1], [0], [0], [1], [0, 0, 1, 1], [], []>} : vector<32x128xbf16>, vector<128x64xbf16>, vector<32x64xf32> -> vector<32x64xf32>
    %c0_18 = arith.constant 0 : index
    %c0_19 = arith.constant 0 : index
    %c0_20 = arith.constant 0 : index
    %19 = vector.load %arg7[%c0_18, %c0_19, %c0_20] : memref<2x1x64xf32, #tpu.memory_space<vmem>>, vector<1x1x64xf32>
    %20 = vector.shape_cast %19 : vector<1x1x64xf32> to vector<1x64xf32>
    %21 = vector.broadcast %20 : vector<1x64xf32> to vector<32x64xf32>
    %22 = arith.addf %18, %21 : vector<32x64xf32>
    %cst_21 = arith.constant 1.250000e-01 : f32
    %23 = vector.broadcast %cst_21 : f32 to vector<32x64xf32>
    %24 = arith.mulf %8, %23 : vector<32x64xf32>
    %25 = arith.truncf %24 : vector<32x64xf32> to vector<32x64xbf16>
    %26 = arith.truncf %15 : vector<32x64xf32> to vector<32x64xbf16>
    %27 = arith.truncf %22 : vector<32x64xf32> to vector<32x64xbf16>
    %c0_22 = arith.constant 0 : index
    %c0_23 = arith.constant 0 : index
    %c0_24 = arith.constant 0 : index
    %28 = vector.load %arg8[%c0_22, %c0_23, %c0_24] : memref<2x64x128xbf16, #tpu.memory_space<vmem>>, vector<1x64x128xbf16>
    %29 = vector.shape_cast %28 : vector<1x64x128xbf16> to vector<64x128xbf16>
    %c1 = arith.constant 1 : index
    %c0_25 = arith.constant 0 : index
    %c0_26 = arith.constant 0 : index
    %30 = vector.load %arg2[%c1, %c0_25, %c0_26] : memref<2x128x64xbf16, #tpu.memory_space<vmem>>, vector<1x128x64xbf16>
    %31 = vector.shape_cast %30 : vector<1x128x64xbf16> to vector<128x64xbf16>
    %cst_27 = arith.constant dense<0.000000e+00> : vector<32x64xf32>
    %32 = tpu.matmul %0, %31, %cst_27 {dimension_numbers = #tpu.dot_dimension_numbers<[1], [0], [0], [1], [0, 0, 1, 1], [], []>} : vector<32x128xbf16>, vector<128x64xbf16>, vector<32x64xf32> -> vector<32x64xf32>
    %c1_28 = arith.constant 1 : index
    %c0_29 = arith.constant 0 : index
    %c0_30 = arith.constant 0 : index
    %33 = vector.load %arg5[%c1_28, %c0_29, %c0_30] : memref<2x1x64xf32, #tpu.memory_space<vmem>>, vector<1x1x64xf32>
    %34 = vector.shape_cast %33 : vector<1x1x64xf32> to vector<1x64xf32>
    %35 = vector.broadcast %34 : vector<1x64xf32> to vector<32x64xf32>
    %36 = arith.addf %32, %35 : vector<32x64xf32>
    %c1_31 = arith.constant 1 : index
    %c0_32 = arith.constant 0 : index
    %c0_33 = arith.constant 0 : index
    %37 = vector.load %arg3[%c1_31, %c0_32, %c0_33] : memref<2x128x64xbf16, #tpu.memory_space<vmem>>, vector<1x128x64xbf16>
    %38 = vector.shape_cast %37 : vector<1x128x64xbf16> to vector<128x64xbf16>
    %cst_34 = arith.constant dense<0.000000e+00> : vector<32x64xf32>
    %39 = tpu.matmul %0, %38, %cst_34 {dimension_numbers = #tpu.dot_dimension_numbers<[1], [0], [0], [1], [0, 0, 1, 1], [], []>} : vector<32x128xbf16>, vector<128x64xbf16>, vector<32x64xf32> -> vector<32x64xf32>
    %c1_35 = arith.constant 1 : index
    %c0_36 = arith.constant 0 : index
    %c0_37 = arith.constant 0 : index
    %40 = vector.load %arg6[%c1_35, %c0_36, %c0_37] : memref<2x1x64xf32, #tpu.memory_space<vmem>>, vector<1x1x64xf32>
    %41 = vector.shape_cast %40 : vector<1x1x64xf32> to vector<1x64xf32>
    %42 = vector.broadcast %41 : vector<1x64xf32> to vector<32x64xf32>
    %43 = arith.addf %39, %42 : vector<32x64xf32>
    %c1_38 = arith.constant 1 : index
    %c0_39 = arith.constant 0 : index
    %c0_40 = arith.constant 0 : index
    %44 = vector.load %arg4[%c1_38, %c0_39, %c0_40] : memref<2x128x64xbf16, #tpu.memory_space<vmem>>, vector<1x128x64xbf16>
    %45 = vector.shape_cast %44 : vector<1x128x64xbf16> to vector<128x64xbf16>
    %cst_41 = arith.constant dense<0.000000e+00> : vector<32x64xf32>
    %46 = tpu.matmul %0, %45, %cst_41 {dimension_numbers = #tpu.dot_dimension_numbers<[1], [0], [0], [1], [0, 0, 1, 1], [], []>} : vector<32x128xbf16>, vector<128x64xbf16>, vector<32x64xf32> -> vector<32x64xf32>
    %c1_42 = arith.constant 1 : index
    %c0_43 = arith.constant 0 : index
    %c0_44 = arith.constant 0 : index
    %47 = vector.load %arg7[%c1_42, %c0_43, %c0_44] : memref<2x1x64xf32, #tpu.memory_space<vmem>>, vector<1x1x64xf32>
    %48 = vector.shape_cast %47 : vector<1x1x64xf32> to vector<1x64xf32>
    %49 = vector.broadcast %48 : vector<1x64xf32> to vector<32x64xf32>
    %50 = arith.addf %46, %49 : vector<32x64xf32>
    %cst_45 = arith.constant 1.250000e-01 : f32
    %51 = vector.broadcast %cst_45 : f32 to vector<32x64xf32>
    %52 = arith.mulf %36, %51 : vector<32x64xf32>
    %53 = arith.truncf %52 : vector<32x64xf32> to vector<32x64xbf16>
    %54 = arith.truncf %43 : vector<32x64xf32> to vector<32x64xbf16>
    %55 = arith.truncf %50 : vector<32x64xf32> to vector<32x64xbf16>
    %c1_46 = arith.constant 1 : index
    %c0_47 = arith.constant 0 : index
    %c0_48 = arith.constant 0 : index
    %56 = vector.load %arg8[%c1_46, %c0_47, %c0_48] : memref<2x64x128xbf16, #tpu.memory_space<vmem>>, vector<1x64x128xbf16>
    %57 = vector.shape_cast %56 : vector<1x64x128xbf16> to vector<64x128xbf16>
    %c0_49 = arith.constant 0 : index
    %c0_50 = arith.constant 0 : index
    %58 = vector.load %arg9[%c0_49, %c0_50] : memref<1x128xf32, #tpu.memory_space<vmem>>, vector<1x128xf32>
    %cst_51 = arith.constant 0.000000e+00 : f32
    %59 = vector.broadcast %cst_51 : f32 to vector<16x128xf32>
    %60 = vector.broadcast %58 : vector<1x128xf32> to vector<16x128xf32>
    %61 = arith.addf %59, %60 : vector<16x128xf32>
    %62 = vector.extract_strided_slice %25 {offsets = [0, 0], sizes = [16, 64], strides = [1, 1]} : vector<32x64xbf16> to vector<16x64xbf16>
    %63 = vector.extract_strided_slice %26 {offsets = [0, 0], sizes = [16, 64], strides = [1, 1]} : vector<32x64xbf16> to vector<16x64xbf16>
    %64 = vector.extract_strided_slice %27 {offsets = [0, 0], sizes = [16, 64], strides = [1, 1]} : vector<32x64xbf16> to vector<16x64xbf16>
    %cst_52 = arith.constant dense<0.000000e+00> : vector<16x16xf32>
    %65 = tpu.matmul %62, %63, %cst_52 {dimension_numbers = #tpu.dot_dimension_numbers<[1], [1], [0], [0], [0, 0, 1, 0], [], []>} : vector<16x64xbf16>, vector<16x64xbf16>, vector<16x16xf32> -> vector<16x16xf32>
    %66 = math.exp %65 : vector<16x16xf32>
    %cst_53 = arith.constant dense<0.000000e+00> : vector<16xf32>
    %67 = vector.multi_reduction <add>, %66, %cst_53 [1] : vector<16x16xf32> to vector<16xf32>
    %68 = vector.shape_cast %67 : vector<16xf32> to vector<16x1xf32>
    %69 = tpu.reciprocal %68 {approx = true} : vector<16x1xf32> -> vector<16x1xf32>
    %70 = vector.broadcast %69 : vector<16x1xf32> to vector<16x16xf32>
    %71 = arith.mulf %66, %70 : vector<16x16xf32>
    %72 = arith.truncf %71 : vector<16x16xf32> to vector<16x16xbf16>
    %cst_54 = arith.constant dense<0.000000e+00> : vector<16x64xf32>
    %73 = tpu.matmul %72, %64, %cst_54 {dimension_numbers = #tpu.dot_dimension_numbers<[1], [0], [0], [1], [0, 0, 1, 1], [], []>} : vector<16x16xbf16>, vector<16x64xbf16>, vector<16x64xf32> -> vector<16x64xf32>
    %74 = arith.truncf %73 : vector<16x64xf32> to vector<16x64xbf16>
    %cst_55 = arith.constant dense<0.000000e+00> : vector<16x128xf32>
    %75 = tpu.matmul %74, %29, %cst_55 {dimension_numbers = #tpu.dot_dimension_numbers<[1], [0], [0], [1], [0, 0, 1, 1], [], []>} : vector<16x64xbf16>, vector<64x128xbf16>, vector<16x128xf32> -> vector<16x128xf32>
    %76 = arith.addf %61, %75 : vector<16x128xf32>
    %77 = vector.extract_strided_slice %53 {offsets = [0, 0], sizes = [16, 64], strides = [1, 1]} : vector<32x64xbf16> to vector<16x64xbf16>
    %78 = vector.extract_strided_slice %54 {offsets = [0, 0], sizes = [16, 64], strides = [1, 1]} : vector<32x64xbf16> to vector<16x64xbf16>
    %79 = vector.extract_strided_slice %55 {offsets = [0, 0], sizes = [16, 64], strides = [1, 1]} : vector<32x64xbf16> to vector<16x64xbf16>
    %cst_56 = arith.constant dense<0.000000e+00> : vector<16x16xf32>
    %80 = tpu.matmul %77, %78, %cst_56 {dimension_numbers = #tpu.dot_dimension_numbers<[1], [1], [0], [0], [0, 0, 1, 0], [], []>} : vector<16x64xbf16>, vector<16x64xbf16>, vector<16x16xf32> -> vector<16x16xf32>
    %81 = math.exp %80 : vector<16x16xf32>
    %cst_57 = arith.constant dense<0.000000e+00> : vector<16xf32>
    %82 = vector.multi_reduction <add>, %81, %cst_57 [1] : vector<16x16xf32> to vector<16xf32>
    %83 = vector.shape_cast %82 : vector<16xf32> to vector<16x1xf32>
    %84 = tpu.reciprocal %83 {approx = true} : vector<16x1xf32> -> vector<16x1xf32>
    %85 = vector.broadcast %84 : vector<16x1xf32> to vector<16x16xf32>
    %86 = arith.mulf %81, %85 : vector<16x16xf32>
    %87 = arith.truncf %86 : vector<16x16xf32> to vector<16x16xbf16>
    %cst_58 = arith.constant dense<0.000000e+00> : vector<16x64xf32>
    %88 = tpu.matmul %87, %79, %cst_58 {dimension_numbers = #tpu.dot_dimension_numbers<[1], [0], [0], [1], [0, 0, 1, 1], [], []>} : vector<16x16xbf16>, vector<16x64xbf16>, vector<16x64xf32> -> vector<16x64xf32>
    %89 = arith.truncf %88 : vector<16x64xf32> to vector<16x64xbf16>
    %cst_59 = arith.constant dense<0.000000e+00> : vector<16x128xf32>
    %90 = tpu.matmul %89, %57, %cst_59 {dimension_numbers = #tpu.dot_dimension_numbers<[1], [0], [0], [1], [0, 0, 1, 1], [], []>} : vector<16x64xbf16>, vector<64x128xbf16>, vector<16x128xf32> -> vector<16x128xf32>
    %91 = arith.addf %76, %90 : vector<16x128xf32>
    %cst_60 = arith.constant 0.000000e+00 : f32
    %92 = vector.broadcast %cst_60 : f32 to vector<16x128xf32>
    %93 = vector.broadcast %58 : vector<1x128xf32> to vector<16x128xf32>
    %94 = arith.addf %92, %93 : vector<16x128xf32>
    %95 = vector.extract_strided_slice %25 {offsets = [16, 0], sizes = [16, 64], strides = [1, 1]} : vector<32x64xbf16> to vector<16x64xbf16>
    %96 = vector.extract_strided_slice %26 {offsets = [16, 0], sizes = [16, 64], strides = [1, 1]} : vector<32x64xbf16> to vector<16x64xbf16>
    %97 = vector.extract_strided_slice %27 {offsets = [16, 0], sizes = [16, 64], strides = [1, 1]} : vector<32x64xbf16> to vector<16x64xbf16>
    %cst_61 = arith.constant dense<0.000000e+00> : vector<16x16xf32>
    %98 = tpu.matmul %95, %96, %cst_61 {dimension_numbers = #tpu.dot_dimension_numbers<[1], [1], [0], [0], [0, 0, 1, 0], [], []>} : vector<16x64xbf16>, vector<16x64xbf16>, vector<16x16xf32> -> vector<16x16xf32>
    %99 = math.exp %98 : vector<16x16xf32>
    %cst_62 = arith.constant dense<0.000000e+00> : vector<16xf32>
    %100 = vector.multi_reduction <add>, %99, %cst_62 [1] : vector<16x16xf32> to vector<16xf32>
    %101 = vector.shape_cast %100 : vector<16xf32> to vector<16x1xf32>
    %102 = tpu.reciprocal %101 {approx = true} : vector<16x1xf32> -> vector<16x1xf32>
    %103 = vector.broadcast %102 : vector<16x1xf32> to vector<16x16xf32>
    %104 = arith.mulf %99, %103 : vector<16x16xf32>
    %105 = arith.truncf %104 : vector<16x16xf32> to vector<16x16xbf16>
    %cst_63 = arith.constant dense<0.000000e+00> : vector<16x64xf32>
    %106 = tpu.matmul %105, %97, %cst_63 {dimension_numbers = #tpu.dot_dimension_numbers<[1], [0], [0], [1], [0, 0, 1, 1], [], []>} : vector<16x16xbf16>, vector<16x64xbf16>, vector<16x64xf32> -> vector<16x64xf32>
    %107 = arith.truncf %106 : vector<16x64xf32> to vector<16x64xbf16>
    %cst_64 = arith.constant dense<0.000000e+00> : vector<16x128xf32>
    %108 = tpu.matmul %107, %29, %cst_64 {dimension_numbers = #tpu.dot_dimension_numbers<[1], [0], [0], [1], [0, 0, 1, 1], [], []>} : vector<16x64xbf16>, vector<64x128xbf16>, vector<16x128xf32> -> vector<16x128xf32>
    %109 = arith.addf %94, %108 : vector<16x128xf32>
    %110 = vector.extract_strided_slice %53 {offsets = [16, 0], sizes = [16, 64], strides = [1, 1]} : vector<32x64xbf16> to vector<16x64xbf16>
    %111 = vector.extract_strided_slice %54 {offsets = [16, 0], sizes = [16, 64], strides = [1, 1]} : vector<32x64xbf16> to vector<16x64xbf16>
    %112 = vector.extract_strided_slice %55 {offsets = [16, 0], sizes = [16, 64], strides = [1, 1]} : vector<32x64xbf16> to vector<16x64xbf16>
    %cst_65 = arith.constant dense<0.000000e+00> : vector<16x16xf32>
    %113 = tpu.matmul %110, %111, %cst_65 {dimension_numbers = #tpu.dot_dimension_numbers<[1], [1], [0], [0], [0, 0, 1, 0], [], []>} : vector<16x64xbf16>, vector<16x64xbf16>, vector<16x16xf32> -> vector<16x16xf32>
    %114 = math.exp %113 : vector<16x16xf32>
    %cst_66 = arith.constant dense<0.000000e+00> : vector<16xf32>
    %115 = vector.multi_reduction <add>, %114, %cst_66 [1] : vector<16x16xf32> to vector<16xf32>
    %116 = vector.shape_cast %115 : vector<16xf32> to vector<16x1xf32>
    %117 = tpu.reciprocal %116 {approx = true} : vector<16x1xf32> -> vector<16x1xf32>
    %118 = vector.broadcast %117 : vector<16x1xf32> to vector<16x16xf32>
    %119 = arith.mulf %114, %118 : vector<16x16xf32>
    %120 = arith.truncf %119 : vector<16x16xf32> to vector<16x16xbf16>
    %cst_67 = arith.constant dense<0.000000e+00> : vector<16x64xf32>
    %121 = tpu.matmul %120, %112, %cst_67 {dimension_numbers = #tpu.dot_dimension_numbers<[1], [0], [0], [1], [0, 0, 1, 1], [], []>} : vector<16x16xbf16>, vector<16x64xbf16>, vector<16x64xf32> -> vector<16x64xf32>
    %122 = arith.truncf %121 : vector<16x64xf32> to vector<16x64xbf16>
    %cst_68 = arith.constant dense<0.000000e+00> : vector<16x128xf32>
    %123 = tpu.matmul %122, %57, %cst_68 {dimension_numbers = #tpu.dot_dimension_numbers<[1], [0], [0], [1], [0, 0, 1, 1], [], []>} : vector<16x64xbf16>, vector<64x128xbf16>, vector<16x128xf32> -> vector<16x128xf32>
    %124 = arith.addf %109, %123 : vector<16x128xf32>
    %125 = tpu.concatenate %91, %124 in 0 : vector<16x128xf32>, vector<16x128xf32> -> vector<32x128xf32>
    %126 = arith.addf %1, %125 : vector<32x128xf32>
    %c0_69 = arith.constant 0 : index
    %c0_70 = arith.constant 0 : index
    %127 = vector.load %arg10[%c0_69, %c0_70] : memref<2x128xf32, #tpu.memory_space<vmem>>, vector<2x128xf32>
    %cst_71 = arith.constant dense<0.000000e+00> : vector<32xf32>
    %128 = vector.multi_reduction <add>, %126, %cst_71 [1] : vector<32x128xf32> to vector<32xf32>
    %129 = vector.shape_cast %128 : vector<32xf32> to vector<32x1xf32>
    %cst_72 = arith.constant 1.280000e+02 : f32
    %130 = vector.broadcast %cst_72 : f32 to vector<32x1xf32>
    %131 = arith.divf %129, %130 : vector<32x1xf32>
    %132 = vector.broadcast %131 : vector<32x1xf32> to vector<32x128xf32>
    %133 = arith.subf %126, %132 : vector<32x128xf32>
    %134 = arith.mulf %133, %133 : vector<32x128xf32>
    %cst_73 = arith.constant dense<0.000000e+00> : vector<32xf32>
    %135 = vector.multi_reduction <add>, %134, %cst_73 [1] : vector<32x128xf32> to vector<32xf32>
    %136 = vector.shape_cast %135 : vector<32xf32> to vector<32x1xf32>
    %cst_74 = arith.constant 1.280000e+02 : f32
    %137 = vector.broadcast %cst_74 : f32 to vector<32x1xf32>
    %138 = arith.divf %136, %137 : vector<32x1xf32>
    %139 = vector.broadcast %131 : vector<32x1xf32> to vector<32x128xf32>
    %140 = arith.subf %126, %139 : vector<32x128xf32>
    %cst_75 = arith.constant 9.99999974E-6 : f32
    %141 = vector.broadcast %cst_75 : f32 to vector<32x1xf32>
    %142 = arith.addf %138, %141 : vector<32x1xf32>
    %143 = math.rsqrt %142 : vector<32x1xf32>
    %144 = vector.broadcast %143 : vector<32x1xf32> to vector<32x128xf32>
    %145 = arith.mulf %140, %144 : vector<32x128xf32>
    %146 = vector.extract_strided_slice %127 {offsets = [0, 0], sizes = [1, 128], strides = [1, 1]} : vector<2x128xf32> to vector<1x128xf32>
    %147 = vector.broadcast %146 : vector<1x128xf32> to vector<32x128xf32>
    %148 = arith.mulf %145, %147 : vector<32x128xf32>
    %149 = vector.extract_strided_slice %127 {offsets = [1, 0], sizes = [1, 128], strides = [1, 1]} : vector<2x128xf32> to vector<1x128xf32>
    %150 = vector.broadcast %149 : vector<1x128xf32> to vector<32x128xf32>
    %151 = arith.addf %148, %150 : vector<32x128xf32>
    %152 = arith.truncf %151 : vector<32x128xf32> to vector<32x128xbf16>
    %c0_76 = arith.constant 0 : index
    %c0_77 = arith.constant 0 : index
    %153 = vector.load %arg11[%c0_76, %c0_77] : memref<128x256xbf16, #tpu.memory_space<vmem>>, vector<128x256xbf16>
    %cst_78 = arith.constant dense<0.000000e+00> : vector<32x256xf32>
    %154 = tpu.matmul %152, %153, %cst_78 {dimension_numbers = #tpu.dot_dimension_numbers<[1], [0], [0], [1], [0, 0, 1, 1], [], []>} : vector<32x128xbf16>, vector<128x256xbf16>, vector<32x256xf32> -> vector<32x256xf32>
    %c0_79 = arith.constant 0 : index
    %c0_80 = arith.constant 0 : index
    %155 = vector.load %arg12[%c0_79, %c0_80] : memref<1x256xf32, #tpu.memory_space<vmem>>, vector<1x256xf32>
    %156 = vector.broadcast %155 : vector<1x256xf32> to vector<32x256xf32>
    %157 = arith.addf %154, %156 : vector<32x256xf32>
    %cst_81 = arith.constant 5.000000e-01 : f32
    %158 = vector.broadcast %cst_81 : f32 to vector<32x256xf32>
    %159 = arith.mulf %158, %157 : vector<32x256xf32>
    %cst_82 = arith.constant 4.471500e-02 : f32
    %160 = vector.broadcast %cst_82 : f32 to vector<32x256xf32>
    %161 = arith.mulf %160, %157 : vector<32x256xf32>
    %162 = arith.mulf %161, %157 : vector<32x256xf32>
    %163 = arith.mulf %162, %157 : vector<32x256xf32>
    %164 = arith.addf %157, %163 : vector<32x256xf32>
    %cst_83 = arith.constant 0.797884583 : f32
    %165 = vector.broadcast %cst_83 : f32 to vector<32x256xf32>
    %166 = arith.mulf %165, %164 : vector<32x256xf32>
    %167 = math.tanh %166 : vector<32x256xf32>
    %cst_84 = arith.constant 1.000000e+00 : f32
    %168 = vector.broadcast %cst_84 : f32 to vector<32x256xf32>
    %169 = arith.addf %168, %167 : vector<32x256xf32>
    %170 = arith.mulf %159, %169 : vector<32x256xf32>
    %171 = arith.truncf %170 : vector<32x256xf32> to vector<32x256xbf16>
    %c0_85 = arith.constant 0 : index
    %c0_86 = arith.constant 0 : index
    %172 = vector.load %arg13[%c0_85, %c0_86] : memref<256x128xbf16, #tpu.memory_space<vmem>>, vector<256x128xbf16>
    %cst_87 = arith.constant dense<0.000000e+00> : vector<32x128xf32>
    %173 = tpu.matmul %171, %172, %cst_87 {dimension_numbers = #tpu.dot_dimension_numbers<[1], [0], [0], [1], [0, 0, 1, 1], [], []>} : vector<32x256xbf16>, vector<256x128xbf16>, vector<32x128xf32> -> vector<32x128xf32>
    %c0_88 = arith.constant 0 : index
    %c0_89 = arith.constant 0 : index
    %174 = vector.load %arg14[%c0_88, %c0_89] : memref<1x128xf32, #tpu.memory_space<vmem>>, vector<1x128xf32>
    %175 = vector.broadcast %174 : vector<1x128xf32> to vector<32x128xf32>
    %176 = arith.addf %173, %175 : vector<32x128xf32>
    %177 = arith.addf %151, %176 : vector<32x128xf32>
    %c0_90 = arith.constant 0 : index
    %c0_91 = arith.constant 0 : index
    %178 = vector.load %arg15[%c0_90, %c0_91] : memref<2x128xf32, #tpu.memory_space<vmem>>, vector<2x128xf32>
    %cst_92 = arith.constant dense<0.000000e+00> : vector<32xf32>
    %179 = vector.multi_reduction <add>, %177, %cst_92 [1] : vector<32x128xf32> to vector<32xf32>
    %180 = vector.shape_cast %179 : vector<32xf32> to vector<32x1xf32>
    %cst_93 = arith.constant 1.280000e+02 : f32
    %181 = vector.broadcast %cst_93 : f32 to vector<32x1xf32>
    %182 = arith.divf %180, %181 : vector<32x1xf32>
    %183 = vector.broadcast %182 : vector<32x1xf32> to vector<32x128xf32>
    %184 = arith.subf %177, %183 : vector<32x128xf32>
    %185 = arith.mulf %184, %184 : vector<32x128xf32>
    %cst_94 = arith.constant dense<0.000000e+00> : vector<32xf32>
    %186 = vector.multi_reduction <add>, %185, %cst_94 [1] : vector<32x128xf32> to vector<32xf32>
    %187 = vector.shape_cast %186 : vector<32xf32> to vector<32x1xf32>
    %cst_95 = arith.constant 1.280000e+02 : f32
    %188 = vector.broadcast %cst_95 : f32 to vector<32x1xf32>
    %189 = arith.divf %187, %188 : vector<32x1xf32>
    %190 = vector.broadcast %182 : vector<32x1xf32> to vector<32x128xf32>
    %191 = arith.subf %177, %190 : vector<32x128xf32>
    %cst_96 = arith.constant 9.99999974E-6 : f32
    %192 = vector.broadcast %cst_96 : f32 to vector<32x1xf32>
    %193 = arith.addf %189, %192 : vector<32x1xf32>
    %194 = math.rsqrt %193 : vector<32x1xf32>
    %195 = vector.broadcast %194 : vector<32x1xf32> to vector<32x128xf32>
    %196 = arith.mulf %191, %195 : vector<32x128xf32>
    %197 = vector.extract_strided_slice %178 {offsets = [0, 0], sizes = [1, 128], strides = [1, 1]} : vector<2x128xf32> to vector<1x128xf32>
    %198 = vector.broadcast %197 : vector<1x128xf32> to vector<32x128xf32>
    %199 = arith.mulf %196, %198 : vector<32x128xf32>
    %200 = vector.extract_strided_slice %178 {offsets = [1, 0], sizes = [1, 128], strides = [1, 1]} : vector<2x128xf32> to vector<1x128xf32>
    %201 = vector.broadcast %200 : vector<1x128xf32> to vector<32x128xf32>
    %202 = arith.addf %199, %201 : vector<32x128xf32>
    %203 = arith.truncf %202 : vector<32x128xf32> to vector<32x128xbf16>
    %c0_97 = arith.constant 0 : index
    %c0_98 = arith.constant 0 : index
    %204 = vector.load %arg16[%c0_97, %c0_98] : memref<32x128xbf16, #tpu.memory_space<vmem>>, vector<32x128xbf16>
    tpu.vector_store %arg16[%c0_97, %c0_98], %203 {strides = array<i32>} : memref<32x128xbf16, #tpu.memory_space<vmem>>, vector<32x128xbf16>,
    %205 = vector.extract_strided_slice %202 {offsets = [0, 0], sizes = [16, 128], strides = [1, 1]} : vector<32x128xf32> to vector<16x128xf32>
    %cst_99 = arith.constant dense<0.000000e+00> : vector<128xf32>
    %206 = vector.multi_reduction <add>, %205, %cst_99 [0] : vector<16x128xf32> to vector<128xf32>
    %207 = vector.shape_cast %206 : vector<128xf32> to vector<1x128xf32>
    %cst_100 = arith.constant 1.600000e+01 : f32
    %208 = vector.broadcast %cst_100 : f32 to vector<1x128xf32>
    %209 = arith.divf %207, %208 : vector<1x128xf32>
    %210 = vector.extract_strided_slice %202 {offsets = [16, 0], sizes = [16, 128], strides = [1, 1]} : vector<32x128xf32> to vector<16x128xf32>
    %cst_101 = arith.constant dense<0.000000e+00> : vector<128xf32>
    %211 = vector.multi_reduction <add>, %210, %cst_101 [0] : vector<16x128xf32> to vector<128xf32>
    %212 = vector.shape_cast %211 : vector<128xf32> to vector<1x128xf32>
    %cst_102 = arith.constant 1.600000e+01 : f32
    %213 = vector.broadcast %cst_102 : f32 to vector<1x128xf32>
    %214 = arith.divf %212, %213 : vector<1x128xf32>
    %215 = tpu.concatenate %209, %214 in 0 : vector<1x128xf32>, vector<1x128xf32> -> vector<2x128xf32>
    %c0_103 = arith.constant 0 : index
    %c0_104 = arith.constant 0 : index
    %216 = vector.load %arg17[%c0_103, %c0_104] : memref<2x128xf32, #tpu.memory_space<vmem>>, vector<2x128xf32>
    tpu.vector_store %arg17[%c0_103, %c0_104], %215 {strides = array<i32>} : memref<2x128xf32, #tpu.memory_space<vmem>>, vector<2x128xf32>,
    return
  }
  func.func @transform_0(%arg0: i32) -> (i32, i32) {
    %c0_i32 = arith.constant 0 : i32
    %c0_i32_0 = arith.constant 0 : i32
    %c0_i32_1 = arith.constant 0 : i32
    return %c0_i32, %c0_i32_0 : i32, i32
  }
  func.func @transform_1(%arg0: i32) -> (i32, i32, i32) {
    %c0_i32 = arith.constant 0 : i32
    %c0_i32_0 = arith.constant 0 : i32
    %c0_i32_1 = arith.constant 0 : i32
    %c0_i32_2 = arith.constant 0 : i32
    return %c0_i32, %c0_i32_0, %c0_i32_1 : i32, i32, i32
  }
  func.func @transform_2(%arg0: i32) -> (i32, i32, i32) {
    %c0_i32 = arith.constant 0 : i32
    %c0_i32_0 = arith.constant 0 : i32
    %c0_i32_1 = arith.constant 0 : i32
    %c0_i32_2 = arith.constant 0 : i32
    return %c0_i32, %c0_i32_0, %c0_i32_1 : i32, i32, i32
  }
  func.func @transform_3(%arg0: i32) -> (i32, i32, i32) {
    %c0_i32 = arith.constant 0 : i32
    %c0_i32_0 = arith.constant 0 : i32
    %c0_i32_1 = arith.constant 0 : i32
    %c0_i32_2 = arith.constant 0 : i32
    return %c0_i32, %c0_i32_0, %c0_i32_1 : i32, i32, i32
  }
  func.func @transform_4(%arg0: i32) -> (i32, i32, i32) {
    %c0_i32 = arith.constant 0 : i32
    %c0_i32_0 = arith.constant 0 : i32
    %c0_i32_1 = arith.constant 0 : i32
    %c0_i32_2 = arith.constant 0 : i32
    return %c0_i32, %c0_i32_0, %c0_i32_1 : i32, i32, i32
  }
  func.func @transform_5(%arg0: i32) -> (i32, i32, i32) {
    %c0_i32 = arith.constant 0 : i32
    %c0_i32_0 = arith.constant 0 : i32
    %c0_i32_1 = arith.constant 0 : i32
    %c0_i32_2 = arith.constant 0 : i32
    return %c0_i32, %c0_i32_0, %c0_i32_1 : i32, i32, i32
  }
  func.func @transform_6(%arg0: i32) -> (i32, i32, i32) {
    %c0_i32 = arith.constant 0 : i32
    %c0_i32_0 = arith.constant 0 : i32
    %c0_i32_1 = arith.constant 0 : i32
    %c0_i32_2 = arith.constant 0 : i32
    return %c0_i32, %c0_i32_0, %c0_i32_1 : i32, i32, i32
  }
  func.func @transform_7(%arg0: i32) -> (i32, i32, i32) {
    %c0_i32 = arith.constant 0 : i32
    %c0_i32_0 = arith.constant 0 : i32
    %c0_i32_1 = arith.constant 0 : i32
    %c0_i32_2 = arith.constant 0 : i32
    return %c0_i32, %c0_i32_0, %c0_i32_1 : i32, i32, i32
  }
  func.func @transform_8(%arg0: i32) -> (i32, i32) {
    %c0_i32 = arith.constant 0 : i32
    %c0_i32_0 = arith.constant 0 : i32
    %c0_i32_1 = arith.constant 0 : i32
    return %c0_i32, %c0_i32_0 : i32, i32
  }
  func.func @transform_9(%arg0: i32) -> (i32, i32) {
    %c0_i32 = arith.constant 0 : i32
    %c0_i32_0 = arith.constant 0 : i32
    %c0_i32_1 = arith.constant 0 : i32
    return %c0_i32, %c0_i32_0 : i32, i32
  }
  func.func @transform_10(%arg0: i32) -> (i32, i32) {
    %c0_i32 = arith.constant 0 : i32
    %c0_i32_0 = arith.constant 0 : i32
    %c0_i32_1 = arith.constant 0 : i32
    return %c0_i32, %c0_i32_0 : i32, i32
  }
  func.func @transform_11(%arg0: i32) -> (i32, i32) {
    %c0_i32 = arith.constant 0 : i32
    %c0_i32_0 = arith.constant 0 : i32
    %c0_i32_1 = arith.constant 0 : i32
    return %c0_i32, %c0_i32_0 : i32, i32
  }
  func.func @transform_12(%arg0: i32) -> (i32, i32) {
    %c0_i32 = arith.constant 0 : i32
    %c0_i32_0 = arith.constant 0 : i32
    %c0_i32_1 = arith.constant 0 : i32
    return %c0_i32, %c0_i32_0 : i32, i32
  }
  func.func @transform_13(%arg0: i32) -> (i32, i32) {
    %c0_i32 = arith.constant 0 : i32
    %c0_i32_0 = arith.constant 0 : i32
    %c0_i32_1 = arith.constant 0 : i32
    return %c0_i32, %c0_i32_0 : i32, i32
  }
  func.func @transform_14(%arg0: i32) -> (i32, i32) {
    %c0_i32 = arith.constant 0 : i32
    %c0_i32_0 = arith.constant 0 : i32
    %c0_i32_1 = arith.constant 0 : i32
    return %c0_i32, %c0_i32_0 : i32, i32
  }
  func.func @transform_15(%arg0: i32) -> (i32, i32) {
    %c0_i32 = arith.constant 0 : i32
    %c0_i32_0 = arith.constant 0 : i32
    %c0_i32_1 = arith.constant 0 : i32
    return %c0_i32, %c0_i32_0 : i32, i32
  }
  func.func @transform_16(%arg0: i32) -> (i32, i32) {
    %c0_i32 = arith.constant 0 : i32
    %c0_i32_0 = arith.constant 0 : i32
    %c0_i32_1 = arith.constant 0 : i32
    return %c0_i32, %c0_i32_0 : i32, i32
  }
}

</mosaic_0001>

<bundles_post_ra>
// kernel: wavlm_forward.4
= control target key start
LH: loop header
LB: loop body
LE: loop exit
PB: predicated region body
PF: predicated region fallthrough
CT: control target
= control target key end

     0   :  { %v2777_v34 = vmov 0.0   ;;  %vm2778_vm0 = vmmov 0   ;;  %vm842_vm1 = vcmask 523264   ;;  %vm894_vm2 = vcmask 130048   ;;  %s3423_s2 = inlined_call_operand.vmem [shape: bf16[2,128,64], index: 2, kind: input, shape index: {}]   ;;  %s3424_s1 = inlined_call_operand.vmem [shape: bf16[2,128,64], index: 1, kind: input, shape index: {}]   ;;  %s3425_s0 = inlined_call_operand.vmem [shape: bf16[32,128], index: 0, kind: input, shape index: {}]   ;;  %s3426_s3 = inlined_call_operand.vmem [shape: bf16[2,128,64], index: 3, kind: input, shape index: {}]   ;;  %s3427_s5 = inlined_call_operand.vmem [shape: f32[2,1,64], index: 5, kind: input, shape index: {}]   ;;  %s3428_s4 = inlined_call_operand.vmem [shape: f32[2,1,64], index: 4, kind: input, shape index: {}]   ;;  %s3429_s6 = inlined_call_operand.vmem [shape: f32[2,1,64], index: 6, kind: input, shape index: {}]   ;;  %s3430_s7 = inlined_call_operand.vmem [shape: bf16[2,64,128], index: 7, kind: input, shape index: {}]   ;;  %s3431_s8 = inlined_call_operand.vmem [shape: f32[1,128], index: 8, kind: input, shape index: {}]   ;;  %s3432_s10 = inlined_call_operand.vmem [shape: bf16[128,256], index: 10, kind: input, shape index: {}]   ;;  %s3433_s9 = inlined_call_operand.vmem [shape: f32[2,128], index: 9, kind: input, shape index: {}]   ;;  %s3434_s12 = inlined_call_operand.vmem [shape: bf16[256,128], index: 12, kind: input, shape index: {}]   ;;  %s3435_s11 = inlined_call_operand.vmem [shape: f32[1,256], index: 11, kind: input, shape index: {}]   ;;  %s3436_s13 = inlined_call_operand.vmem [shape: f32[1,128], index: 13, kind: input, shape index: {}]   ;;  %s3437_s14 = inlined_call_operand.vmem [shape: f32[2,128], index: 14, kind: input, shape index: {}]   ;;  %s3438_s15 = inlined_call_operand.vmem [shape: bf16[32,128], index: 15, kind: output, shape index: {}]  }
   0x1   :  { %v2613_v0 = vld [vmem:[%s3423_s2 + $0x38] sm:$0xff]   ;;  %v2615_v2 = vld [vmem:[%s3423_s2 + $0x30] sm:$0xff]   ;;  %v2617_v4 = vld [vmem:[%s3423_s2 + $0x28] sm:$0xff]  }
   0x2   :  { %v2614_v1 = vld [vmem:[%s3424_s1 + $0x38] sm:$0xff]   ;;  %2414 = vmatprep.subr.bf16.mxu1 %v2613_v0  ;;  %v2616_v3 = vld [vmem:[%s3424_s1 + $0x30] sm:$0xff]   ;;  %v2618_v5 = vld [vmem:[%s3424_s1 + $0x28] sm:$0xff]  }
   0x3   :  { %2394 = vmatprep.subr.bf16.mxu0 %v2614_v1  ;;  %2415 = vmatpush3.bf16.msra.mxu1 %v2613_v0  ;;  %v2619_v6 = vld [vmem:[%s3423_s2 + $0x20] sm:$0xff]   ;;  %v2621_v8 = vld [vmem:[%s3423_s2 + $0x18] sm:$0xff]   ;;  %v2623_v10 = vld [vmem:[%s3423_s2 + $0x10] sm:$0xff]  }
   0x4   :  { %2395 = vmatpush3.bf16.msra.mxu0 %v2614_v1  ;;  %2416 = vmatprep.subr.bf16.mxu1 %v2615_v2  ;;  %v2620_v7 = vld [vmem:[%s3424_s1 + $0x20] sm:$0xff]   ;;  %v2622_v9 = vld [vmem:[%s3424_s1 + $0x18] sm:$0xff]   ;;  %v2624_v12 = vld [vmem:[%s3424_s1 + $0x10] sm:$0xff]  }
   0x5   :  { %2396 = vmatprep.subr.bf16.mxu0 %v2616_v3  ;;  %v2896_v11 = vld [vmem:[%s3425_s0] sm:$0xff]   ;;  %v2625_v13 = vld [vmem:[%s3423_s2 + $0x8] sm:$0xff]   ;;  %v2631_v18 = vld [vmem:[%s3424_s1 + $0x78] sm:$0xff]  }
   0x6   :  { %2430 = vmatprep.mubr.bf16.mxu1 %v2896_v11  ;;  %v2626_v14 = vld [vmem:[%s3424_s1 + $0x8] sm:$0xff]   ;;  %2410 = vmatprep.mubr.bf16.mxu0 %v2896_v11  ;;  %v2627_v15 = vld [vmem:[%s3423_s2] sm:$0xff]   ;;  %v2632_v19 = vld [vmem:[%s3424_s1 + $0x70] sm:$0xff]  }
   0x7   :  { %2417 = vmatpush3.bf16.msra.mxu1 %v2615_v2  ;;  %v2628_v16 = vld [vmem:[%s3424_s1] sm:$0xff]   ;;  %v2918_v17 = vld [vmem:[%s3425_s0 + $0x8] sm:$0xff]   ;;  %v2635_v22 = vld [vmem:[%s3424_s1 + $0x58] sm:$0xff]  }
   0x8   :  { %2397 = vmatpush3.bf16.msra.mxu0 %v2616_v3  ;;  %2418 = vmatprep.subr.bf16.mxu1 %v2617_v4  ;;  %v2633_v20 = vld [vmem:[%s3424_s1 + $0x68] sm:$0xff]   ;;  %v2634_v21 = vld [vmem:[%s3424_s1 + $0x60] sm:$0xff]   ;;  %v2636_v23 = vld [vmem:[%s3424_s1 + $0x50] sm:$0xff]  }
   0x9   :  { %2398 = vmatprep.subr.bf16.mxu0 %v2618_v5  ;;  %v2637_v24 = vld [vmem:[%s3424_s1 + $0x48] sm:$0xff]   ;;  %v2638_v25 = vld [vmem:[%s3424_s1 + $0x40] sm:$0xff]   ;;  %v2639_v26 = vld [vmem:[%s3426_s3 + $0x78] sm:$0xff]  }
   0xa   :  { %v2640_v27 = vld [vmem:[%s3426_s3 + $0x70] sm:$0xff]   ;;  %v2641_v28 = vld [vmem:[%s3426_s3 + $0x68] sm:$0xff]   ;;  %v2642_v29 = vld [vmem:[%s3426_s3 + $0x60] sm:$0xff]  }
   0xb   :  { %2419 = vmatpush3.bf16.msra.mxu1 %v2617_v4  ;;  %v2643_v30 = vld [vmem:[%s3426_s3 + $0x58] sm:$0xff]   ;;  %v2644_v31 = vld [vmem:[%s3426_s3 + $0x50] sm:$0xff]   ;;  %v2645_v32 = vld [vmem:[%s3426_s3 + $0x48] sm:$0xff]  }
   0xc   :  { %2399 = vmatpush3.bf16.msra.mxu0 %v2618_v5  ;;  %2420 = vmatprep.subr.bf16.mxu1 %v2619_v6  ;;  %v2646_v33 = vld [vmem:[%s3426_s3 + $0x40] sm:$0xff]   ;;  %v2647_v35 = vld [vmem:[%s3426_s3 + $0x38] sm:$0xff]   ;;  %v2648_v36 = vld [vmem:[%s3426_s3 + $0x30] sm:$0xff]  }
   0xd   :  { %2400 = vmatprep.subr.bf16.mxu0 %v2620_v7  ;;  %v2649_v37 = vld [vmem:[%s3426_s3 + $0x28] sm:$0xff]   ;;  %v2650_v38 = vld [vmem:[%s3426_s3 + $0x20] sm:$0xff]   ;;  %v2651_v39 = vld [vmem:[%s3426_s3 + $0x18] sm:$0xff]  }
   0xe   :  { %v2652_v40 = vld [vmem:[%s3426_s3 + $0x10] sm:$0xff]   ;;  %v2653_v41 = vld [vmem:[%s3426_s3 + $0x8] sm:$0xff]   ;;  %v2654_v42 = vld [vmem:[%s3426_s3] sm:$0xff]  }
   0xf   :  { %2421 = vmatpush3.bf16.msra.mxu1 %v2619_v6  ;;  %v2655_v43 = vld [vmem:[%s3423_s2 + $0x78] sm:$0xff]   ;;  %v2656_v44 = vld [vmem:[%s3423_s2 + $0x70] sm:$0xff]   ;;  %v2657_v45 = vld [vmem:[%s3423_s2 + $0x68] sm:$0xff]  }
  0x10   :  { %2401 = vmatpush3.bf16.msra.mxu0 %v2620_v7  ;;  %2422 = vmatprep.subr.bf16.mxu1 %v2621_v8  ;;  %v2658_v46 = vld [vmem:[%s3423_s2 + $0x60] sm:$0xff]   ;;  %v2659_v47 = vld [vmem:[%s3423_s2 + $0x58] sm:$0xff]   ;;  %v2660_v48 = vld [vmem:[%s3423_s2 + $0x50] sm:$0xff]  }
  0x11   :  { %2402 = vmatprep.subr.bf16.mxu0 %v2622_v9  ;;  %v2661_v49 = vld [vmem:[%s3423_s2 + $0x48] sm:$0xff]   ;;  %v2662_v50 = vld [vmem:[%s3423_s2 + $0x40] sm:$0xff]  }
  0x12   :  { %v2093_v51 = vld [vmem:[%s3427_s5] ss:$0 sm:$0xff] }
  0x13   :  { %2423 = vmatpush3.bf16.msra.mxu1 %v2621_v8  ;;  %v2082_v52 = vld [vmem:[%s3428_s4] ss:$0 sm:$0xff] }
  0x14   :  { %2403 = vmatpush3.bf16.msra.mxu0 %v2622_v9  ;;  %2424 = vmatprep.subr.bf16.mxu1 %v2623_v10 }
  0x15   :  { %2404 = vmatprep.subr.bf16.mxu0 %v2624_v12 }
  0x17   :  { %2425 = vmatpush3.bf16.msra.mxu1 %v2623_v10 }
  0x18   :  { %2405 = vmatpush3.bf16.msra.mxu0 %v2624_v12  ;;  %2426 = vmatprep.subr.bf16.mxu1 %v2625_v13 }
  0x19   :  { %2406 = vmatprep.subr.bf16.mxu0 %v2626_v14 }
  0x1b   :  { %2427 = vmatpush3.bf16.msra.mxu1 %v2625_v13 }
  0x1c   :  { %2407 = vmatpush3.bf16.msra.mxu0 %v2626_v14  ;;  %2428 = vmatprep.subr.bf16.mxu1 %v2627_v15 }
  0x1d   :  { %2408 = vmatprep.subr.bf16.mxu0 %v2628_v16 }
  0x1f   :  { %2429 = vmatpush3.bf16.msra.mxu1 %v2627_v15  ;;  %v2128_v15 = vld [vmem:[%s3428_s4 + $0x1] ss:$0 sm:$0xff] }
  0x20   :  { %2409 = vmatpush3.bf16.msra.mxu0 %v2628_v16  ;;  %2454 = vmatprep.subr.bf16.mxu1 %v2631_v18 }
  0x21   :  { %2434 = vmatprep.subr.bf16.mxu0 %v2647_v35 }
  0x22   :  { %2431 = vmatmul.mubr.bf16.vlgmr.msra.gmra.mxu1 %v2918_v17 }
  0x23   :  { %2411 = vmatmul.mubr.bf16.vlgmr.msra.gmra.mxu0 %v2918_v17  ;;  %2455 = vmatpush3.bf16.msra.mxu1 %v2631_v18 }
  0x24   :  { %2456 = vmatprep.subr.bf16.mxu1 %v2632_v19  ;;  %2470 = vmatprep.mubr.bf16.mxu1 %v2896_v11 }
  0x25   :  { %2450 = vmatprep.mubr.bf16.mxu0 %v2896_v11  ;;  %2435 = vmatpush3.bf16.msra.mxu0 %v2647_v35 }
  0x26   :  { %2436 = vmatprep.subr.bf16.mxu0 %v2648_v36 }
  0x27   :  { %2457 = vmatpush3.bf16.msra.mxu1 %v2632_v19 }
  0x28   :  { %2458 = vmatprep.subr.bf16.mxu1 %v2633_v20 }
  0x29   :  { %2437 = vmatpush3.bf16.msra.mxu0 %v2648_v36 }
  0x2a   :  { %2438 = vmatprep.subr.bf16.mxu0 %v2649_v37 }
  0x2b   :  { %2459 = vmatpush3.bf16.msra.mxu1 %v2633_v20 }
  0x2c   :  { %2460 = vmatprep.subr.bf16.mxu1 %v2634_v21 }
  0x2d   :  { %2439 = vmatpush3.bf16.msra.mxu0 %v2649_v37 }
  0x2e   :  { %2440 = vmatprep.subr.bf16.mxu0 %v2650_v38 }
  0x2f   :  { %2461 = vmatpush3.bf16.msra.mxu1 %v2634_v21 }
  0x30   :  { %2462 = vmatprep.subr.bf16.mxu1 %v2635_v22 }
  0x31   :  { %2441 = vmatpush3.bf16.msra.mxu0 %v2650_v38 }
  0x32   :  { %2442 = vmatprep.subr.bf16.mxu0 %v2651_v39 }
  0x33   :  { %2463 = vmatpush3.bf16.msra.mxu1 %v2635_v22 }
  0x34   :  { %2464 = vmatprep.subr.bf16.mxu1 %v2636_v23 }
  0x35   :  { %2443 = vmatpush3.bf16.msra.mxu0 %v2651_v39  ;;  %v2102_v39 = vld [vmem:[%s3429_s6] ss:$0 sm:$0xff] }
  0x36   :  { %2444 = vmatprep.subr.bf16.mxu0 %v2652_v40 }
  0x37   :  { %2465 = vmatpush3.bf16.msra.mxu1 %v2636_v23 }
  0x38   :  { %2466 = vmatprep.subr.bf16.mxu1 %v2637_v24 }
  0x39   :  { %2445 = vmatpush3.bf16.msra.mxu0 %v2652_v40 }
  0x3a   :  { %2446 = vmatprep.subr.bf16.mxu0 %v2653_v41 }
  0x3b   :  { %2467 = vmatpush3.bf16.msra.mxu1 %v2637_v24 }
  0x3c   :  { %2468 = vmatprep.subr.bf16.mxu1 %v2638_v25 }
  0x3d   :  { %2447 = vmatpush3.bf16.msra.mxu0 %v2653_v41 }
  0x3e   :  { %2448 = vmatprep.subr.bf16.mxu0 %v2654_v42 }
  0x3f   :  { %2469 = vmatpush3.bf16.msra.mxu1 %v2638_v25 }
  0x40   :  { %2494 = vmatprep.subr.bf16.mxu1 %v2639_v26 }
  0x41   :  { %2449 = vmatpush3.bf16.msra.mxu0 %v2654_v42 }
  0x42   :  { %2471 = vmatmul.mubr.bf16.vlgmr.msra.gmra.mxu1 %v2918_v17  ;;  %2474 = vmatprep.subr.bf16.mxu0 %v2655_v43 }
  0x43   :  { %2495 = vmatpush3.bf16.msra.mxu1 %v2639_v26  ;;  %2510 = vmatprep.mubr.bf16.mxu1 %v2896_v11 }
  0x44   :  { %2496 = vmatprep.subr.bf16.mxu1 %v2640_v27  ;;  %2451 = vmatmul.mubr.bf16.vlgmr.msra.gmra.mxu0 %v2918_v17 }
  0x45   :  { %2475 = vmatpush3.bf16.msra.mxu0 %v2655_v43  ;;  %2490 = vmatprep.mubr.bf16.mxu0 %v2896_v11 }
  0x46   :  { %2476 = vmatprep.subr.bf16.mxu0 %v2656_v44 }
  0x47   :  { %2497 = vmatpush3.bf16.msra.mxu1 %v2640_v27 }
  0x48   :  { %2498 = vmatprep.subr.bf16.mxu1 %v2641_v28 }
  0x49   :  { %2477 = vmatpush3.bf16.msra.mxu0 %v2656_v44 }
  0x4a   :  { %2478 = vmatprep.subr.bf16.mxu0 %v2657_v45 }
  0x4b   :  { %2499 = vmatpush3.bf16.msra.mxu1 %v2641_v28 }
  0x4c   :  { %2500 = vmatprep.subr.bf16.mxu1 %v2642_v29 }
  0x4d   :  { %2479 = vmatpush3.bf16.msra.mxu0 %v2657_v45 }
  0x4e   :  { %2480 = vmatprep.subr.bf16.mxu0 %v2658_v46 }
  0x4f   :  { %2501 = vmatpush3.bf16.msra.mxu1 %v2642_v29 }
  0x50   :  { %2502 = vmatprep.subr.bf16.mxu1 %v2643_v30 }
  0x51   :  { %2481 = vmatpush3.bf16.msra.mxu0 %v2658_v46 }
  0x52   :  { %2482 = vmatprep.subr.bf16.mxu0 %v2659_v47 }
  0x53   :  { %2503 = vmatpush3.bf16.msra.mxu1 %v2643_v30 }
  0x54   :  { %2504 = vmatprep.subr.bf16.mxu1 %v2644_v31 }
  0x55   :  { %2483 = vmatpush3.bf16.msra.mxu0 %v2659_v47 }
  0x56   :  { %2484 = vmatprep.subr.bf16.mxu0 %v2660_v48 }
  0x57   :  { %2505 = vmatpush3.bf16.msra.mxu1 %v2644_v31  ;;  %v3073_v31 = vld [vmem:[%s3429_s6 + $0x1] ss:$0 sm:$0xff] }
  0x58   :  { %2506 = vmatprep.subr.bf16.mxu1 %v2645_v32 }
  0x59   :  { %2485 = vmatpush3.bf16.msra.mxu0 %v2660_v48 }
  0x5a   :  { %2486 = vmatprep.subr.bf16.mxu0 %v2661_v49 }
  0x5b   :  { %2507 = vmatpush3.bf16.msra.mxu1 %v2645_v32 }
  0x5c   :  { %2508 = vmatprep.subr.bf16.mxu1 %v2646_v33 }
  0x5d   :  { %2487 = vmatpush3.bf16.msra.mxu0 %v2661_v49 }
  0x5e   :  { %2488 = vmatprep.subr.bf16.mxu0 %v2662_v50 }
  0x5f   :  { %2509 = vmatpush3.bf16.msra.mxu1 %v2646_v33 }
  0x60   :  { %2514 = vmatprep.subr.bf16.mxu1 %v2777_v34 }
  0x61   :  { %2489 = vmatpush3.bf16.msra.mxu0 %v2662_v50 }
  0x62   :  { %2511 = vmatmul.mubr.bf16.vlgmr.msra.gmra.mxu1 %v2918_v17  ;;  %2526 = vmatprep.subr.bf16.mxu0 %v2777_v34 }
  0x63   :  { %2516 = vmatprep.mubr.msk.bf16.mxu1 %vm2778_vm0, %v2777_v34 }
  0x64   :  { %2491 = vmatmul.mubr.bf16.vlgmr.msra.gmra.mxu0 %v2918_v17 }
  0x65   :  { %2534 = vmatprep.mubr.msk.bf16.mxu0 %vm2778_vm0, %v2777_v34 }
  0xe2   :  { %v2432_v53 = vpop.f32.mrf.mxu1 }
  0xe3   :  { %v3038_v54 = vadd.f32 %v2432_v53, %v2093_v51  ;;  %v2412_v55 = vpop.f32.mrf.mxu0 }
  0xe4   :  { %v185_v56 = vadd.f32 %v2412_v55, %v2082_v52  ;;  %v296_v57 = vpop.f32.mrf.mxu1 }
  0xe5   :  { %v176_v58 = vpop.f32.mrf.mxu0  ;;  %v297_v1 = vadd.f32 %v2093_v51, %v296_v57 }
  0xe6   :  { %v2433_v59 = vpop.f32.mrf.mxu1  ;;  %v3042_v62 = vmul.f32 0.125, %v185_v56  ;;  %v177_v6 = vadd.f32 %v2082_v52, %v176_v58 }
  0xe7   :  { %v3040_v60 = vadd.f32 %v2433_v59, %v2093_v51  ;;  %v2413_v61 = vpop.f32.mrf.mxu0 }
  0xe8   :  { %v188_v63 = vadd.f32 %v2413_v61, %v2082_v52  ;;  %v299_v0 = vpop.f32.mrf.mxu1  ;;  %v431_v12 = vmul.f32 0.125, %v177_v6 }
  0xe9   :  { %v438_v2 = vpack.c.bf16 %v3040_v60, %v3038_v54  ;;  %v300_v3 = vadd.f32 %v2093_v51, %v299_v0  ;;  %v179_v4 = vpop.f32.mrf.mxu0 }
  0xea   :  { %v3046_v5 = vmul.f32 0.125, %v188_v63  ;;  %v180_v8 = vadd.f32 %v2082_v52, %v179_v4 }
  0xeb   :  { %v437_v7 = vpack.c.bf16 %v300_v3, %v297_v1  ;;  %v2154_v1 = vld [vmem:[%s3427_s5 + $0x1] ss:$0 sm:$0xff] }
  0xec   :  { %v436_v9 = vpack.c.bf16 %v3046_v5, %v3042_v62  ;;  %v432_v13 = vmul.f32 0.125, %v180_v8  ;;  %v3196_v62 = vld [vmem:[%s3430_s7 + $0x20] sm:$0xff]  }
  0xed   :  { %v847_v10 = vsel %vm842_vm1, %v437_v7, 0 }
  0xee   :  { %2515 = vmatpush3.bf16.xpose.msra.mxu1 %v847_v10  ;;  %v435_v14 = vpack.c.bf16 %v432_v13, %v431_v12  ;;  %v3109_v10 = vld [vmem:[%s3430_s7 + $0x18] sm:$0xff]   ;;  %v3114_v12 = vld [vmem:[%s3430_s7 + $0x10] sm:$0xff]  }
  0xef   :  { %2520 = vmatprep.subr.bf16.mxu1 %v2777_v34  ;;  %2527 = vmatpush3.bf16.msra.mxu0 %v3109_v10 }
  0xf0   :  { %2528 = vmatprep.subr.bf16.mxu0 %v2777_v34 }
  0xf3   :  { %2529 = vmatpush3.bf16.msra.mxu0 %v3114_v12 }
  0xf4   :  { %2530 = vmatprep.subr.bf16.mxu0 %v2777_v34 }
  0xf5   :  { %2517 = vmatmul.mubr.msk.bf16.vlgmr.msra.gmra.mxu1 %vm842_vm1, %v435_v14 }
  0xf6   :  { %2522 = vmatprep.mubr.msk.bf16.mxu1 %vm2778_vm0, %v2777_v34 }
 0x102   :  { %v2472_v16 = vpop.f32.mrf.mxu1 }
 0x103   :  { %v565_v18 = vadd.f32 %v2472_v16, %v2128_v15 }
 0x104   :  { %v556_v19 = vpop.f32.mrf.mxu1  ;;  %v2452_v40 = vpop.f32.mrf.mxu0 }
 0x105   :  { %v557_v20 = vadd.f32 %v2128_v15, %v556_v19  ;;  %v3058_v22 = vmul.f32 0.125, %v565_v18  ;;  %v3088_v41 = vadd.f32 %v2452_v40, %v2102_v39 }
 0x106   :  { %v2473_v21 = vpop.f32.mrf.mxu1  ;;  %v416_v42 = vpop.f32.mrf.mxu0 }
 0x107   :  { %v568_v23 = vadd.f32 %v2473_v21, %v2128_v15  ;;  %v3060_v25 = vmul.f32 0.125, %v557_v20  ;;  %v417_v44 = vadd.f32 %v2102_v39, %v416_v42  ;;  %v3138_v42 = vld [vmem:[%s3430_s7 + $0x8] sm:$0xff]  }
 0x108   :  { %v559_v24 = vpop.f32.mrf.mxu1  ;;  %v2453_v43 = vpop.f32.mrf.mxu0  ;;  %2531 = vmatpush3.bf16.msra.mxu0 %v3138_v42 }
 0x109   :  { %v3062_v26 = vmul.f32 0.125, %v568_v23  ;;  %v560_v27 = vadd.f32 %v2128_v15, %v559_v24  ;;  %v3090_v45 = vadd.f32 %v2453_v43, %v2102_v39  ;;  %2532 = vmatprep.subr.bf16.mxu0 %v2777_v34 }
 0x10a   :  { %v419_v46 = vpop.f32.mrf.mxu0 }
 0x10b   :  { %v820_v28 = vpack.c.bf16 %v3062_v26, %v3058_v22  ;;  %v3066_v29 = vmul.f32 0.125, %v560_v27  ;;  %v440_v47 = vpack.c.bf16 %v3090_v45, %v3088_v41  ;;  %v420_v48 = vadd.f32 %v2102_v39, %v419_v46 }
 0x10d   :  { %v819_v30 = vpack.c.bf16 %v3066_v29, %v3060_v25  ;;  %v439_v49 = vpack.c.bf16 %v420_v48, %v417_v44  ;;  %v3145_v25 = vld [vmem:[%s3430_s7] sm:$0xff]  }
 0x10e   :  { %2533 = vmatpush3.bf16.msra.mxu0 %v3145_v25 }
 0x10f   :  { %2521 = vmatpush3.bf16.msra.mxu1 %v439_v49  ;;  %2550 = vmatprep.subr.bf16.mxu0 %v2777_v34 }
 0x110   :  { %2538 = vmatprep.subr.bf16.mxu1 %v2777_v34 }
 0x122   :  { %v2512_v32 = vpop.f32.mrf.mxu1 }
 0x123   :  { %v3076_v33 = vadd.f32 %v2512_v32, %v3073_v31 }
 0x124   :  { %v3078_v35 = vpop.f32.mrf.mxu1  ;;  %v2492_v0 = vpop.f32.mrf.mxu0 }
 0x125   :  { %v3100_v3 = vadd.f32 %v2492_v0, %v2154_v1 }
 0x126   :  { %v2513_v36 = vpop.f32.mrf.mxu1  ;;  %v678_v4 = vpop.f32.mrf.mxu0 }
 0x127   :  { %v3081_v37 = vadd.f32 %v2513_v36, %v3073_v31  ;;  %v679_v16 = vadd.f32 %v2154_v1, %v678_v4  ;;  %v801_v36 = vadd.f32 %v3073_v31, %v3078_v35 }
 0x128   :  { %v803_v50 = vpop.f32.mrf.mxu1  ;;  %v2493_v6 = vpop.f32.mrf.mxu0 }
 0x129   :  { %v824_v38 = vpack.c.bf16 %v3081_v37, %v3076_v33  ;;  %v3102_v7 = vadd.f32 %v2493_v6, %v2154_v1  ;;  %v804_v39 = vadd.f32 %v3073_v31, %v803_v50 }
 0x12a   :  { %v681_v15 = vpop.f32.mrf.mxu0 }
 0x12b   :  { %v822_v8 = vpack.c.bf16 %v3102_v7, %v3100_v3  ;;  %v682_v18 = vadd.f32 %v2154_v1, %v681_v15  ;;  %v823_v40 = vpack.c.bf16 %v804_v39, %v801_v36  ;;  %v3189_v15 = vld [vmem:[%s3430_s7 + $0x28] sm:$0xff]  }
 0x12d   :  { %v821_v21 = vpack.c.bf16 %v682_v18, %v679_v16 }
 0x12f   :  { %v1025_v32 = vsel %vm842_vm1, %v821_v21, 0 }
 0x1b5   :  { %v883_v51 = vpop.f32.mrf.mxu1 }
 0x1b6   :  { %v890_v52 = vmul.f32 1.442695, %v883_v51 }
 0x1b7   :  { %v2518_v53 = vpop.f32.mrf.mxu1 }
 0x1b8   :  { %2713 = vpow2.f32 %v890_v52 }
 0x1b9   :  { %v886_v55 = vpop.f32.mrf.mxu1 }
 0x1ba   :  { %v892_v56 = vmul.f32 1.442695, %v886_v55 }
 0x1bb   :  { %v2519_v57 = vpop.f32.mrf.mxu1 }
 0x1bc   :  { %2715 = vpow2.f32 %v892_v56  ;;  %v3157_v57 = vld [vmem:[%s3430_s7 + $0x38] sm:$0xff]  }
 0x1c5   :  { %v2714_v58 = vpop.eup %2713 }
 0x1c6   :  { %v895_v59 = vsel %vm894_vm2, %v2714_v58, 0.0 }
 0x1c7   :  { %896 = vadd.xlane.f32.xlu0 %v895_v59 }
 0x1c9   :  { %v2716_v61 = vpop.eup %2715 }
 0x1ca   :  { %v898_v63 = vsel %vm894_vm2, %v2716_v61, 0.0 }
 0x1cb   :  { %899 = vadd.xlane.f32.xlu0 %v898_v63 }
 0x250   :  { %v897_v13 = vpop.xlane.xlu0 %896 }
 0x251   :  { %2717 = vrcp.f32 %v897_v13  ;;  %v1202_v13 = vsel %vm842_vm1, %v438_v2, 0 }
 0x254   :  { %v900_v14 = vpop.xlane.xlu0 %899 }
 0x255   :  { %2719 = vrcp.f32 %v900_v14 }
 0x25e   :  { %v2718_v19 = vpop.eup %2717 }
 0x25f   :  { %v903_v23 = vmul.f32 %v2718_v19, %v2714_v58  ;;  %v3163_v58 = vld [vmem:[%s3430_s7 + $0x30] sm:$0xff]  }
 0x262   :  { %v2720_v20 = vpop.eup %2719 }
 0x263   :  { %v904_v24 = vmul.f32 %v2720_v20, %v2716_v61 }
 0x265   :  { %v905_v27 = vpack.c.bf16 %v904_v24, %v903_v23 }
 0x267   :  { %2523 = vmatmul.mubr.msk.bf16.vlgmr.msra.gmra.mxu1 %vm894_vm2, %v905_v27 }
 0x268   :  { %2539 = vmatpush3.bf16.xpose.msra.mxu1 %v1025_v32  ;;  %2540 = vmatprep.mubr.msk.bf16.mxu1 %vm2778_vm0, %v2777_v34 }
 0x269   :  { %2544 = vmatprep.subr.bf16.mxu1 %v2777_v34 }
 0x26f   :  { %2541 = vmatmul.mubr.msk.bf16.vlgmr.msra.gmra.mxu1 %vm842_vm1, %v819_v30 }
 0x270   :  { %2545 = vmatpush3.bf16.msra.mxu1 %v823_v40  ;;  %2546 = vmatprep.mubr.msk.bf16.mxu1 %vm2778_vm0, %v2777_v34 }
 0x271   :  { %2562 = vmatprep.subr.bf16.mxu1 %v2777_v34 }
 0x327   :  { %v943_v29 = vpop.f32.mrf.mxu1 }
 0x329   :  { %v2524_v30 = vpop.f32.mrf.mxu1 }
 0x32b   :  { %v946_v31 = vpop.f32.mrf.mxu1 }
 0x32c   :  { %v950_v35 = vpack.c.bf16 %v946_v31, %v943_v29  ;;  %v3228_v31 = vld [vmem:[%s3431_s8] ss:$0 sm:$0xff] }
 0x32d   :  { %v2525_v43 = vpop.f32.mrf.mxu1 }
 0x32e   :  { %2535 = vmatmul.mubr.msk.bf16.vlgmr.msra.gmra.mxu0 %vm842_vm1, %v950_v35 }
 0x32f   :  { %v1061_v44 = vpop.f32.mrf.mxu1  ;;  %2558 = vmatprep.mubr.msk.bf16.mxu0 %vm2778_vm0, %v2777_v34  ;;  %2551 = vmatpush3.bf16.msra.mxu0 %v3157_v57 }
 0x330   :  { %v1068_v46 = vmul.f32 1.442695, %v1061_v44  ;;  %2552 = vmatprep.subr.bf16.mxu0 %v2777_v34 }
 0x331   :  { %v2542_v48 = vpop.f32.mrf.mxu1 }
 0x332   :  { %2721 = vpow2.f32 %v1068_v46 }
 0x333   :  { %v1064_v49 = vpop.f32.mrf.mxu1  ;;  %2553 = vmatpush3.bf16.msra.mxu0 %v3163_v58 }
 0x334   :  { %v1070_v50 = vmul.f32 1.442695, %v1064_v49  ;;  %2554 = vmatprep.subr.bf16.mxu0 %v2777_v34 }
 0x335   :  { %v2543_v51 = vpop.f32.mrf.mxu1 }
 0x336   :  { %2723 = vpow2.f32 %v1070_v50 }
 0x337   :  { %2555 = vmatpush3.bf16.msra.mxu0 %v3189_v15 }
 0x338   :  { %2556 = vmatprep.subr.bf16.mxu0 %v2777_v34 }
 0x33b   :  { %2557 = vmatpush3.bf16.msra.mxu0 %v3196_v62 }
 0x33c   :  { %2574 = vmatprep.subr.bf16.mxu0 %v2777_v34 }
 0x33f   :  { %v2722_v52 = vpop.eup %2721 }
 0x340   :  { %v1072_v53 = vsel %vm894_vm2, %v2722_v52, 0.0 }
 0x341   :  { %1073 = vadd.xlane.f32.xlu1 %v1072_v53 }
 0x343   :  { %v2724_v55 = vpop.eup %2723 }
 0x344   :  { %v1075_v56 = vsel %vm894_vm2, %v2724_v55, 0.0 }
 0x345   :  { %1076 = vadd.xlane.f32.xlu1 %v1075_v56  ;;  %v55_v56 = vunpack.c.l.bf16 %v2896_v11 }
 0x3ca   :  { %v1074_v59 = vpop.xlane.xlu1 %1073 }
 0x3cb   :  { %2725 = vrcp.f32 %v1074_v59 }
 0x3ce   :  { %v1077_v61 = vpop.xlane.xlu1 %1076 }
 0x3cf   :  { %2727 = vrcp.f32 %v1077_v61 }
 0x3d8   :  { %v2726_v63 = vpop.eup %2725 }
 0x3d9   :  { %v1080_v1 = vmul.f32 %v2726_v63, %v2722_v52 }
 0x3dc   :  { %v2728_v0 = vpop.eup %2727 }
 0x3dd   :  { %v1081_v4 = vmul.f32 %v2728_v0, %v2724_v55 }
 0x3df   :  { %v1082_v6 = vpack.c.bf16 %v1081_v4, %v1080_v1 }
 0x3e1   :  { %2547 = vmatmul.mubr.msk.bf16.vlgmr.msra.gmra.mxu1 %vm894_vm2, %v1082_v6 }
 0x3e2   :  { %2563 = vmatpush3.bf16.xpose.msra.mxu1 %v1202_v13  ;;  %2564 = vmatprep.mubr.msk.bf16.mxu1 %vm2778_vm0, %v2777_v34 }
 0x3e3   :  { %2568 = vmatprep.subr.bf16.mxu1 %v2777_v34 }
 0x3e9   :  { %2565 = vmatmul.mubr.msk.bf16.vlgmr.msra.gmra.mxu1 %vm842_vm1, %v436_v9 }
 0x3ea   :  { %2569 = vmatpush3.bf16.msra.mxu1 %v440_v47  ;;  %2570 = vmatprep.mubr.msk.bf16.mxu1 %vm2778_vm0, %v2777_v34 }
 0x3eb   :  { %2586 = vmatprep.subr.bf16.mxu1 %v2777_v34 }
 0x3ee   :  { %v1012_v54 = vpop.f32.mrf.mxu0 }
 0x3ef   :  { %v1019_v3 = vadd.f32 %v3228_v31, %v1012_v54 }
 0x3f0   :  { %v2536_v60 = vpop.f32.mrf.mxu0 }
 0x3f2   :  { %v1015_v2 = vpop.f32.mrf.mxu0 }
 0x3f3   :  { %v1020_v22 = vadd.f32 %v3228_v31, %v1015_v2 }
 0x3f4   :  { %v2537_v14 = vpop.f32.mrf.mxu0 }
 0x4a1   :  { %v1120_v5 = vpop.f32.mrf.mxu1 }
 0x4a3   :  { %v2548_v9 = vpop.f32.mrf.mxu1 }
 0x4a5   :  { %v1123_v41 = vpop.f32.mrf.mxu1 }
 0x4a6   :  { %v1127_v45 = vpack.c.bf16 %v1123_v41, %v1120_v5 }
 0x4a7   :  { %v2549_v47 = vpop.f32.mrf.mxu1 }
 0x4a8   :  { %2559 = vmatmul.mubr.msk.bf16.vlgmr.msra.gmra.mxu0 %vm842_vm1, %v1127_v45 }
 0x4a9   :  { %v1238_v16 = vpop.f32.mrf.mxu1  ;;  %2575 = vmatpush3.bf16.msra.mxu0 %v3109_v10  ;;  %2582 = vmatprep.mubr.msk.bf16.mxu0 %vm2778_vm0, %v2777_v34 }
 0x4aa   :  { %v1245_v18 = vmul.f32 1.442695, %v1238_v16  ;;  %2576 = vmatprep.subr.bf16.mxu0 %v2777_v34 }
 0x4ab   :  { %v2566_v19 = vpop.f32.mrf.mxu1 }
 0x4ac   :  { %2729 = vpow2.f32 %v1245_v18  ;;  %v57_v19 = vunpack.c.l.bf16 %v2918_v17 }
 0x4ad   :  { %v1241_v20 = vpop.f32.mrf.mxu1  ;;  %2577 = vmatpush3.bf16.msra.mxu0 %v3114_v12 }
 0x4ae   :  { %v1247_v21 = vmul.f32 1.442695, %v1241_v20  ;;  %2578 = vmatprep.subr.bf16.mxu0 %v2777_v34 }
 0x4af   :  { %v2567_v23 = vpop.f32.mrf.mxu1 }
 0x4b0   :  { %2731 = vpow2.f32 %v1247_v21 }
 0x4b1   :  { %2579 = vmatpush3.bf16.msra.mxu0 %v3138_v42 }
 0x4b2   :  { %2580 = vmatprep.subr.bf16.mxu0 %v2777_v34 }
 0x4b5   :  { %2581 = vmatpush3.bf16.msra.mxu0 %v3145_v25  ;;  %v1355_v25 = vsel %vm842_vm1, %v822_v8, 0 }
 0x4b6   :  { %2598 = vmatprep.subr.bf16.mxu0 %v2777_v34 }
 0x4b9   :  { %v2730_v10 = vpop.eup %2729 }
 0x4ba   :  { %v1249_v24 = vsel %vm894_vm2, %v2730_v10, 0.0 }
 0x4bb   :  { %1250 = vadd.xlane.f32.xlu0 %v1249_v24 }
 0x4bd   :  { %v2732_v27 = vpop.eup %2731 }
 0x4be   :  { %v1252_v12 = vsel %vm894_vm2, %v2732_v27, 0.0 }
 0x4bf   :  { %1253 = vadd.xlane.f32.xlu1 %v1252_v12 }
 0x544   :  { %v1251_v32 = vpop.xlane.xlu0 %1250 }
 0x545   :  { %2733 = vrcp.f32 %v1251_v32 }
 0x548   :  { %v1254_v36 = vpop.xlane.xlu1 %1253 }
 0x549   :  { %2735 = vrcp.f32 %v1254_v36  ;;  %v58_v36 = vunpack.c.h.bf16 %v2918_v17  ;;  %v2673_v17 = vld [vmem:[%s3432_s10 + $0x74] ss:$8 sps:$4 sm:$0xff]  }
 0x552   :  { %v2734_v39 = vpop.eup %2733 }
 0x553   :  { %v1257_v42 = vmul.f32 %v2734_v39, %v2730_v10 }
 0x556   :  { %v2736_v40 = vpop.eup %2735 }
 0x557   :  { %v1258_v29 = vmul.f32 %v2736_v40, %v2732_v27 }
 0x559   :  { %v1259_v30 = vpack.c.bf16 %v1258_v29, %v1257_v42 }
 0x55b   :  { %2571 = vmatmul.mubr.msk.bf16.vlgmr.msra.gmra.mxu1 %vm894_vm2, %v1259_v30 }
 0x55c   :  { %2587 = vmatpush3.bf16.xpose.msra.mxu1 %v1355_v25  ;;  %2588 = vmatprep.mubr.msk.bf16.mxu1 %vm2778_vm0, %v2777_v34 }
 0x55d   :  { %2592 = vmatprep.subr.bf16.mxu1 %v2777_v34 }
 0x563   :  { %2589 = vmatmul.mubr.msk.bf16.vlgmr.msra.gmra.mxu1 %vm842_vm1, %v820_v28 }
 0x564   :  { %2593 = vmatpush3.bf16.msra.mxu1 %v824_v38  ;;  %2594 = vmatprep.mubr.msk.bf16.mxu1 %vm2778_vm0, %v2777_v34 }
 0x565   :  { %1680 = vmatprep.subr.bf16.mxu1 %v2673_v17 }
 0x568   :  { %v1189_v7 = vpop.f32.mrf.mxu0 }
 0x569   :  { %v1196_v8 = vadd.f32 %v1189_v7, %v1019_v3  ;;  %v2676_v7 = vld [vmem:[%s3432_s10 + $0x64] ss:$8 sps:$4 sm:$0xff]  }
 0x56a   :  { %v2560_v35 = vpop.f32.mrf.mxu0 }
 0x56b   :  { %v1504_v61 = vadd.f32 %v1196_v8, %v55_v56  ;;  %v2674_v8 = vld [vmem:[%s3432_s10 + $0x60] ss:$8 sps:$4 sm:$0xff]   ;;  %v2679_v35 = vld [vmem:[%s3432_s10 + $0x54] ss:$8 sps:$4 sm:$0xff]  }
 0x56c   :  { %v1192_v26 = vpop.f32.mrf.mxu0 }
 0x56d   :  { %v1197_v28 = vadd.f32 %v1192_v26, %v1020_v22  ;;  %v2677_v22 = vld [vmem:[%s3432_s10 + $0x50] ss:$8 sps:$4 sm:$0xff]   ;;  %v2680_v26 = vld [vmem:[%s3432_s10 + $0x40] ss:$8 sps:$4 sm:$0xff]  }
 0x56e   :  { %v2561_v43 = vpop.f32.mrf.mxu0 }
 0x56f   :  { %v2685_v43 = vld [vmem:[%s3432_s10 + $0x34] ss:$8 sps:$4 sm:$0xff]  }
 0x61b   :  { %v1297_v44 = vpop.f32.mrf.mxu1 }
 0x61d   :  { %v2572_v46 = vpop.f32.mrf.mxu1 }
 0x61e   :  { %v2779_v46 = vmov 0  }
 0x61f   :  { %v1300_v48 = vpop.f32.mrf.mxu1 }
 0x620   :  { %v1304_v49 = vpack.c.bf16 %v1300_v48, %v1297_v44  ;;  %v2683_v44 = vld [vmem:[%s3432_s10 + $0x30] ss:$8 sps:$4 sm:$0xff]   ;;  %v2688_v48 = vld [vmem:[%s3432_s10 + $0x24] ss:$8 sps:$4 sm:$0xff]  }
 0x621   :  { %v2573_v50 = vpop.f32.mrf.mxu1 }
 0x622   :  { %2583 = vmatmul.mubr.msk.bf16.vlgmr.msra.gmra.mxu0 %vm842_vm1, %v1304_v49  ;;  %v2686_v49 = vld [vmem:[%s3432_s10 + $0x20] ss:$8 sps:$4 sm:$0xff]   ;;  %v2691_v50 = vld [vmem:[%s3432_s10 + $0x14] ss:$8 sps:$4 sm:$0xff]  }
 0x623   :  { %v1391_v33 = vpop.f32.mrf.mxu1  ;;  %2599 = vmatpush3.bf16.msra.mxu0 %v3157_v57  ;;  %2606 = vmatprep.mubr.msk.bf16.mxu0 %vm2778_vm0, %v2777_v34 }
 0x624   :  { %v1398_v37 = vmul.f32 1.442695, %v1391_v33  ;;  %2600 = vmatprep.subr.bf16.mxu0 %v2777_v34  ;;  %v2689_v33 = vld [vmem:[%s3432_s10 + $0x10] ss:$8 sps:$4 sm:$0xff]  }
 0x625   :  { %v2590_v38 = vpop.f32.mrf.mxu1 }
 0x626   :  { %2737 = vpow2.f32 %v1398_v37  ;;  %v2694_v37 = vld [vmem:[%s3432_s10 + $0x4] ss:$8 sps:$4 sm:$0xff]   ;;  %v2692_v38 = vld [vmem:[%s3432_s10] ss:$8 sps:$4 sm:$0xff]  }
 0x627   :  { %v1394_v51 = vpop.f32.mrf.mxu1  ;;  %2601 = vmatpush3.bf16.msra.mxu0 %v3163_v58  ;;  %v56_v58 = vunpack.c.h.bf16 %v2896_v11 }
 0x628   :  { %v1400_v52 = vmul.f32 1.442695, %v1394_v51  ;;  %2602 = vmatprep.subr.bf16.mxu0 %v2777_v34 }
 0x629   :  { %v2591_v53 = vpop.f32.mrf.mxu1  ;;  %v1505_v0 = vadd.f32 %v1197_v28, %v56_v58  ;;  %v2682_v28 = vld [vmem:[%s3432_s10 + $0x44] ss:$8 sps:$4 sm:$0xff]  }
 0x62a   :  { %2739 = vpow2.f32 %v1400_v52 }
 0x62b   :  { %2603 = vmatpush3.bf16.msra.mxu0 %v3189_v15 }
 0x62c   :  { %2604 = vmatprep.subr.bf16.mxu0 %v2777_v34 }
 0x62f   :  { %2605 = vmatpush3.bf16.msra.mxu0 %v3196_v62 }
 0x633   :  { %v2738_v55 = vpop.eup %2737 }
 0x634   :  { %v1402_v57 = vsel %vm894_vm2, %v2738_v55, 0.0 }
 0x635   :  { %1403 = vadd.xlane.f32.xlu0 %v1402_v57 }
 0x637   :  { %v2740_v59 = vpop.eup %2739 }
 0x638   :  { %v1405_v63 = vsel %vm894_vm2, %v2740_v59, 0.0 }
 0x639   :  { %1406 = vadd.xlane.f32.xlu1 %v1405_v63  ;;  %1509 = vadd.xlane.f32.xlu0 %v1504_v61 }
 0x63d   :  { %1511 = vadd.xlane.f32.xlu1 %v1505_v0 }
 0x6be   :  { %v1404_v1 = vpop.xlane.xlu0 %1403 }
 0x6bf   :  { %2741 = vrcp.f32 %v1404_v1 }
 0x6c2   :  { %v1407_v34 = vpop.xlane.xlu1 %1406  ;;  %v1510_v47 = vpop.xlane.xlu0 %1509 }
 0x6c3   :  { %2743 = vrcp.f32 %v1407_v34  ;;  %v1518_v16 = vmul.f32 0.0078125, %v1510_v47 }
 0x6c5   :  { %v3255_v10 = vsub.f32 %v1504_v61, %v1518_v16 }
 0x6c6   :  { %v1512_v20 = vpop.xlane.xlu1 %1511 }
 0x6c7   :  { %v1519_v27 = vmul.f32 0.0078125, %v1512_v20  ;;  %v1526_v25 = vmul.f32 %v3255_v10, %v3255_v10  ;;  %v2696_v20 = vld [vmem:[%s3434_s12 + $0x38] sm:$0xff]  }
 0x6c9   :  { %v3259_v29 = vsub.f32 %v1505_v0, %v1519_v27  ;;  %v2701_v27 = vld [vmem:[%s3434_s12 + $0x60] sm:$0xff]  }
 0x6cb   :  { %v1527_v3 = vmul.f32 %v3259_v29, %v3259_v29 }
 0x6cc   :  { %v2742_v4 = vpop.eup %2741 }
 0x6cd   :  { %v1410_v13 = vmul.f32 %v2742_v4, %v2738_v55 }
 0x6d0   :  { %v2744_v6 = vpop.eup %2743 }
 0x6d1   :  { %v1411_v54 = vmul.f32 %v2744_v6, %v2740_v59  ;;  %v1554_v6 = vlaneseq }
 0x6d3   :  { %v1412_v60 = vpack.c.bf16 %v1411_v54, %v1410_v13  ;;  %v1555_v13 = vshrl.u32 %v1554_v6, 7 }
 0x6d5   :  { %2595 = vmatmul.mubr.msk.bf16.vlgmr.msra.gmra.mxu1 %vm894_vm2, %v1412_v60  ;;  %v3321_v54 = vsub.s32 0, %v1555_v13  ;;  %v1508_v60 = vld [vmem:[%s3433_s9] sm:$0x3] }
 0x6d6   :  { %1712 = vmatprep.mubr.bf16.mxu1 %v2779_v46 }
 0x6e2   :  { %v1342_v2 = vpop.f32.mrf.mxu0 }
 0x6e3   :  { %v1349_v18 = vadd.f32 %v3228_v31, %v1342_v2 }
 0x6e4   :  { %v2584_v14 = vpop.f32.mrf.mxu0 }
 0x6e6   :  { %v1345_v11 = vpop.f32.mrf.mxu0 }
 0x6e7   :  { %v1350_v12 = vadd.f32 %v3228_v31, %v1345_v11  ;;  %v2671_v31 = vld [vmem:[%s3432_s10 + $0x70] ss:$8 sps:$4 sm:$0xff]   ;;  %v1557_v11 = vrot.slane %v1508_v60, %v3321_v54 }
 0x6e8   :  { %v2585_v15 = vpop.f32.mrf.mxu0  ;;  %1681 = vmatpush1.bf16.msra.mxu1 %v2671_v31 }
 0x6e9   :  { %1682 = vmatprep.subr.bf16.mxu1 %v2676_v7  ;;  %v3328_v15 = vsub.s32 1, %v1555_v13 }
 0x6ec   :  { %1683 = vmatpush1.bf16.msra.mxu1 %v2674_v8 }
 0x6ed   :  { %1684 = vmatprep.subr.bf16.mxu1 %v2679_v35 }
 0x6f0   :  { %1685 = vmatpush1.bf16.msra.mxu1 %v2677_v22 }
 0x6f1   :  { %1686 = vmatprep.subr.bf16.mxu1 %v2682_v28 }
 0x6f4   :  { %1687 = vmatpush1.bf16.msra.mxu1 %v2680_v26 }
 0x6f5   :  { %1688 = vmatprep.subr.bf16.mxu1 %v2685_v43 }
 0x6f8   :  { %1689 = vmatpush1.bf16.msra.mxu1 %v2683_v44 }
 0x6f9   :  { %1690 = vmatprep.subr.bf16.mxu1 %v2688_v48 }
 0x6fc   :  { %1691 = vmatpush1.bf16.msra.mxu1 %v2686_v49 }
 0x6fd   :  { %1692 = vmatprep.subr.bf16.mxu1 %v2691_v50 }
 0x700   :  { %1693 = vmatpush1.bf16.msra.mxu1 %v2689_v33  ;;  %v1588_v33 = vld [vmem:[%s3435_s11] sm:$0x3] }
 0x701   :  { %1694 = vmatprep.subr.bf16.mxu1 %v2694_v37  ;;  %v1593_v37 = vrot.slane %v1588_v33, %v3321_v54 }
 0x704   :  { %1695 = vmatpush1.bf16.msra.mxu1 %v2692_v38  ;;  %v3399_v38 = vrot.slane %v1588_v33, %v3328_v15 }
 0x795   :  { %v1450_v62 = vpop.f32.mrf.mxu1 }
 0x797   :  { %v2596_v5 = vpop.f32.mrf.mxu1 }
 0x799   :  { %v1453_v9 = vpop.f32.mrf.mxu1 }
 0x79a   :  { %v1457_v41 = vpack.c.bf16 %v1453_v9, %v1450_v62 }
 0x79b   :  { %v2597_v45 = vpop.f32.mrf.mxu1 }
 0x79c   :  { %2607 = vmatmul.mubr.msk.bf16.vlgmr.msra.gmra.mxu0 %vm842_vm1, %v1457_v41  ;;  %v1565_v41 = vrot.slane %v1508_v60, %v3328_v15 }
 0x85c   :  { %v1495_v21 = vpop.f32.mrf.mxu0 }
 0x85d   :  { %v1502_v23 = vadd.f32 %v1495_v21, %v1349_v18  ;;  %v2697_v21 = vld [vmem:[%s3434_s12 + $0x70] sm:$0xff]  }
 0x85e   :  { %v2608_v24 = vpop.f32.mrf.mxu0 }
 0x85f   :  { %v1506_v32 = vadd.f32 %v1502_v23, %v57_v19  ;;  %v2695_v19 = vld [vmem:[%s3434_s12 + $0x78] sm:$0xff]   ;;  %v2698_v23 = vld [vmem:[%s3434_s12 + $0x30] sm:$0xff]   ;;  %v2700_v24 = vld [vmem:[%s3434_s12 + $0x28] sm:$0xff]  }
 0x860   :  { %v1498_v39 = vpop.f32.mrf.mxu0  ;;  %2366 = vmatprep.subr.bf16.mxu0 %v2695_v19 }
 0x861   :  { %v1503_v40 = vadd.f32 %v1498_v39, %v1350_v12  ;;  %1513 = vadd.xlane.f32.xlu0 %v1506_v32  ;;  %2367 = vmatpush3.bf16.msra.mxu0 %v2696_v20  ;;  %v2702_v12 = vld [vmem:[%s3434_s12 + $0x20] sm:$0xff]   ;;  %v2705_v39 = vld [vmem:[%s3434_s12 + $0x50] sm:$0xff]  }
 0x862   :  { %v2609_v42 = vpop.f32.mrf.mxu0  ;;  %2368 = vmatprep.subr.bf16.mxu0 %v2697_v21 }
 0x863   :  { %v1507_v30 = vadd.f32 %v1503_v40, %v58_v36  ;;  %v2704_v36 = vld [vmem:[%s3434_s12 + $0x18] sm:$0xff]   ;;  %v2706_v40 = vld [vmem:[%s3434_s12 + $0x10] sm:$0xff]   ;;  %v2707_v42 = vld [vmem:[%s3434_s12 + $0x48] sm:$0xff]  }
 0x865   :  { %1515 = vadd.xlane.f32.xlu1 %v1507_v30  ;;  %1530 = vadd.xlane.f32.xlu0 %v1526_v25  ;;  %v2710_v25 = vld [vmem:[%s3434_s12] sm:$0xff]  }
 0x866   :  { %2369 = vmatpush3.bf16.msra.mxu0 %v2698_v23 }
 0x869   :  { %1532 = vadd.xlane.f32.xlu1 %v1527_v3 }
 0x8ea   :  { %v1514_v51 = vpop.xlane.xlu0 %1513 }
 0x8eb   :  { %v1520_v52 = vmul.f32 0.0078125, %v1514_v51 }
 0x8ed   :  { %v3313_v53 = vsub.f32 %v1506_v32, %v1520_v52  ;;  %v2703_v32 = vld [vmem:[%s3434_s12 + $0x58] sm:$0xff]  }
 0x8ee   :  { %v1516_v55 = vpop.xlane.xlu1 %1515  ;;  %v1531_v56 = vpop.xlane.xlu0 %1530 }
 0x8ef   :  { %v1521_v57 = vmul.f32 0.0078125, %v1516_v55  ;;  %v1538_v59 = vmul.f32 0.0078125, %v1531_v56  ;;  %v1528_v61 = vmul.f32 %v3313_v53, %v3313_v53 }
 0x8f1   :  { %v3317_v58 = vsub.f32 %v1507_v30, %v1521_v57  ;;  %v1542_v63 = vadd.f32 1e-05, %v1538_v59  ;;  %1534 = vadd.xlane.f32.xlu0 %v1528_v61  ;;  %v2709_v30 = vld [vmem:[%s3434_s12 + $0x40] sm:$0xff]  }
 0x8f2   :  { %v1533_v0 = vpop.xlane.xlu1 %1532 }
 0x8f3   :  { %2745 = vrsqrt.f32 %v1542_v63  ;;  %v1539_v1 = vmul.f32 0.0078125, %v1533_v0  ;;  %v1529_v34 = vmul.f32 %v3317_v58, %v3317_v58 }
 0x8f5   :  { %v1543_v4 = vadd.f32 1e-05, %v1539_v1  ;;  %1536 = vadd.xlane.f32.xlu1 %v1529_v34 }
 0x8f7   :  { %2747 = vrsqrt.f32 %v1543_v4 }
 0x900   :  { %v2746_v2 = vpop.eup %2745 }
 0x901   :  { %v1550_v14 = vmul.f32 %v2746_v2, %v3255_v10  ;;  %v2699_v10 = vld [vmem:[%s3434_s12 + $0x68] sm:$0xff]  }
 0x902   :  { %2370 = vmatprep.subr.bf16.mxu0 %v2699_v10 }
 0x903   :  { %v1558_v9 = vmul.f32 %v1557_v11, %v1550_v14  ;;  %2371 = vmatpush3.bf16.msra.mxu0 %v2700_v24 }
 0x904   :  { %v2748_v62 = vpop.eup %2747  ;;  %2372 = vmatprep.subr.bf16.mxu0 %v2701_v27 }
 0x905   :  { %v1551_v5 = vmul.f32 %v2748_v62, %v3259_v29  ;;  %v3332_v47 = vadd.f32 %v1565_v41, %v1558_v9  ;;  %v2708_v29 = vld [vmem:[%s3434_s12 + $0x8] sm:$0xff]  }
 0x907   :  { %v1559_v45 = vmul.f32 %v1557_v11, %v1551_v5  ;;  %2373 = vmatpush3.bf16.msra.mxu0 %v2702_v12 }
 0x908   :  { %2374 = vmatprep.subr.bf16.mxu0 %v2703_v32 }
 0x909   :  { %v3334_v16 = vadd.f32 %v1565_v41, %v1559_v45 }
 0x90b   :  { %v1570_v18 = vpack.c.bf16 %v3334_v16, %v3332_v47  ;;  %2375 = vmatpush3.bf16.msra.mxu0 %v2704_v36 }
 0x90c   :  { %2376 = vmatprep.subr.bf16.mxu0 %v2705_v39 }
 0x90d   :  { %1713 = vmatmul.mubr.bf16.vlgmr.msra.gmra.mxu1 %v1570_v18 }
 0x90e   :  { %1722 = vmatprep.mubr.bf16.mxu1 %v2779_v46 }
 0x90f   :  { %2377 = vmatpush3.bf16.msra.mxu0 %v2706_v40 }
 0x910   :  { %2378 = vmatprep.subr.bf16.mxu0 %v2707_v42 }
 0x913   :  { %2379 = vmatpush3.bf16.msra.mxu0 %v2708_v29 }
 0x914   :  { %2380 = vmatprep.subr.bf16.mxu0 %v2709_v30 }
 0x917   :  { %2381 = vmatpush3.bf16.msra.mxu0 %v2710_v25 }
 0x97a   :  { %v1535_v3 = vpop.xlane.xlu0 %1534 }
 0x97b   :  { %v1540_v17 = vmul.f32 0.0078125, %v1535_v3 }
 0x97d   :  { %v1544_v31 = vadd.f32 1e-05, %v1540_v17 }
 0x97e   :  { %v1537_v7 = vpop.xlane.xlu1 %1536 }
 0x97f   :  { %2749 = vrsqrt.f32 %v1544_v31  ;;  %v1541_v8 = vmul.f32 0.0078125, %v1537_v7 }
 0x981   :  { %v1545_v35 = vadd.f32 1e-05, %v1541_v8 }
 0x983   :  { %2751 = vrsqrt.f32 %v1545_v35 }
 0x98c   :  { %v2750_v22 = vpop.eup %2749 }
 0x98d   :  { %v1552_v26 = vmul.f32 %v2750_v22, %v3313_v53 }
 0x98f   :  { %v1560_v44 = vmul.f32 %v1557_v11, %v1552_v26 }
 0x990   :  { %v2752_v28 = vpop.eup %2751 }
 0x991   :  { %v1553_v43 = vmul.f32 %v2752_v28, %v3317_v58  ;;  %v3388_v48 = vadd.f32 %v1565_v41, %v1560_v44 }
 0x993   :  { %v1561_v46 = vmul.f32 %v1557_v11, %v1553_v43 }
 0x995   :  { %v3390_v49 = vadd.f32 %v1565_v41, %v1561_v46 }
 0x997   :  { %v1571_v50 = vpack.c.bf16 %v3390_v49, %v3388_v48 }
 0x999   :  { %1723 = vmatmul.mubr.bf16.gmra.mxu1 %v1571_v50 }
 0x9cd   :  { %v1714_v51 = vpop.f32.mrf.mxu1 }
 0x9ce   :  { %v1715_v52 = vadd.f32 %v1714_v51, %v1593_v37 }
 0x9cf   :  { %v1716_v53 = vpop.f32.mrf.mxu1 }
 0x9d0   :  { %v1741_v55 = vmul.f32 0.044715, %v1715_v52  ;;  %v1717_v56 = vadd.f32 %v1716_v53, %v3399_v38  ;;  %v1733_v29 = vmul.f32 0.5, %v1715_v52 }
 0x9d1   :  { %v1718_v57 = vpop.f32.mrf.mxu1 }
 0x9d2   :  { %v1749_v59 = vmul.f32 %v1741_v55, %v1715_v52  ;;  %v1742_v61 = vmul.f32 0.044715, %v1717_v56  ;;  %v1719_v58 = vadd.f32 %v1718_v57, %v1593_v37  ;;  %v1734_v39 = vmul.f32 0.5, %v1717_v56 }
 0x9d3   :  { %v1720_v63 = vpop.f32.mrf.mxu1 }
 0x9d4   :  { %v1757_v0 = vmul.f32 %v1749_v59, %v1715_v52  ;;  %v1750_v1 = vmul.f32 %v1742_v61, %v1717_v56  ;;  %v1743_v34 = vmul.f32 0.044715, %v1719_v58  ;;  %v1721_v4 = vadd.f32 %v1720_v63, %v3399_v38 }
 0x9d5   :  { %v1735_v32 = vmul.f32 0.5, %v1719_v58 }
 0x9d6   :  { %v1765_v6 = vadd.f32 %v1757_v0, %v1715_v52  ;;  %v1758_v13 = vmul.f32 %v1750_v1, %v1717_v56  ;;  %v1751_v60 = vmul.f32 %v1743_v34, %v1719_v58  ;;  %v1744_v2 = vmul.f32 0.044715, %v1721_v4 }
 0x9d7   :  { %v1736_v40 = vmul.f32 0.5, %v1721_v4 }
 0x9d8   :  { %v1759_v14 = vmul.f32 %v1751_v60, %v1719_v58  ;;  %v1752_v11 = vmul.f32 %v1744_v2, %v1721_v4  ;;  %v1766_v62 = vadd.f32 %v1758_v13, %v1717_v56  ;;  %v1773_v5 = vmul.f32 0.7978846, %v1765_v6 }
 0x9da   :  { %v1767_v9 = vadd.f32 %v1759_v14, %v1719_v58  ;;  %v1760_v41 = vmul.f32 %v1752_v11, %v1721_v4  ;;  %v1774_v45 = vmul.f32 0.7978846, %v1766_v62 }
 0x9dc   :  { %v1775_v18 = vmul.f32 0.7978846, %v1767_v9  ;;  %v1768_v19 = vadd.f32 %v1760_v41, %v1721_v4  ;;  %2753 = vtanh.f32 %v1774_v45 }
 0x9dd   :  { %2755 = vtanh.f32 %v1773_v5 }
 0x9de   :  { %2757 = vtanh.f32 %v1775_v18  ;;  %v1776_v20 = vmul.f32 0.7978846, %v1768_v19 }
 0x9e0   :  { %2759 = vtanh.f32 %v1776_v20 }
 0x9e9   :  { %v2754_v21 = vpop.eup %2753 }
 0x9ea   :  { %v2756_v23 = vpop.eup %2755  ;;  %v1790_v24 = vadd.f32 1.0, %v2754_v21 }
 0x9eb   :  { %v2758_v10 = vpop.eup %2757  ;;  %v1789_v36 = vadd.f32 1.0, %v2756_v23 }
 0x9ec   :  { %v1791_v27 = vadd.f32 1.0, %v2758_v10  ;;  %v1798_v25 = vmul.f32 %v1790_v24, %v1734_v39 }
 0x9ed   :  { %v2760_v12 = vpop.eup %2759  ;;  %v1797_v17 = vmul.f32 %v1789_v36, %v1733_v29  ;;  %v2234_v36 = vld [vmem:[%s3436_s13] ss:$0 sm:$0xff] }
 0x9ee   :  { %v1792_v42 = vadd.f32 1.0, %v2760_v12  ;;  %v1799_v30 = vmul.f32 %v1791_v27, %v1735_v32 }
 0x9f0   :  { %v1800_v3 = vmul.f32 %v1792_v42, %v1736_v40  ;;  %v1805_v7 = vpack.c.bf16 %v1799_v30, %v1797_v17 }
 0x9f2   :  { %v1806_v31 = vpack.c.bf16 %v1800_v3, %v1798_v25 }
 0x9f4   :  { %1976 = vmatprep.mubr.bf16.mxu0 %v1806_v31 }
 0x9f5   :  { %1977 = vmatmul.mubr.bf16.vlgmr.msra.gmra.mxu0 %v1805_v7 }
 0xa59   :  { %v1724_v8 = vpop.f32.mrf.mxu1 }
 0xa5a   :  { %v1725_v35 = vadd.f32 %v1724_v8, %v1593_v37 }
 0xa5b   :  { %v1726_v22 = vpop.f32.mrf.mxu1 }
 0xa5c   :  { %v1745_v26 = vmul.f32 0.044715, %v1725_v35  ;;  %v1727_v28 = vadd.f32 %v1726_v22, %v3399_v38  ;;  %v1737_v20 = vmul.f32 0.5, %v1725_v35 }
 0xa5d   :  { %v1728_v43 = vpop.f32.mrf.mxu1 }
 0xa5e   :  { %v1753_v44 = vmul.f32 %v1745_v26, %v1725_v35  ;;  %v1746_v46 = vmul.f32 0.044715, %v1727_v28  ;;  %v1729_v50 = vadd.f32 %v1728_v43, %v1593_v37  ;;  %v1738_v45 = vmul.f32 0.5, %v1727_v28 }
 0xa5f   :  { %v1730_v33 = vpop.f32.mrf.mxu1 }
 0xa60   :  { %v1761_v51 = vmul.f32 %v1753_v44, %v1725_v35  ;;  %v1754_v52 = vmul.f32 %v1746_v46, %v1727_v28  ;;  %v1747_v53 = vmul.f32 0.044715, %v1729_v50  ;;  %v1731_v55 = vadd.f32 %v1730_v33, %v3399_v38 }
 0xa61   :  { %v1739_v9 = vmul.f32 0.5, %v1729_v50 }
 0xa62   :  { %v1762_v56 = vmul.f32 %v1754_v52, %v1727_v28  ;;  %v1755_v57 = vmul.f32 %v1747_v53, %v1729_v50  ;;  %v1748_v59 = vmul.f32 0.044715, %v1731_v55  ;;  %v1769_v61 = vadd.f32 %v1761_v51, %v1725_v35 }
 0xa63   :  { %v1740_v18 = vmul.f32 0.5, %v1731_v55 }
 0xa64   :  { %v1763_v58 = vmul.f32 %v1755_v57, %v1729_v50  ;;  %v1756_v63 = vmul.f32 %v1748_v59, %v1731_v55  ;;  %v1770_v0 = vadd.f32 %v1762_v56, %v1727_v28  ;;  %v1777_v1 = vmul.f32 0.7978846, %v1769_v61 }
 0xa66   :  { %v1764_v34 = vmul.f32 %v1756_v63, %v1731_v55  ;;  %v1778_v4 = vmul.f32 0.7978846, %v1770_v0  ;;  %v1771_v6 = vadd.f32 %v1763_v58, %v1729_v50 }
 0xa68   :  { %v1772_v13 = vadd.f32 %v1764_v34, %v1731_v55  ;;  %2761 = vtanh.f32 %v1778_v4  ;;  %v1779_v37 = vmul.f32 0.7978846, %v1771_v6 }
 0xa69   :  { %2763 = vtanh.f32 %v1777_v1 }
 0xa6a   :  { %v1780_v60 = vmul.f32 0.7978846, %v1772_v13  ;;  %2765 = vtanh.f32 %v1779_v37 }
 0xa6c   :  { %2767 = vtanh.f32 %v1780_v60  ;;  %v1997_v60 = vld [vmem:[%s3437_s14] sm:$0x3] }
 0xa75   :  { %v2762_v2 = vpop.eup %2761 }
 0xa76   :  { %v2764_v38 = vpop.eup %2763  ;;  %v1794_v11 = vadd.f32 1.0, %v2762_v2 }
 0xa77   :  { %v2766_v14 = vpop.eup %2765  ;;  %v1793_v41 = vadd.f32 1.0, %v2764_v38  ;;  %v2045_v38 = vrot.slane %v1997_v60, %v3321_v54 }
 0xa78   :  { %v1795_v62 = vadd.f32 1.0, %v2766_v14  ;;  %v1802_v23 = vmul.f32 %v1794_v11, %v1738_v45 }
 0xa79   :  { %v2768_v5 = vpop.eup %2767  ;;  %v1801_v24 = vmul.f32 %v1793_v41, %v1737_v20 }
 0xa7a   :  { %v1796_v19 = vadd.f32 1.0, %v2768_v5  ;;  %v1803_v21 = vmul.f32 %v1795_v62, %v1739_v9  ;;  %v2053_v62 = vrot.slane %v1997_v60, %v3328_v15 }
 0xa7c   :  { %v1804_v10 = vmul.f32 %v1796_v19, %v1740_v18  ;;  %v1807_v12 = vpack.c.bf16 %v1803_v21, %v1801_v24 }
 0xa7e   :  { %v1808_v27 = vpack.c.bf16 %v1804_v10, %v1802_v23 }
 0xa80   :  { %1984 = vmatprep.mubr.bf16.mxu0 %v1808_v27 }
 0xa81   :  { %1985 = vmatmul.mubr.bf16.gmra.mxu0 %v1807_v12 }
 0xab5   :  { %v2382_v32 = vpop.f32.mrf.mxu0 }
 0xab7   :  { %v2383_v39 = vpop.f32.mrf.mxu0 }
 0xab8   :  { %v2384_v40 = vadd.f32 %v2383_v39, %v2382_v32 }
 0xab9   :  { %v2385_v42 = vpop.f32.mrf.mxu0 }
 0xaba   :  { %v1979_v29 = vadd.f32 %v2384_v40, %v2234_v36 }
 0xabb   :  { %v2386_v30 = vpop.f32.mrf.mxu0 }
 0xabc   :  { %v2387_v25 = vadd.f32 %v2386_v30, %v2385_v42  ;;  %v1993_v3 = vadd.f32 %v1979_v29, %v3332_v47 }
 0xabe   :  { %v1982_v17 = vadd.f32 %v2387_v25, %v2234_v36  ;;  %1998 = vadd.xlane.f32.xlu0 %v1993_v3 }
 0xac0   :  { %v1994_v31 = vadd.f32 %v1982_v17, %v3334_v16 }
 0xac2   :  { %2000 = vadd.xlane.f32.xlu1 %v1994_v31 }
 0xb41   :  { %v2388_v7 = vpop.f32.mrf.mxu0 }
 0xb43   :  { %v2389_v8 = vpop.f32.mrf.mxu0 }
 0xb44   :  { %v2390_v35 = vadd.f32 %v2389_v8, %v2388_v7 }
 0xb45   :  { %v2391_v22 = vpop.f32.mrf.mxu0 }
 0xb46   :  { %v1987_v26 = vadd.f32 %v2390_v35, %v2234_v36 }
 0xb47   :  { %v2392_v28 = vpop.f32.mrf.mxu0  ;;  %v1999_v43 = vpop.xlane.xlu0 %1998 }
 0xb48   :  { %v2393_v44 = vadd.f32 %v2392_v28, %v2391_v22  ;;  %v2006_v46 = vmul.f32 0.0078125, %v1999_v43  ;;  %v1995_v50 = vadd.f32 %v1987_v26, %v3388_v48 }
 0xb4a   :  { %v1990_v33 = vadd.f32 %v2393_v44, %v2234_v36  ;;  %v2010_v51 = vsub.f32 %v1993_v3, %v2006_v46  ;;  %2002 = vadd.xlane.f32.xlu0 %v1995_v50 }
 0xb4b   :  { %v2001_v47 = vpop.xlane.xlu1 %2000 }
 0xb4c   :  { %v2007_v52 = vmul.f32 0.0078125, %v2001_v47  ;;  %v1996_v53 = vadd.f32 %v1990_v33, %v3390_v49  ;;  %v2014_v16 = vmul.f32 %v2010_v51, %v2010_v51 }
 0xb4e   :  { %v2011_v55 = vsub.f32 %v1994_v31, %v2007_v52  ;;  %2004 = vadd.xlane.f32.xlu1 %v1996_v53  ;;  %2018 = vadd.xlane.f32.xlu0 %v2014_v16 }
 0xb50   :  { %v2015_v56 = vmul.f32 %v2011_v55, %v2011_v55 }
 0xb52   :  { %2020 = vadd.xlane.f32.xlu1 %v2015_v56 }
 0xbd3   :  { %v2003_v57 = vpop.xlane.xlu0 %2002 }
 0xbd4   :  { %v2008_v59 = vmul.f32 0.0078125, %v2003_v57 }
 0xbd6   :  { %v2012_v61 = vsub.f32 %v1995_v50, %v2008_v59 }
 0xbd7   :  { %v2005_v58 = vpop.xlane.xlu1 %2004  ;;  %v2019_v63 = vpop.xlane.xlu0 %2018 }
 0xbd8   :  { %v2009_v0 = vmul.f32 0.0078125, %v2005_v58  ;;  %v2026_v48 = vmul.f32 0.0078125, %v2019_v63  ;;  %v2016_v1 = vmul.f32 %v2012_v61, %v2012_v61 }
 0xbda   :  { %v2013_v34 = vsub.f32 %v1996_v53, %v2009_v0  ;;  %v2030_v4 = vadd.f32 1e-05, %v2026_v48  ;;  %2022 = vadd.xlane.f32.xlu0 %v2016_v1 }
 0xbdb   :  { %v2021_v6 = vpop.xlane.xlu1 %2020 }
 0xbdc   :  { %2769 = vrsqrt.f32 %v2030_v4  ;;  %v2027_v49 = vmul.f32 0.0078125, %v2021_v6  ;;  %v2017_v13 = vmul.f32 %v2013_v34, %v2013_v34 }
 0xbde   :  { %v2031_v37 = vadd.f32 1e-05, %v2027_v49  ;;  %2024 = vadd.xlane.f32.xlu1 %v2017_v13 }
 0xbe0   :  { %2771 = vrsqrt.f32 %v2031_v37 }
 0xbe9   :  { %v2770_v2 = vpop.eup %2769 }
 0xbea   :  { %v2038_v14 = vmul.f32 %v2770_v2, %v2010_v51 }
 0xbec   :  { %v2046_v5 = vmul.f32 %v2045_v38, %v2038_v14 }
 0xbed   :  { %v2772_v11 = vpop.eup %2771 }
 0xbee   :  { %v2039_v9 = vmul.f32 %v2772_v11, %v2011_v55  ;;  %v2054_v45 = vadd.f32 %v2053_v62, %v2046_v5 }
 0xbf0   :  { %v2047_v41 = vmul.f32 %v2045_v38, %v2039_v9 }
 0xbf2   :  { %v2055_v18 = vadd.f32 %v2053_v62, %v2047_v41 }
 0xbf4   :  { %v2262_v19 = vpack.c.bf16 %v2055_v18, %v2054_v45 }
 0xbf6   :  { %2263 = vst [vmem:[%s3438_s15] sm:$0xff] %v2262_v19  }
 0xc63   :  { %v2023_v20 = vpop.xlane.xlu0 %2022 }
 0xc64   :  { %v2028_v21 = vmul.f32 0.0078125, %v2023_v20 }
 0xc66   :  { %v2032_v23 = vadd.f32 1e-05, %v2028_v21 }
 0xc67   :  { %v2025_v10 = vpop.xlane.xlu1 %2024 }
 0xc68   :  { %2773 = vrsqrt.f32 %v2032_v23  ;;  %v2029_v54 = vmul.f32 0.0078125, %v2025_v10 }
 0xc6a   :  { %v2033_v24 = vadd.f32 1e-05, %v2029_v54 }
 0xc6c   :  { %2775 = vrsqrt.f32 %v2033_v24 }
 0xc75   :  { %v2774_v27 = vpop.eup %2773 }
 0xc76   :  { %v2040_v15 = vmul.f32 %v2774_v27, %v2012_v61 }
 0xc78   :  { %v2048_v32 = vmul.f32 %v2045_v38, %v2040_v15 }
 0xc79   :  { %v2776_v12 = vpop.eup %2775 }
 0xc7a   :  { %v2041_v36 = vmul.f32 %v2776_v12, %v2013_v34  ;;  %v2056_v40 = vadd.f32 %v2053_v62, %v2048_v32 }
 0xc7c   :  { %v2049_v39 = vmul.f32 %v2045_v38, %v2041_v36 }
 0xc7e   :  { %v2057_v42 = vadd.f32 %v2053_v62, %v2049_v39 }
 0xc80   :  { %v2267_v29 = vpack.c.bf16 %v2057_v42, %v2056_v40 }
 0xc82   :  { %2269 = vst [vmem:[%s3438_s15 + $0x8] sm:$0xff] %v2267_v29  }

// kernel: wavlm_forward.5
= control target key start
LH: loop header
LB: loop body
LE: loop exit
PB: predicated region body
PF: predicated region fallthrough
CT: control target
= control target key end

     0   :  { %s3534_s0 = inlined_call_operand.vmem [shape: bf16[32,128], index: 0, kind: input, shape index: {}]   ;;  %s3535_s1 = inlined_call_operand.vmem [shape: bf16[2,128,64], index: 1, kind: input, shape index: {}]   ;;  %s3536_s2 = inlined_call_operand.vmem [shape: bf16[2,128,64], index: 2, kind: input, shape index: {}]   ;;  %s3537_s3 = inlined_call_operand.vmem [shape: bf16[2,128,64], index: 3, kind: input, shape index: {}]   ;;  %s3538_s4 = inlined_call_operand.vmem [shape: f32[2,1,64], index: 4, kind: input, shape index: {}]   ;;  %s3539_s5 = inlined_call_operand.vmem [shape: f32[2,1,64], index: 5, kind: input, shape index: {}]   ;;  %s3540_s6 = inlined_call_operand.vmem [shape: f32[2,1,64], index: 6, kind: input, shape index: {}]   ;;  %s3541_s7 = inlined_call_operand.vmem [shape: bf16[2,64,128], index: 7, kind: input, shape index: {}]   ;;  %s3542_s8 = inlined_call_operand.vmem [shape: f32[1,128], index: 8, kind: input, shape index: {}]   ;;  %s3543_s9 = inlined_call_operand.vmem [shape: f32[2,128], index: 9, kind: input, shape index: {}]   ;;  %s3544_s10 = inlined_call_operand.vmem [shape: bf16[128,256], index: 10, kind: input, shape index: {}]   ;;  %s3545_s11 = inlined_call_operand.vmem [shape: f32[1,256], index: 11, kind: input, shape index: {}]   ;;  %s3546_s12 = inlined_call_operand.vmem [shape: bf16[256,128], index: 12, kind: input, shape index: {}]   ;;  %s3547_s13 = inlined_call_operand.vmem [shape: f32[1,128], index: 13, kind: input, shape index: {}]   ;;  %s3548_s14 = inlined_call_operand.vmem [shape: f32[2,128], index: 14, kind: input, shape index: {}]   ;;  %s3549_s15 = inlined_call_operand.hbm [shape: bf16[32,128], index: 15, kind: output, shape index: {0}]   ;;  %s3550_s16 = inlined_call_operand.hbm [shape: f32[2,128], index: 16, kind: output, shape index: {1}]  }
   0x1   :  { %3552 = sst [smem:[#allocation8_spill]] %s3534_s0 }
   0x2   :  { %22 = vsyncpa [#allocation3], 0  ;;  %v2667_v0 = vld [vmem:[%s3536_s2 + $0x38] sm:$0xff]   ;;  %v2669_v2 = vld [vmem:[%s3536_s2 + $0x30] sm:$0xff]   ;;  %s3553_s30 = sld [smem:[#allocation8_spill]] }
   0x3   :  { %v2668_v1 = vld [vmem:[%s3535_s1 + $0x38] sm:$0xff]   ;;  %2464 = vmatprep.subr.bf16.mxu1 %v2667_v0  ;;  %v2670_v3 = vld [vmem:[%s3535_s1 + $0x30] sm:$0xff]   ;;  %v2671_v4 = vld [vmem:[%s3536_s2 + $0x28] sm:$0xff]  }
   0x4   :  { %2444 = vmatprep.subr.bf16.mxu0 %v2668_v1  ;;  %2465 = vmatpush3.bf16.msra.mxu1 %v2667_v0  ;;  %v2672_v5 = vld [vmem:[%s3535_s1 + $0x28] sm:$0xff]   ;;  %v2673_v6 = vld [vmem:[%s3536_s2 + $0x20] sm:$0xff]   ;;  %v2675_v8 = vld [vmem:[%s3536_s2 + $0x18] sm:$0xff]  }
   0x5   :  { %2445 = vmatpush3.bf16.msra.mxu0 %v2668_v1  ;;  %2466 = vmatprep.subr.bf16.mxu1 %v2669_v2  ;;  %v2674_v7 = vld [vmem:[%s3535_s1 + $0x20] sm:$0xff]   ;;  %v2676_v9 = vld [vmem:[%s3535_s1 + $0x18] sm:$0xff]   ;;  %v2677_v10 = vld [vmem:[%s3536_s2 + $0x10] sm:$0xff]  }
   0x6   :  { %2446 = vmatprep.subr.bf16.mxu0 %v2670_v3  ;;  %v2678_v12 = vld [vmem:[%s3535_s1 + $0x10] sm:$0xff]   ;;  %v2679_v13 = vld [vmem:[%s3536_s2 + $0x8] sm:$0xff]   ;;  %v2681_v15 = vld [vmem:[%s3536_s2] sm:$0xff]  }
   0x7   :  { %v2680_v14 = vld [vmem:[%s3535_s1 + $0x8] sm:$0xff]   ;;  %v2682_v16 = vld [vmem:[%s3535_s1] sm:$0xff]   ;;  %v2685_v18 = vld [vmem:[%s3535_s1 + $0x78] sm:$0xff]  }
   0x8   :  { %2467 = vmatpush3.bf16.msra.mxu1 %v2669_v2  ;;  %v3005_v11 = vld [vmem:[%s3553_s30] sm:$0xff]   ;;  %v3027_v17 = vld [vmem:[%s3553_s30 + $0x8] sm:$0xff]   ;;  %v2686_v19 = vld [vmem:[%s3535_s1 + $0x70] sm:$0xff]  }
   0x9   :  { %2447 = vmatpush3.bf16.msra.mxu0 %v2670_v3  ;;  %2468 = vmatprep.subr.bf16.mxu1 %v2671_v4  ;;  %v2687_v20 = vld [vmem:[%s3535_s1 + $0x68] sm:$0xff]   ;;  %v2688_v21 = vld [vmem:[%s3535_s1 + $0x60] sm:$0xff]   ;;  %v2689_v22 = vld [vmem:[%s3535_s1 + $0x58] sm:$0xff]  }
   0xa   :  { %2448 = vmatprep.subr.bf16.mxu0 %v2672_v5  ;;  %2480 = vmatprep.mubr.bf16.mxu1 %v3005_v11  ;;  %v2690_v23 = vld [vmem:[%s3535_s1 + $0x50] sm:$0xff]   ;;  %v2691_v24 = vld [vmem:[%s3535_s1 + $0x48] sm:$0xff]   ;;  %v2692_v25 = vld [vmem:[%s3535_s1 + $0x40] sm:$0xff]  }
   0xb   :  { %2460 = vmatprep.mubr.bf16.mxu0 %v3005_v11  ;;  %v2693_v26 = vld [vmem:[%s3537_s3 + $0x78] sm:$0xff]   ;;  %v2694_v27 = vld [vmem:[%s3537_s3 + $0x70] sm:$0xff]  }
   0xc   :  { %2469 = vmatpush3.bf16.msra.mxu1 %v2671_v4 }
   0xd   :  { %2449 = vmatpush3.bf16.msra.mxu0 %v2672_v5  ;;  %2470 = vmatprep.subr.bf16.mxu1 %v2673_v6 }
   0xe   :  { %2450 = vmatprep.subr.bf16.mxu0 %v2674_v7 }
  0x10   :  { %2471 = vmatpush3.bf16.msra.mxu1 %v2673_v6 }
  0x11   :  { %2451 = vmatpush3.bf16.msra.mxu0 %v2674_v7  ;;  %2472 = vmatprep.subr.bf16.mxu1 %v2675_v8 }
  0x12   :  { %2452 = vmatprep.subr.bf16.mxu0 %v2676_v9 }
  0x14   :  { %2473 = vmatpush3.bf16.msra.mxu1 %v2675_v8 }
  0x15   :  { %2453 = vmatpush3.bf16.msra.mxu0 %v2676_v9  ;;  %2474 = vmatprep.subr.bf16.mxu1 %v2677_v10 }
  0x16   :  { %2454 = vmatprep.subr.bf16.mxu0 %v2678_v12 }
  0x18   :  { %2475 = vmatpush3.bf16.msra.mxu1 %v2677_v10 }
  0x19   :  { %2455 = vmatpush3.bf16.msra.mxu0 %v2678_v12  ;;  %2476 = vmatprep.subr.bf16.mxu1 %v2679_v13 }
  0x1a   :  { %2456 = vmatprep.subr.bf16.mxu0 %v2680_v14 }
  0x1c   :  { %2477 = vmatpush3.bf16.msra.mxu1 %v2679_v13 }
  0x1d   :  { %2457 = vmatpush3.bf16.msra.mxu0 %v2680_v14  ;;  %2478 = vmatprep.subr.bf16.mxu1 %v2681_v15 }
  0x1e   :  { %2458 = vmatprep.subr.bf16.mxu0 %v2682_v16 }
  0x20   :  { %2479 = vmatpush3.bf16.msra.mxu1 %v2681_v15 }
  0x21   :  { %2459 = vmatpush3.bf16.msra.mxu0 %v2682_v16  ;;  %2504 = vmatprep.subr.bf16.mxu1 %v2685_v18 }
  0x23   :  { %2481 = vmatmul.mubr.bf16.vlgmr.msra.gmra.mxu1 %v3027_v17 }
  0x24   :  { %2461 = vmatmul.mubr.bf16.vlgmr.msra.gmra.mxu0 %v3027_v17  ;;  %2505 = vmatpush3.bf16.msra.mxu1 %v2685_v18 }
  0x25   :  { %2506 = vmatprep.subr.bf16.mxu1 %v2686_v19  ;;  %2520 = vmatprep.mubr.bf16.mxu1 %v3005_v11 }
  0x26   :  { %2500 = vmatprep.mubr.bf16.mxu0 %v3005_v11 }
  0x28   :  { %2507 = vmatpush3.bf16.msra.mxu1 %v2686_v19 }
  0x29   :  { %2508 = vmatprep.subr.bf16.mxu1 %v2687_v20 }
  0x2c   :  { %2509 = vmatpush3.bf16.msra.mxu1 %v2687_v20 }
  0x2d   :  { %2510 = vmatprep.subr.bf16.mxu1 %v2688_v21 }
  0x30   :  { %2511 = vmatpush3.bf16.msra.mxu1 %v2688_v21 }
  0x31   :  { %2512 = vmatprep.subr.bf16.mxu1 %v2689_v22 }
  0x34   :  { %2513 = vmatpush3.bf16.msra.mxu1 %v2689_v22 }
  0x35   :  { %2514 = vmatprep.subr.bf16.mxu1 %v2690_v23 }
  0x38   :  { %2515 = vmatpush3.bf16.msra.mxu1 %v2690_v23 }
  0x39   :  { %2516 = vmatprep.subr.bf16.mxu1 %v2691_v24 }
  0x3c   :  { %2517 = vmatpush3.bf16.msra.mxu1 %v2691_v24 }
  0x3d   :  { %2518 = vmatprep.subr.bf16.mxu1 %v2692_v25 }
  0x40   :  { %2519 = vmatpush3.bf16.msra.mxu1 %v2692_v25 }
  0x41   :  { %2544 = vmatprep.subr.bf16.mxu1 %v2693_v26 }
  0x42   :  { %23 = vsyncpa [#allocation5], 0  ;;  %v2695_v28 = vld [vmem:[%s3537_s3 + $0x68] sm:$0xff]   ;;  %v2696_v29 = vld [vmem:[%s3537_s3 + $0x60] sm:$0xff]   ;;  %v2877_v34 = vmov 0.0   ;;  %vm2878_vm0 = vmmov 0  }
  0x43   :  { %2521 = vmatmul.mubr.bf16.vlgmr.msra.gmra.mxu1 %v3027_v17  ;;  %v2697_v30 = vld [vmem:[%s3537_s3 + $0x58] sm:$0xff]   ;;  %v2698_v31 = vld [vmem:[%s3537_s3 + $0x50] sm:$0xff]   ;;  %v2699_v32 = vld [vmem:[%s3537_s3 + $0x48] sm:$0xff]   ;;  %vm846_vm1 = vcmask 523264   ;;  %vm898_vm2 = vcmask 130048  }
  0x44   :  { %2545 = vmatpush3.bf16.msra.mxu1 %v2693_v26  ;;  %2560 = vmatprep.mubr.bf16.mxu1 %v3005_v11  ;;  %v2700_v33 = vld [vmem:[%s3537_s3 + $0x40] sm:$0xff]   ;;  %v2701_v35 = vld [vmem:[%s3537_s3 + $0x38] sm:$0xff]   ;;  %v2702_v36 = vld [vmem:[%s3537_s3 + $0x30] sm:$0xff]  }
  0x45   :  { %2546 = vmatprep.subr.bf16.mxu1 %v2694_v27  ;;  %2484 = vmatprep.subr.bf16.mxu0 %v2701_v35  ;;  %v2703_v37 = vld [vmem:[%s3537_s3 + $0x28] sm:$0xff]   ;;  %v2704_v38 = vld [vmem:[%s3537_s3 + $0x20] sm:$0xff]   ;;  %v2705_v39 = vld [vmem:[%s3537_s3 + $0x18] sm:$0xff]  }
  0x46   :  { %2485 = vmatpush3.bf16.msra.mxu0 %v2701_v35  ;;  %v2706_v40 = vld [vmem:[%s3537_s3 + $0x10] sm:$0xff]   ;;  %v2707_v41 = vld [vmem:[%s3537_s3 + $0x8] sm:$0xff]   ;;  %v2708_v42 = vld [vmem:[%s3537_s3] sm:$0xff]  }
  0x47   :  { %2486 = vmatprep.subr.bf16.mxu0 %v2702_v36  ;;  %v2709_v43 = vld [vmem:[%s3536_s2 + $0x78] sm:$0xff]   ;;  %v2710_v44 = vld [vmem:[%s3536_s2 + $0x70] sm:$0xff]   ;;  %v2711_v45 = vld [vmem:[%s3536_s2 + $0x68] sm:$0xff]  }
  0x48   :  { %2547 = vmatpush3.bf16.msra.mxu1 %v2694_v27  ;;  %v2712_v46 = vld [vmem:[%s3536_s2 + $0x60] sm:$0xff]   ;;  %v2713_v47 = vld [vmem:[%s3536_s2 + $0x58] sm:$0xff]   ;;  %v2714_v48 = vld [vmem:[%s3536_s2 + $0x50] sm:$0xff]  }
  0x49   :  { %2548 = vmatprep.subr.bf16.mxu1 %v2695_v28  ;;  %v2715_v49 = vld [vmem:[%s3536_s2 + $0x48] sm:$0xff]   ;;  %v2716_v50 = vld [vmem:[%s3536_s2 + $0x40] sm:$0xff]  }
  0x4a   :  { %2487 = vmatpush3.bf16.msra.mxu0 %v2702_v36  ;;  %v2143_v51 = vld [vmem:[%s3539_s5] ss:$0 sm:$0xff]  ;;  %v2178_v14 = vld [vmem:[%s3538_s4 + $0x1] ss:$0 sm:$0xff] }
  0x4b   :  { %2488 = vmatprep.subr.bf16.mxu0 %v2703_v37  ;;  %v2132_v52 = vld [vmem:[%s3538_s4] ss:$0 sm:$0xff] }
  0x4c   :  { %2549 = vmatpush3.bf16.msra.mxu1 %v2695_v28 }
  0x4d   :  { %2550 = vmatprep.subr.bf16.mxu1 %v2696_v29 }
  0x4e   :  { %2489 = vmatpush3.bf16.msra.mxu0 %v2703_v37  ;;  %v2152_v37 = vld [vmem:[%s3540_s6] ss:$0 sm:$0xff] }
  0x4f   :  { %2490 = vmatprep.subr.bf16.mxu0 %v2704_v38 }
  0x50   :  { %2551 = vmatpush3.bf16.msra.mxu1 %v2696_v29  ;;  %v3182_v29 = vld [vmem:[%s3540_s6 + $0x1] ss:$0 sm:$0xff] }
  0x51   :  { %2552 = vmatprep.subr.bf16.mxu1 %v2697_v30 }
  0x52   :  { %2491 = vmatpush3.bf16.msra.mxu0 %v2704_v38 }
  0x53   :  { %2492 = vmatprep.subr.bf16.mxu0 %v2705_v39 }
  0x54   :  { %2553 = vmatpush3.bf16.msra.mxu1 %v2697_v30 }
  0x55   :  { %2554 = vmatprep.subr.bf16.mxu1 %v2698_v31 }
  0x56   :  { %2493 = vmatpush3.bf16.msra.mxu0 %v2705_v39 }
  0x57   :  { %2494 = vmatprep.subr.bf16.mxu0 %v2706_v40 }
  0x58   :  { %2555 = vmatpush3.bf16.msra.mxu1 %v2698_v31 }
  0x59   :  { %2556 = vmatprep.subr.bf16.mxu1 %v2699_v32 }
  0x5a   :  { %2495 = vmatpush3.bf16.msra.mxu0 %v2706_v40 }
  0x5b   :  { %2496 = vmatprep.subr.bf16.mxu0 %v2707_v41 }
  0x5c   :  { %2557 = vmatpush3.bf16.msra.mxu1 %v2699_v32 }
  0x5d   :  { %2558 = vmatprep.subr.bf16.mxu1 %v2700_v33 }
  0x5e   :  { %2497 = vmatpush3.bf16.msra.mxu0 %v2707_v41 }
  0x5f   :  { %2498 = vmatprep.subr.bf16.mxu0 %v2708_v42 }
  0x60   :  { %2559 = vmatpush3.bf16.msra.mxu1 %v2700_v33 }
  0x61   :  { %2564 = vmatprep.subr.bf16.mxu1 %v2877_v34 }
  0x62   :  { %2499 = vmatpush3.bf16.msra.mxu0 %v2708_v42 }
  0x63   :  { %2561 = vmatmul.mubr.bf16.vlgmr.msra.gmra.mxu1 %v3027_v17  ;;  %2524 = vmatprep.subr.bf16.mxu0 %v2709_v43 }
  0x64   :  { %2566 = vmatprep.mubr.msk.bf16.mxu1 %vm2878_vm0, %v2877_v34 }
  0x65   :  { %2501 = vmatmul.mubr.bf16.vlgmr.msra.gmra.mxu0 %v3027_v17 }
  0x66   :  { %2525 = vmatpush3.bf16.msra.mxu0 %v2709_v43  ;;  %2540 = vmatprep.mubr.bf16.mxu0 %v3005_v11 }
  0x67   :  { %2526 = vmatprep.subr.bf16.mxu0 %v2710_v44 }
  0x6a   :  { %2527 = vmatpush3.bf16.msra.mxu0 %v2710_v44 }
  0x6b   :  { %2528 = vmatprep.subr.bf16.mxu0 %v2711_v45 }
  0x6e   :  { %2529 = vmatpush3.bf16.msra.mxu0 %v2711_v45 }
  0x6f   :  { %2530 = vmatprep.subr.bf16.mxu0 %v2712_v46 }
  0x72   :  { %2531 = vmatpush3.bf16.msra.mxu0 %v2712_v46 }
  0x73   :  { %2532 = vmatprep.subr.bf16.mxu0 %v2713_v47 }
  0x76   :  { %2533 = vmatpush3.bf16.msra.mxu0 %v2713_v47 }
  0x77   :  { %2534 = vmatprep.subr.bf16.mxu0 %v2714_v48 }
  0x7a   :  { %2535 = vmatpush3.bf16.msra.mxu0 %v2714_v48 }
  0x7b   :  { %2536 = vmatprep.subr.bf16.mxu0 %v2715_v49 }
  0x7e   :  { %2537 = vmatpush3.bf16.msra.mxu0 %v2715_v49 }
  0x7f   :  { %2538 = vmatprep.subr.bf16.mxu0 %v2716_v50 }
  0x82   :  { %2539 = vmatpush3.bf16.msra.mxu0 %v2716_v50 }
  0x83   :  { %2576 = vmatprep.subr.bf16.mxu0 %v2877_v34 }
  0x85   :  { %2541 = vmatmul.mubr.bf16.vlgmr.msra.gmra.mxu0 %v3027_v17 }
  0x86   :  { %2584 = vmatprep.mubr.msk.bf16.mxu0 %vm2878_vm0, %v2877_v34 }
  0xe3   :  { %v2482_v53 = vpop.f32.mrf.mxu1 }
  0xe4   :  { %v3147_v54 = vadd.f32 %v2482_v53, %v2143_v51  ;;  %v2462_v55 = vpop.f32.mrf.mxu0 }
  0xe5   :  { %v189_v56 = vadd.f32 %v2462_v55, %v2132_v52  ;;  %v300_v57 = vpop.f32.mrf.mxu1 }
  0xe6   :  { %v180_v58 = vpop.f32.mrf.mxu0  ;;  %v301_v1 = vadd.f32 %v2143_v51, %v300_v57 }
  0xe7   :  { %v2483_v59 = vpop.f32.mrf.mxu1  ;;  %v3151_v62 = vmul.f32 0.125, %v189_v56  ;;  %v181_v6 = vadd.f32 %v2132_v52, %v180_v58 }
  0xe8   :  { %v3149_v60 = vadd.f32 %v2483_v59, %v2143_v51  ;;  %v2463_v61 = vpop.f32.mrf.mxu0 }
  0xe9   :  { %v192_v63 = vadd.f32 %v2463_v61, %v2132_v52  ;;  %v303_v0 = vpop.f32.mrf.mxu1  ;;  %v435_v11 = vmul.f32 0.125, %v181_v6 }
  0xea   :  { %v442_v2 = vpack.c.bf16 %v3149_v60, %v3147_v54  ;;  %v304_v3 = vadd.f32 %v2143_v51, %v303_v0  ;;  %v183_v4 = vpop.f32.mrf.mxu0 }
  0xeb   :  { %v3155_v5 = vmul.f32 0.125, %v192_v63  ;;  %v184_v8 = vadd.f32 %v2132_v52, %v183_v4  ;;  %v2204_v63 = vld [vmem:[%s3539_s5 + $0x1] ss:$0 sm:$0xff] }
  0xec   :  { %v441_v7 = vpack.c.bf16 %v304_v3, %v301_v1 }
  0xed   :  { %v440_v9 = vpack.c.bf16 %v3155_v5, %v3151_v62  ;;  %v436_v12 = vmul.f32 0.125, %v184_v8  ;;  %v3224_v8 = vld [vmem:[%s3541_s7 + $0x10] sm:$0xff]   ;;  %v3305_v62 = vld [vmem:[%s3541_s7 + $0x20] sm:$0xff]  }
  0xee   :  { %v851_v10 = vsel %vm846_vm1, %v441_v7, 0  ;;  %v3218_v7 = vld [vmem:[%s3541_s7 + $0x18] sm:$0xff]  }
  0xef   :  { %2565 = vmatpush3.bf16.xpose.msra.mxu1 %v851_v10  ;;  %v439_v13 = vpack.c.bf16 %v436_v12, %v435_v11  ;;  %2577 = vmatpush3.bf16.msra.mxu0 %v3218_v7 }
  0xf0   :  { %2570 = vmatprep.subr.bf16.mxu1 %v2877_v34  ;;  %2578 = vmatprep.subr.bf16.mxu0 %v2877_v34 }
  0xf3   :  { %2579 = vmatpush3.bf16.msra.mxu0 %v3224_v8 }
  0xf4   :  { %2580 = vmatprep.subr.bf16.mxu0 %v2877_v34 }
  0xf6   :  { %2567 = vmatmul.mubr.msk.bf16.vlgmr.msra.gmra.mxu1 %vm846_vm1, %v439_v13 }
  0xf7   :  { %2572 = vmatprep.mubr.msk.bf16.mxu1 %vm2878_vm0, %v2877_v34 }
 0x103   :  { %v2522_v15 = vpop.f32.mrf.mxu1 }
 0x104   :  { %v569_v16 = vadd.f32 %v2522_v15, %v2178_v14 }
 0x105   :  { %v560_v17 = vpop.f32.mrf.mxu1 }
 0x106   :  { %v561_v18 = vadd.f32 %v2178_v14, %v560_v17  ;;  %v3167_v20 = vmul.f32 0.125, %v569_v16 }
 0x107   :  { %v2523_v19 = vpop.f32.mrf.mxu1 }
 0x108   :  { %v572_v21 = vadd.f32 %v2523_v19, %v2178_v14  ;;  %v3169_v23 = vmul.f32 0.125, %v561_v18 }
 0x109   :  { %v563_v22 = vpop.f32.mrf.mxu1 }
 0x10a   :  { %v3171_v24 = vmul.f32 0.125, %v572_v21  ;;  %v564_v25 = vadd.f32 %v2178_v14, %v563_v22 }
 0x10c   :  { %v824_v26 = vpack.c.bf16 %v3171_v24, %v3167_v20  ;;  %v3175_v27 = vmul.f32 0.125, %v564_v25 }
 0x10e   :  { %v823_v28 = vpack.c.bf16 %v3175_v27, %v3169_v23  ;;  %v3254_v23 = vld [vmem:[%s3541_s7] sm:$0xff]  }
 0x123   :  { %v2562_v30 = vpop.f32.mrf.mxu1 }
 0x124   :  { %v3185_v31 = vadd.f32 %v2562_v30, %v3182_v29 }
 0x125   :  { %v3187_v32 = vpop.f32.mrf.mxu1  ;;  %v2502_v38 = vpop.f32.mrf.mxu0 }
 0x126   :  { %v3197_v39 = vadd.f32 %v2502_v38, %v2152_v37  ;;  %v805_v25 = vadd.f32 %v3182_v29, %v3187_v32 }
 0x127   :  { %v2563_v33 = vpop.f32.mrf.mxu1  ;;  %v420_v40 = vpop.f32.mrf.mxu0 }
 0x128   :  { %v3190_v35 = vadd.f32 %v2563_v33, %v3182_v29  ;;  %v421_v42 = vadd.f32 %v2152_v37, %v420_v40 }
 0x129   :  { %v2503_v41 = vpop.f32.mrf.mxu0  ;;  %v807_v48 = vpop.f32.mrf.mxu1 }
 0x12a   :  { %v828_v36 = vpack.c.bf16 %v3190_v35, %v3185_v31  ;;  %v3199_v43 = vadd.f32 %v2503_v41, %v2152_v37  ;;  %v808_v30 = vadd.f32 %v3182_v29, %v807_v48 }
 0x12b   :  { %v423_v44 = vpop.f32.mrf.mxu0 }
 0x12c   :  { %v444_v45 = vpack.c.bf16 %v3199_v43, %v3197_v39  ;;  %v424_v46 = vadd.f32 %v2152_v37, %v423_v44  ;;  %v827_v33 = vpack.c.bf16 %v808_v30, %v805_v25  ;;  %v3247_v37 = vld [vmem:[%s3541_s7 + $0x8] sm:$0xff]  }
 0x12d   :  { %2581 = vmatpush3.bf16.msra.mxu0 %v3247_v37 }
 0x12e   :  { %v443_v47 = vpack.c.bf16 %v424_v46, %v421_v42  ;;  %2582 = vmatprep.subr.bf16.mxu0 %v2877_v34 }
 0x130   :  { %2571 = vmatpush3.bf16.msra.mxu1 %v443_v47 }
 0x131   :  { %2588 = vmatprep.subr.bf16.mxu1 %v2877_v34  ;;  %2583 = vmatpush3.bf16.msra.mxu0 %v3254_v23 }
 0x132   :  { %2600 = vmatprep.subr.bf16.mxu0 %v2877_v34 }
 0x145   :  { %v2542_v61 = vpop.f32.mrf.mxu0 }
 0x146   :  { %v3209_v0 = vadd.f32 %v2542_v61, %v2204_v63 }
 0x147   :  { %v682_v1 = vpop.f32.mrf.mxu0 }
 0x148   :  { %v683_v13 = vadd.f32 %v2204_v63, %v682_v1  ;;  %v1206_v1 = vsel %vm846_vm1, %v442_v2, 0 }
 0x149   :  { %v2543_v3 = vpop.f32.mrf.mxu0 }
 0x14a   :  { %v3211_v4 = vadd.f32 %v2543_v3, %v2204_v63 }
 0x14b   :  { %v685_v12 = vpop.f32.mrf.mxu0 }
 0x14c   :  { %v826_v6 = vpack.c.bf16 %v3211_v4, %v3209_v0  ;;  %v686_v14 = vadd.f32 %v2204_v63, %v685_v12 }
 0x14e   :  { %v825_v17 = vpack.c.bf16 %v686_v14, %v683_v13 }
 0x150   :  { %v1029_v22 = vsel %vm846_vm1, %v825_v17, 0 }
 0x1b6   :  { %v887_v49 = vpop.f32.mrf.mxu1 }
 0x1b7   :  { %v894_v50 = vmul.f32 1.442695, %v887_v49 }
 0x1b8   :  { %v2568_v51 = vpop.f32.mrf.mxu1 }
 0x1b9   :  { %2767 = vpow2.f32 %v894_v50 }
 0x1ba   :  { %v890_v52 = vpop.f32.mrf.mxu1 }
 0x1bb   :  { %v896_v53 = vmul.f32 1.442695, %v890_v52  ;;  %v3266_v52 = vld [vmem:[%s3541_s7 + $0x38] sm:$0xff]  }
 0x1bc   :  { %v2569_v55 = vpop.f32.mrf.mxu1 }
 0x1bd   :  { %2769 = vpow2.f32 %v896_v53  ;;  %v3272_v53 = vld [vmem:[%s3541_s7 + $0x30] sm:$0xff]  }
 0x1c6   :  { %v2768_v56 = vpop.eup %2767 }
 0x1c7   :  { %v899_v57 = vsel %vm898_vm2, %v2768_v56, 0.0 }
 0x1c8   :  { %900 = vadd.xlane.f32.xlu0 %v899_v57 }
 0x1ca   :  { %v2770_v58 = vpop.eup %2769 }
 0x1cb   :  { %v902_v59 = vsel %vm898_vm2, %v2770_v58, 0.0 }
 0x1cc   :  { %903 = vadd.xlane.f32.xlu0 %v902_v59 }
 0x251   :  { %v901_v10 = vpop.xlane.xlu0 %900 }
 0x252   :  { %2771 = vrcp.f32 %v901_v10  ;;  %v3298_v10 = vld [vmem:[%s3541_s7 + $0x28] sm:$0xff]  }
 0x255   :  { %v904_v11 = vpop.xlane.xlu0 %903 }
 0x256   :  { %2773 = vrcp.f32 %v904_v11 }
 0x25f   :  { %v2772_v15 = vpop.eup %2771 }
 0x260   :  { %v907_v18 = vmul.f32 %v2772_v15, %v2768_v56 }
 0x263   :  { %v2774_v16 = vpop.eup %2773 }
 0x264   :  { %v908_v19 = vmul.f32 %v2774_v16, %v2770_v58 }
 0x266   :  { %v909_v21 = vpack.c.bf16 %v908_v19, %v907_v18 }
 0x268   :  { %2573 = vmatmul.mubr.msk.bf16.vlgmr.msra.gmra.mxu1 %vm898_vm2, %v909_v21 }
 0x269   :  { %2589 = vmatpush3.bf16.xpose.msra.mxu1 %v1029_v22  ;;  %2590 = vmatprep.mubr.msk.bf16.mxu1 %vm2878_vm0, %v2877_v34 }
 0x26a   :  { %2594 = vmatprep.subr.bf16.mxu1 %v2877_v34 }
 0x270   :  { %2591 = vmatmul.mubr.msk.bf16.vlgmr.msra.gmra.mxu1 %vm846_vm1, %v823_v28 }
 0x271   :  { %2595 = vmatpush3.bf16.msra.mxu1 %v827_v33  ;;  %2596 = vmatprep.mubr.msk.bf16.mxu1 %vm2878_vm0, %v2877_v34 }
 0x272   :  { %2612 = vmatprep.subr.bf16.mxu1 %v2877_v34 }
 0x328   :  { %v947_v27 = vpop.f32.mrf.mxu1 }
 0x32a   :  { %v2574_v28 = vpop.f32.mrf.mxu1 }
 0x32c   :  { %v950_v29 = vpop.f32.mrf.mxu1 }
 0x32d   :  { %v954_v32 = vpack.c.bf16 %v950_v29, %v947_v27  ;;  %v3337_v27 = vld [vmem:[%s3542_s8] ss:$0 sm:$0xff] }
 0x32e   :  { %v2575_v38 = vpop.f32.mrf.mxu1 }
 0x32f   :  { %2585 = vmatmul.mubr.msk.bf16.vlgmr.msra.gmra.mxu0 %vm846_vm1, %v954_v32 }
 0x330   :  { %v1065_v40 = vpop.f32.mrf.mxu1  ;;  %2608 = vmatprep.mubr.msk.bf16.mxu0 %vm2878_vm0, %v2877_v34  ;;  %2601 = vmatpush3.bf16.msra.mxu0 %v3266_v52 }
 0x331   :  { %v1072_v41 = vmul.f32 1.442695, %v1065_v40  ;;  %2602 = vmatprep.subr.bf16.mxu0 %v2877_v34 }
 0x332   :  { %v2592_v42 = vpop.f32.mrf.mxu1 }
 0x333   :  { %2775 = vpow2.f32 %v1072_v41 }
 0x334   :  { %v1068_v44 = vpop.f32.mrf.mxu1  ;;  %2603 = vmatpush3.bf16.msra.mxu0 %v3272_v53 }
 0x335   :  { %v1074_v46 = vmul.f32 1.442695, %v1068_v44  ;;  %2604 = vmatprep.subr.bf16.mxu0 %v2877_v34 }
 0x336   :  { %v2593_v47 = vpop.f32.mrf.mxu1 }
 0x337   :  { %2777 = vpow2.f32 %v1074_v46 }
 0x338   :  { %2605 = vmatpush3.bf16.msra.mxu0 %v3298_v10 }
 0x339   :  { %2606 = vmatprep.subr.bf16.mxu0 %v2877_v34 }
 0x33c   :  { %2607 = vmatpush3.bf16.msra.mxu0 %v3305_v62 }
 0x33d   :  { %2624 = vmatprep.subr.bf16.mxu0 %v2877_v34 }
 0x340   :  { %v2776_v48 = vpop.eup %2775 }
 0x341   :  { %v1076_v49 = vsel %vm898_vm2, %v2776_v48, 0.0 }
 0x342   :  { %1077 = vadd.xlane.f32.xlu1 %v1076_v49  ;;  %v2831_v49 = vld [vmem:[%s3553_s30] sm:$0xff]  }
 0x344   :  { %v2778_v50 = vpop.eup %2777 }
 0x345   :  { %v1079_v51 = vsel %vm898_vm2, %v2778_v50, 0.0 }
 0x346   :  { %1080 = vadd.xlane.f32.xlu1 %v1079_v51 }
 0x3cb   :  { %v1078_v55 = vpop.xlane.xlu1 %1077 }
 0x3cc   :  { %2779 = vrcp.f32 %v1078_v55  ;;  %v60_v55 = vunpack.c.h.bf16 %v2831_v49 }
 0x3cf   :  { %v1081_v56 = vpop.xlane.xlu1 %1080 }
 0x3d0   :  { %2781 = vrcp.f32 %v1081_v56 }
 0x3d9   :  { %v2780_v57 = vpop.eup %2779 }
 0x3da   :  { %v1084_v59 = vmul.f32 %v2780_v57, %v2776_v48 }
 0x3dd   :  { %v2782_v58 = vpop.eup %2781 }
 0x3de   :  { %v1085_v61 = vmul.f32 %v2782_v58, %v2778_v50  ;;  %v59_v50 = vunpack.c.l.bf16 %v2831_v49 }
 0x3e0   :  { %v1086_v63 = vpack.c.bf16 %v1085_v61, %v1084_v59 }
 0x3e2   :  { %2597 = vmatmul.mubr.msk.bf16.vlgmr.msra.gmra.mxu1 %vm898_vm2, %v1086_v63 }
 0x3e3   :  { %2613 = vmatpush3.bf16.xpose.msra.mxu1 %v1206_v1  ;;  %2614 = vmatprep.mubr.msk.bf16.mxu1 %vm2878_vm0, %v2877_v34 }
 0x3e4   :  { %2618 = vmatprep.subr.bf16.mxu1 %v2877_v34 }
 0x3ea   :  { %2615 = vmatmul.mubr.msk.bf16.vlgmr.msra.gmra.mxu1 %vm846_vm1, %v440_v9 }
 0x3eb   :  { %2619 = vmatpush3.bf16.msra.mxu1 %v444_v45  ;;  %2620 = vmatprep.mubr.msk.bf16.mxu1 %vm2878_vm0, %v2877_v34 }
 0x3ec   :  { %2636 = vmatprep.subr.bf16.mxu1 %v2877_v34 }
 0x3ef   :  { %v1016_v54 = vpop.f32.mrf.mxu0 }
 0x3f0   :  { %v1023_v0 = vadd.f32 %v3337_v27, %v1016_v54 }
 0x3f1   :  { %v2586_v60 = vpop.f32.mrf.mxu0 }
 0x3f3   :  { %v1019_v2 = vpop.f32.mrf.mxu0 }
 0x3f4   :  { %v1024_v20 = vadd.f32 %v3337_v27, %v1019_v2 }
 0x3f5   :  { %v2587_v3 = vpop.f32.mrf.mxu0 }
 0x4a2   :  { %v1124_v5 = vpop.f32.mrf.mxu1 }
 0x4a4   :  { %v2598_v9 = vpop.f32.mrf.mxu1 }
 0x4a6   :  { %v1127_v39 = vpop.f32.mrf.mxu1 }
 0x4a7   :  { %v1131_v43 = vpack.c.bf16 %v1127_v39, %v1124_v5 }
 0x4a8   :  { %v2599_v45 = vpop.f32.mrf.mxu1 }
 0x4a9   :  { %2609 = vmatmul.mubr.msk.bf16.vlgmr.msra.gmra.mxu0 %vm846_vm1, %v1131_v43 }
 0x4aa   :  { %v1242_v11 = vpop.f32.mrf.mxu1  ;;  %2625 = vmatpush3.bf16.msra.mxu0 %v3218_v7  ;;  %2632 = vmatprep.mubr.msk.bf16.mxu0 %vm2878_vm0, %v2877_v34 }
 0x4ab   :  { %v1249_v12 = vmul.f32 1.442695, %v1242_v11  ;;  %2626 = vmatprep.subr.bf16.mxu0 %v2877_v34 }
 0x4ac   :  { %v2616_v13 = vpop.f32.mrf.mxu1 }
 0x4ad   :  { %2783 = vpow2.f32 %v1249_v12  ;;  %v2832_v13 = vld [vmem:[%s3553_s30 + $0x8] sm:$0xff]  }
 0x4ae   :  { %v1245_v14 = vpop.f32.mrf.mxu1  ;;  %2627 = vmatpush3.bf16.msra.mxu0 %v3224_v8 }
 0x4af   :  { %v1251_v15 = vmul.f32 1.442695, %v1245_v14  ;;  %2628 = vmatprep.subr.bf16.mxu0 %v2877_v34  ;;  %v61_v14 = vunpack.c.l.bf16 %v2832_v13 }
 0x4b0   :  { %v2617_v16 = vpop.f32.mrf.mxu1 }
 0x4b1   :  { %2785 = vpow2.f32 %v1251_v15 }
 0x4b2   :  { %2629 = vmatpush3.bf16.msra.mxu0 %v3247_v37 }
 0x4b3   :  { %2630 = vmatprep.subr.bf16.mxu0 %v2877_v34 }
 0x4b6   :  { %2631 = vmatpush3.bf16.msra.mxu0 %v3254_v23  ;;  %v1359_v23 = vsel %vm846_vm1, %v826_v6, 0 }
 0x4b7   :  { %2648 = vmatprep.subr.bf16.mxu0 %v2877_v34 }
 0x4ba   :  { %v2784_v7 = vpop.eup %2783 }
 0x4bb   :  { %v1253_v17 = vsel %vm898_vm2, %v2784_v7, 0.0 }
 0x4bc   :  { %1254 = vadd.xlane.f32.xlu0 %v1253_v17 }
 0x4be   :  { %v2786_v18 = vpop.eup %2785 }
 0x4bf   :  { %v1256_v8 = vsel %vm898_vm2, %v2786_v18, 0.0 }
 0x4c0   :  { %1257 = vadd.xlane.f32.xlu1 %v1256_v8 }
 0x545   :  { %v1255_v19 = vpop.xlane.xlu0 %1254 }
 0x546   :  { %2787 = vrcp.f32 %v1255_v19 }
 0x549   :  { %v1258_v21 = vpop.xlane.xlu1 %1257 }
 0x54a   :  { %2789 = vrcp.f32 %v1258_v21 }
 0x553   :  { %v2788_v22 = vpop.eup %2787 }
 0x554   :  { %v1261_v30 = vmul.f32 %v2788_v22, %v2784_v7  ;;  %v62_v22 = vunpack.c.h.bf16 %v2832_v13 }
 0x557   :  { %v2790_v25 = vpop.eup %2789 }
 0x558   :  { %v1262_v33 = vmul.f32 %v2790_v25, %v2786_v18 }
 0x55a   :  { %v1263_v37 = vpack.c.bf16 %v1262_v33, %v1261_v30 }
 0x55c   :  { %2621 = vmatmul.mubr.msk.bf16.vlgmr.msra.gmra.mxu1 %vm898_vm2, %v1263_v37 }
 0x55d   :  { %2637 = vmatpush3.bf16.xpose.msra.mxu1 %v1359_v23  ;;  %2638 = vmatprep.mubr.msk.bf16.mxu1 %vm2878_vm0, %v2877_v34 }
 0x55e   :  { %2642 = vmatprep.subr.bf16.mxu1 %v2877_v34 }
 0x564   :  { %2639 = vmatmul.mubr.msk.bf16.vlgmr.msra.gmra.mxu1 %vm846_vm1, %v824_v26 }
 0x565   :  { %2643 = vmatpush3.bf16.msra.mxu1 %v828_v36  ;;  %2644 = vmatprep.mubr.msk.bf16.mxu1 %vm2878_vm0, %v2877_v34 }
 0x569   :  { %v1193_v4 = vpop.f32.mrf.mxu0 }
 0x56a   :  { %v1200_v6 = vadd.f32 %v1193_v4, %v1023_v0 }
 0x56b   :  { %v2610_v28 = vpop.f32.mrf.mxu0 }
 0x56c   :  { %v2730_v28 = vld [vmem:[%s3544_s10 + $0x64] ss:$8 sps:$4 sm:$0xff]  }
 0x56d   :  { %v1196_v24 = vpop.f32.mrf.mxu0 }
 0x56e   :  { %v1201_v26 = vadd.f32 %v1196_v24, %v1024_v20  ;;  %v2728_v20 = vld [vmem:[%s3544_s10 + $0x60] ss:$8 sps:$4 sm:$0xff]   ;;  %v2733_v24 = vld [vmem:[%s3544_s10 + $0x54] ss:$8 sps:$4 sm:$0xff]  }
 0x56f   :  { %v2611_v29 = vpop.f32.mrf.mxu0 }
 0x570   :  { %v1509_v57 = vadd.f32 %v1201_v26, %v60_v55  ;;  %v2731_v26 = vld [vmem:[%s3544_s10 + $0x50] ss:$8 sps:$4 sm:$0xff]   ;;  %v2734_v29 = vld [vmem:[%s3544_s10 + $0x40] ss:$8 sps:$4 sm:$0xff]  }
 0x61c   :  { %v1301_v32 = vpop.f32.mrf.mxu1 }
 0x61e   :  { %v2622_v38 = vpop.f32.mrf.mxu1 }
 0x61f   :  { %v2739_v38 = vld [vmem:[%s3544_s10 + $0x34] ss:$8 sps:$4 sm:$0xff]  }
 0x620   :  { %v1304_v40 = vpop.f32.mrf.mxu1 }
 0x621   :  { %v1308_v41 = vpack.c.bf16 %v1304_v40, %v1301_v32  ;;  %v2736_v32 = vld [vmem:[%s3544_s10 + $0x44] ss:$8 sps:$4 sm:$0xff]   ;;  %v2737_v40 = vld [vmem:[%s3544_s10 + $0x30] ss:$8 sps:$4 sm:$0xff]  }
 0x622   :  { %v2623_v42 = vpop.f32.mrf.mxu1 }
 0x623   :  { %2633 = vmatmul.mubr.msk.bf16.vlgmr.msra.gmra.mxu0 %vm846_vm1, %v1308_v41  ;;  %v2879_v41 = vmov 0   ;;  %v2742_v42 = vld [vmem:[%s3544_s10 + $0x24] ss:$8 sps:$4 sm:$0xff]  }
 0x624   :  { %v1395_v31 = vpop.f32.mrf.mxu1  ;;  %2649 = vmatpush3.bf16.msra.mxu0 %v3266_v52  ;;  %2656 = vmatprep.mubr.msk.bf16.mxu0 %vm2878_vm0, %v2877_v34 }
 0x625   :  { %v1402_v35 = vmul.f32 1.442695, %v1395_v31  ;;  %2650 = vmatprep.subr.bf16.mxu0 %v2877_v34  ;;  %v2740_v31 = vld [vmem:[%s3544_s10 + $0x20] ss:$8 sps:$4 sm:$0xff]  }
 0x626   :  { %v2640_v36 = vpop.f32.mrf.mxu1 }
 0x627   :  { %2791 = vpow2.f32 %v1402_v35  ;;  %v2745_v35 = vld [vmem:[%s3544_s10 + $0x14] ss:$8 sps:$4 sm:$0xff]   ;;  %v2743_v36 = vld [vmem:[%s3544_s10 + $0x10] ss:$8 sps:$4 sm:$0xff]  }
 0x628   :  { %v1398_v44 = vpop.f32.mrf.mxu1  ;;  %2651 = vmatpush3.bf16.msra.mxu0 %v3272_v53  ;;  %v1508_v53 = vadd.f32 %v1200_v6, %v59_v50  ;;  %v2725_v6 = vld [vmem:[%s3544_s10 + $0x70] ss:$8 sps:$4 sm:$0xff]  }
 0x629   :  { %v1404_v46 = vmul.f32 1.442695, %v1398_v44  ;;  %2652 = vmatprep.subr.bf16.mxu0 %v2877_v34  ;;  %v2748_v44 = vld [vmem:[%s3544_s10 + $0x4] ss:$8 sps:$4 sm:$0xff]  }
 0x62a   :  { %v2641_v47 = vpop.f32.mrf.mxu1 }
 0x62b   :  { %2793 = vpow2.f32 %v1404_v46  ;;  %v2746_v46 = vld [vmem:[%s3544_s10] ss:$8 sps:$4 sm:$0xff]  }
 0x62c   :  { %2653 = vmatpush3.bf16.msra.mxu0 %v3298_v10 }
 0x62d   :  { %2654 = vmatprep.subr.bf16.mxu0 %v2877_v34 }
 0x630   :  { %2655 = vmatpush3.bf16.msra.mxu0 %v3305_v62 }
 0x634   :  { %v2792_v48 = vpop.eup %2791 }
 0x635   :  { %v1406_v51 = vsel %vm898_vm2, %v2792_v48, 0.0 }
 0x636   :  { %1407 = vadd.xlane.f32.xlu0 %v1406_v51 }
 0x638   :  { %v2794_v52 = vpop.eup %2793 }
 0x639   :  { %v1409_v56 = vsel %vm898_vm2, %v2794_v52, 0.0 }
 0x63a   :  { %1410 = vadd.xlane.f32.xlu1 %v1409_v56  ;;  %1513 = vadd.xlane.f32.xlu0 %v1508_v53 }
 0x63e   :  { %1515 = vadd.xlane.f32.xlu1 %v1509_v57 }
 0x6bf   :  { %v1408_v34 = vpop.xlane.xlu0 %1407 }
 0x6c0   :  { %2795 = vrcp.f32 %v1408_v34 }
 0x6c3   :  { %v1411_v58 = vpop.xlane.xlu1 %1410  ;;  %v1514_v45 = vpop.xlane.xlu0 %1513 }
 0x6c4   :  { %2797 = vrcp.f32 %v1411_v58  ;;  %v1522_v11 = vmul.f32 0.0078125, %v1514_v45 }
 0x6c6   :  { %v3367_v17 = vsub.f32 %v1508_v53, %v1522_v11 }
 0x6c7   :  { %v1516_v15 = vpop.xlane.xlu1 %1515 }
 0x6c8   :  { %v1523_v8 = vmul.f32 0.0078125, %v1516_v15  ;;  %v1530_v0 = vmul.f32 %v3367_v17, %v3367_v17  ;;  %v2750_v15 = vld [vmem:[%s3546_s12 + $0x38] sm:$0xff]  }
 0x6ca   :  { %v3370_v37 = vsub.f32 %v1509_v57, %v1523_v8  ;;  %v2755_v8 = vld [vmem:[%s3546_s12 + $0x60] sm:$0xff]  }
 0x6cc   :  { %v1531_v4 = vmul.f32 %v3370_v37, %v3370_v37 }
 0x6cd   :  { %v2796_v59 = vpop.eup %2795 }
 0x6ce   :  { %v1414_v63 = vmul.f32 %v2796_v59, %v2792_v48 }
 0x6d1   :  { %v2798_v61 = vpop.eup %2797 }
 0x6d2   :  { %v1415_v1 = vmul.f32 %v2798_v61, %v2794_v52 }
 0x6d4   :  { %v1416_v54 = vpack.c.bf16 %v1415_v1, %v1414_v63  ;;  %v1558_v63 = vlaneseq }
 0x6d6   :  { %2645 = vmatmul.mubr.msk.bf16.vlgmr.msra.gmra.mxu1 %vm898_vm2, %v1416_v54  ;;  %v1559_v1 = vshrl.u32 %v1558_v63, 7 }
 0x6d7   :  { %1716 = vmatprep.mubr.bf16.mxu1 %v2879_v41 }
 0x6d8   :  { %v3432_v54 = vsub.s32 0, %v1559_v1 }
 0x6e3   :  { %v1346_v60 = vpop.f32.mrf.mxu0 }
 0x6e4   :  { %v1353_v12 = vadd.f32 %v3337_v27, %v1346_v60  ;;  %v1512_v60 = vld [vmem:[%s3543_s9] sm:$0x3] }
 0x6e5   :  { %v2634_v2 = vpop.f32.mrf.mxu0 }
 0x6e7   :  { %v1349_v3 = vpop.f32.mrf.mxu0 }
 0x6e8   :  { %v1354_v19 = vadd.f32 %v3337_v27, %v1349_v3  ;;  %v2727_v27 = vld [vmem:[%s3544_s10 + $0x74] ss:$8 sps:$4 sm:$0xff]  }
 0x6e9   :  { %v2635_v10 = vpop.f32.mrf.mxu0  ;;  %1684 = vmatprep.subr.bf16.mxu1 %v2727_v27 }
 0x6ea   :  { %1685 = vmatpush1.bf16.msra.mxu1 %v2725_v6  ;;  %v1561_v10 = vrot.slane %v1512_v60, %v3432_v54 }
 0x6eb   :  { %1686 = vmatprep.subr.bf16.mxu1 %v2730_v28 }
 0x6ee   :  { %1687 = vmatpush1.bf16.msra.mxu1 %v2728_v20 }
 0x6ef   :  { %1688 = vmatprep.subr.bf16.mxu1 %v2733_v24 }
 0x6f2   :  { %1689 = vmatpush1.bf16.msra.mxu1 %v2731_v26 }
 0x6f3   :  { %1690 = vmatprep.subr.bf16.mxu1 %v2736_v32 }
 0x6f6   :  { %1691 = vmatpush1.bf16.msra.mxu1 %v2734_v29 }
 0x6f7   :  { %1692 = vmatprep.subr.bf16.mxu1 %v2739_v38 }
 0x6fa   :  { %1693 = vmatpush1.bf16.msra.mxu1 %v2737_v40 }
 0x6fb   :  { %1694 = vmatprep.subr.bf16.mxu1 %v2742_v42 }
 0x6fe   :  { %1695 = vmatpush1.bf16.msra.mxu1 %v2740_v31 }
 0x6ff   :  { %1696 = vmatprep.subr.bf16.mxu1 %v2745_v35 }
 0x702   :  { %1697 = vmatpush1.bf16.msra.mxu1 %v2743_v36  ;;  %v1592_v36 = vld [vmem:[%s3545_s11] sm:$0x3] }
 0x703   :  { %1698 = vmatprep.subr.bf16.mxu1 %v2748_v44  ;;  %v1597_v44 = vrot.slane %v1592_v36, %v3432_v54 }
 0x706   :  { %1699 = vmatpush1.bf16.msra.mxu1 %v2746_v46 }
 0x796   :  { %v1454_v62 = vpop.f32.mrf.mxu1 }
 0x798   :  { %v2646_v5 = vpop.f32.mrf.mxu1 }
 0x79a   :  { %v1457_v9 = vpop.f32.mrf.mxu1 }
 0x79b   :  { %v1461_v39 = vpack.c.bf16 %v1457_v9, %v1454_v62  ;;  %v3439_v62 = vsub.s32 1, %v1559_v1 }
 0x79c   :  { %v2647_v43 = vpop.f32.mrf.mxu1 }
 0x79d   :  { %2657 = vmatmul.mubr.msk.bf16.vlgmr.msra.gmra.mxu0 %vm846_vm1, %v1461_v39  ;;  %v1569_v43 = vrot.slane %v1512_v60, %v3439_v62  ;;  %v3510_v46 = vrot.slane %v1592_v36, %v3439_v62 }
 0x85d   :  { %v1499_v16 = vpop.f32.mrf.mxu0 }
 0x85e   :  { %v1506_v7 = vadd.f32 %v1499_v16, %v1353_v12  ;;  %v2751_v16 = vld [vmem:[%s3546_s12 + $0x70] sm:$0xff]  }
 0x85f   :  { %v2658_v18 = vpop.f32.mrf.mxu0 }
 0x860   :  { %v1510_v21 = vadd.f32 %v1506_v7, %v61_v14  ;;  %v2749_v14 = vld [vmem:[%s3546_s12 + $0x78] sm:$0xff]   ;;  %v2752_v7 = vld [vmem:[%s3546_s12 + $0x30] sm:$0xff]   ;;  %v2754_v18 = vld [vmem:[%s3546_s12 + $0x28] sm:$0xff]  }
 0x861   :  { %v1502_v25 = vpop.f32.mrf.mxu0  ;;  %2416 = vmatprep.subr.bf16.mxu0 %v2749_v14 }
 0x862   :  { %v1507_v30 = vadd.f32 %v1502_v25, %v1354_v19  ;;  %1517 = vadd.xlane.f32.xlu0 %v1510_v21  ;;  %2417 = vmatpush3.bf16.msra.mxu0 %v2750_v15  ;;  %v2756_v19 = vld [vmem:[%s3546_s12 + $0x20] sm:$0xff]   ;;  %v2759_v25 = vld [vmem:[%s3546_s12 + $0x50] sm:$0xff]  }
 0x863   :  { %v2659_v33 = vpop.f32.mrf.mxu0  ;;  %2418 = vmatprep.subr.bf16.mxu0 %v2751_v16 }
 0x864   :  { %v1511_v23 = vadd.f32 %v1507_v30, %v62_v22  ;;  %v2758_v22 = vld [vmem:[%s3546_s12 + $0x18] sm:$0xff]   ;;  %v2760_v30 = vld [vmem:[%s3546_s12 + $0x10] sm:$0xff]   ;;  %v2761_v33 = vld [vmem:[%s3546_s12 + $0x48] sm:$0xff]  }
 0x866   :  { %1519 = vadd.xlane.f32.xlu1 %v1511_v23  ;;  %1534 = vadd.xlane.f32.xlu0 %v1530_v0  ;;  %v2764_v0 = vld [vmem:[%s3546_s12] sm:$0xff]  }
 0x867   :  { %2419 = vmatpush3.bf16.msra.mxu0 %v2752_v7 }
 0x86a   :  { %1536 = vadd.xlane.f32.xlu1 %v1531_v4 }
 0x8eb   :  { %v1518_v47 = vpop.xlane.xlu0 %1517 }
 0x8ec   :  { %v1524_v48 = vmul.f32 0.0078125, %v1518_v47 }
 0x8ee   :  { %v3424_v49 = vsub.f32 %v1510_v21, %v1524_v48  ;;  %v2757_v21 = vld [vmem:[%s3546_s12 + $0x58] sm:$0xff]  }
 0x8ef   :  { %v1520_v50 = vpop.xlane.xlu1 %1519  ;;  %v1535_v51 = vpop.xlane.xlu0 %1534 }
 0x8f0   :  { %v1525_v52 = vmul.f32 0.0078125, %v1520_v50  ;;  %v1542_v53 = vmul.f32 0.0078125, %v1535_v51  ;;  %v1532_v55 = vmul.f32 %v3424_v49, %v3424_v49 }
 0x8f2   :  { %v3428_v56 = vsub.f32 %v1511_v23, %v1525_v52  ;;  %v1546_v57 = vadd.f32 1e-05, %v1542_v53  ;;  %1538 = vadd.xlane.f32.xlu0 %v1532_v55  ;;  %v2763_v23 = vld [vmem:[%s3546_s12 + $0x40] sm:$0xff]  }
 0x8f3   :  { %v1537_v34 = vpop.xlane.xlu1 %1536 }
 0x8f4   :  { %2799 = vrsqrt.f32 %v1546_v57  ;;  %v1543_v58 = vmul.f32 0.0078125, %v1537_v34  ;;  %v1533_v59 = vmul.f32 %v3428_v56, %v3428_v56 }
 0x8f6   :  { %v1547_v61 = vadd.f32 1e-05, %v1543_v58  ;;  %1540 = vadd.xlane.f32.xlu1 %v1533_v59 }
 0x8f8   :  { %2801 = vrsqrt.f32 %v1547_v61 }
 0x901   :  { %v2800_v2 = vpop.eup %2799 }
 0x902   :  { %v1554_v3 = vmul.f32 %v2800_v2, %v3367_v17  ;;  %v2753_v17 = vld [vmem:[%s3546_s12 + $0x68] sm:$0xff]  }
 0x903   :  { %2420 = vmatprep.subr.bf16.mxu0 %v2753_v17 }
 0x904   :  { %v1562_v39 = vmul.f32 %v1561_v10, %v1554_v3  ;;  %2421 = vmatpush3.bf16.msra.mxu0 %v2754_v18 }
 0x905   :  { %v2802_v5 = vpop.eup %2801  ;;  %2422 = vmatprep.subr.bf16.mxu0 %v2755_v8 }
 0x906   :  { %v1555_v9 = vmul.f32 %v2802_v5, %v3370_v37  ;;  %v3443_v11 = vadd.f32 %v1569_v43, %v1562_v39  ;;  %v2762_v37 = vld [vmem:[%s3546_s12 + $0x8] sm:$0xff]  }
 0x908   :  { %v1563_v45 = vmul.f32 %v1561_v10, %v1555_v9  ;;  %2423 = vmatpush3.bf16.msra.mxu0 %v2756_v19 }
 0x909   :  { %2424 = vmatprep.subr.bf16.mxu0 %v2757_v21 }
 0x90a   :  { %v3445_v12 = vadd.f32 %v1569_v43, %v1563_v45 }
 0x90c   :  { %v1574_v13 = vpack.c.bf16 %v3445_v12, %v3443_v11  ;;  %2425 = vmatpush3.bf16.msra.mxu0 %v2758_v22 }
 0x90d   :  { %2426 = vmatprep.subr.bf16.mxu0 %v2759_v25 }
 0x90e   :  { %1717 = vmatmul.mubr.bf16.vlgmr.msra.gmra.mxu1 %v1574_v13 }
 0x90f   :  { %1726 = vmatprep.mubr.bf16.mxu1 %v2879_v41 }
 0x910   :  { %2427 = vmatpush3.bf16.msra.mxu0 %v2760_v30 }
 0x911   :  { %2428 = vmatprep.subr.bf16.mxu0 %v2761_v33 }
 0x914   :  { %2429 = vmatpush3.bf16.msra.mxu0 %v2762_v37 }
 0x915   :  { %2430 = vmatprep.subr.bf16.mxu0 %v2763_v23 }
 0x918   :  { %2431 = vmatpush3.bf16.msra.mxu0 %v2764_v0 }
 0x97b   :  { %v1539_v4 = vpop.xlane.xlu0 %1538 }
 0x97c   :  { %v1544_v27 = vmul.f32 0.0078125, %v1539_v4 }
 0x97e   :  { %v1548_v6 = vadd.f32 1e-05, %v1544_v27 }
 0x97f   :  { %v1541_v28 = vpop.xlane.xlu1 %1540 }
 0x980   :  { %2803 = vrsqrt.f32 %v1548_v6  ;;  %v1545_v20 = vmul.f32 0.0078125, %v1541_v28 }
 0x982   :  { %v1549_v24 = vadd.f32 1e-05, %v1545_v20 }
 0x984   :  { %2805 = vrsqrt.f32 %v1549_v24 }
 0x98d   :  { %v2804_v26 = vpop.eup %2803 }
 0x98e   :  { %v1556_v29 = vmul.f32 %v2804_v26, %v3424_v49 }
 0x990   :  { %v1564_v40 = vmul.f32 %v1561_v10, %v1556_v29 }
 0x991   :  { %v2806_v32 = vpop.eup %2805 }
 0x992   :  { %v1557_v38 = vmul.f32 %v2806_v32, %v3428_v56  ;;  %v3499_v42 = vadd.f32 %v1569_v43, %v1564_v40 }
 0x994   :  { %v1565_v41 = vmul.f32 %v1561_v10, %v1557_v38 }
 0x996   :  { %v3501_v31 = vadd.f32 %v1569_v43, %v1565_v41 }
 0x998   :  { %v1575_v35 = vpack.c.bf16 %v3501_v31, %v3499_v42 }
 0x99a   :  { %1727 = vmatmul.mubr.bf16.gmra.mxu1 %v1575_v35 }
 0x9ce   :  { %v1718_v47 = vpop.f32.mrf.mxu1 }
 0x9cf   :  { %v1719_v48 = vadd.f32 %v1718_v47, %v1597_v44 }
 0x9d0   :  { %v1720_v49 = vpop.f32.mrf.mxu1 }
 0x9d1   :  { %v1745_v50 = vmul.f32 0.044715, %v1719_v48  ;;  %v1721_v51 = vadd.f32 %v1720_v49, %v3510_v46  ;;  %v1737_v37 = vmul.f32 0.5, %v1719_v48 }
 0x9d2   :  { %v1722_v52 = vpop.f32.mrf.mxu1 }
 0x9d3   :  { %v1753_v53 = vmul.f32 %v1745_v50, %v1719_v48  ;;  %v1746_v55 = vmul.f32 0.044715, %v1721_v51  ;;  %v1723_v56 = vadd.f32 %v1722_v52, %v1597_v44  ;;  %v1738_v25 = vmul.f32 0.5, %v1721_v51 }
 0x9d4   :  { %v1724_v57 = vpop.f32.mrf.mxu1 }
 0x9d5   :  { %v1761_v34 = vmul.f32 %v1753_v53, %v1719_v48  ;;  %v1754_v58 = vmul.f32 %v1746_v55, %v1721_v51  ;;  %v1747_v59 = vmul.f32 0.044715, %v1723_v56  ;;  %v1725_v61 = vadd.f32 %v1724_v57, %v3510_v46 }
 0x9d6   :  { %v1739_v21 = vmul.f32 0.5, %v1723_v56 }
 0x9d7   :  { %v1769_v63 = vadd.f32 %v1761_v34, %v1719_v48  ;;  %v1762_v1 = vmul.f32 %v1754_v58, %v1721_v51  ;;  %v1755_v60 = vmul.f32 %v1747_v59, %v1723_v56  ;;  %v1748_v2 = vmul.f32 0.044715, %v1725_v61 }
 0x9d8   :  { %v1740_v30 = vmul.f32 0.5, %v1725_v61 }
 0x9d9   :  { %v1763_v3 = vmul.f32 %v1755_v60, %v1723_v56  ;;  %v1756_v10 = vmul.f32 %v1748_v2, %v1725_v61  ;;  %v1770_v5 = vadd.f32 %v1762_v1, %v1721_v51  ;;  %v1777_v9 = vmul.f32 0.7978846, %v1769_v63 }
 0x9db   :  { %v1771_v39 = vadd.f32 %v1763_v3, %v1723_v56  ;;  %v1764_v43 = vmul.f32 %v1756_v10, %v1725_v61  ;;  %v1778_v45 = vmul.f32 0.7978846, %v1770_v5 }
 0x9dd   :  { %v1779_v13 = vmul.f32 0.7978846, %v1771_v39  ;;  %v1772_v14 = vadd.f32 %v1764_v43, %v1725_v61  ;;  %2807 = vtanh.f32 %v1778_v45 }
 0x9de   :  { %2809 = vtanh.f32 %v1777_v9 }
 0x9df   :  { %2811 = vtanh.f32 %v1779_v13  ;;  %v1780_v15 = vmul.f32 0.7978846, %v1772_v14 }
 0x9e1   :  { %2813 = vtanh.f32 %v1780_v15 }
 0x9ea   :  { %v2808_v16 = vpop.eup %2807 }
 0x9eb   :  { %v2810_v7 = vpop.eup %2809  ;;  %v1794_v18 = vadd.f32 1.0, %v2808_v16 }
 0x9ec   :  { %v2812_v17 = vpop.eup %2811  ;;  %v1793_v22 = vadd.f32 1.0, %v2810_v7 }
 0x9ed   :  { %v1795_v8 = vadd.f32 1.0, %v2812_v17  ;;  %v1802_v0 = vmul.f32 %v1794_v18, %v1738_v25 }
 0x9ee   :  { %v2814_v19 = vpop.eup %2813  ;;  %v1801_v27 = vmul.f32 %v1793_v22, %v1737_v37  ;;  %v2284_v22 = vld [vmem:[%s3547_s13] ss:$0 sm:$0xff] }
 0x9ef   :  { %v1796_v33 = vadd.f32 1.0, %v2814_v19  ;;  %v1803_v23 = vmul.f32 %v1795_v8, %v1739_v21 }
 0x9f1   :  { %v1804_v4 = vmul.f32 %v1796_v33, %v1740_v30  ;;  %v1809_v28 = vpack.c.bf16 %v1803_v23, %v1801_v27 }
 0x9f3   :  { %v1810_v6 = vpack.c.bf16 %v1804_v4, %v1802_v0 }
 0x9f5   :  { %1980 = vmatprep.mubr.bf16.mxu0 %v1810_v6 }
 0x9f6   :  { %1981 = vmatmul.mubr.bf16.vlgmr.msra.gmra.mxu0 %v1809_v28 }
 0xa5a   :  { %v1728_v20 = vpop.f32.mrf.mxu1 }
 0xa5b   :  { %v1729_v24 = vadd.f32 %v1728_v20, %v1597_v44 }
 0xa5c   :  { %v1730_v26 = vpop.f32.mrf.mxu1 }
 0xa5d   :  { %v1749_v29 = vmul.f32 0.044715, %v1729_v24  ;;  %v1731_v32 = vadd.f32 %v1730_v26, %v3510_v46  ;;  %v1741_v15 = vmul.f32 0.5, %v1729_v24 }
 0xa5e   :  { %v1732_v38 = vpop.f32.mrf.mxu1 }
 0xa5f   :  { %v1757_v40 = vmul.f32 %v1749_v29, %v1729_v24  ;;  %v1750_v41 = vmul.f32 0.044715, %v1731_v32  ;;  %v1733_v35 = vadd.f32 %v1732_v38, %v1597_v44  ;;  %v1742_v45 = vmul.f32 0.5, %v1731_v32 }
 0xa60   :  { %v1734_v36 = vpop.f32.mrf.mxu1 }
 0xa61   :  { %v1765_v47 = vmul.f32 %v1757_v40, %v1729_v24  ;;  %v1758_v48 = vmul.f32 %v1750_v41, %v1731_v32  ;;  %v1751_v49 = vmul.f32 0.044715, %v1733_v35  ;;  %v1735_v50 = vadd.f32 %v1734_v36, %v3510_v46 }
 0xa62   :  { %v1743_v39 = vmul.f32 0.5, %v1733_v35 }
 0xa63   :  { %v1766_v51 = vmul.f32 %v1758_v48, %v1731_v32  ;;  %v1759_v52 = vmul.f32 %v1751_v49, %v1733_v35  ;;  %v1752_v53 = vmul.f32 0.044715, %v1735_v50  ;;  %v1773_v55 = vadd.f32 %v1765_v47, %v1729_v24 }
 0xa64   :  { %v1744_v13 = vmul.f32 0.5, %v1735_v50 }
 0xa65   :  { %v1767_v56 = vmul.f32 %v1759_v52, %v1733_v35  ;;  %v1760_v57 = vmul.f32 %v1752_v53, %v1735_v50  ;;  %v1774_v34 = vadd.f32 %v1766_v51, %v1731_v32  ;;  %v1781_v58 = vmul.f32 0.7978846, %v1773_v55 }
 0xa67   :  { %v1768_v59 = vmul.f32 %v1760_v57, %v1735_v50  ;;  %v1782_v61 = vmul.f32 0.7978846, %v1774_v34  ;;  %v1775_v63 = vadd.f32 %v1767_v56, %v1733_v35 }
 0xa69   :  { %v1776_v1 = vadd.f32 %v1768_v59, %v1735_v50  ;;  %2815 = vtanh.f32 %v1782_v61  ;;  %v1783_v44 = vmul.f32 0.7978846, %v1775_v63 }
 0xa6a   :  { %2817 = vtanh.f32 %v1781_v58 }
 0xa6b   :  { %v1784_v60 = vmul.f32 0.7978846, %v1776_v1  ;;  %2819 = vtanh.f32 %v1783_v44 }
 0xa6d   :  { %2821 = vtanh.f32 %v1784_v60  ;;  %v2001_v60 = vld [vmem:[%s3548_s14] sm:$0x3]  ;;  %s2880_s14 = smov [#allocation2]  }
 0xa6e   :  { %s2107_s8 = sshll.u32 %s2880_s14, 4  ;;  %s2108_s8 = int_to_ptr.vmem [resolvable:$true] %s2107_s8 }
 0xa6f   :  { %s2833_s23 = scalar_lea.vmem %s2108_s8, 256  ;;  %p2838_p1 = scmp.lt.s32.totalorder %s2108_s8, %s2108_s8 }
 0xa70   :  { %p2834_p0 = scmp.ne.s32.totalorder %s2108_s8, %s2833_s23  ;;  %p2839_p2 = scmp.lt.s32.totalorder %s2833_s23, %s2833_s23 }
 0xa72   :  { %p2840_p3 = por %p2839_p2, %p2838_p1 }
 0xa74   :  { %p2841_p4 = pnand %p2840_p3, %p2834_p0 }
 0xa76   :  { %v2816_v2 = vpop.eup %2815 }
 0xa77   :  { %v2818_v46 = vpop.eup %2817  ;;  %v1798_v10 = vadd.f32 1.0, %v2816_v2 }
 0xa78   :  { %v2820_v3 = vpop.eup %2819  ;;  %v1797_v43 = vadd.f32 1.0, %v2818_v46 }
 0xa79   :  { %v1799_v5 = vadd.f32 1.0, %v2820_v3  ;;  %v1806_v7 = vmul.f32 %v1798_v10, %v1742_v45  ;;  %v2049_v3 = vrot.slane %v2001_v60, %v3432_v54 }
 0xa7a   :  { %v2822_v9 = vpop.eup %2821  ;;  %v1805_v18 = vmul.f32 %v1797_v43, %v1741_v15 }
 0xa7b   :  { %v1800_v14 = vadd.f32 1.0, %v2822_v9  ;;  %v1807_v16 = vmul.f32 %v1799_v5, %v1743_v39  ;;  %v2057_v39 = vrot.slane %v2001_v60, %v3439_v62 }
 0xa7d   :  { %v1808_v17 = vmul.f32 %v1800_v14, %v1744_v13  ;;  %v1811_v19 = vpack.c.bf16 %v1807_v16, %v1805_v18 }
 0xa7f   :  { %v1812_v8 = vpack.c.bf16 %v1808_v17, %v1806_v7 }
 0xa81   :  { %1988 = vmatprep.mubr.bf16.mxu0 %v1812_v8 }
 0xa82   :  { %1989 = vmatmul.mubr.bf16.gmra.mxu0 %v1811_v19 }
 0xab6   :  { %v2432_v21 = vpop.f32.mrf.mxu0 }
 0xab8   :  { %v2433_v25 = vpop.f32.mrf.mxu0 }
 0xab9   :  { %v2434_v30 = vadd.f32 %v2433_v25, %v2432_v21 }
 0xaba   :  { %v2435_v33 = vpop.f32.mrf.mxu0 }
 0xabb   :  { %v1983_v37 = vadd.f32 %v2434_v30, %v2284_v22 }
 0xabc   :  { %v2436_v23 = vpop.f32.mrf.mxu0 }
 0xabd   :  { %v2437_v0 = vadd.f32 %v2436_v23, %v2435_v33  ;;  %v1997_v4 = vadd.f32 %v1983_v37, %v3443_v11 }
 0xabf   :  { %v1986_v27 = vadd.f32 %v2437_v0, %v2284_v22  ;;  %2002 = vadd.xlane.f32.xlu0 %v1997_v4 }
 0xac1   :  { %v1998_v6 = vadd.f32 %v1986_v27, %v3445_v12 }
 0xac3   :  { %2004 = vadd.xlane.f32.xlu1 %v1998_v6 }
 0xb42   :  { %v2438_v28 = vpop.f32.mrf.mxu0 }
 0xb44   :  { %v2439_v20 = vpop.f32.mrf.mxu0 }
 0xb45   :  { %v2440_v24 = vadd.f32 %v2439_v20, %v2438_v28 }
 0xb46   :  { %v2441_v26 = vpop.f32.mrf.mxu0 }
 0xb47   :  { %v1991_v29 = vadd.f32 %v2440_v24, %v2284_v22 }
 0xb48   :  { %v2442_v32 = vpop.f32.mrf.mxu0  ;;  %v2003_v38 = vpop.xlane.xlu0 %2002 }
 0xb49   :  { %v2443_v40 = vadd.f32 %v2442_v32, %v2441_v26  ;;  %v2010_v41 = vmul.f32 0.0078125, %v2003_v38  ;;  %v1999_v35 = vadd.f32 %v1991_v29, %v3499_v42 }
 0xb4b   :  { %v1994_v36 = vadd.f32 %v2443_v40, %v2284_v22  ;;  %v2014_v47 = vsub.f32 %v1997_v4, %v2010_v41  ;;  %2006 = vadd.xlane.f32.xlu0 %v1999_v35 }
 0xb4c   :  { %v2005_v11 = vpop.xlane.xlu1 %2004 }
 0xb4d   :  { %v2011_v48 = vmul.f32 0.0078125, %v2005_v11  ;;  %v2000_v49 = vadd.f32 %v1994_v36, %v3501_v31  ;;  %v2018_v12 = vmul.f32 %v2014_v47, %v2014_v47 }
 0xb4f   :  { %v2015_v50 = vsub.f32 %v1998_v6, %v2011_v48  ;;  %2008 = vadd.xlane.f32.xlu1 %v2000_v49  ;;  %2022 = vadd.xlane.f32.xlu0 %v2018_v12 }
 0xb51   :  { %v2019_v51 = vmul.f32 %v2015_v50, %v2015_v50 }
 0xb53   :  { %2024 = vadd.xlane.f32.xlu1 %v2019_v51 }
 0xbd4   :  { %v2007_v52 = vpop.xlane.xlu0 %2006 }
 0xbd5   :  { %v2012_v53 = vmul.f32 0.0078125, %v2007_v52 }
 0xbd7   :  { %v2016_v55 = vsub.f32 %v1999_v35, %v2012_v53 }
 0xbd8   :  { %v2009_v56 = vpop.xlane.xlu1 %2008  ;;  %v2023_v57 = vpop.xlane.xlu0 %2022 }
 0xbd9   :  { %v2013_v34 = vmul.f32 0.0078125, %v2009_v56  ;;  %v2030_v42 = vmul.f32 0.0078125, %v2023_v57  ;;  %v2020_v58 = vmul.f32 %v2016_v55, %v2016_v55 }
 0xbdb   :  { %v2017_v59 = vsub.f32 %v2000_v49, %v2013_v34  ;;  %v2034_v61 = vadd.f32 1e-05, %v2030_v42  ;;  %2026 = vadd.xlane.f32.xlu0 %v2020_v58 }
 0xbdc   :  { %v2025_v63 = vpop.xlane.xlu1 %2024 }
 0xbdd   :  { %2823 = vrsqrt.f32 %v2034_v61  ;;  %v2031_v31 = vmul.f32 0.0078125, %v2025_v63  ;;  %v2021_v1 = vmul.f32 %v2017_v59, %v2017_v59 }
 0xbdf   :  { %v2035_v44 = vadd.f32 1e-05, %v2031_v31  ;;  %2028 = vadd.xlane.f32.xlu1 %v2021_v1 }
 0xbe1   :  { %2825 = vrsqrt.f32 %v2035_v44 }
 0xbea   :  { %v2824_v2 = vpop.eup %2823 }
 0xbeb   :  { %v2042_v46 = vmul.f32 %v2824_v2, %v2014_v47 }
 0xbed   :  { %v2050_v9 = vmul.f32 %v2049_v3, %v2042_v46 }
 0xbee   :  { %v2826_v10 = vpop.eup %2825 }
 0xbef   :  { %v2043_v5 = vmul.f32 %v2826_v10, %v2015_v50  ;;  %v2058_v45 = vadd.f32 %v2057_v39, %v2050_v9 }
 0xbf1   :  { %v2051_v43 = vmul.f32 %v2049_v3, %v2043_v5 }
 0xbf3   :  { %v2059_v13 = vadd.f32 %v2057_v39, %v2051_v43 }
 0xbf5   :  { %v2312_v14 = vpack.c.bf16 %v2059_v13, %v2058_v45  ;;  %v2082_v15 = vadd.f32 %v2059_v13, %v2058_v45 }
 0xbf7   :  { %2313 = vst [vmem:[#allocation2] sm:$0xff] %v2312_v14   ;;  %v2083_v22 = vrot.slane %v2082_v15, 4 }
 0xbf9   :  { %v2084_v33 = vadd.f32 %v2083_v22, %v2082_v15 }
 0xbfb   :  { %v2085_v4 = vrot.slane %v2084_v33, 2 }
 0xbfd   :  { %v2086_v20 = vadd.f32 %v2085_v4, %v2084_v33 }
 0xc64   :  { %v2027_v16 = vpop.xlane.xlu0 %2026 }
 0xc65   :  { %v2032_v7 = vmul.f32 0.0078125, %v2027_v16 }
 0xc67   :  { %v2036_v17 = vadd.f32 1e-05, %v2032_v7 }
 0xc68   :  { %v2029_v18 = vpop.xlane.xlu1 %2028 }
 0xc69   :  { %2827 = vrsqrt.f32 %v2036_v17  ;;  %v2033_v8 = vmul.f32 0.0078125, %v2029_v18 }
 0xc6b   :  { %v2037_v19 = vadd.f32 1e-05, %v2033_v8 }
 0xc6d   :  { %2829 = vrsqrt.f32 %v2037_v19 }
 0xc76   :  { %v2828_v54 = vpop.eup %2827 }
 0xc77   :  { %v2044_v21 = vmul.f32 %v2828_v54, %v2016_v55 }
 0xc79   :  { %v2052_v62 = vmul.f32 %v2049_v3, %v2044_v21 }
 0xc7a   :  { %v2830_v25 = vpop.eup %2829 }
 0xc7b   :  { %v2045_v30 = vmul.f32 %v2830_v25, %v2017_v59  ;;  %v2060_v23 = vadd.f32 %v2057_v39, %v2052_v62 }
 0xc7d   :  { %v2053_v37 = vmul.f32 %v2049_v3, %v2045_v30 }
 0xc7f   :  { %v2061_v0 = vadd.f32 %v2057_v39, %v2053_v37 }
 0xc81   :  { %v2317_v27 = vpack.c.bf16 %v2061_v0, %v2060_v23  ;;  %v2091_v6 = vadd.f32 %v2061_v0, %v2060_v23 }
 0xc83   :  { %2319 = vst [vmem:[#allocation2 + $0x8] sm:$0xff] %v2317_v27   ;;  %v2092_v28 = vrot.slane %v2091_v6, 4 }
 0xc84   :  { %2844 = shalt.err (!%p2841_p4)
}
 0xc85   :  { %s2881_s6 = smov 64   ;;  %s2882_s24 = smov 4   ;;  %v2093_v24 = vadd.f32 %v2092_v28, %v2091_v6  ;;  %v2087_v26 = vrot.slane %v2086_v20, 1  ;;  %vm2099_vm3 = vcmask 1040384  }
 0xc86   :  { %2113 = dma.vmem_to_hbm [thread:$0]  %s2108_s8, 256, %s3549_s15, [#allocation3], %s2881_s6, %s2881_s6, %s2882_s24  }
 0xc87   :  { %v2094_v29 = vrot.slane %v2093_v24, 2  ;;  %v2088_v38 = vadd.f32 %v2087_v26, %v2086_v20  ;;  %s2883_s26 = smov [#allocation4]  }
 0xc88   :  { %s2120_s27 = sshll.u32 %s2883_s26, 4  ;;  %s2121_s27 = int_to_ptr.vmem [resolvable:$true] %s2120_s27 }
 0xc89   :  { %v2095_v32 = vadd.f32 %v2094_v29, %v2093_v24  ;;  %v2090_v35 = vmul.f32 0.0625, %v2088_v38  ;;  %s2853_s28 = scalar_lea.vmem %s2121_s27, 32  ;;  %p2858_p6 = scmp.lt.s32.totalorder %s2121_s27, %s2121_s27 }
 0xc8a   :  { %p2854_p5 = scmp.ne.s32.totalorder %s2121_s27, %s2853_s28  ;;  %p2859_p7 = scmp.lt.s32.totalorder %s2853_s28, %s2853_s28 }
 0xc8b   :  { %v2096_v40 = vrot.slane %v2095_v32, 1 }
 0xc8c   :  { %p2860_p8 = por %p2859_p7, %p2858_p6 }
 0xc8d   :  { %v2097_v41 = vadd.f32 %v2096_v40, %v2095_v32 }
 0xc8e   :  { %p2861_p9 = pnand %p2860_p8, %p2854_p5 }
 0xc8f   :  { %v2098_v36 = vmul.f32 0.0625, %v2097_v41 }
 0xc91   :  { %v2100_v47 = vsel %vm2099_vm3, %v2090_v35, %v2098_v36 }
 0xc92   :  { %2101 = vst [vmem:[#allocation4] sm:$0x3] %v2100_v47 }
 0xc93   :  { %2864 = shalt.err (!%p2861_p9)
}
 0xc94   :  { %2123 = dma.vmem_to_hbm [thread:$0]  %s2121_s27, 32, %s3550_s16, [#allocation5]  }
 0xc95   :  { %2873 = dma.done.wait [#allocation3], 256  }
 0xc96   :  { %2874 = vsyncadd [#allocation3], 4294967040 }
 0xc97   :  { %2875 = dma.done.wait [#allocation5], 32  }
 0xc98   :  { %2876 = vsyncadd [#allocation5], 4294967264 }
 0xc99   :  { %2130 = vsyncpa [#allocation3], 1 }
 0xc9a   :  { %2131 = vsyncpa [#allocation5], 1 }

// kernel: wavlm_forward.3
= control target key start
LH: loop header
LB: loop body
LE: loop exit
PB: predicated region body
PF: predicated region fallthrough
CT: control target
= control target key end

     0   :  { %vm106_vm0 = vcmask 1044480   ;;  %v4125_v0 = vmov 0.0   ;;  %vm4126_vm1 = vmmov 0   ;;  %vm90_vm2 = vcmask 80896   ;;  %s4127_s30 = smov 64   ;;  %s5019_s1 = inlined_call_operand.vmem [shape: bf16[10,32], index: 1, kind: input, shape index: {}]   ;;  %s5020_s0 = inlined_call_operand.vmem [shape: bf16[2,65,10], index: 0, kind: input, shape index: {}]   ;;  %s5021_s3 = inlined_call_operand.vmem [shape: bf16[3,32,32], index: 3, kind: input, shape index: {}]   ;;  %s5022_s2 = inlined_call_operand.vmem [shape: f32[2,32], index: 2, kind: input, shape index: {}]   ;;  %s5023_s4 = inlined_call_operand.vmem [shape: bf16[2,32,32], index: 4, kind: input, shape index: {}]   ;;  %s5024_s6 = inlined_call_operand.vmem [shape: bf16[32,128], index: 6, kind: input, shape index: {}]   ;;  %s5025_s5 = inlined_call_operand.vmem [shape: f32[2,32], index: 5, kind: input, shape index: {}]   ;;  %s5026_s8 = inlined_call_operand.vmem [shape: bf16[4,2,64,64], index: 8, kind: input, shape index: {}]   ;;  %s5027_s7 = inlined_call_operand.vmem [shape: f32[1,128], index: 7, kind: input, shape index: {}]   ;;  %s5028_s9 = inlined_call_operand.vmem [shape: f32[1,128], index: 9, kind: input, shape index: {}]   ;;  %s5029_s10 = inlined_call_operand.vmem [shape: f32[2,128], index: 10, kind: input, shape index: {}]   ;;  %s5030_s11 = inlined_call_operand.vmem [shape: bf16[32,128], index: 11, kind: output, shape index: {}]  }
   0x1   :  { %3603 = vmatprep.subr.bf16.mxu0 %v4125_v0  ;;  %50 = vst [vmem:[#allocation4] sm:$0xff] %v4125_v0  ;;  %51 = vst [vmem:[#allocation4 + $0x8] sm:$0xff] %v4125_v0  ;;  %v3938_v1 = vld [vmem:[%s5019_s1] sm:$0x1f]   ;;  %3605 = vmatprep.mubr.msk.bf16.mxu0 %vm4126_vm1, %v4125_v0  ;;  %v3940_v4 = vld [vmem:[%s5020_s0 + $0x8] sm:$0xff]   ;;  %vm182_vm3 = vcmask 261120  }
   0x2   :  { %52 = vst [vmem:[#allocation4 + $0x10] sm:$0xf] %v4125_v0  ;;  %v4197_v2 = vsel %vm106_vm0, %v3938_v1, 0  ;;  %v3939_v3 = vld [vmem:[%s5020_s0] sm:$0xff]   ;;  %v3941_v5 = vld [vmem:[%s5020_s0 + $0x10] sm:$0xff]   ;;  %v3942_v6 = vld [vmem:[%s5020_s0 + $0x18] sm:$0xff]  }
   0x3   :  { %3604 = vmatpush3.bf16.msra.mxu0 %v4197_v2  ;;  %v3943_v7 = vld [vmem:[%s5020_s0 + $0x20] ss:$0 sps:$4 sm:$0x11]   ;;  %v3944_v19 = vld [vmem:[%s5021_s3 + $0x18] sm:$0xff]   ;;  %v3945_v21 = vld [vmem:[%s5021_s3 + $0x10] sm:$0xff]   ;;  %vm198_vm4 = vcmask 253952  }
   0x4   :  { %3665 = vmatprep.subr.bf16.mxu0 %v4125_v0  ;;  %3625 = vmatprep.subr.bf16.mxu1 %v3944_v19  ;;  %v4248_v38 = vld [vmem:[%s5021_s3 + $0x8] sm:$0xff]   ;;  %vm965_vm5 = vcmask 523264  }
   0x5   :  { %3626 = vmatpush3.bf16.msra.mxu1 %v3944_v19 }
   0x6   :  { %3606 = vmatmul.mubr.msk.bf16.vlgmr.msra.gmra.mxu0 %vm90_vm2, %v3939_v3  ;;  %3627 = vmatprep.subr.bf16.mxu1 %v3945_v21 }
   0x7   :  { %3609 = vmatprep.mubr.msk.bf16.mxu0 %vm4126_vm1, %v4125_v0 }
   0x9   :  { %3628 = vmatpush3.bf16.msra.mxu1 %v3945_v21 }
   0xa   :  { %3633 = vmatprep.subr.bf16.mxu1 %v4248_v38 }
   0xe   :  { %3610 = vmatmul.mubr.msk.bf16.gmra.mxu0 %vm90_vm2, %v3940_v4 }
   0xf   :  { %3613 = vmatprep.mubr.msk.bf16.mxu0 %vm4126_vm1, %v4125_v0 }
  0x16   :  { %3614 = vmatmul.mubr.msk.bf16.gmra.mxu0 %vm90_vm2, %v3941_v5 }
  0x17   :  { %3617 = vmatprep.mubr.msk.bf16.mxu0 %vm4126_vm1, %v4125_v0 }
  0x1e   :  { %3618 = vmatmul.mubr.msk.bf16.gmra.mxu0 %vm90_vm2, %v3942_v6 }
  0x1f   :  { %3621 = vmatprep.mubr.msk.bf16.mxu0 %vm4126_vm1, %v4125_v0 }
  0x26   :  { %3622 = vmatmul.mubr.msk.bf16.gmra.mxu0 %vm90_vm2, %v3943_v7 }
  0x27   :  { %3669 = vmatprep.mubr.msk.bf16.mxu0 %vm4126_vm1, %v4125_v0 }
  0xc6   :  { %v144_v8 = vpop.f32.mrf.mxu0 }
  0xc7   :  { %v183_v16 = vsel %vm182_vm3, %v144_v8, 0.0 }
  0xc8   :  { %v3607_v9 = vpop.f32.mrf.mxu0 }
  0xca   :  { %v147_v10 = vpop.f32.mrf.mxu0 }
  0xcb   :  { %v184_v17 = vsel %vm182_vm3, %v147_v10, 0.0 }
  0xcc   :  { %v3608_v11 = vpop.f32.mrf.mxu0  ;;  %v185_v23 = vadd.f32 %v184_v17, %v183_v16 }
  0xce   :  { %v152_v12 = vpop.f32.mrf.mxu0 }
  0xcf   :  { %v186_v20 = vsel %vm182_vm3, %v152_v12, 0.0 }
  0xd0   :  { %v3611_v13 = vpop.f32.mrf.mxu0  ;;  %v187_v27 = vadd.f32 %v186_v20, %v185_v23 }
  0xd2   :  { %v155_v14 = vpop.f32.mrf.mxu0 }
  0xd3   :  { %v188_v25 = vsel %vm182_vm3, %v155_v14, 0.0 }
  0xd4   :  { %v3612_v15 = vpop.f32.mrf.mxu0  ;;  %v189_v29 = vadd.f32 %v188_v25, %v187_v27 }
  0xd6   :  { %v160_v18 = vpop.f32.mrf.mxu0 }
  0xd7   :  { %v190_v26 = vsel %vm182_vm3, %v160_v18, 0.0 }
  0xd8   :  { %v3615_v22 = vpop.f32.mrf.mxu0  ;;  %v191_v32 = vadd.f32 %v190_v26, %v189_v29 }
  0xda   :  { %v163_v24 = vpop.f32.mrf.mxu0 }
  0xdb   :  { %v192_v31 = vsel %vm182_vm3, %v163_v24, 0.0 }
  0xdc   :  { %v3616_v28 = vpop.f32.mrf.mxu0  ;;  %v193_v35 = vadd.f32 %v192_v31, %v191_v32 }
  0xde   :  { %v168_v30 = vpop.f32.mrf.mxu0 }
  0xdf   :  { %v194_v34 = vsel %vm182_vm3, %v168_v30, 0.0 }
  0xe0   :  { %v3619_v33 = vpop.f32.mrf.mxu0  ;;  %v195_v39 = vadd.f32 %v194_v34, %v193_v35 }
  0xe2   :  { %v171_v36 = vpop.f32.mrf.mxu0 }
  0xe3   :  { %v196_v37 = vsel %vm182_vm3, %v171_v36, 0.0 }
  0xe4   :  { %v3620_v40 = vpop.f32.mrf.mxu0  ;;  %v197_v41 = vadd.f32 %v196_v37, %v195_v39 }
  0xe5   :  { %v41_v40 = vld [vmem:[%s5022_s2] sm:$0x3] }
  0xe6   :  { %v176_v42 = vpop.f32.mrf.mxu0 }
  0xe7   :  { %v199_v43 = vsel %vm198_vm4, %v176_v42, 0.0 }
  0xe8   :  { %v200_v44 = vadd.f32 %v199_v43, %v197_v41  ;;  %v3623_v45 = vpop.f32.mrf.mxu0 }
  0xea   :  { %v201_v46 = vrot.slane %v200_v44, 4  ;;  %v179_v47 = vpop.f32.mrf.mxu0 }
  0xec   :  { %v202_v48 = vadd.f32 %v201_v46, %v200_v44  ;;  %v3624_v49 = vpop.f32.mrf.mxu0 }
  0xee   :  { %v203_v50 = vrot.slane %v202_v48, 2 }
  0xf0   :  { %v204_v51 = vadd.f32 %v203_v50, %v202_v48 }
  0xf2   :  { %v205_v52 = vrot.slane %v204_v51, 1 }
  0xf4   :  { %v206_v53 = vadd.f32 %v205_v52, %v204_v51 }
  0xf6   :  { %v208_v54 = vmul.f32 0.015384615, %v206_v53 }
  0xf8   :  { %v209_v55 = vsub.f32 %v144_v8, %v208_v54  ;;  %v210_v56 = vsub.f32 %v147_v10, %v208_v54  ;;  %v211_v57 = vsub.f32 %v152_v12, %v208_v54  ;;  %v212_v58 = vsub.f32 %v155_v14, %v208_v54 }
  0xf9   :  { %v213_v59 = vsub.f32 %v160_v18, %v208_v54  ;;  %v214_v63 = vsub.f32 %v163_v24, %v208_v54  ;;  %v215_v6 = vsub.f32 %v168_v30, %v208_v54  ;;  %v216_v8 = vsub.f32 %v171_v36, %v208_v54 }
  0xfa   :  { %v218_v60 = vmul.f32 %v209_v55, %v209_v55  ;;  %v219_v61 = vmul.f32 %v210_v56, %v210_v56  ;;  %v220_v62 = vmul.f32 %v211_v57, %v211_v57  ;;  %v221_v1 = vmul.f32 %v212_v58, %v212_v58 }
  0xfb   :  { %v222_v7 = vmul.f32 %v213_v59, %v213_v59  ;;  %v223_v10 = vmul.f32 %v214_v63, %v214_v63  ;;  %v217_v14 = vsub.f32 %v176_v42, %v208_v54  ;;  %v224_v15 = vmul.f32 %v215_v6, %v215_v6 }
  0xfc   :  { %v227_v3 = vsel %vm182_vm3, %v218_v60, 0.0  ;;  %v228_v4 = vsel %vm182_vm3, %v219_v61, 0.0  ;;  %v230_v9 = vsel %vm182_vm3, %v220_v62, 0.0  ;;  %v232_v12 = vsel %vm182_vm3, %v221_v1, 0.0 }
  0xfd   :  { %v229_v5 = vadd.f32 %v228_v4, %v227_v3  ;;  %v234_v16 = vsel %vm182_vm3, %v222_v7, 0.0  ;;  %v225_v18 = vmul.f32 %v216_v8, %v216_v8  ;;  %v236_v19 = vsel %vm182_vm3, %v223_v10, 0.0 }
  0xfe   :  { %v226_v21 = vmul.f32 %v217_v14, %v217_v14  ;;  %v238_v22 = vsel %vm182_vm3, %v224_v15, 0.0  ;;  %v262_v36 = vlaneseq }
  0xff   :  { %v231_v11 = vadd.f32 %v230_v9, %v229_v5  ;;  %v240_v24 = vsel %vm182_vm3, %v225_v18, 0.0 }
 0x100   :  { %v242_v26 = vsel %vm198_vm4, %v226_v21, 0.0  ;;  %v263_v37 = vshrl.u32 %v262_v36, 7 }
 0x101   :  { %v233_v13 = vadd.f32 %v232_v12, %v231_v11 }
 0x102   :  { %v4261_v39 = vsub.s32 0, %v263_v37  ;;  %v4266_v41 = vsub.s32 1, %v263_v37 }
 0x103   :  { %v235_v17 = vadd.f32 %v234_v16, %v233_v13 }
 0x104   :  { %v4269_v42 = vrot.slane %v41_v40, %v4261_v39  ;;  %v4272_v44 = vrot.slane %v41_v40, %v4266_v41 }
 0x105   :  { %v237_v20 = vadd.f32 %v236_v19, %v235_v17 }
 0x107   :  { %v239_v23 = vadd.f32 %v238_v22, %v237_v20 }
 0x109   :  { %v241_v25 = vadd.f32 %v240_v24, %v239_v23 }
 0x10b   :  { %v243_v27 = vadd.f32 %v242_v26, %v241_v25 }
 0x10d   :  { %v244_v28 = vrot.slane %v243_v27, 4 }
 0x10f   :  { %v245_v29 = vadd.f32 %v244_v28, %v243_v27 }
 0x111   :  { %v246_v30 = vrot.slane %v245_v29, 2 }
 0x113   :  { %v247_v31 = vadd.f32 %v246_v30, %v245_v29 }
 0x115   :  { %v248_v32 = vrot.slane %v247_v31, 1 }
 0x117   :  { %v249_v33 = vadd.f32 %v248_v32, %v247_v31 }
 0x119   :  { %v250_v34 = vmul.f32 0.015384615, %v249_v33 }
 0x11b   :  { %v251_v35 = vadd.f32 1e-05, %v250_v34 }
 0x11d   :  { %4035 = vrsqrt.f32 %v251_v35 }
 0x12a   :  { %v4036_v43 = vpop.eup %4035 }
 0x12b   :  { %v253_v45 = vmul.f32 %v4036_v43, %v209_v55  ;;  %v254_v46 = vmul.f32 %v4036_v43, %v210_v56  ;;  %v255_v47 = vmul.f32 %v4036_v43, %v211_v57  ;;  %v256_v48 = vmul.f32 %v4036_v43, %v212_v58 }
 0x12c   :  { %v257_v49 = vmul.f32 %v4036_v43, %v213_v59  ;;  %v258_v50 = vmul.f32 %v4036_v43, %v214_v63  ;;  %v259_v51 = vmul.f32 %v4036_v43, %v215_v6  ;;  %v260_v52 = vmul.f32 %v4036_v43, %v216_v8 }
 0x12d   :  { %v261_v53 = vmul.f32 %v4036_v43, %v217_v14  ;;  %v266_v54 = vmul.f32 %v4269_v42, %v253_v45  ;;  %v267_v60 = vmul.f32 %v4269_v42, %v254_v46  ;;  %v268_v61 = vmul.f32 %v4269_v42, %v255_v47 }
 0x12e   :  { %v269_v62 = vmul.f32 %v4269_v42, %v256_v48  ;;  %v270_v1 = vmul.f32 %v4269_v42, %v257_v49  ;;  %v271_v55 = vmul.f32 %v4269_v42, %v258_v50  ;;  %v272_v56 = vmul.f32 %v4269_v42, %v259_v51 }
 0x12f   :  { %v273_v57 = vmul.f32 %v4269_v42, %v260_v52  ;;  %v274_v58 = vmul.f32 %v4269_v42, %v261_v53  ;;  %v4284_v59 = vadd.f32 %v4272_v44, %v266_v54  ;;  %v4287_v63 = vadd.f32 %v4272_v44, %v267_v60 }
 0x130   :  { %v4290_v3 = vadd.f32 %v4272_v44, %v268_v61  ;;  %v282_v4 = vadd.f32 %v4272_v44, %v269_v62  ;;  %v4294_v5 = vadd.f32 %v4272_v44, %v270_v1  ;;  %v4297_v6 = vadd.f32 %v4272_v44, %v271_v55 }
 0x131   :  { %v4300_v7 = vadd.f32 %v4272_v44, %v272_v56  ;;  %v4303_v9 = vadd.f32 %v4272_v44, %v273_v57  ;;  %v4306_v11 = vadd.f32 %v4272_v44, %v274_v58  ;;  %v297_v8 = vmul.f32 0.044715, %v4284_v59 }
 0x132   :  { %v298_v10 = vmul.f32 0.044715, %v4287_v63  ;;  %v299_v12 = vmul.f32 0.044715, %v4290_v3  ;;  %v300_v13 = vmul.f32 0.044715, %v282_v4 }
 0x133   :  { %v301_v14 = vmul.f32 0.044715, %v4294_v5  ;;  %v302_v15 = vmul.f32 0.044715, %v4297_v6  ;;  %v303_v16 = vmul.f32 0.044715, %v4300_v7  ;;  %v306_v17 = vmul.f32 %v297_v8, %v4284_v59 }
 0x134   :  { %v304_v18 = vmul.f32 0.044715, %v4303_v9  ;;  %v305_v19 = vmul.f32 0.044715, %v4306_v11  ;;  %v307_v20 = vmul.f32 %v298_v10, %v4287_v63  ;;  %v308_v21 = vmul.f32 %v299_v12, %v4290_v3 }
 0x135   :  { %v309_v22 = vmul.f32 %v300_v13, %v282_v4  ;;  %v310_v23 = vmul.f32 %v301_v14, %v4294_v5  ;;  %v311_v24 = vmul.f32 %v302_v15, %v4297_v6  ;;  %v312_v25 = vmul.f32 %v303_v16, %v4300_v7 }
 0x136   :  { %v313_v26 = vmul.f32 %v304_v18, %v4303_v9  ;;  %v314_v27 = vmul.f32 %v305_v19, %v4306_v11  ;;  %v315_v28 = vmul.f32 %v306_v17, %v4284_v59  ;;  %v316_v32 = vmul.f32 %v307_v20, %v4287_v63 }
 0x137   :  { %v318_v29 = vmul.f32 %v309_v22, %v282_v4  ;;  %v319_v30 = vmul.f32 %v310_v23, %v4294_v5  ;;  %v320_v31 = vmul.f32 %v311_v24, %v4297_v6  ;;  %v321_v33 = vmul.f32 %v312_v25, %v4300_v7 }
 0x138   :  { %v322_v34 = vmul.f32 %v313_v26, %v4303_v9  ;;  %v323_v35 = vmul.f32 %v314_v27, %v4306_v11  ;;  %v317_v36 = vmul.f32 %v308_v21, %v4290_v3  ;;  %v324_v50 = vadd.f32 %v315_v28, %v4284_v59 }
 0x139   :  { %v327_v37 = vadd.f32 %v318_v29, %v282_v4  ;;  %v328_v40 = vadd.f32 %v319_v30, %v4294_v5  ;;  %v329_v43 = vadd.f32 %v320_v31, %v4297_v6  ;;  %v330_v45 = vadd.f32 %v321_v33, %v4300_v7 }
 0x13a   :  { %v331_v46 = vadd.f32 %v322_v34, %v4303_v9  ;;  %v332_v47 = vadd.f32 %v323_v35, %v4306_v11  ;;  %v325_v53 = vadd.f32 %v316_v32, %v4287_v63  ;;  %v326_v54 = vadd.f32 %v317_v36, %v4290_v3 }
 0x13b   :  { %v336_v48 = vmul.f32 0.7978846, %v327_v37  ;;  %v337_v49 = vmul.f32 0.7978846, %v328_v40  ;;  %v338_v51 = vmul.f32 0.7978846, %v329_v43 }
 0x13c   :  { %v339_v52 = vmul.f32 0.7978846, %v330_v45  ;;  %v340_v60 = vmul.f32 0.7978846, %v331_v46  ;;  %v341_v61 = vmul.f32 0.7978846, %v332_v47 }
 0x13d   :  { %4037 = vtanh.f32 %v336_v48  ;;  %v333_v62 = vmul.f32 0.7978846, %v324_v50  ;;  %v334_v1 = vmul.f32 0.7978846, %v325_v53  ;;  %v335_v55 = vmul.f32 0.7978846, %v326_v54 }
 0x13e   :  { %4039 = vtanh.f32 %v337_v49  ;;  %v291_v58 = vmul.f32 0.5, %v282_v4  ;;  %v292_v12 = vmul.f32 0.5, %v4294_v5  ;;  %v293_v15 = vmul.f32 0.5, %v4297_v6  ;;  %v3947_v47 = vld [vmem:[%s5021_s3] sm:$0xff]   ;;  %v3948_v49 = vld [vmem:[%s5021_s3 + $0x28] sm:$0xff]  }
 0x13f   :  { %4041 = vtanh.f32 %v338_v51  ;;  %v294_v19 = vmul.f32 0.5, %v4300_v7  ;;  %v295_v23 = vmul.f32 0.5, %v4303_v9  ;;  %v296_v5 = vmul.f32 0.5, %v4306_v11 }
 0x140   :  { %4043 = vtanh.f32 %v339_v52  ;;  %v288_v7 = vmul.f32 0.5, %v4284_v59  ;;  %v289_v31 = vmul.f32 0.5, %v4287_v63  ;;  %v290_v11 = vmul.f32 0.5, %v4290_v3 }
 0x141   :  { %4045 = vtanh.f32 %v340_v60  ;;  %v3949_v60 = vld [vmem:[%s5021_s3 + $0x20] sm:$0xff]  }
 0x142   :  { %4047 = vtanh.f32 %v341_v61 }
 0x143   :  { %4049 = vtanh.f32 %v333_v62 }
 0x144   :  { %4051 = vtanh.f32 %v334_v1 }
 0x145   :  { %4053 = vtanh.f32 %v335_v55  ;;  %v3950_v55 = vld [vmem:[%s5023_s4 + $0x18] sm:$0xff]  }
 0x14a   :  { %v4038_v56 = vpop.eup %4037 }
 0x14b   :  { %v4040_v57 = vpop.eup %4039  ;;  %v354_v8 = vadd.f32 1.0, %v4038_v56  ;;  %v3951_v56 = vld [vmem:[%s5023_s4 + $0x10] sm:$0xff]  }
 0x14c   :  { %v4042_v10 = vpop.eup %4041  ;;  %v355_v13 = vadd.f32 1.0, %v4040_v57 }
 0x14d   :  { %v4044_v14 = vpop.eup %4043  ;;  %v356_v16 = vadd.f32 1.0, %v4042_v10  ;;  %v363_v17 = vmul.f32 %v354_v8, %v291_v58 }
 0x14e   :  { %v4046_v18 = vpop.eup %4045  ;;  %v357_v20 = vadd.f32 1.0, %v4044_v14  ;;  %v364_v21 = vmul.f32 %v355_v13, %v292_v12 }
 0x14f   :  { %v4048_v22 = vpop.eup %4047  ;;  %v358_v24 = vadd.f32 1.0, %v4046_v18  ;;  %v365_v4 = vmul.f32 %v356_v16, %v293_v15  ;;  %372 = vst.msk [vmem:[#allocation2 + $0x18] sm:$0xff] %vm182_vm3, %v363_v17 }
 0x150   :  { %v4050_v25 = vpop.eup %4049  ;;  %v359_v26 = vadd.f32 1.0, %v4048_v22  ;;  %v366_v27 = vmul.f32 %v357_v20, %v294_v19  ;;  %373 = vst.msk [vmem:[#allocation2 + $0x20] sm:$0xff] %vm182_vm3, %v364_v21 }
 0x151   :  { %v4052_v6 = vpop.eup %4051  ;;  %v367_v28 = vmul.f32 %v358_v24, %v295_v23  ;;  %374 = vst.msk [vmem:[#allocation2 + $0x28] sm:$0xff] %vm182_vm3, %v365_v4  ;;  %v351_v29 = vadd.f32 1.0, %v4050_v25 }
 0x152   :  { %v4054_v30 = vpop.eup %4053  ;;  %v368_v9 = vmul.f32 %v359_v26, %v296_v5  ;;  %375 = vst.msk [vmem:[#allocation2 + $0x30] sm:$0xff] %vm182_vm3, %v366_v27  ;;  %v352_v32 = vadd.f32 1.0, %v4052_v6 }
 0x153   :  { %376 = vst.msk [vmem:[#allocation2 + $0x38] sm:$0xff] %vm182_vm3, %v367_v28  ;;  %v353_v33 = vadd.f32 1.0, %v4054_v30  ;;  %v360_v34 = vmul.f32 %v351_v29, %v288_v7 }
 0x154   :  { %377 = vst.msk [vmem:[#allocation2 + $0x40] sm:$0x1] %vm198_vm4, %v368_v9  ;;  %v361_v35 = vmul.f32 %v352_v32, %v289_v31 }
 0x155   :  { %v362_v36 = vmul.f32 %v353_v33, %v290_v11  ;;  %369 = vst.msk [vmem:[#allocation2] sm:$0xff] %vm182_vm3, %v360_v34 }
 0x156   :  { %370 = vst.msk [vmem:[#allocation2 + $0x8] sm:$0xff] %vm182_vm3, %v361_v35 }
 0x157   :  { %371 = vst.msk [vmem:[#allocation2 + $0x10] sm:$0xff] %vm182_vm3, %v362_v36 }
 0x158   :  { %v396_v59 = vld [vmem:[#allocation2 + $0x21] ss:$2 sm:$0xff]  ;;  %v382_v50 = vld [vmem:[#allocation2 + $0x20] ss:$2 sm:$0xff] }
 0x15a   :  { %v398_v37 = vld [vmem:[#allocation2 + $0x31] ss:$2 sm:$0xff]  ;;  %v384_v51 = vld [vmem:[#allocation2 + $0x30] ss:$2 sm:$0xff] }
 0x15b   :  { %v400_v43 = vpack.c.bf16 %v398_v37, %v396_v59  ;;  %v386_v54 = vpack.c.bf16 %v384_v51, %v382_v50  ;;  %v547_v62 = vld [vmem:[#allocation2 + $0x32] ss:$2 sm:$0xff] }
 0x15d   :  { %v392_v63 = vld [vmem:[#allocation2 + $0x1] ss:$2 sm:$0xff]  ;;  %v378_v45 = vld [vmem:[#allocation2] ss:$2 sm:$0xff] }
 0x15e   :  { %v394_v40 = vld [vmem:[#allocation2 + $0x11] ss:$2 sm:$0xff]  ;;  %v380_v46 = vld [vmem:[#allocation2 + $0x10] ss:$2 sm:$0xff] }
 0x15f   :  { %v399_v3 = vpack.c.bf16 %v394_v40, %v392_v63  ;;  %v385_v48 = vpack.c.bf16 %v380_v46, %v378_v45  ;;  %v541_v52 = vld [vmem:[#allocation2 + $0x2] ss:$2 sm:$0xff]  ;;  %v543_v53 = vld [vmem:[#allocation2 + $0x12] ss:$2 sm:$0xff] }
 0x160   :  { %v548_v61 = vpack.c.bf16 %v543_v53, %v541_v52 }
 0x161   :  { %3629 = vmatprep.mubr.msk.bf16.mxu1 %vm182_vm3, %v399_v3 }
 0x162   :  { %3630 = vmatmul.mubr.msk.bf16.vlgmr.msra.gmra.mxu1 %vm182_vm3, %v400_v43 }
 0x163   :  { %3634 = vmatpush3.bf16.msra.mxu1 %v4248_v38  ;;  %3637 = vmatprep.mubr.msk.bf16.mxu1 %vm182_vm3, %v385_v48  ;;  %v545_v38 = vld [vmem:[#allocation2 + $0x22] ss:$2 sm:$0xff] }
 0x164   :  { %3635 = vmatprep.subr.bf16.mxu1 %v3947_v47  ;;  %v549_v1 = vpack.c.bf16 %v547_v62, %v545_v38 }
 0x167   :  { %3636 = vmatpush3.bf16.msra.mxu1 %v3947_v47 }
 0x168   :  { %3641 = vmatprep.subr.bf16.mxu1 %v3948_v49 }
 0x16a   :  { %3638 = vmatmul.mubr.msk.bf16.vlgmr.msra.gmra.mxu1 %vm182_vm3, %v386_v54 }
 0x16b   :  { %3642 = vmatpush3.bf16.msra.mxu1 %v3948_v49  ;;  %3645 = vmatprep.mubr.msk.bf16.mxu1 %vm182_vm3, %v548_v61 }
 0x16c   :  { %3643 = vmatprep.subr.bf16.mxu1 %v3949_v60 }
 0x16f   :  { %3644 = vmatpush3.bf16.msra.mxu1 %v3949_v60 }
 0x170   :  { %3649 = vmatprep.subr.bf16.mxu1 %v4125_v0 }
 0x172   :  { %3646 = vmatmul.mubr.msk.bf16.vlgmr.msra.gmra.mxu1 %vm182_vm3, %v549_v1 }
 0x173   :  { %3653 = vmatprep.mubr.msk.bf16.mxu1 %vm4126_vm1, %v4125_v0  ;;  %3650 = vmatpush3.bf16.msra.mxu1 %v3950_v55 }
 0x174   :  { %3651 = vmatprep.subr.bf16.mxu1 %v4125_v0 }
 0x177   :  { %3652 = vmatpush3.bf16.msra.mxu1 %v3951_v56 }
 0x178   :  { %3657 = vmatprep.subr.bf16.mxu1 %v4125_v0 }
 0x222   :  { %v3631_v57 = vpop.f32.mrf.mxu1 }
 0x224   :  { %v458_v58 = vpop.f32.mrf.mxu1 }
 0x226   :  { %v3632_v8 = vpop.f32.mrf.mxu1 }
 0x228   :  { %v461_v10 = vpop.f32.mrf.mxu1 }
 0x22a   :  { %v3639_v12 = vpop.f32.mrf.mxu1 }
 0x22b   :  { %v534_v16 = vadd.f32 %v3639_v12, %v3631_v57  ;;  %v3952_v57 = vld [vmem:[%s5023_s4 + $0x8] sm:$0xff]  }
 0x22c   :  { %v525_v13 = vpop.f32.mrf.mxu1 }
 0x22d   :  { %v526_v18 = vadd.f32 %v525_v13, %v458_v58 }
 0x22e   :  { %v3640_v14 = vpop.f32.mrf.mxu1 }
 0x22f   :  { %v537_v21 = vadd.f32 %v3640_v14, %v3632_v8  ;;  %v3953_v8 = vld [vmem:[%s5023_s4] sm:$0xff]  }
 0x230   :  { %v528_v15 = vpop.f32.mrf.mxu1 }
 0x231   :  { %v529_v26 = vadd.f32 %v528_v15, %v461_v10 }
 0x232   :  { %v3647_v17 = vpop.f32.mrf.mxu1 }
 0x233   :  { %v624_v19 = vadd.f32 %v3647_v17, %v534_v16 }
 0x234   :  { %v607_v20 = vpop.f32.mrf.mxu1 }
 0x235   :  { %v632_v22 = vmul.f32 0.044715, %v624_v19  ;;  %v622_v23 = vadd.f32 %v607_v20, %v526_v18  ;;  %v628_v46 = vmul.f32 0.5, %v624_v19 }
 0x236   :  { %v3648_v24 = vpop.f32.mrf.mxu1 }
 0x237   :  { %v636_v4 = vmul.f32 %v632_v22, %v624_v19  ;;  %v630_v25 = vmul.f32 0.044715, %v622_v23  ;;  %v625_v5 = vadd.f32 %v3648_v24, %v537_v21  ;;  %v626_v49 = vmul.f32 0.5, %v622_v23 }
 0x238   :  { %v610_v27 = vpop.f32.mrf.mxu1 }
 0x239   :  { %v640_v6 = vmul.f32 %v636_v4, %v624_v19  ;;  %v634_v28 = vmul.f32 %v630_v25, %v622_v23  ;;  %v633_v7 = vmul.f32 0.044715, %v625_v5  ;;  %v623_v29 = vadd.f32 %v610_v27, %v529_v26 }
 0x23a   :  { %v629_v53 = vmul.f32 0.5, %v625_v5 }
 0x23b   :  { %v644_v30 = vadd.f32 %v640_v6, %v624_v19  ;;  %v638_v9 = vmul.f32 %v634_v28, %v622_v23  ;;  %v637_v31 = vmul.f32 %v633_v7, %v625_v5  ;;  %v631_v32 = vmul.f32 0.044715, %v623_v29 }
 0x23c   :  { %v627_v38 = vmul.f32 0.5, %v623_v29 }
 0x23d   :  { %v648_v11 = vmul.f32 0.7978846, %v644_v30  ;;  %v642_v33 = vadd.f32 %v638_v9, %v622_v23  ;;  %v641_v34 = vmul.f32 %v637_v31, %v625_v5  ;;  %v635_v35 = vmul.f32 %v631_v32, %v623_v29 }
 0x23f   :  { %4055 = vtanh.f32 %v648_v11  ;;  %v646_v36 = vmul.f32 0.7978846, %v642_v33  ;;  %v645_v59 = vadd.f32 %v641_v34, %v625_v5  ;;  %v639_v37 = vmul.f32 %v635_v35, %v623_v29 }
 0x241   :  { %4057 = vtanh.f32 %v646_v36  ;;  %v649_v63 = vmul.f32 0.7978846, %v645_v59  ;;  %v643_v40 = vadd.f32 %v639_v37, %v623_v29  ;;  %v4407_v37 = vld [vmem:[%s5024_s6 + $0x8] sm:$0xff]  }
 0x242   :  { %3666 = vmatpush3.bf16.msra.mxu0 %v4407_v37 }
 0x243   :  { %4059 = vtanh.f32 %v649_v63  ;;  %v647_v43 = vmul.f32 0.7978846, %v643_v40  ;;  %3667 = vmatprep.subr.bf16.mxu0 %v4125_v0 }
 0x245   :  { %4061 = vtanh.f32 %v647_v43 }
 0x24c   :  { %v4056_v45 = vpop.eup %4055 }
 0x24d   :  { %v656_v3 = vadd.f32 1.0, %v4056_v45 }
 0x24e   :  { %v4058_v47 = vpop.eup %4057 }
 0x24f   :  { %v660_v48 = vmul.f32 %v656_v3, %v628_v46  ;;  %v654_v50 = vadd.f32 1.0, %v4058_v47 }
 0x250   :  { %v4060_v51 = vpop.eup %4059 }
 0x251   :  { %664 = vst.msk [vmem:[#allocation3 + $0x10] sm:$0xff] %vm182_vm3, %v660_v48  ;;  %v658_v52 = vmul.f32 %v654_v50, %v626_v49  ;;  %v657_v54 = vadd.f32 1.0, %v4060_v51  ;;  %v4416_v51 = vld [vmem:[%s5024_s6] sm:$0xff]  }
 0x252   :  { %v4062_v60 = vpop.eup %4061  ;;  %3668 = vmatpush3.bf16.msra.mxu0 %v4416_v51 }
 0x253   :  { %662 = vst.msk [vmem:[#allocation3] sm:$0xff] %vm182_vm3, %v658_v52  ;;  %v661_v61 = vmul.f32 %v657_v54, %v629_v53  ;;  %v655_v62 = vadd.f32 1.0, %v4062_v60  ;;  %3685 = vmatprep.subr.bf16.mxu0 %v4125_v0 }
 0x255   :  { %665 = vst.msk [vmem:[#allocation3 + $0x18] sm:$0xff] %vm182_vm3, %v661_v61  ;;  %v659_v1 = vmul.f32 %v655_v62, %v627_v38  ;;  %v42_v62 = vld [vmem:[%s5025_s5] sm:$0x3] }
 0x257   :  { %663 = vst.msk [vmem:[#allocation3 + $0x8] sm:$0xff] %vm182_vm3, %v659_v1 }
 0x25c   :  { %v677_v56 = vld [vmem:[#allocation3 + $0x11] ss:$2 sm:$0xff]  ;;  %v668_v12 = vld [vmem:[#allocation3 + $0x10] ss:$2 sm:$0xff] }
 0x25e   :  { %v675_v55 = vld [vmem:[#allocation3 + $0x1] ss:$2 sm:$0xff]  ;;  %v666_v10 = vld [vmem:[#allocation3] ss:$2 sm:$0xff] }
 0x25f   :  { %v678_v58 = vpack.c.bf16 %v677_v56, %v675_v55  ;;  %v669_v13 = vpack.c.bf16 %v668_v12, %v666_v10  ;;  %v4424_v55 = vrot.slane %v42_v62, %v4261_v39 }
 0x261   :  { %3654 = vmatmul.mubr.msk.bf16.vlgmr.msra.gmra.mxu1 %vm182_vm3, %v678_v58 }
 0x262   :  { %3658 = vmatpush3.bf16.msra.mxu1 %v3952_v57  ;;  %3661 = vmatprep.mubr.msk.bf16.mxu1 %vm4126_vm1, %v4125_v0 }
 0x263   :  { %3659 = vmatprep.subr.bf16.mxu1 %v4125_v0 }
 0x266   :  { %3660 = vmatpush3.bf16.msra.mxu1 %v3953_v8  ;;  %v4428_v8 = vrot.slane %v42_v62, %v4266_v41  ;;  %v3982_v62 = vld [vmem:[%s5026_s8 + $0xf8] sm:$0xff]  }
 0x267   :  { %3673 = vmatprep.subr.bf16.mxu1 %v4125_v0 }
 0x269   :  { %3662 = vmatmul.mubr.msk.bf16.vlgmr.msra.gmra.mxu1 %vm182_vm3, %v669_v13 }
 0x26a   :  { %3681 = vmatprep.mubr.msk.bf16.mxu1 %vm4126_vm1, %v4125_v0 }
 0x321   :  { %v733_v14 = vpop.f32.mrf.mxu1 }
 0x323   :  { %v3655_v15 = vpop.f32.mrf.mxu1 }
 0x324   :  { %v4434_v15 = vld [vmem:[#allocation4] sm:$0xff] }
 0x325   :  { %v736_v16 = vpop.f32.mrf.mxu1 }
 0x327   :  { %v3656_v17 = vpop.f32.mrf.mxu1 }
 0x328   :  { %v3957_v17 = vld [vmem:[%s5026_s8 + $0x18] sm:$0xff]  }
 0x329   :  { %v789_v18 = vpop.f32.mrf.mxu1 }
 0x32a   :  { %v790_v19 = vadd.f32 %v789_v18, %v733_v14  ;;  %v3958_v18 = vld [vmem:[%s5026_s8 + $0x50] sm:$0xff]  }
 0x32b   :  { %v3663_v20 = vpop.f32.mrf.mxu1 }
 0x32c   :  { %v798_v21 = vmul.f32 0.044715, %v790_v19  ;;  %v796_v9 = vmul.f32 0.5, %v790_v19  ;;  %v3960_v20 = vld [vmem:[%s5026_s8 + $0x48] sm:$0xff]  }
 0x32d   :  { %v792_v22 = vpop.f32.mrf.mxu1 }
 0x32e   :  { %v793_v23 = vadd.f32 %v792_v22, %v736_v16  ;;  %v800_v24 = vmul.f32 %v798_v21, %v790_v19  ;;  %v3956_v16 = vld [vmem:[%s5026_s8 + $0x58] sm:$0xff]   ;;  %v3961_v21 = vld [vmem:[%s5026_s8 + $0x8] sm:$0xff]   ;;  %v3962_v22 = vld [vmem:[%s5026_s8 + $0x40] sm:$0xff]  }
 0x32f   :  { %v3664_v4 = vpop.f32.mrf.mxu1  ;;  %3674 = vmatpush3.bf16.msra.mxu1 %v3956_v16  ;;  %v3990_v16 = vld [vmem:[%s5020_s0 + $0x34] sm:$0xff]  }
 0x330   :  { %v799_v25 = vmul.f32 0.044715, %v793_v23  ;;  %v802_v5 = vmul.f32 %v800_v24, %v790_v19  ;;  %v797_v34 = vmul.f32 0.5, %v793_v23  ;;  %3675 = vmatprep.subr.bf16.mxu1 %v4434_v15  ;;  %v3203_v24 = vld [vmem:[%s5027_s7] ss:$0 sm:$0xff] }
 0x332   :  { %v804_v26 = vadd.f32 %v802_v5, %v790_v19  ;;  %v801_v27 = vmul.f32 %v799_v25, %v793_v23  ;;  %v3959_v19 = vld [vmem:[%s5026_s8 + $0x10] sm:$0xff]  }
 0x333   :  { %3676 = vmatpush3.bf16.msra.mxu1 %v3958_v18 }
 0x334   :  { %v806_v6 = vmul.f32 0.7978846, %v804_v26  ;;  %v803_v28 = vmul.f32 %v801_v27, %v793_v23  ;;  %3677 = vmatprep.subr.bf16.mxu1 %v4434_v15 }
 0x336   :  { %4063 = vtanh.f32 %v806_v6  ;;  %v805_v7 = vadd.f32 %v803_v28, %v793_v23  ;;  %v3963_v23 = vld [vmem:[%s5026_s8] sm:$0xff]  }
 0x337   :  { %3678 = vmatpush3.bf16.msra.mxu1 %v3960_v20 }
 0x338   :  { %v807_v29 = vmul.f32 0.7978846, %v805_v7  ;;  %3679 = vmatprep.subr.bf16.mxu1 %v4434_v15 }
 0x33a   :  { %4065 = vtanh.f32 %v807_v29  ;;  %v3964_v29 = vld [vmem:[%s5026_s8 + $0x98] sm:$0xff]  }
 0x33b   :  { %3680 = vmatpush3.bf16.msra.mxu1 %v3962_v22 }
 0x33c   :  { %3697 = vmatprep.subr.bf16.mxu1 %v4434_v15 }
 0x343   :  { %v4064_v30 = vpop.eup %4063 }
 0x344   :  { %v810_v31 = vadd.f32 1.0, %v4064_v30 }
 0x346   :  { %v812_v32 = vmul.f32 %v810_v31, %v796_v9 }
 0x347   :  { %v4066_v11 = vpop.eup %4065 }
 0x348   :  { %v814_v33 = vsel %vm182_vm3, %v812_v32, 0.0  ;;  %v811_v35 = vadd.f32 1.0, %v4066_v11 }
 0x349   :  { %815 = vadd.xlane.f32.xlu0 %v814_v33  ;;  %v3965_v33 = vld [vmem:[%s5026_s8 + $0xd8] sm:$0xff]  }
 0x34a   :  { %v813_v36 = vmul.f32 %v811_v35, %v797_v34  ;;  %v3966_v34 = vld [vmem:[%s5026_s8 + $0x90] sm:$0xff]  }
 0x34b   :  { %v3967_v35 = vld [vmem:[%s5026_s8 + $0xd0] sm:$0xff]  }
 0x34c   :  { %v817_v59 = vsel %vm182_vm3, %v813_v36, 0.0 }
 0x34d   :  { %818 = vadd.xlane.f32.xlu0 %v817_v59 }
 0x3d2   :  { %v816_v63 = vpop.xlane.xlu0 %815 }
 0x3d3   :  { %v821_v40 = vmul.f32 0.03125, %v816_v63  ;;  %v3968_v63 = vld [vmem:[%s5026_s8 + $0x88] sm:$0xff]  }
 0x3d5   :  { %v823_v43 = vsub.f32 %v812_v32, %v821_v40 }
 0x3d6   :  { %v819_v45 = vpop.xlane.xlu0 %818 }
 0x3d7   :  { %v822_v46 = vmul.f32 0.03125, %v819_v45  ;;  %v825_v3 = vmul.f32 %v823_v43, %v823_v43  ;;  %v3970_v45 = vld [vmem:[%s5026_s8 + $0x80] sm:$0xff]  }
 0x3d9   :  { %v824_v47 = vsub.f32 %v813_v36, %v822_v46  ;;  %v827_v48 = vsel %vm182_vm3, %v825_v3, 0.0  ;;  %v3971_v46 = vld [vmem:[%s5026_s8 + $0xc0] sm:$0xff]   ;;  %v3972_v3 = vld [vmem:[%s5026_s8 + $0x78] sm:$0xff]  }
 0x3da   :  { %828 = vadd.xlane.f32.xlu1 %v827_v48  ;;  %v3973_v48 = vld [vmem:[%s5026_s8 + $0x70] sm:$0xff]  }
 0x3db   :  { %v826_v49 = vmul.f32 %v824_v47, %v824_v47 }
 0x3dd   :  { %v830_v50 = vsel %vm182_vm3, %v826_v49, 0.0  ;;  %v3976_v49 = vld [vmem:[%s5026_s8 + $0x30] sm:$0xff]  }
 0x3de   :  { %831 = vadd.xlane.f32.xlu1 %v830_v50  ;;  %v3975_v50 = vld [vmem:[%s5026_s8 + $0x68] sm:$0xff]  }
 0x463   :  { %v829_v52 = vpop.xlane.xlu1 %828 }
 0x464   :  { %v833_v53 = vmul.f32 0.03125, %v829_v52  ;;  %v3978_v52 = vld [vmem:[%s5026_s8 + $0x28] sm:$0xff]  }
 0x466   :  { %v835_v54 = vadd.f32 1e-05, %v833_v53  ;;  %v3977_v53 = vld [vmem:[%s5026_s8 + $0x60] sm:$0xff]  }
 0x467   :  { %v832_v60 = vpop.xlane.xlu1 %831 }
 0x468   :  { %4067 = vrsqrt.f32 %v835_v54  ;;  %v834_v61 = vmul.f32 0.03125, %v832_v60  ;;  %v3979_v54 = vld [vmem:[%s5026_s8 + $0x20] sm:$0xff]   ;;  %v3980_v60 = vld [vmem:[%s5026_s8 + $0xb8] sm:$0xff]  }
 0x46a   :  { %v836_v38 = vadd.f32 1e-05, %v834_v61 }
 0x46c   :  { %4069 = vrsqrt.f32 %v836_v38 }
 0x475   :  { %v4068_v1 = vpop.eup %4067 }
 0x476   :  { %v839_v56 = vmul.f32 %v4068_v1, %v823_v43  ;;  %v3969_v43 = vld [vmem:[%s5026_s8 + $0xc8] sm:$0xff]   ;;  %v3981_v1 = vld [vmem:[%s5026_s8 + $0xb0] sm:$0xff]  }
 0x478   :  { %v845_v0 = vmul.f32 %v4424_v55, %v839_v56 }
 0x479   :  { %v4070_v57 = vpop.eup %4069 }
 0x47a   :  { %v840_v58 = vmul.f32 %v4070_v57, %v824_v47  ;;  %v851_v12 = vadd.f32 %v4428_v8, %v845_v0  ;;  %v3974_v47 = vld [vmem:[%s5026_s8 + $0x38] sm:$0xff]   ;;  %v3984_v57 = vld [vmem:[%s5026_s8 + $0xf0] sm:$0xff]   ;;  %v3983_v0 = vld [vmem:[%s5026_s8 + $0xa8] sm:$0xff]  }
 0x47c   :  { %v846_v10 = vmul.f32 %v4424_v55, %v840_v58  ;;  %v3986_v58 = vld [vmem:[%s5026_s8 + $0xe8] sm:$0xff]  }
 0x47e   :  { %v852_v13 = vadd.f32 %v4428_v8, %v846_v10  ;;  %v3985_v10 = vld [vmem:[%s5026_s8 + $0xa0] sm:$0xff]  }
 0x480   :  { %v853_v14 = vpack.c.bf16 %v852_v13, %v851_v12  ;;  %v3987_v12 = vld [vmem:[%s5026_s8 + $0xe0] sm:$0xff]  }
 0x482   :  { %3670 = vmatmul.mubr.msk.bf16.vlgmr.msra.gmra.mxu0 %vm182_vm3, %v853_v14  ;;  %v3988_v14 = vld [vmem:[%s5020_s0 + $0x24] sm:$0xff]  }
 0x483   :  { %3693 = vmatprep.mubr.msk.bf16.mxu0 %vm4126_vm1, %v4434_v15  ;;  %3686 = vmatpush3.bf16.msra.mxu0 %v3957_v17 }
 0x484   :  { %3687 = vmatprep.subr.bf16.mxu0 %v4434_v15 }
 0x487   :  { %3688 = vmatpush3.bf16.msra.mxu0 %v3959_v19 }
 0x488   :  { %3689 = vmatprep.subr.bf16.mxu0 %v4434_v15 }
 0x48b   :  { %3690 = vmatpush3.bf16.msra.mxu0 %v3961_v21 }
 0x48c   :  { %3691 = vmatprep.subr.bf16.mxu0 %v4434_v15 }
 0x48f   :  { %3692 = vmatpush3.bf16.msra.mxu0 %v3963_v23 }
 0x490   :  { %3709 = vmatprep.subr.bf16.mxu0 %v4434_v15 }
 0x542   :  { %v909_v4 = vpop.f32.mrf.mxu0 }
 0x543   :  { %v4473_v25 = vadd.f32 %v3203_v24, %v909_v4 }
 0x544   :  { %v3671_v5 = vpop.f32.mrf.mxu0 }
 0x545   :  { %916 = vst [vmem:[#allocation4 + $0x2] sm:$0xff] %v4473_v25 }
 0x546   :  { %v912_v26 = vpop.f32.mrf.mxu0 }
 0x547   :  { %v4476_v27 = vadd.f32 %v3203_v24, %v912_v26 }
 0x548   :  { %v3672_v6 = vpop.f32.mrf.mxu0 }
 0x549   :  { %917 = vst [vmem:[#allocation4 + $0xa] sm:$0xff] %v4476_v27  ;;  %v1080_v28 = vpack.c.bf16 %v4476_v27, %v4473_v25 }
 0x54b   :  { %1412 = vrot.lane.b32.xlu1 %v1080_v28, %s4127_s30 }
 0x54c   :  { %v929_v7 = vld [vmem:[#allocation4 + $0x1] sm:$0xff] }
 0x54d   :  { %v918_v9 = vld [vmem:[#allocation4] sm:$0xff] }
 0x550   :  { %v930_v30 = vld [vmem:[#allocation4 + $0x9] sm:$0xff] }
 0x551   :  { %v919_v31 = vld [vmem:[#allocation4 + $0x8] sm:$0xff]  ;;  %v931_v32 = vpack.c.bf16 %v930_v30, %v929_v7 }
 0x552   :  { %v920_v11 = vpack.c.bf16 %v919_v31, %v918_v9  ;;  %v1160_v36 = vld [vmem:[#allocation4 + $0x3] sm:$0xff]  ;;  %v1161_v59 = vld [vmem:[#allocation4 + $0xb] sm:$0xff] }
 0x553   :  { %1261 = vrot.lane.b32.xlu0 %v931_v32, %s4127_s30  ;;  %3682 = vmatmul.mubr.msk.bf16.vlgmr.msra.gmra.mxu1 %vm965_vm5, %v931_v32  ;;  %v1162_v40 = vpack.c.bf16 %v1161_v59, %v1160_v36 }
 0x554   :  { %3694 = vmatmul.mubr.msk.bf16.vlgmr.msra.gmra.mxu0 %vm965_vm5, %v920_v11  ;;  %3698 = vmatpush3.bf16.msra.mxu1 %v3964_v29 }
 0x555   :  { %3710 = vmatpush3.bf16.msra.mxu0 %v3965_v33  ;;  %3699 = vmatprep.subr.bf16.mxu1 %v4434_v15 }
 0x556   :  { %3711 = vmatprep.subr.bf16.mxu0 %v4434_v15  ;;  %1332 = vrot.lane.b32.xlu1 %v920_v11, %s4127_s30 }
 0x557   :  { %3705 = vmatprep.mubr.msk.bf16.mxu1 %vm4126_vm1, %v4434_v15  ;;  %3717 = vmatprep.mubr.msk.bf16.mxu0 %vm4126_vm1, %v4434_v15 }
 0x558   :  { %3700 = vmatpush3.bf16.msra.mxu1 %v3966_v34 }
 0x559   :  { %3712 = vmatpush3.bf16.msra.mxu0 %v3967_v35  ;;  %3701 = vmatprep.subr.bf16.mxu1 %v4434_v15 }
 0x55a   :  { %3713 = vmatprep.subr.bf16.mxu0 %v4434_v15  ;;  %1494 = vrot.lane.b32.xlu1 %v1162_v40, %s4127_s30 }
 0x55c   :  { %3702 = vmatpush3.bf16.msra.mxu1 %v3968_v63 }
 0x55d   :  { %3714 = vmatpush3.bf16.msra.mxu0 %v3969_v43  ;;  %3703 = vmatprep.subr.bf16.mxu1 %v4434_v15 }
 0x55e   :  { %3715 = vmatprep.subr.bf16.mxu0 %v4434_v15 }
 0x560   :  { %3704 = vmatpush3.bf16.msra.mxu1 %v3970_v45 }
 0x561   :  { %3716 = vmatpush3.bf16.msra.mxu0 %v3971_v46  ;;  %3721 = vmatprep.subr.bf16.mxu1 %v4434_v15 }
 0x562   :  { %3733 = vmatprep.subr.bf16.mxu0 %v4434_v15 }
 0x563   :  { %3706 = vmatmul.mubr.msk.bf16.vlgmr.msra.gmra.mxu1 %vm965_vm5, %v1080_v28 }
 0x564   :  { %3718 = vmatmul.mubr.msk.bf16.vlgmr.msra.gmra.mxu0 %vm965_vm5, %v1162_v40  ;;  %3722 = vmatpush3.bf16.msra.mxu1 %v3972_v3 }
 0x565   :  { %3723 = vmatprep.subr.bf16.mxu1 %v4434_v15  ;;  %3734 = vmatpush3.bf16.msra.mxu0 %v3974_v47 }
 0x566   :  { %3735 = vmatprep.subr.bf16.mxu0 %v4434_v15  ;;  %3729 = vmatprep.mubr.msk.bf16.mxu1 %vm4126_vm1, %v4434_v15 }
 0x567   :  { %3741 = vmatprep.mubr.msk.bf16.mxu0 %vm4126_vm1, %v4434_v15 }
 0x568   :  { %3724 = vmatpush3.bf16.msra.mxu1 %v3973_v48 }
 0x569   :  { %3725 = vmatprep.subr.bf16.mxu1 %v4434_v15  ;;  %3736 = vmatpush3.bf16.msra.mxu0 %v3976_v49 }
 0x56a   :  { %3737 = vmatprep.subr.bf16.mxu0 %v4434_v15 }
 0x56c   :  { %3726 = vmatpush3.bf16.msra.mxu1 %v3975_v50 }
 0x56d   :  { %3727 = vmatprep.subr.bf16.mxu1 %v4434_v15  ;;  %3738 = vmatpush3.bf16.msra.mxu0 %v3978_v52 }
 0x56e   :  { %3739 = vmatprep.subr.bf16.mxu0 %v4434_v15 }
 0x570   :  { %3728 = vmatpush3.bf16.msra.mxu1 %v3977_v53 }
 0x571   :  { %3745 = vmatprep.subr.bf16.mxu1 %v4434_v15  ;;  %3740 = vmatpush3.bf16.msra.mxu0 %v3979_v54 }
 0x572   :  { %3757 = vmatprep.subr.bf16.mxu0 %v4434_v15 }
 0x5bd   :  { %v1413_v61 = vpop.permute.xlu1 %1412 }
 0x5c5   :  { %v1262_v38 = vpop.permute.xlu0 %1261 }
 0x5c6   :  { %3730 = vmatmul.mubr.msk.bf16.vlgmr.msra.gmra.mxu1 %vm965_vm5, %v1262_v38 }
 0x5c7   :  { %3746 = vmatpush3.bf16.msra.mxu1 %v3980_v60  ;;  %3753 = vmatprep.mubr.msk.bf16.mxu1 %vm4126_vm1, %v4434_v15 }
 0x5c8   :  { %3747 = vmatprep.subr.bf16.mxu1 %v4434_v15  ;;  %v1333_v56 = vpop.permute.xlu1 %1332 }
 0x5c9   :  { %3742 = vmatmul.mubr.msk.bf16.vlgmr.msra.gmra.mxu0 %vm965_vm5, %v1333_v56 }
 0x5ca   :  { %3758 = vmatpush3.bf16.msra.mxu0 %v3982_v62  ;;  %3765 = vmatprep.mubr.msk.bf16.mxu0 %vm4126_vm1, %v4434_v15 }
 0x5cb   :  { %3748 = vmatpush3.bf16.msra.mxu1 %v3981_v1  ;;  %3759 = vmatprep.subr.bf16.mxu0 %v4434_v15 }
 0x5cc   :  { %3749 = vmatprep.subr.bf16.mxu1 %v4434_v15  ;;  %v1495_v13 = vpop.permute.xlu1 %1494 }
 0x5ce   :  { %3760 = vmatpush3.bf16.msra.mxu0 %v3984_v57 }
 0x5cf   :  { %3750 = vmatpush3.bf16.msra.mxu1 %v3983_v0  ;;  %3761 = vmatprep.subr.bf16.mxu0 %v4434_v15 }
 0x5d0   :  { %3751 = vmatprep.subr.bf16.mxu1 %v4434_v15 }
 0x5d2   :  { %3762 = vmatpush3.bf16.msra.mxu0 %v3986_v58 }
 0x5d3   :  { %3752 = vmatpush3.bf16.msra.mxu1 %v3985_v10  ;;  %3763 = vmatprep.subr.bf16.mxu0 %v4434_v15 }
 0x5d4   :  { %3769 = vmatprep.subr.bf16.mxu1 %v4434_v15 }
 0x5d6   :  { %3754 = vmatmul.mubr.msk.bf16.vlgmr.msra.gmra.mxu1 %vm965_vm5, %v1413_v61  ;;  %3764 = vmatpush3.bf16.msra.mxu0 %v3987_v12 }
 0x5d7   :  { %3770 = vmatpush3.bf16.msra.mxu1 %v4197_v2  ;;  %3771 = vmatprep.mubr.msk.bf16.mxu1 %vm4126_vm1, %v4434_v15  ;;  %v3989_v2 = vld [vmem:[%s5020_s0 + $0x2c] sm:$0xff]  }
 0x5d8   :  { %3831 = vmatprep.subr.bf16.mxu1 %v4434_v15 }
 0x5d9   :  { %3766 = vmatmul.mubr.msk.bf16.vlgmr.msra.gmra.mxu0 %vm965_vm5, %v1495_v13 }
 0x5de   :  { %3772 = vmatmul.mubr.msk.bf16.vlgmr.msra.gmra.mxu1 %vm90_vm2, %v3988_v14 }
 0x5df   :  { %3775 = vmatprep.mubr.msk.bf16.mxu1 %vm4126_vm1, %v4434_v15  ;;  %3832 = vmatpush3.bf16.msra.mxu1 %v4407_v37  ;;  %v3991_v37 = vld [vmem:[%s5020_s0 + $0x3c] sm:$0xff]  }
 0x5e0   :  { %3833 = vmatprep.subr.bf16.mxu1 %v4434_v15 }
 0x5e3   :  { %3834 = vmatpush3.bf16.msra.mxu1 %v4416_v51  ;;  %v3992_v51 = vld [vmem:[%s5020_s0 + $0x44] ss:$0 sps:$4 sm:$0x11]  }
 0x5e4   :  { %3851 = vmatprep.subr.bf16.mxu1 %v4434_v15 }
 0x5e6   :  { %3776 = vmatmul.mubr.msk.bf16.gmra.mxu1 %vm90_vm2, %v3989_v2 }
 0x5e7   :  { %3779 = vmatprep.mubr.msk.bf16.mxu1 %vm4126_vm1, %v4434_v15 }
 0x5ee   :  { %3780 = vmatmul.mubr.msk.bf16.gmra.mxu1 %vm90_vm2, %v3990_v16 }
 0x5ef   :  { %3783 = vmatprep.mubr.msk.bf16.mxu1 %vm4126_vm1, %v4434_v15 }
 0x5f6   :  { %3784 = vmatmul.mubr.msk.bf16.gmra.mxu1 %vm90_vm2, %v3991_v37 }
 0x5f7   :  { %3787 = vmatprep.mubr.msk.bf16.mxu1 %vm4126_vm1, %v4434_v15 }
 0x5fe   :  { %3788 = vmatmul.mubr.msk.bf16.gmra.mxu1 %vm90_vm2, %v3992_v51 }
 0x5ff   :  { %3835 = vmatprep.mubr.msk.bf16.mxu1 %vm4126_vm1, %v4434_v15 }
 0x613   :  { %v1003_v17 = vpop.f32.mrf.mxu1 }
 0x614   :  { %v1071_v18 = vpop.f32.mrf.mxu0 }
 0x615   :  { %v1072_v19 = vadd.f32 %v1071_v18, %v1003_v17  ;;  %v3683_v20 = vpop.f32.mrf.mxu1 }
 0x616   :  { %v3695_v21 = vpop.f32.mrf.mxu0  ;;  %v3994_v20 = vld [vmem:[%s5021_s3 + $0x10] sm:$0xff]  }
 0x617   :  { %v1006_v22 = vpop.f32.mrf.mxu1 }
 0x618   :  { %v1074_v23 = vpop.f32.mrf.mxu0 }
 0x619   :  { %v1075_v24 = vadd.f32 %v1074_v23, %v1006_v22  ;;  %v3684_v4 = vpop.f32.mrf.mxu1 }
 0x61a   :  { %v3696_v5 = vpop.f32.mrf.mxu0 }
 0x623   :  { %v1151_v26 = vpop.f32.mrf.mxu1 }
 0x624   :  { %v1158_v6 = vadd.f32 %v1151_v26, %v1072_v19  ;;  %v1233_v28 = vpop.f32.mrf.mxu0  ;;  %v3993_v19 = vld [vmem:[%s5021_s3 + $0x18] sm:$0xff]  }
 0x625   :  { %v3707_v7 = vpop.f32.mrf.mxu1  ;;  %3791 = vmatprep.subr.bf16.mxu0 %v3993_v19 }
 0x626   :  { %v4638_v29 = vadd.f32 %v1233_v28, %v1158_v6  ;;  %v3719_v30 = vpop.f32.mrf.mxu0  ;;  %3792 = vmatpush3.bf16.msra.mxu0 %v3993_v19 }
 0x627   :  { %v1154_v9 = vpop.f32.mrf.mxu1  ;;  %3793 = vmatprep.subr.bf16.mxu0 %v3994_v20 }
 0x628   :  { %v1159_v31 = vadd.f32 %v1154_v9, %v1075_v24  ;;  %v1236_v32 = vpop.f32.mrf.mxu0 }
 0x629   :  { %v3708_v11 = vpop.f32.mrf.mxu1 }
 0x62a   :  { %v4640_v33 = vadd.f32 %v1236_v32, %v1159_v31  ;;  %v3720_v34 = vpop.f32.mrf.mxu0  ;;  %3794 = vmatpush3.bf16.msra.mxu0 %v3994_v20  ;;  %v4662_v11 = vld [vmem:[%s5021_s3 + $0x8] sm:$0xff]  }
 0x62b   :  { %3799 = vmatprep.subr.bf16.mxu0 %v4662_v11 }
 0x686   :  { %v1324_v35 = vpop.f32.mrf.mxu1 }
 0x688   :  { %v3731_v36 = vpop.f32.mrf.mxu1 }
 0x689   :  { %v1395_v59 = vpop.f32.mrf.mxu0 }
 0x68a   :  { %v1327_v63 = vpop.f32.mrf.mxu1  ;;  %v1396_v40 = vadd.f32 %v1395_v59, %v1324_v35 }
 0x68b   :  { %v3743_v43 = vpop.f32.mrf.mxu0 }
 0x68c   :  { %v3732_v45 = vpop.f32.mrf.mxu1 }
 0x68d   :  { %v1398_v46 = vpop.f32.mrf.mxu0 }
 0x68e   :  { %v1399_v3 = vadd.f32 %v1398_v46, %v1327_v63 }
 0x68f   :  { %v3744_v47 = vpop.f32.mrf.mxu0 }
 0x696   :  { %v1475_v48 = vpop.f32.mrf.mxu1 }
 0x697   :  { %v1482_v49 = vadd.f32 %v1475_v48, %v1396_v40 }
 0x698   :  { %v3755_v50 = vpop.f32.mrf.mxu1 }
 0x699   :  { %v1557_v52 = vpop.f32.mrf.mxu0 }
 0x69a   :  { %v1478_v53 = vpop.f32.mrf.mxu1  ;;  %v4642_v54 = vadd.f32 %v1557_v52, %v1482_v49 }
 0x69b   :  { %v1483_v60 = vadd.f32 %v1478_v53, %v1399_v3  ;;  %v3767_v61 = vpop.f32.mrf.mxu0 }
 0x69c   :  { %v3756_v38 = vpop.f32.mrf.mxu1 }
 0x69d   :  { %v1560_v62 = vpop.f32.mrf.mxu0 }
 0x69e   :  { %v4644_v1 = vadd.f32 %v1560_v62, %v1483_v60  ;;  %v1731_v56 = vpop.f32.mrf.mxu1 }
 0x69f   :  { %v3768_v57 = vpop.f32.mrf.mxu0  ;;  %v1769_v17 = vsel %vm182_vm3, %v1731_v56, 0.0 }
 0x6a0   :  { %v3773_v0 = vpop.f32.mrf.mxu1 }
 0x6a2   :  { %v1734_v58 = vpop.f32.mrf.mxu1 }
 0x6a3   :  { %v1770_v37 = vsel %vm182_vm3, %v1734_v58, 0.0 }
 0x6a4   :  { %v3774_v10 = vpop.f32.mrf.mxu1  ;;  %v1771_v21 = vadd.f32 %v1770_v37, %v1769_v17 }
 0x6a6   :  { %v1739_v12 = vpop.f32.mrf.mxu1 }
 0x6a7   :  { %v1772_v18 = vsel %vm182_vm3, %v1739_v12, 0.0 }
 0x6a8   :  { %v3777_v13 = vpop.f32.mrf.mxu1  ;;  %v1773_v24 = vadd.f32 %v1772_v18, %v1771_v21 }
 0x6aa   :  { %v1742_v14 = vpop.f32.mrf.mxu1 }
 0x6ab   :  { %v1774_v23 = vsel %vm182_vm3, %v1742_v14, 0.0 }
 0x6ac   :  { %v3778_v2 = vpop.f32.mrf.mxu1  ;;  %v1775_v26 = vadd.f32 %v1774_v23, %v1773_v24 }
 0x6ae   :  { %v1747_v16 = vpop.f32.mrf.mxu1 }
 0x6af   :  { %v1776_v5 = vsel %vm182_vm3, %v1747_v16, 0.0 }
 0x6b0   :  { %v3781_v51 = vpop.f32.mrf.mxu1  ;;  %v1777_v7 = vadd.f32 %v1776_v5, %v1775_v26 }
 0x6b2   :  { %v1750_v22 = vpop.f32.mrf.mxu1 }
 0x6b3   :  { %v1778_v28 = vsel %vm182_vm3, %v1750_v22, 0.0 }
 0x6b4   :  { %v3782_v4 = vpop.f32.mrf.mxu1  ;;  %v1779_v31 = vadd.f32 %v1778_v28, %v1777_v7 }
 0x6b6   :  { %v1755_v6 = vpop.f32.mrf.mxu1 }
 0x6b7   :  { %v1780_v9 = vsel %vm182_vm3, %v1755_v6, 0.0 }
 0x6b8   :  { %v3785_v30 = vpop.f32.mrf.mxu1  ;;  %v1781_v35 = vadd.f32 %v1780_v9, %v1779_v31 }
 0x6ba   :  { %v1758_v32 = vpop.f32.mrf.mxu1 }
 0x6bb   :  { %v1782_v34 = vsel %vm182_vm3, %v1758_v32, 0.0 }
 0x6bc   :  { %v3786_v36 = vpop.f32.mrf.mxu1  ;;  %v1783_v59 = vadd.f32 %v1782_v34, %v1781_v35 }
 0x6be   :  { %v1763_v63 = vpop.f32.mrf.mxu1 }
 0x6bf   :  { %v1784_v40 = vsel %vm198_vm4, %v1763_v63, 0.0 }
 0x6c0   :  { %v1785_v43 = vadd.f32 %v1784_v40, %v1783_v59  ;;  %v3789_v45 = vpop.f32.mrf.mxu1 }
 0x6c2   :  { %v1786_v46 = vrot.slane %v1785_v43, 4  ;;  %v1766_v3 = vpop.f32.mrf.mxu1 }
 0x6c4   :  { %v1787_v47 = vadd.f32 %v1786_v46, %v1785_v43  ;;  %v3790_v48 = vpop.f32.mrf.mxu1 }
 0x6c6   :  { %v1788_v49 = vrot.slane %v1787_v47, 2 }
 0x6c8   :  { %v1789_v50 = vadd.f32 %v1788_v49, %v1787_v47 }
 0x6ca   :  { %v1790_v52 = vrot.slane %v1789_v50, 1 }
 0x6cc   :  { %v1791_v53 = vadd.f32 %v1790_v52, %v1789_v50 }
 0x6ce   :  { %v1792_v60 = vmul.f32 0.015384615, %v1791_v53 }
 0x6d0   :  { %v1793_v61 = vsub.f32 %v1731_v56, %v1792_v60  ;;  %v1794_v38 = vsub.f32 %v1734_v58, %v1792_v60  ;;  %v1795_v62 = vsub.f32 %v1739_v12, %v1792_v60  ;;  %v1796_v57 = vsub.f32 %v1742_v14, %v1792_v60 }
 0x6d1   :  { %v1797_v0 = vsub.f32 %v1747_v16, %v1792_v60  ;;  %v1798_v37 = vsub.f32 %v1750_v22, %v1792_v60  ;;  %v1799_v20 = vsub.f32 %v1755_v6, %v1792_v60  ;;  %v1800_v56 = vsub.f32 %v1758_v32, %v1792_v60 }
 0x6d2   :  { %v1802_v10 = vmul.f32 %v1793_v61, %v1793_v61  ;;  %v1803_v13 = vmul.f32 %v1794_v38, %v1794_v38  ;;  %v1804_v2 = vmul.f32 %v1795_v62, %v1795_v62  ;;  %v1805_v51 = vmul.f32 %v1796_v57, %v1796_v57 }
 0x6d3   :  { %v1806_v21 = vmul.f32 %v1797_v0, %v1797_v0  ;;  %v1807_v58 = vmul.f32 %v1798_v37, %v1798_v37  ;;  %v1801_v16 = vsub.f32 %v1763_v63, %v1792_v60  ;;  %v1808_v4 = vmul.f32 %v1799_v20, %v1799_v20 }
 0x6d4   :  { %v1811_v17 = vsel %vm182_vm3, %v1802_v10, 0.0  ;;  %v1812_v18 = vsel %vm182_vm3, %v1803_v13, 0.0  ;;  %v1814_v23 = vsel %vm182_vm3, %v1804_v2, 0.0  ;;  %v1816_v12 = vsel %vm182_vm3, %v1805_v51, 0.0 }
 0x6d5   :  { %v1813_v19 = vadd.f32 %v1812_v18, %v1811_v17  ;;  %v1818_v22 = vsel %vm182_vm3, %v1806_v21, 0.0  ;;  %v1809_v26 = vmul.f32 %v1800_v56, %v1800_v56  ;;  %v1820_v28 = vsel %vm182_vm3, %v1807_v58, 0.0 }
 0x6d6   :  { %v1810_v30 = vmul.f32 %v1801_v16, %v1801_v16  ;;  %v1822_v6 = vsel %vm182_vm3, %v1808_v4, 0.0 }
 0x6d7   :  { %v1815_v24 = vadd.f32 %v1814_v23, %v1813_v19  ;;  %v1824_v31 = vsel %vm182_vm3, %v1809_v26, 0.0 }
 0x6d8   :  { %v1826_v34 = vsel %vm198_vm4, %v1810_v30, 0.0 }
 0x6d9   :  { %v1817_v14 = vadd.f32 %v1816_v12, %v1815_v24 }
 0x6db   :  { %v1819_v5 = vadd.f32 %v1818_v22, %v1817_v14 }
 0x6dd   :  { %v1821_v7 = vadd.f32 %v1820_v28, %v1819_v5 }
 0x6df   :  { %v1823_v9 = vadd.f32 %v1822_v6, %v1821_v7 }
 0x6e1   :  { %v1825_v32 = vadd.f32 %v1824_v31, %v1823_v9 }
 0x6e3   :  { %v1827_v35 = vadd.f32 %v1826_v34, %v1825_v32 }
 0x6e5   :  { %v1828_v36 = vrot.slane %v1827_v35, 4 }
 0x6e7   :  { %v1829_v59 = vadd.f32 %v1828_v36, %v1827_v35 }
 0x6e9   :  { %v1830_v63 = vrot.slane %v1829_v59, 2 }
 0x6eb   :  { %v1831_v40 = vadd.f32 %v1830_v63, %v1829_v59 }
 0x6ed   :  { %v1832_v43 = vrot.slane %v1831_v40, 1 }
 0x6ef   :  { %v1833_v45 = vadd.f32 %v1832_v43, %v1831_v40 }
 0x6f1   :  { %v1834_v46 = vmul.f32 0.015384615, %v1833_v45 }
 0x6f3   :  { %v1835_v3 = vadd.f32 1e-05, %v1834_v46 }
 0x6f5   :  { %4071 = vrsqrt.f32 %v1835_v3 }
 0x702   :  { %v4072_v47 = vpop.eup %4071 }
 0x703   :  { %v1837_v48 = vmul.f32 %v4072_v47, %v1793_v61  ;;  %v1838_v49 = vmul.f32 %v4072_v47, %v1794_v38  ;;  %v1839_v50 = vmul.f32 %v4072_v47, %v1795_v62  ;;  %v1840_v52 = vmul.f32 %v4072_v47, %v1796_v57 }
 0x704   :  { %v1841_v53 = vmul.f32 %v4072_v47, %v1797_v0  ;;  %v1842_v60 = vmul.f32 %v4072_v47, %v1798_v37  ;;  %v1843_v10 = vmul.f32 %v4072_v47, %v1799_v20  ;;  %v1844_v13 = vmul.f32 %v4072_v47, %v1800_v56 }
 0x705   :  { %v1845_v2 = vmul.f32 %v4072_v47, %v1801_v16  ;;  %v1846_v51 = vmul.f32 %v1837_v48, %v4269_v42  ;;  %v1847_v17 = vmul.f32 %v1838_v49, %v4269_v42  ;;  %v1848_v18 = vmul.f32 %v1839_v50, %v4269_v42 }
 0x706   :  { %v1849_v19 = vmul.f32 %v1840_v52, %v4269_v42  ;;  %v1850_v21 = vmul.f32 %v1841_v53, %v4269_v42  ;;  %v1851_v61 = vmul.f32 %v1842_v60, %v4269_v42  ;;  %v1852_v38 = vmul.f32 %v1843_v10, %v4269_v42 }
 0x707   :  { %v1853_v62 = vmul.f32 %v1844_v13, %v4269_v42  ;;  %v1854_v57 = vmul.f32 %v1845_v2, %v4269_v42  ;;  %v4686_v0 = vadd.f32 %v1846_v51, %v4272_v44  ;;  %v4689_v37 = vadd.f32 %v1847_v17, %v4272_v44 }
 0x708   :  { %v4692_v20 = vadd.f32 %v1848_v18, %v4272_v44  ;;  %v4695_v23 = vadd.f32 %v1849_v19, %v4272_v44  ;;  %v4698_v24 = vadd.f32 %v1850_v21, %v4272_v44  ;;  %v4701_v56 = vadd.f32 %v1851_v61, %v4272_v44 }
 0x709   :  { %v4704_v42 = vadd.f32 %v1852_v38, %v4272_v44  ;;  %v4707_v58 = vadd.f32 %v1853_v62, %v4272_v44  ;;  %v4710_v12 = vadd.f32 %v1854_v57, %v4272_v44  ;;  %v1873_v14 = vmul.f32 0.044715, %v4686_v0 }
 0x70a   :  { %v1874_v16 = vmul.f32 0.044715, %v4689_v37  ;;  %v1875_v4 = vmul.f32 0.044715, %v4692_v20  ;;  %v1876_v22 = vmul.f32 0.044715, %v4695_v23 }
 0x70b   :  { %v1877_v5 = vmul.f32 0.044715, %v4698_v24  ;;  %v1878_v26 = vmul.f32 0.044715, %v4701_v56  ;;  %v1879_v28 = vmul.f32 0.044715, %v4704_v42  ;;  %v1882_v44 = vmul.f32 %v1873_v14, %v4686_v0 }
 0x70c   :  { %v1880_v7 = vmul.f32 0.044715, %v4707_v58  ;;  %v1881_v30 = vmul.f32 0.044715, %v4710_v12  ;;  %v1883_v6 = vmul.f32 %v1874_v16, %v4689_v37  ;;  %v1884_v9 = vmul.f32 %v1875_v4, %v4692_v20 }
 0x70d   :  { %v1885_v31 = vmul.f32 %v1876_v22, %v4695_v23  ;;  %v1886_v32 = vmul.f32 %v1877_v5, %v4698_v24  ;;  %v1887_v34 = vmul.f32 %v1878_v26, %v4701_v56  ;;  %v1888_v35 = vmul.f32 %v1879_v28, %v4704_v42 }
 0x70e   :  { %v1889_v36 = vmul.f32 %v1880_v7, %v4707_v58  ;;  %v1890_v59 = vmul.f32 %v1881_v30, %v4710_v12  ;;  %v1891_v63 = vmul.f32 %v1882_v44, %v4686_v0  ;;  %v1892_v40 = vmul.f32 %v1883_v6, %v4689_v37 }
 0x70f   :  { %v1893_v43 = vmul.f32 %v1884_v9, %v4692_v20  ;;  %v1894_v45 = vmul.f32 %v1885_v31, %v4695_v23  ;;  %v1895_v46 = vmul.f32 %v1886_v32, %v4698_v24  ;;  %v1896_v3 = vmul.f32 %v1887_v34, %v4701_v56 }
 0x710   :  { %v1897_v47 = vmul.f32 %v1888_v35, %v4704_v42  ;;  %v1898_v48 = vmul.f32 %v1889_v36, %v4707_v58  ;;  %v1899_v49 = vmul.f32 %v1890_v59, %v4710_v12  ;;  %v1900_v50 = vadd.f32 %v1891_v63, %v4686_v0 }
 0x711   :  { %v1901_v52 = vadd.f32 %v1892_v40, %v4689_v37  ;;  %v1902_v53 = vadd.f32 %v1893_v43, %v4692_v20  ;;  %v1903_v60 = vadd.f32 %v1894_v45, %v4695_v23  ;;  %v1904_v10 = vadd.f32 %v1895_v46, %v4698_v24 }
 0x712   :  { %v1905_v13 = vadd.f32 %v1896_v3, %v4701_v56  ;;  %v1906_v2 = vadd.f32 %v1897_v47, %v4704_v42  ;;  %v1909_v51 = vmul.f32 0.7978846, %v1900_v50  ;;  %v1907_v18 = vadd.f32 %v1898_v48, %v4707_v58 }
 0x713   :  { %v1910_v17 = vmul.f32 0.7978846, %v1901_v52  ;;  %v1911_v19 = vmul.f32 0.7978846, %v1902_v53  ;;  %v1912_v21 = vmul.f32 0.7978846, %v1903_v60  ;;  %v1908_v61 = vadd.f32 %v1899_v49, %v4710_v12 }
 0x714   :  { %v1913_v38 = vmul.f32 0.7978846, %v1904_v10  ;;  %4073 = vtanh.f32 %v1909_v51  ;;  %v1914_v62 = vmul.f32 0.7978846, %v1905_v13  ;;  %v1915_v57 = vmul.f32 0.7978846, %v1906_v2 }
 0x715   :  { %4075 = vtanh.f32 %v1910_v17  ;;  %v1916_v14 = vmul.f32 0.7978846, %v1907_v18  ;;  %v1917_v16 = vmul.f32 0.7978846, %v1908_v61  ;;  %v1864_v5 = vmul.f32 0.5, %v4686_v0  ;;  %v3997_v61 = vld [vmem:[%s5021_s3 + $0x28] sm:$0xff]  }
 0x716   :  { %4077 = vtanh.f32 %v1911_v19  ;;  %v1865_v7 = vmul.f32 0.5, %v4689_v37  ;;  %v1866_v6 = vmul.f32 0.5, %v4692_v20  ;;  %v1867_v34 = vmul.f32 0.5, %v4695_v23  ;;  %v3996_v19 = vld [vmem:[%s5021_s3] sm:$0xff]  }
 0x717   :  { %4079 = vtanh.f32 %v1912_v21  ;;  %v1868_v63 = vmul.f32 0.5, %v4698_v24  ;;  %v1869_v37 = vmul.f32 0.5, %v4701_v56  ;;  %v1870_v3 = vmul.f32 0.5, %v4704_v42 }
 0x718   :  { %4081 = vtanh.f32 %v1913_v38  ;;  %v1871_v24 = vmul.f32 0.5, %v4707_v58  ;;  %v1872_v56 = vmul.f32 0.5, %v4710_v12 }
 0x719   :  { %4083 = vtanh.f32 %v1914_v62 }
 0x71a   :  { %4085 = vtanh.f32 %v1915_v57 }
 0x71b   :  { %4087 = vtanh.f32 %v1916_v14 }
 0x71c   :  { %4089 = vtanh.f32 %v1917_v16 }
 0x721   :  { %v4074_v4 = vpop.eup %4073 }
 0x722   :  { %v4076_v22 = vpop.eup %4075  ;;  %v1927_v26 = vadd.f32 1.0, %v4074_v4  ;;  %v3998_v4 = vld [vmem:[%s5021_s3 + $0x20] sm:$0xff]  }
 0x723   :  { %v4078_v28 = vpop.eup %4077  ;;  %v1928_v30 = vadd.f32 1.0, %v4076_v22 }
 0x724   :  { %v4080_v44 = vpop.eup %4079  ;;  %v1929_v9 = vadd.f32 1.0, %v4078_v28  ;;  %v1936_v31 = vmul.f32 %v1927_v26, %v1864_v5  ;;  %v3999_v28 = vld [vmem:[%s5023_s4 + $0x18] sm:$0xff]  }
 0x725   :  { %v4082_v32 = vpop.eup %4081  ;;  %v1930_v35 = vadd.f32 1.0, %v4080_v44  ;;  %v1937_v36 = vmul.f32 %v1928_v30, %v1865_v7  ;;  %v4000_v7 = vld [vmem:[%s5023_s4 + $0x10] sm:$0xff]  }
 0x726   :  { %v4084_v59 = vpop.eup %4083  ;;  %v1931_v40 = vadd.f32 1.0, %v4082_v32  ;;  %v1938_v0 = vmul.f32 %v1929_v9, %v1866_v6  ;;  %1945 = vst.msk [vmem:[#allocation2] sm:$0xff] %vm182_vm3, %v1936_v31 }
 0x727   :  { %v4086_v43 = vpop.eup %4085  ;;  %v1932_v45 = vadd.f32 1.0, %v4084_v59  ;;  %v1939_v46 = vmul.f32 %v1930_v35, %v1867_v34  ;;  %1946 = vst.msk [vmem:[#allocation2 + $0x8] sm:$0xff] %vm182_vm3, %v1937_v36 }
 0x728   :  { %v4088_v20 = vpop.eup %4087  ;;  %v1933_v23 = vadd.f32 1.0, %v4086_v43  ;;  %v1940_v47 = vmul.f32 %v1931_v40, %v1868_v63  ;;  %1947 = vst.msk [vmem:[#allocation2 + $0x10] sm:$0xff] %vm182_vm3, %v1938_v0 }
 0x729   :  { %v4090_v48 = vpop.eup %4089  ;;  %v1934_v49 = vadd.f32 1.0, %v4088_v20  ;;  %v1941_v50 = vmul.f32 %v1932_v45, %v1869_v37  ;;  %1948 = vst.msk [vmem:[#allocation2 + $0x18] sm:$0xff] %vm182_vm3, %v1939_v46 }
 0x72a   :  { %v1935_v52 = vadd.f32 1.0, %v4090_v48  ;;  %v1942_v53 = vmul.f32 %v1933_v23, %v1870_v3  ;;  %1949 = vst.msk [vmem:[#allocation2 + $0x20] sm:$0xff] %vm182_vm3, %v1940_v47 }
 0x72b   :  { %v1943_v60 = vmul.f32 %v1934_v49, %v1871_v24  ;;  %1950 = vst.msk [vmem:[#allocation2 + $0x28] sm:$0xff] %vm182_vm3, %v1941_v50 }
 0x72c   :  { %v1944_v42 = vmul.f32 %v1935_v52, %v1872_v56  ;;  %1951 = vst.msk [vmem:[#allocation2 + $0x30] sm:$0xff] %vm182_vm3, %v1942_v53 }
 0x72d   :  { %1952 = vst.msk [vmem:[#allocation2 + $0x38] sm:$0xff] %vm182_vm3, %v1943_v60 }
 0x72e   :  { %1953 = vst.msk [vmem:[#allocation2 + $0x40] sm:$0x1] %vm198_vm4, %v1944_v42  ;;  %v1964_v58 = vld [vmem:[#allocation2 + $0x1] ss:$2 sm:$0xff]  ;;  %v1954_v12 = vld [vmem:[#allocation2] ss:$2 sm:$0xff] }
 0x72f   :  { %v2108_v57 = vld [vmem:[#allocation2 + $0x2] ss:$2 sm:$0xff] }
 0x730   :  { %v1965_v10 = vld [vmem:[#allocation2 + $0x11] ss:$2 sm:$0xff]  ;;  %v1955_v51 = vld [vmem:[#allocation2 + $0x10] ss:$2 sm:$0xff] }
 0x731   :  { %v1968_v13 = vpack.c.bf16 %v1965_v10, %v1964_v58  ;;  %v1958_v21 = vpack.c.bf16 %v1955_v51, %v1954_v12  ;;  %v2109_v14 = vld [vmem:[#allocation2 + $0x12] ss:$2 sm:$0xff] }
 0x732   :  { %v1966_v2 = vld [vmem:[#allocation2 + $0x21] ss:$2 sm:$0xff]  ;;  %v1956_v38 = vld [vmem:[#allocation2 + $0x20] ss:$2 sm:$0xff]  ;;  %v2112_v22 = vpack.c.bf16 %v2109_v14, %v2108_v57 }
 0x733   :  { %3795 = vmatprep.mubr.msk.bf16.mxu0 %vm182_vm3, %v1968_v13 }
 0x734   :  { %v1967_v17 = vld [vmem:[#allocation2 + $0x31] ss:$2 sm:$0xff]  ;;  %v1957_v62 = vld [vmem:[#allocation2 + $0x30] ss:$2 sm:$0xff] }
 0x735   :  { %v1969_v18 = vpack.c.bf16 %v1967_v17, %v1966_v2  ;;  %v1959_v16 = vpack.c.bf16 %v1957_v62, %v1956_v38  ;;  %v2111_v5 = vld [vmem:[#allocation2 + $0x32] ss:$2 sm:$0xff] }
 0x737   :  { %3796 = vmatmul.mubr.msk.bf16.vlgmr.msra.gmra.mxu0 %vm182_vm3, %v1969_v18 }
 0x738   :  { %3800 = vmatpush3.bf16.msra.mxu0 %v4662_v11  ;;  %3803 = vmatprep.mubr.msk.bf16.mxu0 %vm182_vm3, %v1958_v21  ;;  %v2110_v11 = vld [vmem:[#allocation2 + $0x22] ss:$2 sm:$0xff] }
 0x739   :  { %3801 = vmatprep.subr.bf16.mxu0 %v3996_v19  ;;  %v2113_v26 = vpack.c.bf16 %v2111_v5, %v2110_v11 }
 0x73c   :  { %3802 = vmatpush3.bf16.msra.mxu0 %v3996_v19 }
 0x73d   :  { %3807 = vmatprep.subr.bf16.mxu0 %v3997_v61 }
 0x73f   :  { %3804 = vmatmul.mubr.msk.bf16.vlgmr.msra.gmra.mxu0 %vm182_vm3, %v1959_v16 }
 0x740   :  { %3808 = vmatpush3.bf16.msra.mxu0 %v3997_v61  ;;  %3811 = vmatprep.mubr.msk.bf16.mxu0 %vm182_vm3, %v2112_v22 }
 0x741   :  { %3809 = vmatprep.subr.bf16.mxu0 %v3998_v4 }
 0x744   :  { %3810 = vmatpush3.bf16.msra.mxu0 %v3998_v4 }
 0x745   :  { %3815 = vmatprep.subr.bf16.mxu0 %v4434_v15 }
 0x747   :  { %3812 = vmatmul.mubr.msk.bf16.vlgmr.msra.gmra.mxu0 %vm182_vm3, %v2113_v26 }
 0x748   :  { %3819 = vmatprep.mubr.msk.bf16.mxu0 %vm4126_vm1, %v4434_v15  ;;  %3816 = vmatpush3.bf16.msra.mxu0 %v3999_v28 }
 0x749   :  { %3817 = vmatprep.subr.bf16.mxu0 %v4434_v15 }
 0x74c   :  { %3818 = vmatpush3.bf16.msra.mxu0 %v4000_v7 }
 0x74d   :  { %3823 = vmatprep.subr.bf16.mxu0 %v4434_v15 }
 0x7f7   :  { %v3797_v30 = vpop.f32.mrf.mxu0 }
 0x7f9   :  { %v2026_v44 = vpop.f32.mrf.mxu0 }
 0x7fb   :  { %v3798_v6 = vpop.f32.mrf.mxu0 }
 0x7fd   :  { %v2029_v9 = vpop.f32.mrf.mxu0 }
 0x7ff   :  { %v3805_v31 = vpop.f32.mrf.mxu0 }
 0x800   :  { %v2102_v36 = vadd.f32 %v3805_v31, %v3797_v30 }
 0x801   :  { %v2093_v32 = vpop.f32.mrf.mxu0 }
 0x802   :  { %v2094_v63 = vadd.f32 %v2093_v32, %v2026_v44  ;;  %v4001_v32 = vld [vmem:[%s5023_s4 + $0x8] sm:$0xff]  }
 0x803   :  { %v3806_v34 = vpop.f32.mrf.mxu0 }
 0x804   :  { %v2105_v43 = vadd.f32 %v3806_v34, %v3798_v6 }
 0x805   :  { %v2096_v35 = vpop.f32.mrf.mxu0 }
 0x806   :  { %v2097_v47 = vadd.f32 %v2096_v35, %v2029_v9  ;;  %v4002_v35 = vld [vmem:[%s5023_s4] sm:$0xff]  }
 0x807   :  { %v3813_v59 = vpop.f32.mrf.mxu0 }
 0x808   :  { %v2187_v40 = vadd.f32 %v3813_v59, %v2102_v36 }
 0x809   :  { %v2170_v0 = vpop.f32.mrf.mxu0 }
 0x80a   :  { %v2195_v37 = vmul.f32 0.044715, %v2187_v40  ;;  %v2185_v45 = vadd.f32 %v2170_v0, %v2094_v63  ;;  %v2191_v38 = vmul.f32 0.5, %v2187_v40 }
 0x80b   :  { %v3814_v46 = vpop.f32.mrf.mxu0 }
 0x80c   :  { %v2199_v20 = vmul.f32 %v2195_v37, %v2187_v40  ;;  %v2193_v3 = vmul.f32 0.044715, %v2185_v45  ;;  %v2188_v23 = vadd.f32 %v3814_v46, %v2105_v43  ;;  %v2189_v16 = vmul.f32 0.5, %v2185_v45 }
 0x80d   :  { %v2173_v48 = vpop.f32.mrf.mxu0 }
 0x80e   :  { %v2203_v24 = vmul.f32 %v2199_v20, %v2187_v40  ;;  %v2197_v49 = vmul.f32 %v2193_v3, %v2185_v45  ;;  %v2196_v50 = vmul.f32 0.044715, %v2188_v23  ;;  %v2186_v56 = vadd.f32 %v2173_v48, %v2097_v47 }
 0x80f   :  { %v2192_v5 = vmul.f32 0.5, %v2188_v23 }
 0x810   :  { %v2207_v52 = vadd.f32 %v2203_v24, %v2187_v40  ;;  %v2201_v53 = vmul.f32 %v2197_v49, %v2185_v45  ;;  %v2200_v60 = vmul.f32 %v2196_v50, %v2188_v23  ;;  %v2194_v42 = vmul.f32 0.044715, %v2186_v56 }
 0x811   :  { %v2190_v30 = vmul.f32 0.5, %v2186_v56 }
 0x812   :  { %v2211_v58 = vmul.f32 0.7978846, %v2207_v52  ;;  %v2205_v10 = vadd.f32 %v2201_v53, %v2185_v45  ;;  %v2204_v13 = vmul.f32 %v2200_v60, %v2188_v23  ;;  %v2198_v2 = vmul.f32 %v2194_v42, %v2186_v56 }
 0x814   :  { %4091 = vtanh.f32 %v2211_v58  ;;  %v2209_v12 = vmul.f32 0.7978846, %v2205_v10  ;;  %v2208_v51 = vadd.f32 %v2204_v13, %v2188_v23  ;;  %v2202_v17 = vmul.f32 %v2198_v2, %v2186_v56 }
 0x816   :  { %4093 = vtanh.f32 %v2209_v12  ;;  %v2212_v18 = vmul.f32 0.7978846, %v2208_v51  ;;  %v2206_v19 = vadd.f32 %v2202_v17, %v2186_v56 }
 0x818   :  { %4095 = vtanh.f32 %v2212_v18  ;;  %v2210_v21 = vmul.f32 0.7978846, %v2206_v19 }
 0x81a   :  { %4097 = vtanh.f32 %v2210_v21 }
 0x821   :  { %v4092_v61 = vpop.eup %4091 }
 0x822   :  { %v2219_v62 = vadd.f32 1.0, %v4092_v61 }
 0x823   :  { %v4094_v57 = vpop.eup %4093 }
 0x824   :  { %v2223_v14 = vmul.f32 %v2219_v62, %v2191_v38  ;;  %v2217_v4 = vadd.f32 1.0, %v4094_v57 }
 0x825   :  { %v4096_v22 = vpop.eup %4095 }
 0x826   :  { %2227 = vst.msk [vmem:[#allocation3 + $0x10] sm:$0xff] %vm182_vm3, %v2223_v14  ;;  %v2221_v11 = vmul.f32 %v2217_v4, %v2189_v16  ;;  %v2220_v26 = vadd.f32 1.0, %v4096_v22 }
 0x827   :  { %v4098_v28 = vpop.eup %4097 }
 0x828   :  { %2225 = vst.msk [vmem:[#allocation3] sm:$0xff] %vm182_vm3, %v2221_v11  ;;  %v2224_v7 = vmul.f32 %v2220_v26, %v2192_v5  ;;  %v2218_v44 = vadd.f32 1.0, %v4098_v28 }
 0x82a   :  { %2228 = vst.msk [vmem:[#allocation3 + $0x18] sm:$0xff] %vm182_vm3, %v2224_v7  ;;  %v2222_v6 = vmul.f32 %v2218_v44, %v2190_v30 }
 0x82c   :  { %2226 = vst.msk [vmem:[#allocation3 + $0x8] sm:$0xff] %vm182_vm3, %v2222_v6 }
 0x831   :  { %v2237_v31 = vld [vmem:[#allocation3 + $0x11] ss:$2 sm:$0xff]  ;;  %v2230_v59 = vld [vmem:[#allocation3 + $0x10] ss:$2 sm:$0xff] }
 0x833   :  { %v2236_v9 = vld [vmem:[#allocation3 + $0x1] ss:$2 sm:$0xff]  ;;  %v2229_v36 = vld [vmem:[#allocation3] ss:$2 sm:$0xff] }
 0x834   :  { %v2238_v34 = vpack.c.bf16 %v2237_v31, %v2236_v9  ;;  %v2231_v63 = vpack.c.bf16 %v2230_v59, %v2229_v36 }
 0x836   :  { %3820 = vmatmul.mubr.msk.bf16.vlgmr.msra.gmra.mxu0 %vm182_vm3, %v2238_v34 }
 0x837   :  { %3824 = vmatpush3.bf16.msra.mxu0 %v4001_v32  ;;  %3827 = vmatprep.mubr.msk.bf16.mxu0 %vm4126_vm1, %v4434_v15 }
 0x838   :  { %3825 = vmatprep.subr.bf16.mxu0 %v4434_v15 }
 0x83b   :  { %3826 = vmatpush3.bf16.msra.mxu0 %v4002_v35 }
 0x83c   :  { %3839 = vmatprep.subr.bf16.mxu0 %v4434_v15 }
 0x83e   :  { %3828 = vmatmul.mubr.msk.bf16.vlgmr.msra.gmra.mxu0 %vm182_vm3, %v2231_v63 }
 0x83f   :  { %3847 = vmatprep.mubr.msk.bf16.mxu0 %vm4126_vm1, %v4434_v15 }
 0x8f6   :  { %v2292_v40 = vpop.f32.mrf.mxu0 }
 0x8f8   :  { %v3821_v0 = vpop.f32.mrf.mxu0 }
 0x8fa   :  { %v2295_v43 = vpop.f32.mrf.mxu0 }
 0x8fc   :  { %v3822_v37 = vpop.f32.mrf.mxu0 }
 0x8fd   :  { %v4004_v37 = vld [vmem:[%s5026_s8 + $0x18] sm:$0xff]  }
 0x8fe   :  { %v2348_v45 = vpop.f32.mrf.mxu0 }
 0x8ff   :  { %v2349_v46 = vadd.f32 %v2348_v45, %v2292_v40  ;;  %v4007_v45 = vld [vmem:[%s5026_s8 + $0x48] sm:$0xff]  }
 0x900   :  { %v3829_v20 = vpop.f32.mrf.mxu0 }
 0x901   :  { %v2357_v3 = vmul.f32 0.044715, %v2349_v46  ;;  %v2355_v13 = vmul.f32 0.5, %v2349_v46  ;;  %v4009_v20 = vld [vmem:[%s5026_s8 + $0x40] sm:$0xff]  }
 0x902   :  { %v2351_v23 = vpop.f32.mrf.mxu0 }
 0x903   :  { %v2352_v47 = vadd.f32 %v2351_v23, %v2295_v43  ;;  %v2359_v48 = vmul.f32 %v2357_v3, %v2349_v46  ;;  %v4003_v43 = vld [vmem:[%s5026_s8 + $0x58] sm:$0xff]   ;;  %v4010_v3 = vld [vmem:[%s5026_s8] sm:$0xff]  }
 0x904   :  { %v3830_v24 = vpop.f32.mrf.mxu0  ;;  %3840 = vmatpush3.bf16.msra.mxu0 %v4003_v43 }
 0x905   :  { %v2358_v49 = vmul.f32 0.044715, %v2352_v47  ;;  %v2361_v50 = vmul.f32 %v2359_v48, %v2349_v46  ;;  %v2356_v18 = vmul.f32 0.5, %v2352_v47  ;;  %3841 = vmatprep.subr.bf16.mxu0 %v4434_v15 }
 0x907   :  { %v2363_v56 = vadd.f32 %v2361_v50, %v2349_v46  ;;  %v2360_v52 = vmul.f32 %v2358_v49, %v2352_v47  ;;  %v4008_v46 = vld [vmem:[%s5026_s8 + $0x8] sm:$0xff]  }
 0x909   :  { %v2365_v53 = vmul.f32 0.7978846, %v2363_v56  ;;  %v2362_v60 = vmul.f32 %v2360_v52, %v2352_v47 }
 0x90b   :  { %4099 = vtanh.f32 %v2365_v53  ;;  %v2364_v42 = vadd.f32 %v2362_v60, %v2352_v47  ;;  %v4124_v47 = vld [vmem:[%s5027_s7] ss:$0 sm:$0xff]  ;;  %v4011_v53 = vld [vmem:[%s5026_s8 + $0x98] sm:$0xff]  }
 0x90d   :  { %v2366_v58 = vmul.f32 0.7978846, %v2364_v42 }
 0x90f   :  { %4101 = vtanh.f32 %v2366_v58 }
 0x918   :  { %v4100_v10 = vpop.eup %4099 }
 0x919   :  { %v2369_v2 = vadd.f32 1.0, %v4100_v10 }
 0x91b   :  { %v2371_v12 = vmul.f32 %v2369_v2, %v2355_v13  ;;  %v4012_v2 = vld [vmem:[%s5026_s8 + $0xd8] sm:$0xff]  }
 0x91c   :  { %v4102_v51 = vpop.eup %4101 }
 0x91d   :  { %v2373_v17 = vsel %vm182_vm3, %v2371_v12, 0.0  ;;  %v2370_v19 = vadd.f32 1.0, %v4102_v51 }
 0x91e   :  { %2374 = vadd.xlane.f32.xlu0 %v2373_v17  ;;  %v4014_v17 = vld [vmem:[%s5026_s8 + $0xd0] sm:$0xff]  }
 0x91f   :  { %v2372_v21 = vmul.f32 %v2370_v19, %v2356_v18 }
 0x921   :  { %v2376_v61 = vsel %vm182_vm3, %v2372_v21, 0.0 }
 0x922   :  { %2377 = vadd.xlane.f32.xlu1 %v2376_v61 }
 0x9a7   :  { %v2375_v38 = vpop.xlane.xlu0 %2374 }
 0x9a8   :  { %v2379_v62 = vmul.f32 0.03125, %v2375_v38  ;;  %v4017_v38 = vld [vmem:[%s5026_s8 + $0x80] sm:$0xff]  }
 0x9aa   :  { %v2381_v57 = vsub.f32 %v2371_v12, %v2379_v62  ;;  %v4013_v12 = vld [vmem:[%s5026_s8 + $0x90] sm:$0xff]   ;;  %v4018_v62 = vld [vmem:[%s5026_s8 + $0xc0] sm:$0xff]  }
 0x9ab   :  { %v2378_v14 = vpop.xlane.xlu1 %2377 }
 0x9ac   :  { %v2380_v16 = vmul.f32 0.03125, %v2378_v14  ;;  %v2383_v4 = vmul.f32 %v2381_v57, %v2381_v57  ;;  %v4020_v14 = vld [vmem:[%s5026_s8 + $0x38] sm:$0xff]  }
 0x9ae   :  { %v2382_v22 = vsub.f32 %v2372_v21, %v2380_v16  ;;  %v2385_v11 = vsel %vm182_vm3, %v2383_v4, 0.0  ;;  %v4015_v21 = vld [vmem:[%s5026_s8 + $0x88] sm:$0xff]   ;;  %v4022_v16 = vld [vmem:[%s5026_s8 + $0x30] sm:$0xff]  }
 0x9af   :  { %2386 = vadd.xlane.f32.xlu0 %v2385_v11  ;;  %v4023_v4 = vld [vmem:[%s5026_s8 + $0x68] sm:$0xff]   ;;  %v4025_v11 = vld [vmem:[%s5026_s8 + $0x60] sm:$0xff]  }
 0x9b0   :  { %v2384_v5 = vmul.f32 %v2382_v22, %v2382_v22 }
 0x9b2   :  { %v2388_v26 = vsel %vm182_vm3, %v2384_v5, 0.0  ;;  %v4026_v5 = vld [vmem:[%s5026_s8 + $0x20] sm:$0xff]  }
 0x9b3   :  { %2389 = vadd.xlane.f32.xlu0 %v2388_v26  ;;  %v4027_v26 = vld [vmem:[%s5026_s8 + $0xb8] sm:$0xff]  }
 0xa38   :  { %v2387_v28 = vpop.xlane.xlu0 %2386 }
 0xa39   :  { %v2391_v7 = vmul.f32 0.03125, %v2387_v28  ;;  %v4028_v28 = vld [vmem:[%s5026_s8 + $0xf8] sm:$0xff]  }
 0xa3b   :  { %v2393_v30 = vadd.f32 1e-05, %v2391_v7 }
 0xa3c   :  { %v2390_v44 = vpop.xlane.xlu0 %2389 }
 0xa3d   :  { %4103 = vrsqrt.f32 %v2393_v30  ;;  %v2392_v6 = vmul.f32 0.03125, %v2390_v44  ;;  %v4029_v44 = vld [vmem:[%s5026_s8 + $0xb0] sm:$0xff]  }
 0xa3f   :  { %v2394_v9 = vadd.f32 1e-05, %v2392_v6  ;;  %v4030_v6 = vld [vmem:[%s5026_s8 + $0xf0] sm:$0xff]  }
 0xa41   :  { %4105 = vrsqrt.f32 %v2394_v9  ;;  %v4031_v9 = vld [vmem:[%s5026_s8 + $0xa8] sm:$0xff]  }
 0xa4a   :  { %v4104_v31 = vpop.eup %4103 }
 0xa4b   :  { %v2397_v32 = vmul.f32 %v4104_v31, %v2381_v57  ;;  %v4019_v57 = vld [vmem:[%s5026_s8 + $0x78] sm:$0xff]   ;;  %v4032_v31 = vld [vmem:[%s5026_s8 + $0xe8] sm:$0xff]  }
 0xa4d   :  { %v2399_v35 = vmul.f32 %v2397_v32, %v4424_v55  ;;  %v4033_v32 = vld [vmem:[%s5026_s8 + $0xa0] sm:$0xff]  }
 0xa4e   :  { %v4106_v34 = vpop.eup %4105 }
 0xa4f   :  { %v2398_v36 = vmul.f32 %v4106_v34, %v2382_v22  ;;  %v2401_v63 = vadd.f32 %v2399_v35, %v4428_v8  ;;  %v4024_v22 = vld [vmem:[%s5026_s8 + $0x28] sm:$0xff]   ;;  %v4034_v35 = vld [vmem:[%s5026_s8 + $0xe0] sm:$0xff]  }
 0xa51   :  { %v2400_v59 = vmul.f32 %v2398_v36, %v4424_v55  ;;  %v4005_v55 = vld [vmem:[%s5026_s8 + $0x50] sm:$0xff]  }
 0xa52   :  { %3842 = vmatpush3.bf16.msra.mxu0 %v4005_v55 }
 0xa53   :  { %v2402_v40 = vadd.f32 %v2400_v59, %v4428_v8  ;;  %v4006_v8 = vld [vmem:[%s5026_s8 + $0x10] sm:$0xff]   ;;  %3843 = vmatprep.subr.bf16.mxu0 %v4434_v15 }
 0xa55   :  { %v2403_v0 = vpack.c.bf16 %v2402_v40, %v2401_v63 }
 0xa56   :  { %3844 = vmatpush3.bf16.msra.mxu0 %v4007_v45 }
 0xa57   :  { %3836 = vmatmul.mubr.msk.bf16.vlgmr.msra.gmra.mxu1 %vm182_vm3, %v2403_v0  ;;  %3845 = vmatprep.subr.bf16.mxu0 %v4434_v15 }
 0xa58   :  { %3859 = vmatprep.mubr.msk.bf16.mxu1 %vm4126_vm1, %v4434_v15  ;;  %3852 = vmatpush3.bf16.msra.mxu1 %v4004_v37 }
 0xa59   :  { %3853 = vmatprep.subr.bf16.mxu1 %v4434_v15 }
 0xa5a   :  { %3846 = vmatpush3.bf16.msra.mxu0 %v4009_v20 }
 0xa5b   :  { %3863 = vmatprep.subr.bf16.mxu0 %v4434_v15 }
 0xa5c   :  { %3854 = vmatpush3.bf16.msra.mxu1 %v4006_v8 }
 0xa5d   :  { %3855 = vmatprep.subr.bf16.mxu1 %v4434_v15 }
 0xa60   :  { %3856 = vmatpush3.bf16.msra.mxu1 %v4008_v46 }
 0xa61   :  { %3857 = vmatprep.subr.bf16.mxu1 %v4434_v15 }
 0xa64   :  { %3858 = vmatpush3.bf16.msra.mxu1 %v4010_v3 }
 0xa65   :  { %3875 = vmatprep.subr.bf16.mxu1 %v4434_v15 }
 0xb17   :  { %v2441_v23 = vpop.f32.mrf.mxu1 }
 0xb18   :  { %v4857_v48 = vadd.f32 %v4124_v47, %v2441_v23 }
 0xb19   :  { %v3837_v24 = vpop.f32.mrf.mxu1 }
 0xb1a   :  { %2448 = vst [vmem:[#allocation4 + $0x2] sm:$0xff] %v4857_v48 }
 0xb1b   :  { %v2444_v49 = vpop.f32.mrf.mxu1 }
 0xb1c   :  { %v4860_v50 = vadd.f32 %v4124_v47, %v2444_v49 }
 0xb1d   :  { %v3838_v56 = vpop.f32.mrf.mxu1 }
 0xb1e   :  { %2449 = vst [vmem:[#allocation4 + $0xa] sm:$0xff] %v4860_v50  ;;  %v2610_v51 = vpack.c.bf16 %v4860_v50, %v4857_v48 }
 0xb21   :  { %v2461_v52 = vld [vmem:[#allocation4 + $0x1] sm:$0xff] }
 0xb22   :  { %v2450_v42 = vld [vmem:[#allocation4] sm:$0xff] }
 0xb25   :  { %v2462_v60 = vld [vmem:[#allocation4 + $0x9] sm:$0xff] }
 0xb26   :  { %v2451_v58 = vld [vmem:[#allocation4 + $0x8] sm:$0xff]  ;;  %v2463_v10 = vpack.c.bf16 %v2462_v60, %v2461_v52 }
 0xb27   :  { %v2452_v13 = vpack.c.bf16 %v2451_v58, %v2450_v42  ;;  %v2689_v18 = vld [vmem:[#allocation4 + $0x3] sm:$0xff]  ;;  %v2690_v19 = vld [vmem:[#allocation4 + $0xb] sm:$0xff] }
 0xb28   :  { %2787 = vrot.lane.b32.xlu0 %v2463_v10, %s4127_s30  ;;  %3848 = vmatmul.mubr.msk.bf16.vlgmr.msra.gmra.mxu0 %vm965_vm5, %v2463_v10  ;;  %v2691_v61 = vpack.c.bf16 %v2690_v19, %v2689_v18  ;;  %v3303_v10 = vld [vmem:[%s5028_s9] ss:$0 sm:$0xff] }
 0xb29   :  { %3864 = vmatpush3.bf16.msra.mxu0 %v4011_v53  ;;  %2858 = vrot.lane.b32.xlu1 %v2452_v13, %s4127_s30 }
 0xb2a   :  { %3860 = vmatmul.mubr.msk.bf16.vlgmr.msra.gmra.mxu1 %vm965_vm5, %v2452_v13  ;;  %3865 = vmatprep.subr.bf16.mxu0 %v4434_v15 }
 0xb2b   :  { %3876 = vmatpush3.bf16.msra.mxu1 %v4012_v2  ;;  %3871 = vmatprep.mubr.msk.bf16.mxu0 %vm4126_vm1, %v4434_v15 }
 0xb2c   :  { %3877 = vmatprep.subr.bf16.mxu1 %v4434_v15  ;;  %1568 = vrot.lane.b32.xlu0 %v4642_v54, %s4127_s30  ;;  %v4016_v54 = vld [vmem:[%s5026_s8 + $0xc8] sm:$0xff]  }
 0xb2d   :  { %3866 = vmatpush3.bf16.msra.mxu0 %v4013_v12  ;;  %2937 = vrot.lane.b32.xlu1 %v2610_v51, %s4127_s30 }
 0xb2e   :  { %3867 = vmatprep.subr.bf16.mxu0 %v4434_v15  ;;  %3883 = vmatprep.mubr.msk.bf16.mxu1 %vm4126_vm1, %v4434_v15 }
 0xb2f   :  { %3878 = vmatpush3.bf16.msra.mxu1 %v4014_v17 }
 0xb30   :  { %3879 = vmatprep.subr.bf16.mxu1 %v4434_v15 }
 0xb31   :  { %3868 = vmatpush3.bf16.msra.mxu0 %v4015_v21  ;;  %3018 = vrot.lane.b32.xlu1 %v2691_v61, %s4127_s30 }
 0xb32   :  { %3869 = vmatprep.subr.bf16.mxu0 %v4434_v15 }
 0xb33   :  { %3880 = vmatpush3.bf16.msra.mxu1 %v4016_v54 }
 0xb34   :  { %3881 = vmatprep.subr.bf16.mxu1 %v4434_v15 }
 0xb35   :  { %3870 = vmatpush3.bf16.msra.mxu0 %v4017_v38  ;;  %1570 = vrot.lane.b32.xlu1 %v4644_v1, %s4127_s30  ;;  %v4021_v1 = vld [vmem:[%s5026_s8 + $0x70] sm:$0xff]  }
 0xb36   :  { %3887 = vmatprep.subr.bf16.mxu0 %v4434_v15 }
 0xb37   :  { %3882 = vmatpush3.bf16.msra.mxu1 %v4018_v62 }
 0xb38   :  { %3872 = vmatmul.mubr.msk.bf16.vlgmr.msra.gmra.mxu0 %vm965_vm5, %v2610_v51  ;;  %3899 = vmatprep.subr.bf16.mxu1 %v4434_v15 }
 0xb39   :  { %3888 = vmatpush3.bf16.msra.mxu0 %v4019_v57  ;;  %3895 = vmatprep.mubr.msk.bf16.mxu0 %vm4126_vm1, %v4434_v15 }
 0xb3a   :  { %3884 = vmatmul.mubr.msk.bf16.vlgmr.msra.gmra.mxu1 %vm965_vm5, %v2691_v61  ;;  %3889 = vmatprep.subr.bf16.mxu0 %v4434_v15 }
 0xb3b   :  { %3900 = vmatpush3.bf16.msra.mxu1 %v4020_v14  ;;  %3907 = vmatprep.mubr.msk.bf16.mxu1 %vm4126_vm1, %v4434_v15 }
 0xb3c   :  { %3901 = vmatprep.subr.bf16.mxu1 %v4434_v15 }
 0xb3d   :  { %3890 = vmatpush3.bf16.msra.mxu0 %v4021_v1 }
 0xb3e   :  { %3891 = vmatprep.subr.bf16.mxu0 %v4434_v15 }
 0xb3f   :  { %3902 = vmatpush3.bf16.msra.mxu1 %v4022_v16 }
 0xb40   :  { %3903 = vmatprep.subr.bf16.mxu1 %v4434_v15 }
 0xb41   :  { %3892 = vmatpush3.bf16.msra.mxu0 %v4023_v4 }
 0xb42   :  { %3893 = vmatprep.subr.bf16.mxu0 %v4434_v15 }
 0xb43   :  { %3904 = vmatpush3.bf16.msra.mxu1 %v4024_v22 }
 0xb44   :  { %3905 = vmatprep.subr.bf16.mxu1 %v4434_v15 }
 0xb45   :  { %3894 = vmatpush3.bf16.msra.mxu0 %v4025_v11 }
 0xb46   :  { %3911 = vmatprep.subr.bf16.mxu0 %v4434_v15 }
 0xb47   :  { %3906 = vmatpush3.bf16.msra.mxu1 %v4026_v5 }
 0xb48   :  { %3923 = vmatprep.subr.bf16.mxu1 %v4434_v15 }
 0xb9a   :  { %v2788_v7 = vpop.permute.xlu0 %2787 }
 0xb9b   :  { %v2859_v30 = vpop.permute.xlu1 %2858  ;;  %3896 = vmatmul.mubr.msk.bf16.vlgmr.msra.gmra.mxu0 %vm965_vm5, %v2788_v7 }
 0xb9c   :  { %3908 = vmatmul.mubr.msk.bf16.vlgmr.msra.gmra.mxu1 %vm965_vm5, %v2859_v30  ;;  %3912 = vmatpush3.bf16.msra.mxu0 %v4027_v26 }
 0xb9d   :  { %3924 = vmatpush3.bf16.msra.mxu1 %v4028_v28  ;;  %3913 = vmatprep.subr.bf16.mxu0 %v4434_v15 }
 0xb9e   :  { %3925 = vmatprep.subr.bf16.mxu1 %v4434_v15  ;;  %3919 = vmatprep.mubr.msk.bf16.mxu0 %vm4126_vm1, %v4434_v15  ;;  %v1569_v58 = vpop.permute.xlu0 %1568 }
 0xb9f   :  { %3931 = vmatprep.mubr.msk.bf16.mxu1 %vm4126_vm1, %v4434_v15  ;;  %v2938_v34 = vpop.permute.xlu1 %2937  ;;  %v1574_v13 = vsel %vm965_vm5, %v4638_v29, %v1569_v58 }
 0xba0   :  { %3914 = vmatpush3.bf16.msra.mxu0 %v4029_v44  ;;  %v1582_v51 = vadd.f32 %v3303_v10, %v1574_v13 }
 0xba1   :  { %3926 = vmatpush3.bf16.msra.mxu1 %v4030_v6  ;;  %3915 = vmatprep.subr.bf16.mxu0 %v4434_v15 }
 0xba2   :  { %3927 = vmatprep.subr.bf16.mxu1 %v4434_v15  ;;  %v1586_v54 = vmul.f32 0.044715, %v1582_v51 }
 0xba3   :  { %v3019_v36 = vpop.permute.xlu1 %3018 }
 0xba4   :  { %3916 = vmatpush3.bf16.msra.mxu0 %v4031_v9  ;;  %v1588_v14 = vmul.f32 %v1586_v54, %v1582_v51 }
 0xba5   :  { %3928 = vmatpush3.bf16.msra.mxu1 %v4032_v31  ;;  %3917 = vmatprep.subr.bf16.mxu0 %v4434_v15 }
 0xba6   :  { %3929 = vmatprep.subr.bf16.mxu1 %v4434_v15  ;;  %v1590_v16 = vmul.f32 %v1588_v14, %v1582_v51 }
 0xba7   :  { %v1571_v21 = vpop.permute.xlu1 %1570 }
 0xba8   :  { %3918 = vmatpush3.bf16.msra.mxu0 %v4033_v32  ;;  %v1575_v57 = vsel %vm965_vm5, %v4640_v33, %v1571_v21  ;;  %v1592_v28 = vadd.f32 %v1590_v16, %v1582_v51 }
 0xba9   :  { %3930 = vmatpush3.bf16.msra.mxu1 %v4034_v35  ;;  %v1583_v1 = vadd.f32 %v3303_v10, %v1575_v57 }
 0xbab   :  { %3920 = vmatmul.mubr.msk.bf16.vlgmr.msra.gmra.mxu0 %vm965_vm5, %v2938_v34  ;;  %v1587_v4 = vmul.f32 0.044715, %v1583_v1  ;;  %v1594_v34 = vmul.f32 0.7978846, %v1592_v28 }
 0xbac   :  { %3932 = vmatmul.mubr.msk.bf16.vlgmr.msra.gmra.mxu1 %vm965_vm5, %v3019_v36 }
 0xbad   :  { %v1589_v6 = vmul.f32 %v1587_v4, %v1583_v1  ;;  %4107 = vtanh.f32 %v1594_v34 }
 0xbe8   :  { %v2533_v59 = vpop.f32.mrf.mxu0 }
 0xbea   :  { %v2601_v63 = vpop.f32.mrf.mxu1  ;;  %v3849_v40 = vpop.f32.mrf.mxu0 }
 0xbeb   :  { %v2602_v0 = vadd.f32 %v2601_v63, %v2533_v59  ;;  %v1591_v59 = vmul.f32 %v1589_v6, %v1583_v1 }
 0xbec   :  { %v3861_v43 = vpop.f32.mrf.mxu1  ;;  %v2536_v37 = vpop.f32.mrf.mxu0 }
 0xbed   :  { %v1593_v63 = vadd.f32 %v1591_v59, %v1583_v1  ;;  %v49_v59 = vld [vmem:[%s5029_s10] sm:$0x3] }
 0xbee   :  { %v2604_v55 = vpop.f32.mrf.mxu1  ;;  %v3850_v8 = vpop.f32.mrf.mxu0 }
 0xbef   :  { %v2605_v45 = vadd.f32 %v2604_v55, %v2536_v37  ;;  %v1595_v40 = vmul.f32 0.7978846, %v1593_v63  ;;  %v1584_v37 = vmul.f32 0.5, %v1582_v51  ;;  %v1630_v63 = vrot.slane %v49_v59, %v4261_v39 }
 0xbf0   :  { %v3862_v46 = vpop.f32.mrf.mxu1 }
 0xbf1   :  { %4109 = vtanh.f32 %v1595_v40 }
 0xbf8   :  { %v2680_v20 = vpop.f32.mrf.mxu0 }
 0xbf9   :  { %v2687_v3 = vadd.f32 %v2680_v20, %v2602_v0  ;;  %v4108_v0 = vpop.eup %4107  ;;  %v1585_v20 = vmul.f32 0.5, %v1583_v1 }
 0xbfa   :  { %v2761_v15 = vpop.f32.mrf.mxu1  ;;  %v3873_v23 = vpop.f32.mrf.mxu0  ;;  %v1598_v43 = vadd.f32 1.0, %v4108_v0 }
 0xbfb   :  { %v4987_v47 = vadd.f32 %v2761_v15, %v2687_v3 }
 0xbfc   :  { %v3885_v24 = vpop.f32.mrf.mxu1  ;;  %v2683_v49 = vpop.f32.mrf.mxu0  ;;  %v1600_v55 = vmul.f32 %v1598_v43, %v1584_v37  ;;  %v1636_v43 = vrot.slane %v49_v59, %v4266_v41 }
 0xbfd   :  { %v2688_v56 = vadd.f32 %v2683_v49, %v2605_v45 }
 0xbfe   :  { %v2764_v52 = vpop.f32.mrf.mxu1  ;;  %v3874_v53 = vpop.f32.mrf.mxu0  ;;  %v1602_v45 = vadd.f32 %v1600_v55, %v4473_v25 }
 0xbff   :  { %v4989_v60 = vadd.f32 %v2764_v52, %v2688_v56  ;;  %v4110_v8 = vpop.eup %4109 }
 0xc00   :  { %v3886_v42 = vpop.f32.mrf.mxu1  ;;  %v1599_v46 = vadd.f32 1.0, %v4110_v8 }
 0xc02   :  { %v1601_v3 = vmul.f32 %v1599_v46, %v1585_v20 }
 0xc04   :  { %v1603_v15 = vadd.f32 %v1601_v3, %v4476_v27 }
 0xc5b   :  { %v2850_v2 = vpop.f32.mrf.mxu0 }
 0xc5c   :  { %v2921_v12 = vpop.f32.mrf.mxu1 }
 0xc5d   :  { %v3897_v17 = vpop.f32.mrf.mxu0  ;;  %v2922_v22 = vadd.f32 %v2921_v12, %v2850_v2 }
 0xc5e   :  { %v3909_v18 = vpop.f32.mrf.mxu1 }
 0xc5f   :  { %v2853_v19 = vpop.f32.mrf.mxu0 }
 0xc60   :  { %v2924_v61 = vpop.f32.mrf.mxu1 }
 0xc61   :  { %v3898_v38 = vpop.f32.mrf.mxu0  ;;  %v2925_v7 = vadd.f32 %v2924_v61, %v2853_v19 }
 0xc62   :  { %v3910_v62 = vpop.f32.mrf.mxu1 }
 0xc6b   :  { %v3000_v29 = vpop.f32.mrf.mxu0 }
 0xc6c   :  { %v3007_v11 = vadd.f32 %v3000_v29, %v2922_v22  ;;  %v3081_v5 = vpop.f32.mrf.mxu1 }
 0xc6d   :  { %v3921_v26 = vpop.f32.mrf.mxu0 }
 0xc6e   :  { %v3088_v30 = vadd.f32 %v3081_v5, %v3007_v11  ;;  %v3933_v44 = vpop.f32.mrf.mxu1 }
 0xc6f   :  { %v3003_v9 = vpop.f32.mrf.mxu0 }
 0xc70   :  { %v3008_v31 = vadd.f32 %v3003_v9, %v2925_v7  ;;  %v3084_v32 = vpop.f32.mrf.mxu1  ;;  %3092 = vrot.lane.b32.xlu0 %v3088_v30, %s4127_s30 }
 0xc71   :  { %v3922_v33 = vpop.f32.mrf.mxu0 }
 0xc72   :  { %v3089_v35 = vadd.f32 %v3084_v32, %v3008_v31  ;;  %v3934_v36 = vpop.f32.mrf.mxu1 }
 0xc74   :  { %3094 = vrot.lane.b32.xlu1 %v3089_v35, %s4127_s30 }
 0xc8f   :  { %1604 = vadd.xlane.f32.xlu0 %v1602_v45 }
 0xc98   :  { %1606 = vadd.xlane.f32.xlu1 %v1603_v15 }
 0xce2   :  { %v3093_v23 = vpop.permute.xlu0 %3092 }
 0xce3   :  { %v3098_v24 = vsel %vm965_vm5, %v4987_v47, %v3093_v23 }
 0xce4   :  { %v3100_v49 = vadd.f32 %v3303_v10, %v3098_v24 }
 0xce6   :  { %v3104_v56 = vmul.f32 0.044715, %v3100_v49  ;;  %v3095_v52 = vpop.permute.xlu1 %3094  ;;  %v3102_v47 = vmul.f32 0.5, %v3100_v49 }
 0xce7   :  { %v3099_v53 = vsel %vm965_vm5, %v4989_v60, %v3095_v52 }
 0xce8   :  { %v3101_v42 = vadd.f32 %v3303_v10, %v3099_v53  ;;  %v3106_v58 = vmul.f32 %v3104_v56, %v3100_v49 }
 0xcea   :  { %v3105_v25 = vmul.f32 0.044715, %v3101_v42  ;;  %v3108_v13 = vmul.f32 %v3106_v58, %v3100_v49  ;;  %v3103_v60 = vmul.f32 0.5, %v3101_v42 }
 0xcec   :  { %v3110_v2 = vadd.f32 %v3108_v13, %v3100_v49  ;;  %v3107_v12 = vmul.f32 %v3105_v25, %v3101_v42 }
 0xcee   :  { %v3112_v51 = vmul.f32 0.7978846, %v3110_v2  ;;  %v3109_v17 = vmul.f32 %v3107_v12, %v3101_v42 }
 0xcf0   :  { %4111 = vtanh.f32 %v3112_v51  ;;  %v3111_v27 = vadd.f32 %v3109_v17, %v3101_v42 }
 0xcf2   :  { %v3113_v18 = vmul.f32 0.7978846, %v3111_v27 }
 0xcf4   :  { %4113 = vtanh.f32 %v3113_v18 }
 0xcfd   :  { %v4112_v19 = vpop.eup %4111 }
 0xcfe   :  { %v3116_v21 = vadd.f32 1.0, %v4112_v19 }
 0xd00   :  { %v3118_v61 = vmul.f32 %v3116_v21, %v3102_v47 }
 0xd01   :  { %v4114_v54 = vpop.eup %4113 }
 0xd02   :  { %v3120_v38 = vadd.f32 %v3118_v61, %v4857_v48  ;;  %v3117_v10 = vadd.f32 1.0, %v4114_v54 }
 0xd04   :  { %3122 = vadd.xlane.f32.xlu0 %v3120_v38  ;;  %v3119_v62 = vmul.f32 %v3117_v10, %v3103_v60 }
 0xd06   :  { %v3121_v57 = vadd.f32 %v3119_v62, %v4860_v50 }
 0xd08   :  { %3124 = vadd.xlane.f32.xlu0 %v3121_v57 }
 0xd18   :  { %v1605_v14 = vpop.xlane.xlu0 %1604 }
 0xd19   :  { %v1609_v1 = vmul.f32 0.0078125, %v1605_v14 }
 0xd1b   :  { %v1611_v16 = vsub.f32 %v1602_v45, %v1609_v1 }
 0xd1d   :  { %v1613_v4 = vmul.f32 %v1611_v16, %v1611_v16 }
 0xd1f   :  { %1615 = vadd.xlane.f32.xlu0 %v1613_v4 }
 0xd21   :  { %v1607_v22 = vpop.xlane.xlu1 %1606 }
 0xd22   :  { %v1610_v29 = vmul.f32 0.0078125, %v1607_v22 }
 0xd24   :  { %v1612_v11 = vsub.f32 %v1603_v15, %v1610_v29 }
 0xd26   :  { %v1614_v5 = vmul.f32 %v1612_v11, %v1612_v11 }
 0xd28   :  { %1617 = vadd.xlane.f32.xlu1 %v1614_v5 }
 0xd8d   :  { %v3123_v26 = vpop.xlane.xlu0 %3122 }
 0xd8e   :  { %v3126_v28 = vmul.f32 0.0078125, %v3123_v26 }
 0xd90   :  { %v3128_v48 = vsub.f32 %v3120_v38, %v3126_v28 }
 0xd91   :  { %v3125_v7 = vpop.xlane.xlu0 %3124 }
 0xd92   :  { %v3127_v30 = vmul.f32 0.0078125, %v3125_v7  ;;  %v3130_v44 = vmul.f32 %v3128_v48, %v3128_v48 }
 0xd94   :  { %v3129_v6 = vsub.f32 %v3121_v57, %v3127_v30  ;;  %3132 = vadd.xlane.f32.xlu0 %v3130_v44 }
 0xd96   :  { %v3131_v50 = vmul.f32 %v3129_v6, %v3129_v6 }
 0xd98   :  { %3134 = vadd.xlane.f32.xlu1 %v3131_v50 }
 0xda8   :  { %v1616_v9 = vpop.xlane.xlu0 %1615 }
 0xda9   :  { %v1619_v31 = vmul.f32 0.0078125, %v1616_v9 }
 0xdab   :  { %v1621_v32 = vadd.f32 1e-05, %v1619_v31 }
 0xdad   :  { %4115 = vrsqrt.f32 %v1621_v32 }
 0xdb1   :  { %v1618_v33 = vpop.xlane.xlu1 %1617 }
 0xdb2   :  { %v1620_v34 = vmul.f32 0.0078125, %v1618_v33 }
 0xdb4   :  { %v1622_v35 = vadd.f32 1e-05, %v1620_v34 }
 0xdb6   :  { %4117 = vrsqrt.f32 %v1622_v35 }
 0xdba   :  { %v4116_v36 = vpop.eup %4115 }
 0xdbb   :  { %v1625_v40 = vmul.f32 %v4116_v36, %v1611_v16 }
 0xdbd   :  { %v1631_v37 = vmul.f32 %v1630_v63, %v1625_v40 }
 0xdbf   :  { %v1637_v45 = vadd.f32 %v1636_v43, %v1631_v37 }
 0xdc3   :  { %v4118_v0 = vpop.eup %4117 }
 0xdc4   :  { %v1626_v55 = vmul.f32 %v4118_v0, %v1612_v11 }
 0xdc6   :  { %v1632_v8 = vmul.f32 %v1630_v63, %v1626_v55 }
 0xdc8   :  { %v1638_v46 = vadd.f32 %v1636_v43, %v1632_v8 }
 0xdca   :  { %v3461_v20 = vpack.c.bf16 %v1638_v46, %v1637_v45 }
 0xdcc   :  { %3462 = vst [vmem:[%s5030_s11] sm:$0xff] %v3461_v20  }
 0xe1d   :  { %v3133_v3 = vpop.xlane.xlu0 %3132 }
 0xe1e   :  { %v3136_v15 = vmul.f32 0.0078125, %v3133_v3 }
 0xe20   :  { %v3138_v23 = vadd.f32 1e-05, %v3136_v15 }
 0xe21   :  { %v3135_v24 = vpop.xlane.xlu1 %3134 }
 0xe22   :  { %4119 = vrsqrt.f32 %v3138_v23  ;;  %v3137_v39 = vmul.f32 0.0078125, %v3135_v24 }
 0xe24   :  { %v3139_v49 = vadd.f32 1e-05, %v3137_v39 }
 0xe26   :  { %4121 = vrsqrt.f32 %v3139_v49 }
 0xe2f   :  { %v4120_v56 = vpop.eup %4119 }
 0xe30   :  { %v3142_v41 = vmul.f32 %v4120_v56, %v3128_v48 }
 0xe32   :  { %v3144_v53 = vmul.f32 %v3142_v41, %v1630_v63 }
 0xe33   :  { %v4122_v52 = vpop.eup %4121 }
 0xe34   :  { %v3143_v42 = vmul.f32 %v4122_v52, %v3129_v6  ;;  %v3146_v25 = vadd.f32 %v3144_v53, %v1636_v43 }
 0xe36   :  { %v3145_v58 = vmul.f32 %v3143_v42, %v1630_v63 }
 0xe38   :  { %v3147_v13 = vadd.f32 %v3145_v58, %v1636_v43 }
 0xe3a   :  { %v3466_v2 = vpack.c.bf16 %v3147_v13, %v3146_v25 }
 0xe3c   :  { %3468 = vst [vmem:[%s5030_s11 + $0x8] sm:$0xff] %v3466_v2  }

</bundles_post_ra>
